<compile_context>
chip_gen: v5e
topology: v5e:2x2
jax: 0.10.0
libtpu: 0.0.40
codegen_flags: <defaults>
</compile_context>

<pallas_src>
import jax
import jax.numpy as jnp
import numpy as np
from jax import lax
from jax.experimental import pallas as pl
from jax.experimental.pallas import tpu as pltpu

# ----- PNet constructor arguments (canonical MTCNN values) -----
MP = 2             # MaxPool2d kernel / stride
KSZ = 3            # conv2 / conv3 kernel size
CLS_NUM = 1        # conv4_1 outputs cls_num + 1 = 2 channels
IS_TRAIN = False
N_HEAD = CLS_NUM + 1 + 4      # packed head channels (2 cls + 4 bbox)
HEAD_PAD = 128                # 1x1 head padded to 128 output lanes (dense store)


# --------------------------- in-kernel helpers ---------------------------
def _prelu(x, alpha):
    # x: (M, C) f32, alpha: (1, C) f32
    return jnp.where(x > 0, x, x * alpha)


def _im2col(h, ksz):
    """(Bt, Hi, Wi, Cin) -> (Bt*Ho*Wo, ksz*ksz*Cin) flat patch matrix."""
    Bt, Hi, Wi, Cin = h.shape
    Ho, Wo = Hi - ksz + 1, Wi - ksz + 1
    if ksz == 1:
        p = h
    else:
        p = jnp.concatenate(
            [h[:, kh:kh + Ho, kw:kw + Wo, :]
             for kh in range(ksz) for kw in range(ksz)],
            axis=-1)                                            # (Bt, Ho, Wo, K)
    return p.reshape(Bt * Ho * Wo, ksz * ksz * Cin), Ho, Wo


def _conv_mxu(p_flat, w, b):
    """ONE 2-D MXU matmul: (M, K) @ (K, Cout) + b, f32 accumulation."""
    y = jnp.dot(p_flat.astype(w.dtype), w, preferred_element_type=jnp.float32)
    return y + b


# ------------------------------- kernel ----------------------------------
def _pnet_kernel(x_ref, w1_ref, w2_ref, w3_ref, w4_ref, vec_ref,
                 out_ref, pool_ref):
    Bt = x_ref.shape[0]
    C1, C2, C3 = w1_ref.shape[1], w2_ref.shape[1], w3_ref.shape[1]

    vec = vec_ref[...]                                 # (8, 128) packed consts
    b1, a1 = vec[0:1, :C1], vec[1:2, :C1]
    b2, a2 = vec[2:3, :C2], vec[3:4, :C2]
    b3, a3 = vec[4:5, :C3], vec[5:6, :C3]
    b4 = vec[6:7, :]                                   # (1, 128), zeros past ch 5

    # ---- conv1 (3x3) + prelu1 : one (Bt*H1*W1, 27)x(27, 10) matmul ----
    p1, H1, W1 = _im2col(x_ref[...], 3)
    h = _prelu(_conv_mxu(p1, w1_ref[...], b1), a1)     # (Bt*H1*W1, 10) f32

    # ---- MaxPool2d(MP, ceil_mode=True) ----
    Hp, Wp = -(-H1 // MP), -(-W1 // MP)
    H1p, W1p = Hp * MP, Wp * MP
    h = h.reshape(Bt, H1, W1, C1)
    if H1p > H1:                                       # ceil-mode row pad
        h = jnp.concatenate(
            [h, jnp.full((Bt, H1p - H1, W1, C1), -jnp.inf, jnp.float32)], axis=1)
    h = jnp.max(h.reshape(Bt, Hp, MP, W1, C1), axis=2)   # H max (leading dim)
    h = h.reshape(Bt * Hp, W1, C1)
    if W1p > W1:                                       # ceil-mode column pad
        h = jnp.concatenate(
            [h, jnp.full((Bt * Hp, W1p - W1, C1), -jnp.inf, jnp.float32)], axis=1)
    # W max: sublane-strided reads from a small VMEM scratch
    pool_ref[...] = h
    pooled = pool_ref[:, pl.ds(0, Wp, stride=MP), :]
    for off in range(1, MP):
        pooled = jnp.maximum(pooled, pool_ref[:, pl.ds(off, Wp, stride=MP), :])
    pooled = pooled.reshape(Bt, Hp, Wp, C1)

    # ---- conv2 + prelu2 ----
    p2, H2, W2 = _im2col(pooled, KSZ)
    h = _prelu(_conv_mxu(p2, w2_ref[...], b2), a2)     # (Bt*H2*W2, 16)
    h = h.reshape(Bt, H2, W2, C2)

    # ---- conv3 + prelu3 ----
    p3, H3, W3 = _im2col(h, KSZ)
    h = _prelu(_conv_mxu(p3, w3_ref[...], b3), a3)     # (M3, 32), M3 = Bt*H3*W3
    M3 = h.shape[0]

    # ---- fused 1x1 heads, zero-padded to 128 output lanes ----
    # columns [0:2] = conv4_1 logits, [2:6] = conv4_2, [6:128] = zeros
    y = _conv_mxu(h, w4_ref[...], b4)                  # (M3, 128) f32

    # Pad M3 to a multiple of 8 so the transpose is fully (8,128)-aligned,
    # then present the heads lane-dense as (channels, M3).
    M3p = -(-M3 // 8) * 8
    if M3p > M3:
        y = jnp.concatenate(
            [y, jnp.zeros((M3p - M3, HEAD_PAD), jnp.float32)], axis=0)
    t = y.T[:, :M3]                                    # (128, M3) lane-dense

    nc = CLS_NUM + 1
    if not IS_TRAIN:
        if nc == 2:
            # 2-channel softmax == sigmoid identity (no cross-lane reduce)
            p_pos = 1.0 / (1.0 + jnp.exp(t[0:1, :] - t[1:2, :]))
            head = jnp.concatenate([1.0 - p_pos, p_pos, t[2:N_HEAD, :]], axis=0)
        else:
            m = jnp.max(t[:nc, :], axis=0, keepdims=True)
            e = jnp.exp(t[:nc, :] - m)
            head = jnp.concatenate(
                [e / jnp.sum(e, axis=0, keepdims=True), t[nc:N_HEAD, :]], axis=0)
    else:
        head = t[:N_HEAD, :]

    out_ref[0] = head                                  # single dense (6, M3) store


# ------------------------------- wrapper ---------------------------------
def _flat_w(w):
    # HWIO (kh, kw, ci, co) -> (kh*kw*ci, co), row order (kh, kw, ci)
    kh, kw, ci, co = w.shape
    return jnp.asarray(w, jnp.float32).reshape(kh * kw * ci, co)


def _pack_vec(params):
    """Pack b1,a1,b2,a2,b3,a3,b4 into one (8, 128) f32 block (one DMA)."""
    rows = [params['b1'], params['a1'], params['b2'], params['a2'],
            params['b3'], params['a3'],
            jnp.concatenate([params['b41'], params['b42']])]
    vec = jnp.zeros((8, 128), jnp.float32)
    for r, v in enumerate(rows):
        vec = vec.at[r, :v.shape[0]].set(jnp.asarray(v, jnp.float32))
    return vec


def _pick_batch_tile(B, max_bt=8):
    """Largest divisor of B <= max_bt that keeps >= 2 grid steps (v7x: 2 TCs)."""
    divisors = [d for d in range(1, min(B, max_bt) + 1) if B % d == 0]
    two_step = [d for d in divisors if B // d >= 2]
    return max(two_step) if two_step else max(divisors)


def pnet_forward(x_nchw, params, *, batch_tile=None, mxu_dtype=jnp.float32):
    """PNet forward. Returns (b, a) in NCHW like the PyTorch module.

    On v6e/v7x pass mxu_dtype=jnp.bfloat16 for ~2x MXU throughput (accumulation
    and all elementwise work stay f32, so this is also safe on v5e).
    """
    B, C, H, W = x_nchw.shape
    assert C == 3
    # HWIO weight layout expected (PyTorch OIHW checkpoints: w.permute(2,3,1,0)).
    assert params['w1'].shape == (3, 3, 3, 10), "w1 must be HWIO (3,3,3,10)"
    assert params['w2'].shape == (KSZ, KSZ, 10, 16), "w2 must be HWIO"
    assert params['w3'].shape == (KSZ, KSZ, 16, 32), "w3 must be HWIO"
    assert params['w41'].shape == (1, 1, 32, CLS_NUM + 1), "w41 must be HWIO"
    assert params['w42'].shape == (1, 1, 32, 4), "w42 must be HWIO"

    bt = batch_tile or _pick_batch_tile(B)
    assert B % bt == 0
    steps = B // bt

    x = jnp.transpose(x_nchw, (0, 2, 3, 1)).astype(jnp.float32)   # NHWC

    H1, W1 = H - 2, W - 2                       # after conv1 (3x3 VALID)
    Hp, Wp = -(-H1 // MP), -(-W1 // MP)         # ceil_mode pooling output
    H2, W2 = Hp - KSZ + 1, Wp - KSZ + 1
    H3, W3 = H2 - KSZ + 1, W2 - KSZ + 1
    assert H3 >= 1 and W3 >= 1
    m3 = bt * H3 * W3

    w1f = _flat_w(params['w1']).astype(mxu_dtype)
    w2f = _flat_w(params['w2']).astype(mxu_dtype)
    w3f = _flat_w(params['w3']).astype(mxu_dtype)
    w4_real = jnp.concatenate([_flat_w(params['w41']), _flat_w(params['w42'])],
                              axis=1)                              # (32, 6)
    w4p = jnp.zeros((32, HEAD_PAD), jnp.float32).at[:, :N_HEAD].set(w4_real)
    w4p = w4p.astype(mxu_dtype)
    vec = _pack_vec(params)

    def full_spec(shape):
        nd = len(shape)
        return pl.BlockSpec(tuple(shape), lambda i, _nd=nd: (0,) * _nd)

    out = pl.pallas_call(
        _pnet_kernel,
        out_shape=jax.ShapeDtypeStruct((steps, N_HEAD, m3), jnp.float32),
        grid=(steps,),
        in_specs=[
            pl.BlockSpec((bt, H, W, 3), lambda i: (i, 0, 0, 0)),
            full_spec(w1f.shape), full_spec(w2f.shape),
            full_spec(w3f.shape), full_spec(w4p.shape),
            full_spec(vec.shape),
        ],
        out_specs=pl.BlockSpec((1, N_HEAD, m3), lambda i: (i, 0, 0)),
        scratch_shapes=[pltpu.VMEM((bt * Hp, Wp * MP, 10), jnp.float32)],
        compiler_params=pltpu.CompilerParams(
            dimension_semantics=("parallel",)),
    )(x, w1f, w2f, w3f, w4p, vec)

    # unpack lane-dense (steps, 6, bt*H3*W3) -> PyTorch NCHW heads (b, a)
    out6 = out.reshape(steps, N_HEAD, bt, H3, W3).transpose(0, 2, 1, 3, 4)
    out6 = out6.reshape(B, N_HEAD, H3, W3)
    a_nchw = out6[:, :CLS_NUM + 1]          # (B, 2, H3, W3) class probabilities
    b_nchw = out6[:, CLS_NUM + 1:]          # (B, 4, H3, W3) box offsets
    return b_nchw, a_nchw


# -------------------- deterministic parameter init ------------------------
def init_params(key):
    def conv_init(k, kh, kw, cin, cout):
        kw_, kb_ = jax.random.split(k)
        w = 0.1 * jax.random.normal(kw_, (kh, kw, cin, cout), jnp.float32)  # HWIO
        b = 0.05 * jax.random.normal(kb_, (cout,), jnp.float32)
        return w, b

    ks = jax.random.split(key, 5)
    w1, b1 = conv_init(ks[0], 3, 3, 3, 10)
    w2, b2 = conv_init(ks[1], KSZ, KSZ, 10, 16)
    w3, b3 = conv_init(ks[2], KSZ, KSZ, 16, 32)
    w41, b41 = conv_init(ks[3], 1, 1, 32, CLS_NUM + 1)
    w42, b42 = conv_init(ks[4], 1, 1, 32, 4)
    return dict(
        w1=w1, b1=b1, a1=jnp.full((10,), 0.25, jnp.float32),   # PReLU default 0.25
        w2=w2, b2=b2, a2=jnp.full((16,), 0.25, jnp.float32),
        w3=w3, b3=b3, a3=jnp.full((32,), 0.25, jnp.float32),
        w41=w41, b41=b41, w42=w42, b42=b42)


# --------------------------- pure-JAX reference ---------------------------
def pnet_reference(x_nchw, params):
    x = jnp.transpose(x_nchw, (0, 2, 3, 1)).astype(jnp.float32)

    def conv(h, w, b):
        y = lax.conv_general_dilated(h, w, (1, 1), 'VALID',
                                     dimension_numbers=('NHWC', 'HWIO', 'NHWC'))
        return y + b[None, None, None, :]

    def prelu(h, a):
        return jnp.where(h > 0, h, h * a[None, None, None, :])

    h = prelu(conv(x, params['w1'], params['b1']), params['a1'])
    # MaxPool2d(MP, ceil_mode=True): pad the high side with -inf (the reduce
    # init value) so windows at the edge are kept, matching the kernel.
    ph, pw = (-h.shape[1]) % MP, (-h.shape[2]) % MP
    h = lax.reduce_window(h, -jnp.inf, lax.max, (1, MP, MP, 1), (1, MP, MP, 1),
                          padding=((0, 0), (0, ph), (0, pw), (0, 0)))
    h = prelu(conv(h, params['w2'], params['b2']), params['a2'])
    h = prelu(conv(h, params['w3'], params['b3']), params['a3'])
    a = conv(h, params['w41'], params['b41'])
    b = conv(h, params['w42'], params['b42'])
    if not IS_TRAIN:
        a = jax.nn.softmax(a, axis=-1)
    return jnp.transpose(b, (0, 3, 1, 2)), jnp.transpose(a, (0, 3, 1, 2))


if __name__ == "__main__":
    key = jax.random.PRNGKey(0)
    pkey, xkey = jax.random.split(key)
    params = init_params(pkey)
    x = jax.random.normal(xkey, (4, 3, 16, 16), jnp.float32)   # NCHW, like PyTorch

    # f32 MXU path (tight check against the pure-JAX reference)
    b_out, a_out = pnet_forward(x, params)
    jax.block_until_ready((b_out, a_out))
    assert b_out.shape == (4, 4, 3, 3) and a_out.shape == (4, CLS_NUM + 1, 3, 3)

    b_ref, a_ref = pnet_reference(x, params)
    np.testing.assert_allclose(np.asarray(b_out), np.asarray(b_ref),
                               rtol=2e-3, atol=5e-4)
    np.testing.assert_allclose(np.asarray(a_out), np.asarray(a_ref),
                               rtol=2e-3, atol=5e-4)

    # bf16 MXU-input path (recommended on v6e/v7x); accumulation stays f32.
    b_bf, a_bf = pnet_forward(x, params, mxu_dtype=jnp.bfloat16)
    jax.block_until_ready((b_bf, a_bf))
    np.testing.assert_allclose(np.asarray(b_bf), np.asarray(b_ref),
                               rtol=1e-1, atol=5e-2)
    np.testing.assert_allclose(np.asarray(a_bf), np.asarray(a_ref),
                               rtol=1e-1, atol=5e-2)

    print("KERNEL_OK")
</pallas_src>

<mosaic_0001>
module attributes {stable_mosaic.version = 11 : i64} {
  func.func @_pnet_kernel(%arg0: i32, %arg1: memref<2x16x16x3xf32, #tpu.memory_space<vmem>>, %arg2: memref<27x10xf32, #tpu.memory_space<vmem>>, %arg3: memref<90x16xf32, #tpu.memory_space<vmem>>, %arg4: memref<144x32xf32, #tpu.memory_space<vmem>>, %arg5: memref<32x128xf32, #tpu.memory_space<vmem>>, %arg6: memref<8x128xf32, #tpu.memory_space<vmem>>, %arg7: memref<1x6x18xf32, #tpu.memory_space<vmem>>, %arg8: memref<14x14x10xf32, #tpu.memory_space<vmem>>) attributes {dimension_semantics = [#tpu.dimension_semantics<parallel>], iteration_bounds = array<i64: 2>, scalar_prefetch = 0 : i64, scratch_operands = 1 : i64, tpu.core_type = #tpu.core_type<tc>, window_params = [{transform_indices = @transform_0, window_bounds = array<i64: 2, 16, 16, 3>}, {pipeline_mode = #tpu.pipeline_mode<synchronous>, transform_indices = @transform_1, window_bounds = array<i64: 27, 10>}, {pipeline_mode = #tpu.pipeline_mode<synchronous>, transform_indices = @transform_2, window_bounds = array<i64: 90, 16>}, {pipeline_mode = #tpu.pipeline_mode<synchronous>, transform_indices = @transform_3, window_bounds = array<i64: 144, 32>}, {pipeline_mode = #tpu.pipeline_mode<synchronous>, transform_indices = @transform_4, window_bounds = array<i64: 32, 128>}, {pipeline_mode = #tpu.pipeline_mode<synchronous>, transform_indices = @transform_5, window_bounds = array<i64: 8, 128>}, {transform_indices = @transform_6, window_bounds = array<i64: 1, 6, 18>}]} {
    %c0 = arith.constant 0 : index
    %c0_0 = arith.constant 0 : index
    %0 = vector.load %arg6[%c0, %c0_0] : memref<8x128xf32, #tpu.memory_space<vmem>>, vector<8x128xf32>
    %1 = vector.extract_strided_slice %0 {offsets = [0, 0], sizes = [1, 10], strides = [1, 1]} : vector<8x128xf32> to vector<1x10xf32>
    %2 = vector.extract_strided_slice %0 {offsets = [1, 0], sizes = [1, 10], strides = [1, 1]} : vector<8x128xf32> to vector<1x10xf32>
    %3 = vector.extract_strided_slice %0 {offsets = [2, 0], sizes = [1, 16], strides = [1, 1]} : vector<8x128xf32> to vector<1x16xf32>
    %4 = vector.extract_strided_slice %0 {offsets = [3, 0], sizes = [1, 16], strides = [1, 1]} : vector<8x128xf32> to vector<1x16xf32>
    %5 = vector.extract_strided_slice %0 {offsets = [4, 0], sizes = [1, 32], strides = [1, 1]} : vector<8x128xf32> to vector<1x32xf32>
    %6 = vector.extract_strided_slice %0 {offsets = [5, 0], sizes = [1, 32], strides = [1, 1]} : vector<8x128xf32> to vector<1x32xf32>
    %7 = vector.extract_strided_slice %0 {offsets = [6, 0], sizes = [1, 128], strides = [1, 1]} : vector<8x128xf32> to vector<1x128xf32>
    %c0_1 = arith.constant 0 : index
    %c0_2 = arith.constant 0 : index
    %c0_3 = arith.constant 0 : index
    %c0_4 = arith.constant 0 : index
    %8 = vector.load %arg1[%c0_1, %c0_2, %c0_3, %c0_4] : memref<2x16x16x3xf32, #tpu.memory_space<vmem>>, vector<2x16x16x3xf32>
    %9 = vector.extract_strided_slice %8 {offsets = [0, 0, 0, 0], sizes = [2, 14, 14, 3], strides = [1, 1, 1, 1]} : vector<2x16x16x3xf32> to vector<2x14x14x3xf32>
    %10 = vector.extract_strided_slice %8 {offsets = [0, 0, 1, 0], sizes = [2, 14, 14, 3], strides = [1, 1, 1, 1]} : vector<2x16x16x3xf32> to vector<2x14x14x3xf32>
    %11 = vector.extract_strided_slice %8 {offsets = [0, 0, 2, 0], sizes = [2, 14, 14, 3], strides = [1, 1, 1, 1]} : vector<2x16x16x3xf32> to vector<2x14x14x3xf32>
    %12 = vector.extract_strided_slice %8 {offsets = [0, 1, 0, 0], sizes = [2, 14, 14, 3], strides = [1, 1, 1, 1]} : vector<2x16x16x3xf32> to vector<2x14x14x3xf32>
    %13 = vector.extract_strided_slice %8 {offsets = [0, 1, 1, 0], sizes = [2, 14, 14, 3], strides = [1, 1, 1, 1]} : vector<2x16x16x3xf32> to vector<2x14x14x3xf32>
    %14 = vector.extract_strided_slice %8 {offsets = [0, 1, 2, 0], sizes = [2, 14, 14, 3], strides = [1, 1, 1, 1]} : vector<2x16x16x3xf32> to vector<2x14x14x3xf32>
    %15 = vector.extract_strided_slice %8 {offsets = [0, 2, 0, 0], sizes = [2, 14, 14, 3], strides = [1, 1, 1, 1]} : vector<2x16x16x3xf32> to vector<2x14x14x3xf32>
    %16 = vector.extract_strided_slice %8 {offsets = [0, 2, 1, 0], sizes = [2, 14, 14, 3], strides = [1, 1, 1, 1]} : vector<2x16x16x3xf32> to vector<2x14x14x3xf32>
    %17 = vector.extract_strided_slice %8 {offsets = [0, 2, 2, 0], sizes = [2, 14, 14, 3], strides = [1, 1, 1, 1]} : vector<2x16x16x3xf32> to vector<2x14x14x3xf32>
    %18 = tpu.concatenate %9, %10, %11, %12, %13, %14, %15, %16, %17 in 3 : vector<2x14x14x3xf32>, vector<2x14x14x3xf32>, vector<2x14x14x3xf32>, vector<2x14x14x3xf32>, vector<2x14x14x3xf32>, vector<2x14x14x3xf32>, vector<2x14x14x3xf32>, vector<2x14x14x3xf32>, vector<2x14x14x3xf32> -> vector<2x14x14x27xf32>
    %19 = vector.shape_cast %18 : vector<2x14x14x27xf32> to vector<392x27xf32>
    %c0_5 = arith.constant 0 : index
    %c0_6 = arith.constant 0 : index
    %20 = vector.load %arg2[%c0_5, %c0_6] : memref<27x10xf32, #tpu.memory_space<vmem>>, vector<27x10xf32>
    %cst = arith.constant dense<0.000000e+00> : vector<392x10xf32>
    %21 = tpu.matmul %19, %20, %cst {dimension_numbers = #tpu.dot_dimension_numbers<[1], [0], [0], [1], [0, 0, 1, 1], [], []>} : vector<392x27xf32>, vector<27x10xf32>, vector<392x10xf32> -> vector<392x10xf32>
    %22 = vector.broadcast %1 : vector<1x10xf32> to vector<392x10xf32>
    %23 = arith.addf %21, %22 : vector<392x10xf32>
    %cst_7 = arith.constant 0.000000e+00 : f32
    %24 = vector.broadcast %cst_7 : f32 to vector<392x10xf32>
    %25 = arith.cmpf ogt, %23, %24 : vector<392x10xf32>
    %26 = vector.broadcast %2 : vector<1x10xf32> to vector<392x10xf32>
    %27 = arith.mulf %23, %26 : vector<392x10xf32>
    %28 = arith.select %25, %23, %27 : vector<392x10xi1>, vector<392x10xf32>
    %29 = vector.shape_cast %28 : vector<392x10xf32> to vector<2x14x14x10xf32>
    %30 = vector.shape_cast %29 : vector<2x14x14x10xf32> to vector<2x7x2x14x10xf32>
    %cst_8 = arith.constant dense<0xFF800000> : vector<2x7x14x10xf32>
    %31 = vector.multi_reduction <maximumf>, %30, %cst_8 [2] : vector<2x7x2x14x10xf32> to vector<2x7x14x10xf32>
    %32 = vector.shape_cast %31 : vector<2x7x14x10xf32> to vector<14x14x10xf32>
    %c0_9 = arith.constant 0 : index
    %c0_10 = arith.constant 0 : index
    %c0_11 = arith.constant 0 : index
    %33 = vector.load %arg8[%c0_9, %c0_10, %c0_11] : memref<14x14x10xf32, #tpu.memory_space<vmem>>, vector<14x14x10xf32>
    tpu.vector_store %arg8[%c0_9, %c0_10, %c0_11], %32 {strides = array<i32>} : memref<14x14x10xf32, #tpu.memory_space<vmem>>, vector<14x14x10xf32>,
    %c0_12 = arith.constant 0 : index
    %c0_13 = arith.constant 0 : index
    %c0_14 = arith.constant 0 : index
    %34 = tpu.strided_load %arg8[%c0_12, %c0_13, %c0_14] {strides = array<i32: 1, 2, 1>} : memref<14x14x10xf32, #tpu.memory_space<vmem>>, vector<14x7x10xf32>
    %c0_15 = arith.constant 0 : index
    %c1 = arith.constant 1 : index
    %c0_16 = arith.constant 0 : index
    %35 = tpu.strided_load %arg8[%c0_15, %c1, %c0_16] {strides = array<i32: 1, 2, 1>} : memref<14x14x10xf32, #tpu.memory_space<vmem>>, vector<14x7x10xf32>
    %36 = arith.maximumf %34, %35 : vector<14x7x10xf32>
    %37 = vector.shape_cast %36 : vector<14x7x10xf32> to vector<2x7x7x10xf32>
    %38 = vector.extract_strided_slice %37 {offsets = [0, 0, 0, 0], sizes = [2, 5, 5, 10], strides = [1, 1, 1, 1]} : vector<2x7x7x10xf32> to vector<2x5x5x10xf32>
    %39 = vector.extract_strided_slice %37 {offsets = [0, 0, 1, 0], sizes = [2, 5, 5, 10], strides = [1, 1, 1, 1]} : vector<2x7x7x10xf32> to vector<2x5x5x10xf32>
    %40 = vector.extract_strided_slice %37 {offsets = [0, 0, 2, 0], sizes = [2, 5, 5, 10], strides = [1, 1, 1, 1]} : vector<2x7x7x10xf32> to vector<2x5x5x10xf32>
    %41 = vector.extract_strided_slice %37 {offsets = [0, 1, 0, 0], sizes = [2, 5, 5, 10], strides = [1, 1, 1, 1]} : vector<2x7x7x10xf32> to vector<2x5x5x10xf32>
    %42 = vector.extract_strided_slice %37 {offsets = [0, 1, 1, 0], sizes = [2, 5, 5, 10], strides = [1, 1, 1, 1]} : vector<2x7x7x10xf32> to vector<2x5x5x10xf32>
    %43 = vector.extract_strided_slice %37 {offsets = [0, 1, 2, 0], sizes = [2, 5, 5, 10], strides = [1, 1, 1, 1]} : vector<2x7x7x10xf32> to vector<2x5x5x10xf32>
    %44 = vector.extract_strided_slice %37 {offsets = [0, 2, 0, 0], sizes = [2, 5, 5, 10], strides = [1, 1, 1, 1]} : vector<2x7x7x10xf32> to vector<2x5x5x10xf32>
    %45 = vector.extract_strided_slice %37 {offsets = [0, 2, 1, 0], sizes = [2, 5, 5, 10], strides = [1, 1, 1, 1]} : vector<2x7x7x10xf32> to vector<2x5x5x10xf32>
    %46 = vector.extract_strided_slice %37 {offsets = [0, 2, 2, 0], sizes = [2, 5, 5, 10], strides = [1, 1, 1, 1]} : vector<2x7x7x10xf32> to vector<2x5x5x10xf32>
    %47 = tpu.concatenate %38, %39, %40, %41, %42, %43, %44, %45, %46 in 3 : vector<2x5x5x10xf32>, vector<2x5x5x10xf32>, vector<2x5x5x10xf32>, vector<2x5x5x10xf32>, vector<2x5x5x10xf32>, vector<2x5x5x10xf32>, vector<2x5x5x10xf32>, vector<2x5x5x10xf32>, vector<2x5x5x10xf32> -> vector<2x5x5x90xf32>
    %48 = vector.shape_cast %47 : vector<2x5x5x90xf32> to vector<50x90xf32>
    %c0_17 = arith.constant 0 : index
    %c0_18 = arith.constant 0 : index
    %49 = vector.load %arg3[%c0_17, %c0_18] : memref<90x16xf32, #tpu.memory_space<vmem>>, vector<90x16xf32>
    %cst_19 = arith.constant dense<0.000000e+00> : vector<50x16xf32>
    %50 = tpu.matmul %48, %49, %cst_19 {dimension_numbers = #tpu.dot_dimension_numbers<[1], [0], [0], [1], [0, 0, 1, 1], [], []>} : vector<50x90xf32>, vector<90x16xf32>, vector<50x16xf32> -> vector<50x16xf32>
    %51 = vector.broadcast %3 : vector<1x16xf32> to vector<50x16xf32>
    %52 = arith.addf %50, %51 : vector<50x16xf32>
    %cst_20 = arith.constant 0.000000e+00 : f32
    %53 = vector.broadcast %cst_20 : f32 to vector<50x16xf32>
    %54 = arith.cmpf ogt, %52, %53 : vector<50x16xf32>
    %55 = vector.broadcast %4 : vector<1x16xf32> to vector<50x16xf32>
    %56 = arith.mulf %52, %55 : vector<50x16xf32>
    %57 = arith.select %54, %52, %56 : vector<50x16xi1>, vector<50x16xf32>
    %58 = vector.shape_cast %57 : vector<50x16xf32> to vector<2x5x5x16xf32>
    %59 = vector.extract_strided_slice %58 {offsets = [0, 0, 0, 0], sizes = [2, 3, 3, 16], strides = [1, 1, 1, 1]} : vector<2x5x5x16xf32> to vector<2x3x3x16xf32>
    %60 = vector.extract_strided_slice %58 {offsets = [0, 0, 1, 0], sizes = [2, 3, 3, 16], strides = [1, 1, 1, 1]} : vector<2x5x5x16xf32> to vector<2x3x3x16xf32>
    %61 = vector.extract_strided_slice %58 {offsets = [0, 0, 2, 0], sizes = [2, 3, 3, 16], strides = [1, 1, 1, 1]} : vector<2x5x5x16xf32> to vector<2x3x3x16xf32>
    %62 = vector.extract_strided_slice %58 {offsets = [0, 1, 0, 0], sizes = [2, 3, 3, 16], strides = [1, 1, 1, 1]} : vector<2x5x5x16xf32> to vector<2x3x3x16xf32>
    %63 = vector.extract_strided_slice %58 {offsets = [0, 1, 1, 0], sizes = [2, 3, 3, 16], strides = [1, 1, 1, 1]} : vector<2x5x5x16xf32> to vector<2x3x3x16xf32>
    %64 = vector.extract_strided_slice %58 {offsets = [0, 1, 2, 0], sizes = [2, 3, 3, 16], strides = [1, 1, 1, 1]} : vector<2x5x5x16xf32> to vector<2x3x3x16xf32>
    %65 = vector.extract_strided_slice %58 {offsets = [0, 2, 0, 0], sizes = [2, 3, 3, 16], strides = [1, 1, 1, 1]} : vector<2x5x5x16xf32> to vector<2x3x3x16xf32>
    %66 = vector.extract_strided_slice %58 {offsets = [0, 2, 1, 0], sizes = [2, 3, 3, 16], strides = [1, 1, 1, 1]} : vector<2x5x5x16xf32> to vector<2x3x3x16xf32>
    %67 = vector.extract_strided_slice %58 {offsets = [0, 2, 2, 0], sizes = [2, 3, 3, 16], strides = [1, 1, 1, 1]} : vector<2x5x5x16xf32> to vector<2x3x3x16xf32>
    %68 = tpu.concatenate %59, %60, %61, %62, %63, %64, %65, %66, %67 in 3 : vector<2x3x3x16xf32>, vector<2x3x3x16xf32>, vector<2x3x3x16xf32>, vector<2x3x3x16xf32>, vector<2x3x3x16xf32>, vector<2x3x3x16xf32>, vector<2x3x3x16xf32>, vector<2x3x3x16xf32>, vector<2x3x3x16xf32> -> vector<2x3x3x144xf32>
    %69 = vector.shape_cast %68 : vector<2x3x3x144xf32> to vector<18x144xf32>
    %c0_21 = arith.constant 0 : index
    %c0_22 = arith.constant 0 : index
    %70 = vector.load %arg4[%c0_21, %c0_22] : memref<144x32xf32, #tpu.memory_space<vmem>>, vector<144x32xf32>
    %cst_23 = arith.constant dense<0.000000e+00> : vector<18x32xf32>
    %71 = tpu.matmul %69, %70, %cst_23 {dimension_numbers = #tpu.dot_dimension_numbers<[1], [0], [0], [1], [0, 0, 1, 1], [], []>} : vector<18x144xf32>, vector<144x32xf32>, vector<18x32xf32> -> vector<18x32xf32>
    %72 = vector.broadcast %5 : vector<1x32xf32> to vector<18x32xf32>
    %73 = arith.addf %71, %72 : vector<18x32xf32>
    %cst_24 = arith.constant 0.000000e+00 : f32
    %74 = vector.broadcast %cst_24 : f32 to vector<18x32xf32>
    %75 = arith.cmpf ogt, %73, %74 : vector<18x32xf32>
    %76 = vector.broadcast %6 : vector<1x32xf32> to vector<18x32xf32>
    %77 = arith.mulf %73, %76 : vector<18x32xf32>
    %78 = arith.select %75, %73, %77 : vector<18x32xi1>, vector<18x32xf32>
    %c0_25 = arith.constant 0 : index
    %c0_26 = arith.constant 0 : index
    %79 = vector.load %arg5[%c0_25, %c0_26] : memref<32x128xf32, #tpu.memory_space<vmem>>, vector<32x128xf32>
    %cst_27 = arith.constant dense<0.000000e+00> : vector<18x128xf32>
    %80 = tpu.matmul %78, %79, %cst_27 {dimension_numbers = #tpu.dot_dimension_numbers<[1], [0], [0], [1], [0, 0, 1, 1], [], []>} : vector<18x32xf32>, vector<32x128xf32>, vector<18x128xf32> -> vector<18x128xf32>
    %81 = vector.broadcast %7 : vector<1x128xf32> to vector<18x128xf32>
    %82 = arith.addf %80, %81 : vector<18x128xf32>
    %cst_28 = arith.constant 0.000000e+00 : f32
    %83 = vector.broadcast %cst_28 : f32 to vector<6x128xf32>
    %84 = tpu.concatenate %82, %83 in 0 : vector<18x128xf32>, vector<6x128xf32> -> vector<24x128xf32>
    %85 = tpu.transpose %84, [1, 0] : vector<24x128xf32> -> vector<128x24xf32>
    %86 = vector.extract_strided_slice %85 {offsets = [0, 0], sizes = [128, 18], strides = [1, 1]} : vector<128x24xf32> to vector<128x18xf32>
    %87 = vector.extract_strided_slice %86 {offsets = [0, 0], sizes = [1, 18], strides = [1, 1]} : vector<128x18xf32> to vector<1x18xf32>
    %88 = vector.extract_strided_slice %86 {offsets = [1, 0], sizes = [1, 18], strides = [1, 1]} : vector<128x18xf32> to vector<1x18xf32>
    %89 = arith.subf %87, %88 : vector<1x18xf32>
    %90 = math.exp %89 : vector<1x18xf32>
    %cst_29 = arith.constant 1.000000e+00 : f32
    %91 = vector.broadcast %cst_29 : f32 to vector<1x18xf32>
    %92 = arith.addf %91, %90 : vector<1x18xf32>
    %cst_30 = arith.constant 1.000000e+00 : f32
    %93 = vector.broadcast %cst_30 : f32 to vector<1x18xf32>
    %94 = arith.divf %93, %92 : vector<1x18xf32>
    %cst_31 = arith.constant 1.000000e+00 : f32
    %95 = vector.broadcast %cst_31 : f32 to vector<1x18xf32>
    %96 = arith.subf %95, %94 : vector<1x18xf32>
    %97 = vector.extract_strided_slice %86 {offsets = [2, 0], sizes = [4, 18], strides = [1, 1]} : vector<128x18xf32> to vector<4x18xf32>
    %98 = tpu.concatenate %96, %94, %97 in 0 : vector<1x18xf32>, vector<1x18xf32>, vector<4x18xf32> -> vector<6x18xf32>
    %c0_32 = arith.constant 0 : index
    %c0_33 = arith.constant 0 : index
    %c0_34 = arith.constant 0 : index
    %99 = vector.load %arg7[%c0_32, %c0_33, %c0_34] : memref<1x6x18xf32, #tpu.memory_space<vmem>>, vector<1x6x18xf32>
    %100 = vector.shape_cast %99 : vector<1x6x18xf32> to vector<6x18xf32>
    %101 = vector.shape_cast %98 : vector<6x18xf32> to vector<1x6x18xf32>
    tpu.vector_store %arg7[%c0_32, %c0_33, %c0_34], %101 {strides = array<i32>} : memref<1x6x18xf32, #tpu.memory_space<vmem>>, vector<1x6x18xf32>,
    return
  }
  func.func @transform_0(%arg0: i32) -> (i32, i32, i32, i32) {
    %c0_i32 = arith.constant 0 : i32
    %c0_i32_0 = arith.constant 0 : i32
    %c0_i32_1 = arith.constant 0 : i32
    %c0_i32_2 = arith.constant 0 : i32
    return %arg0, %c0_i32, %c0_i32_0, %c0_i32_1 : i32, i32, i32, i32
  }
  func.func @transform_1(%arg0: i32) -> (i32, i32) {
    %c0_i32 = arith.constant 0 : i32
    %c0_i32_0 = arith.constant 0 : i32
    %c0_i32_1 = arith.constant 0 : i32
    return %c0_i32, %c0_i32_0 : i32, i32
  }
  func.func @transform_2(%arg0: i32) -> (i32, i32) {
    %c0_i32 = arith.constant 0 : i32
    %c0_i32_0 = arith.constant 0 : i32
    %c0_i32_1 = arith.constant 0 : i32
    return %c0_i32, %c0_i32_0 : i32, i32
  }
  func.func @transform_3(%arg0: i32) -> (i32, i32) {
    %c0_i32 = arith.constant 0 : i32
    %c0_i32_0 = arith.constant 0 : i32
    %c0_i32_1 = arith.constant 0 : i32
    return %c0_i32, %c0_i32_0 : i32, i32
  }
  func.func @transform_4(%arg0: i32) -> (i32, i32) {
    %c0_i32 = arith.constant 0 : i32
    %c0_i32_0 = arith.constant 0 : i32
    %c0_i32_1 = arith.constant 0 : i32
    return %c0_i32, %c0_i32_0 : i32, i32
  }
  func.func @transform_5(%arg0: i32) -> (i32, i32) {
    %c0_i32 = arith.constant 0 : i32
    %c0_i32_0 = arith.constant 0 : i32
    %c0_i32_1 = arith.constant 0 : i32
    return %c0_i32, %c0_i32_0 : i32, i32
  }
  func.func @transform_6(%arg0: i32) -> (i32, i32, i32) {
    %c0_i32 = arith.constant 0 : i32
    %c0_i32_0 = arith.constant 0 : i32
    %c0_i32_1 = arith.constant 0 : i32
    return %arg0, %c0_i32, %c0_i32_0 : i32, i32, i32
  }
}

</mosaic_0001>

<bundles_post_ra>
// kernel: tpu_custom_call.1
= control target key start
LH: loop header
LB: loop body
LE: loop exit
PB: predicated region body
PF: predicated region fallthrough
CT: control target
= control target key end

     0   :  { %s5848_s21 = smov 0   ;;  %s10448_s0 = inlined_call_operand.vmem [shape: f32[4,16,16,3], index: 0, kind: input, shape index: {}]   ;;  %s10449_s1 = inlined_call_operand.vmem [shape: f32[27,10], index: 1, kind: input, shape index: {}]   ;;  %s10450_s2 = inlined_call_operand.vmem [shape: f32[90,16], index: 2, kind: input, shape index: {}]   ;;  %s10451_s3 = inlined_call_operand.vmem [shape: f32[144,32], index: 3, kind: input, shape index: {}]   ;;  %s10452_s4 = inlined_call_operand.vmem [shape: f32[32,128], index: 4, kind: input, shape index: {}]   ;;  %s10453_s5 = inlined_call_operand.vmem [shape: f32[8,128], index: 5, kind: input, shape index: {}]   ;;  %s10454_s6 = inlined_call_operand.vmem [shape: f32[2,6,18], index: 6, kind: output, shape index: {}]  }
   0x1 LB: > { %s5854_s22 = sadd.s32 4294967295, %s5789_s21   ;;  %p5606_p0 = scmp.ge.s32.totalorder %s5789_s21, 1  ;;  %s5789_s21 = sphi %s5848_s21, %s16_s21  }
   0x2   : > { %p214_p1 = scmp.lt.s32.totalorder %s5789_s21, 3 }
   0x4   : > { %p215_p2 = pnand %p5606_p0, %p214_p1 }
   0x6   : > { %218 = sbr.rel (%p215_p2) target bundleno = 2856 (0xb28), region = 44 }
   0xb   : > { %s5607_s23 = sshll.u32 %s5854_s22, 1  ;;  %s5791_s28 = smov 3   ;;  %vm376_vm0 = vcmask 1046528   ;;  %vm629_vm1 = vcmask 1045504   ;;  %vm2930_vm2 = vcmask 1042432   ;;  %vm1979_vm3 = vcmask 48128  }
   0xc   : > { %p245_p3 = scmp.lt.s32.totalorder %s5607_s23, 3  ;;  %s5792_s29 = smov 6   ;;  %vm1922_vm4 = vcmask 23552   ;;  %vm2036_vm5 = vcmask 72704   ;;  %vm2093_vm6 = vcmask 97280   ;;  %vm2150_vm7 = vcmask 121856  }
   0xd   : > { %s5793_s30 = smov 9   ;;  %s5794_s7 = smov 15   ;;  %vm2207_vm8 = vcmask 146432   ;;  %vm2264_vm9 = vcmask 171008   ;;  %vm2321_vm10 = vcmask 195584   ;;  %vm2831_vm11 = vcmask 220160  }
   0xe   : > { %s11018_s23 = smov (!%p245_p3, %s5607_s23), 3  ;;  %s5795_s8 = smov 18   ;;  %vm3589_vm14 = vcmask 74752  }
   0xf   : > { %s5677_s24 = sshll.u32 %s11018_s23, 8  ;;  %s5796_s9 = smov 12  }
  0x10   : > { %s5862_s27 = scalar_lea.vmem %s10448_s0, %s5677_s24  ;;  %s5797_s10 = smov 24  }
  0x11   : > { %v5865_v0 = vld [vmem:[%s5862_s27 + $0x28] sm:$0xff]  ;;  %v5868_v1 = vld [vmem:[%s5862_s27 + $0x18] sm:$0xff]  ;;  %v5881_v6 = vld [vmem:[%s5862_s27 + $0x20] sm:$0xff]  ;;  %s5798_s11 = smov 21   ;;  %s5799_s24 = smov 20  }
  0x12   : > { %v5871_v2 = vld [vmem:[%s5862_s27 + $0x8] sm:$0xff]  ;;  %v5874_v3 = vrot.slane %v5865_v0, 1  ;;  %v5877_v4 = vrot.slane %v5868_v1, 1  ;;  %v5884_v7 = vld [vmem:[%s5862_s27 + $0x10] sm:$0xff]  ;;  %v5887_v8 = vld [vmem:[%s5862_s27] sm:$0xff]  ;;  %v383_v9 = vrot.slane %v5881_v6, 1 }
  0x13   : > { %v378_v5 = vrot.slane %v5871_v2, 1  ;;  %v380_v10 = vrot.slane %v5884_v7, 1  ;;  %v377_v11 = vrot.slane %v5887_v8, 1  ;;  %v5907_v15 = vld [vmem:[%s5862_s27 + $0x40] sm:$0xff]  ;;  %v5910_v16 = vld [vmem:[%s5862_s27 + $0x48] sm:$0xff]  ;;  %v5913_v17 = vld [vmem:[%s5862_s27 + $0x38] sm:$0xff] }
  0x14   : > { %10631 = vst [vmem:[#allocation3_spill] sm:$0xff] %v5874_v3  ;;  %471 = vrot.lane.b32.xlu2 %v5874_v3, %s5791_s28  ;;  %467 = vrot.lane.b32.xlu1 %v5877_v4, %s5791_s28  ;;  %v5899_v12 = vsel %vm376_vm0, %v383_v9, %v5874_v3  ;;  %v5916_v18 = vld [vmem:[%s5862_s27 + $0x30] sm:$0xff]  ;;  %v389_v19 = vrot.slane %v5907_v15, 1  ;;  %v5925_v20 = vrot.slane %v5910_v16, 1  ;;  %v5928_v21 = vrot.slane %v5913_v17, 1  ;;  %v5940_v25 = vld [vmem:[%s5862_s27 + $0x58] sm:$0xff] }
  0x15   : > { %10632 = vst [vmem:[#allocation4_spill] sm:$0xff] %v5877_v4  ;;  %463 = vrot.lane.b32.xlu0 %v378_v5, %s5791_s28  ;;  %v5903_v13 = vsel %vm376_vm0, %v380_v10, %v5877_v4  ;;  %v379_v14 = vsel %vm376_vm0, %v377_v11, %v378_v5  ;;  %v386_v22 = vrot.slane %v5916_v18, 1  ;;  %v5943_v26 = vld [vmem:[%s5862_s27 + $0x50] sm:$0xff]  ;;  %v5952_v27 = vrot.slane %v5940_v25, 1  ;;  %v5963_v31 = vld [vmem:[%s5862_s27 + $0x78] sm:$0xff]  ;;  %v5966_v32 = vld [vmem:[%s5862_s27 + $0x68] sm:$0xff] }
  0x16   : > { %10633 = vst [vmem:[#allocation5_spill] sm:$0xff] %v5899_v12  ;;  %v5933_v23 = vsel %vm376_vm0, %v389_v19, %v5925_v20  ;;  %v392_v28 = vrot.slane %v5943_v26, 1  ;;  %v5960_v30 = vld [vmem:[%s5862_s27 + $0x70] sm:$0xff]  ;;  %v5969_v33 = vld [vmem:[%s5862_s27 + $0x60] sm:$0xff]  ;;  %v5979_v35 = vrot.slane %v5963_v31, 1  ;;  %v5982_v36 = vrot.slane %v5966_v32, 1 }
  0x17   : > { %10634 = vst [vmem:[#allocation6_spill] sm:$0xff] %v5903_v13  ;;  %v5937_v24 = vsel %vm376_vm0, %v386_v22, %v5928_v21  ;;  %v398_v34 = vrot.slane %v5960_v30, 1  ;;  %v395_v37 = vrot.slane %v5969_v33, 1  ;;  %v5994_v40 = vld [vmem:[%s5862_s27 + $0x88] sm:$0xff]  ;;  %v5997_v41 = vld [vmem:[%s5862_s27 + $0x80] sm:$0xff]  ;;  %v6020_v47 = vld [vmem:[%s5862_s27 + $0x98] sm:$0xff] }
  0x18   : > { %10635 = vst [vmem:[#allocation7_spill] sm:$0xff] %v5925_v20  ;;  %v5957_v29 = vsel %vm376_vm0, %v392_v28, %v5952_v27  ;;  %v6006_v42 = vrot.slane %v5994_v40, 1  ;;  %v401_v43 = vrot.slane %v5997_v41, 1  ;;  %v6014_v45 = vld [vmem:[%s5862_s27 + $0xa0] sm:$0xff]  ;;  %v6017_v46 = vld [vmem:[%s5862_s27 + $0xa8] sm:$0xff]  ;;  %v6023_v48 = vld [vmem:[%s5862_s27 + $0x90] sm:$0xff] }
  0x19   : > { %10636 = vst [vmem:[#allocation8_spill] sm:$0xff] %v5928_v21  ;;  %v5987_v38 = vsel %vm376_vm0, %v398_v34, %v5979_v35  ;;  %v5991_v39 = vsel %vm376_vm0, %v395_v37, %v5982_v36  ;;  %v407_v49 = vrot.slane %v6014_v45, 1  ;;  %v6033_v50 = vrot.slane %v6017_v46, 1  ;;  %v6048_v55 = vld [vmem:[%s5862_s27 + $0xb8] sm:$0xff]  ;;  %v6051_v56 = vld [vmem:[%s5862_s27 + $0xb0] sm:$0xff]  ;;  %v6074_v62 = vld [vmem:[%s5862_s27 + $0xc8] sm:$0xff] }
  0x1a   : > { %10637 = vst [vmem:[#allocation9_spill] sm:$0xff] %v5933_v23  ;;  %v6011_v44 = vsel %vm376_vm0, %v401_v43, %v6006_v42  ;;  %v6036_v51 = vrot.slane %v6020_v47, 1  ;;  %v404_v52 = vrot.slane %v6023_v48, 1  ;;  %v6060_v57 = vrot.slane %v6048_v55, 1  ;;  %v6068_v60 = vld [vmem:[%s5862_s27 + $0xd0] sm:$0xff]  ;;  %v6071_v61 = vld [vmem:[%s5862_s27 + $0xd8] sm:$0xff] }
  0x1b   : > { %10638 = vst [vmem:[#allocation10_spill] sm:$0xff] %v5937_v24  ;;  %v6041_v53 = vsel %vm376_vm0, %v407_v49, %v6033_v50  ;;  %v410_v58 = vrot.slane %v6051_v56, 1  ;;  %v6077_v63 = vld [vmem:[%s5862_s27 + $0xc0] sm:$0xff]  ;;  %v416_v5 = vrot.slane %v6068_v60, 1  ;;  %v6087_v9 = vrot.slane %v6071_v61, 1  ;;  %v6102_v22 = vld [vmem:[%s5862_s27 + $0x108] sm:$0xff] }
  0x1c   : > { %469 = vrot.lane.b32.xlu2 %v5899_v12, %s5791_s28  ;;  %465 = vrot.lane.b32.xlu1 %v5903_v13, %s5791_s28  ;;  %10639 = vst [vmem:[#allocation11_spill] sm:$0xff] %v5952_v27  ;;  %v6045_v54 = vsel %vm376_vm0, %v404_v52, %v6036_v51  ;;  %v6090_v10 = vrot.slane %v6074_v62, 1  ;;  %v413_v11 = vrot.slane %v6077_v63, 1  ;;  %v6105_v28 = vld [vmem:[%s5862_s27 + $0x100] sm:$0xff]  ;;  %v420_v34 = vrot.slane %v6102_v22, 1  ;;  %v6120_v52 = vld [vmem:[%s5862_s27 + $0x128] sm:$0xff] }
  0x1d   : > { %461 = vrot.lane.b32.xlu0 %v379_v14, %s5791_s28  ;;  %10640 = vst [vmem:[#allocation12_spill] sm:$0xff] %v5957_v29  ;;  %v6065_v59 = vsel %vm376_vm0, %v410_v58, %v6060_v57  ;;  %v6095_v14 = vsel %vm376_vm0, %v416_v5, %v6087_v9  ;;  %v419_v37 = vrot.slane %v6105_v28, 1  ;;  %v6117_v49 = vld [vmem:[%s5862_s27 + $0x120] sm:$0xff]  ;;  %v6123_v58 = vld [vmem:[%s5862_s27 + $0x118] sm:$0xff]  ;;  %v6126_v5 = vld [vmem:[%s5862_s27 + $0x110] sm:$0xff]  ;;  %s5800_s25 = smov 10  }
  0x1e   : > { %10641 = vst [vmem:[#allocation13_spill] sm:$0xff] %v5979_v35  ;;  %v6099_v19 = vsel %vm376_vm0, %v413_v11, %v6090_v10  ;;  %v425_v11 = vrot.slane %v6117_v49, 1  ;;  %v6355_v13 = vld [vmem:[%s5862_s27 + $0x1d8] sm:$0xff]  ;;  %s5801_s26 = smov 30   ;;  %s5812_s18 = smov 112  }
  0x1f   : > { %10642 = vst [vmem:[#allocation14_spill] sm:$0xff] %v5982_v36  ;;  %v421_v43 = vsel %vm376_vm0, %v419_v37, %v420_v34  ;;  %v6134_v37 = vrot.slane %v6120_v52, 1  ;;  %p251_p4 = scmp.lt.s32.totalorder %s5854_s22, 1 }
  0x20   : > { %10643 = vst [vmem:[#allocation15_spill] sm:$0xff] %v5987_v38 }
  0x21   : > { %10644 = vst [vmem:[#allocation16_spill] sm:$0xff] %v5991_v39  ;;  %s11020_s22 = smov (!%p251_p4, %s5854_s22), 1 }
  0x22   : > { %10645 = vst [vmem:[#allocation17_spill] sm:$0xff] %v6006_v42  ;;  %s5610_s23 = sshll.u32 %s11020_s22, 3 }
  0x23   : > { %10646 = vst [vmem:[#allocation18_spill] sm:$0xff] %v6011_v44 }
  0x24   : > { %477 = vrot.lane.b32.xlu2 %v5933_v23, %s5791_s28  ;;  %475 = vrot.lane.b32.xlu1 %v5928_v21, %s5791_s28  ;;  %10647 = vst [vmem:[#allocation19_spill] sm:$0xff] %v6033_v50  ;;  %v6289_v23 = vld [vmem:[%s5862_s27 + $0x1b0] sm:$0xff]  ;;  %v6298_v21 = vld [vmem:[%s5862_s27 + $0x1a0] sm:$0xff] }
  0x25   : > { %473 = vrot.lane.b32.xlu0 %v5937_v24, %s5791_s28  ;;  %10648 = vst [vmem:[#allocation20_spill] sm:$0xff] %v6036_v51 }
  0x26   : > { %10649 = vst [vmem:[#allocation21_spill] sm:$0xff] %v6041_v53 }
  0x27   : > { %10650 = vst [vmem:[#allocation22_spill] sm:$0xff] %v6045_v54 }
  0x28   : > { %10651 = vst [vmem:[#allocation23_spill] sm:$0xff] %v6060_v57 }
  0x29   : > { %10652 = vst [vmem:[#allocation24_spill] sm:$0xff] %v6065_v59 }
  0x2a   : > { %10653 = vst [vmem:[#allocation25_spill] sm:$0xff] %v6087_v9 }
  0x2b   : > { %10654 = vst [vmem:[#allocation26_spill] sm:$0xff] %v6090_v10 }
  0x2c   : > { %483 = vrot.lane.b32.xlu2 %v5952_v27, %s5791_s28  ;;  %481 = vrot.lane.b32.xlu1 %v5957_v29, %s5791_s28  ;;  %10655 = vst [vmem:[#allocation27_spill] sm:$0xff] %v6095_v14 }
  0x2d   : > { %479 = vrot.lane.b32.xlu0 %v5925_v20, %s5791_s28  ;;  %10656 = vst [vmem:[#allocation28_spill] sm:$0xff] %v6099_v19 }
  0x2e   : > { %10657 = vst [vmem:[#allocation29_spill] sm:$0xff] %v6134_v37 }
  0x34   : > { %489 = vrot.lane.b32.xlu2 %v5987_v38, %s5791_s28  ;;  %487 = vrot.lane.b32.xlu1 %v5982_v36, %s5791_s28 }
  0x35   : > { %485 = vrot.lane.b32.xlu0 %v5991_v39, %s5791_s28  ;;  %v6263_v39 = vld [vmem:[%s5862_s27 + $0x198] sm:$0xff] }
  0x3c   : > { %495 = vrot.lane.b32.xlu2 %v6006_v42, %s5791_s28  ;;  %493 = vrot.lane.b32.xlu1 %v6011_v44, %s5791_s28  ;;  %v6205_v42 = vld [vmem:[%s5862_s27 + $0x168] sm:$0xff] }
  0x3d   : > { %491 = vrot.lane.b32.xlu0 %v5979_v35, %s5791_s28  ;;  %v6230_v44 = vld [vmem:[%s5862_s27 + $0x188] sm:$0xff] }
  0x44   : > { %501 = vrot.lane.b32.xlu2 %v6041_v53, %s5791_s28  ;;  %499 = vrot.lane.b32.xlu1 %v6036_v51, %s5791_s28 }
  0x45   : > { %497 = vrot.lane.b32.xlu0 %v6045_v54, %s5791_s28  ;;  %v6208_v54 = vld [vmem:[%s5862_s27 + $0x160] sm:$0xff] }
  0x4c   : > { %507 = vrot.lane.b32.xlu2 %v6060_v57, %s5791_s28  ;;  %505 = vrot.lane.b32.xlu1 %v6065_v59, %s5791_s28  ;;  %v6169_v59 = vld [vmem:[%s5862_s27 + $0x150] sm:$0xff] }
  0x4d   : > { %503 = vrot.lane.b32.xlu0 %v6033_v50, %s5791_s28  ;;  %v6175_v50 = vld [vmem:[%s5862_s27 + $0x148] sm:$0xff] }
  0x4e   : > { %v6193_v53 = vrot.slane %v6175_v50, 1 }
  0x50   : > { %10665 = vst [vmem:[#allocation37_spill] sm:$0xff] %v6193_v53 }
  0x54   : > { %513 = vrot.lane.b32.xlu2 %v6095_v14, %s5791_s28  ;;  %511 = vrot.lane.b32.xlu1 %v6090_v10, %s5791_s28  ;;  %v6137_v14 = vrot.slane %v6123_v58, 1  ;;  %v6152_v10 = vld [vmem:[%s5862_s27 + $0x130] sm:$0xff] }
  0x55   : > { %509 = vrot.lane.b32.xlu0 %v6099_v19, %s5791_s28  ;;  %v422_v19 = vrot.slane %v6126_v5, 1  ;;  %v428_v57 = vrot.slane %v6152_v10, 1 }
  0x56   : > { %10658 = vst [vmem:[#allocation30_spill] sm:$0xff] %v6137_v14 }
  0x5c   : > { %519 = vrot.lane.b32.xlu2 %v420_v34, %s5791_s28  ;;  %517 = vrot.lane.b32.xlu1 %v421_v43, %s5791_s28  ;;  %v6142_v34 = vsel %vm376_vm0, %v425_v11, %v6134_v37  ;;  %v6146_v43 = vsel %vm376_vm0, %v422_v19, %v6137_v14 }
  0x5d   : > { %515 = vrot.lane.b32.xlu0 %v6087_v9, %s5791_s28  ;;  %10659 = vst [vmem:[#allocation31_spill] sm:$0xff] %v6142_v34  ;;  %v6149_v9 = vld [vmem:[%s5862_s27 + $0x138] sm:$0xff] }
  0x5e   : > { %10660 = vst [vmem:[#allocation32_spill] sm:$0xff] %v6146_v43  ;;  %v6161_v11 = vrot.slane %v6149_v9, 1 }
  0x60   : > { %10661 = vst [vmem:[#allocation33_spill] sm:$0xff] %v6161_v11  ;;  %v6166_v19 = vsel %vm376_vm0, %v428_v57, %v6161_v11  ;;  %v434_v57 = vrot.slane %v6169_v59, 1 }
  0x61   : > { %10662 = vst [vmem:[#allocation34_spill] sm:$0xff] %v6166_v19 }
  0x64   : > { %525 = vrot.lane.b32.xlu2 %v6142_v34, %s5791_s28  ;;  %523 = vrot.lane.b32.xlu1 %v6137_v14, %s5791_s28  ;;  %v6172_v34 = vld [vmem:[%s5862_s27 + $0x158] sm:$0xff]  ;;  %v6178_v14 = vld [vmem:[%s5862_s27 + $0x140] sm:$0xff] }
  0x65   : > { %521 = vrot.lane.b32.xlu0 %v6146_v43, %s5791_s28  ;;  %v6188_v43 = vrot.slane %v6172_v34, 1 }
  0x67   : > { %10663 = vst [vmem:[#allocation35_spill] sm:$0xff] %v6188_v43 }
  0x6c   : > { %531 = vrot.lane.b32.xlu2 %v6161_v11, %s5791_s28  ;;  %529 = vrot.lane.b32.xlu1 %v6166_v19, %s5791_s28  ;;  %v431_v11 = vrot.slane %v6178_v14, 1  ;;  %v6198_v19 = vsel %vm376_vm0, %v434_v57, %v6188_v43  ;;  %v6217_v57 = vrot.slane %v6205_v42, 1 }
  0x6d   : > { %527 = vrot.lane.b32.xlu0 %v6134_v37, %s5791_s28  ;;  %10666 = vst [vmem:[#allocation38_spill] sm:$0xff] %v6198_v19 }
  0x6e   : > { %v6190_v51 = vpop.permute.xlu2 %471  ;;  %v6202_v37 = vsel %vm376_vm0, %v431_v11, %v6193_v53  ;;  %10668 = vst [vmem:[#allocation40_spill] sm:$0xff] %v6217_v57 }
  0x6f   : > { %10664 = vst [vmem:[#allocation36_spill] sm:$0xff] %v6190_v51  ;;  %v437_v51 = vrot.slane %v6208_v54, 1 }
  0x70   : > { %10667 = vst [vmem:[#allocation39_spill] sm:$0xff] %v6202_v37 }
  0x71   : > { %v6224_v35 = vsel %vm376_vm0, %v437_v51, %v6217_v57 }
  0x72   : > { %10670 = vst [vmem:[#allocation42_spill] sm:$0xff] %v6224_v35 }
  0x74   : > { %537 = vrot.lane.b32.xlu2 %v6198_v19, %s5791_s28  ;;  %535 = vrot.lane.b32.xlu1 %v6193_v53, %s5791_s28  ;;  %v6227_v19 = vld [vmem:[%s5862_s27 + $0x180] sm:$0xff]  ;;  %v6233_v53 = vld [vmem:[%s5862_s27 + $0x178] sm:$0xff] }
  0x75   : > { %533 = vrot.lane.b32.xlu0 %v6202_v37, %s5791_s28  ;;  %v6236_v37 = vld [vmem:[%s5862_s27 + $0x170] sm:$0xff]  ;;  %v443_v51 = vrot.slane %v6227_v19, 1  ;;  %v6251_v36 = vrot.slane %v6233_v53, 1 }
  0x76   : > { %v6220_v11 = vpop.permute.xlu2 %469 }
  0x77   : > { %10669 = vst [vmem:[#allocation41_spill] sm:$0xff] %v6220_v11  ;;  %v6246_v11 = vrot.slane %v6230_v44, 1 }
  0x78   : > { %10673 = vst [vmem:[#allocation45_spill] sm:$0xff] %v6251_v36 }
  0x79   : > { %10671 = vst [vmem:[#allocation43_spill] sm:$0xff] %v6246_v11 }
  0x7c   : > { %543 = vrot.lane.b32.xlu2 %v6217_v57, %s5791_s28  ;;  %541 = vrot.lane.b32.xlu1 %v6224_v35, %s5791_s28  ;;  %v440_v57 = vrot.slane %v6236_v37, 1  ;;  %v6256_v35 = vsel %vm376_vm0, %v443_v51, %v6246_v11  ;;  %v6275_v51 = vrot.slane %v6263_v39, 1 }
  0x7d   : > { %539 = vrot.lane.b32.xlu0 %v6188_v43, %s5791_s28  ;;  %10674 = vst [vmem:[#allocation46_spill] sm:$0xff] %v6256_v35 }
  0x7e   : > { %v6248_v38 = vpop.permute.xlu2 %477  ;;  %v6260_v43 = vsel %vm376_vm0, %v440_v57, %v6251_v36  ;;  %10676 = vst [vmem:[#allocation48_spill] sm:$0xff] %v6275_v51 }
  0x7f   : > { %10672 = vst [vmem:[#allocation44_spill] sm:$0xff] %v6248_v38  ;;  %v6266_v38 = vld [vmem:[%s5862_s27 + $0x190] sm:$0xff] }
  0x80   : > { %10675 = vst [vmem:[#allocation47_spill] sm:$0xff] %v6260_v43  ;;  %v446_v29 = vrot.slane %v6266_v38, 1 }
  0x84   : > { %549 = vrot.lane.b32.xlu2 %v6256_v35, %s5791_s28  ;;  %547 = vrot.lane.b32.xlu1 %v6251_v36, %s5791_s28  ;;  %v6286_v35 = vsel %vm376_vm0, %v446_v29, %v6275_v51  ;;  %v6292_v36 = vld [vmem:[%s5862_s27 + $0x1b8] sm:$0xff]  ;;  %v452_v29 = vrot.slane %v6289_v23, 1 }
  0x85   : > { %545 = vrot.lane.b32.xlu0 %v6260_v43, %s5791_s28  ;;  %10680 = vst [vmem:[#allocation52_spill] sm:$0xff] %v6286_v35  ;;  %v6295_v43 = vld [vmem:[%s5862_s27 + $0x1a8] sm:$0xff] }
  0x86   : > { %v6278_v57 = vpop.permute.xlu2 %483  ;;  %v6280_v27 = vpop.permute.xlu1 %467  ;;  %v6315_v24 = vrot.slane %v6295_v43, 1 }
  0x87   : > { %10677 = vst [vmem:[#allocation49_spill] sm:$0xff] %v6278_v57  ;;  %v6282_v20 = vpop.permute.xlu0 %463  ;;  %v6308_v57 = vrot.slane %v6292_v36, 1 }
  0x88   : > { %10678 = vst [vmem:[#allocation50_spill] sm:$0xff] %v6280_v27 }
  0x89   : > { %10679 = vst [vmem:[#allocation51_spill] sm:$0xff] %v6282_v20 }
  0x8a   : > { %10681 = vst [vmem:[#allocation53_spill] sm:$0xff] %v6308_v57 }
  0x8b   : > { %10684 = vst [vmem:[#allocation56_spill] sm:$0xff] %v6315_v24 }
  0x8c   : > { %555 = vrot.lane.b32.xlu2 %v6275_v51, %s5791_s28  ;;  %553 = vrot.lane.b32.xlu1 %v6286_v35, %s5791_s28  ;;  %v449_v51 = vrot.slane %v6298_v21, 1 }
  0x8d   : > { %551 = vrot.lane.b32.xlu0 %v6246_v11, %s5791_s28  ;;  %v6322_v11 = vsel %vm376_vm0, %v452_v29, %v6308_v57 }
  0x8e   : > { %v6310_v27 = vpop.permute.xlu2 %489  ;;  %v6312_v20 = vpop.permute.xlu1 %465  ;;  %10686 = vst [vmem:[#allocation58_spill] sm:$0xff] %v6322_v11  ;;  %v6326_v3 = vsel %vm376_vm0, %v449_v51, %v6315_v24 }
  0x8f   : > { %10682 = vst [vmem:[#allocation54_spill] sm:$0xff] %v6310_v27  ;;  %v6318_v35 = vpop.permute.xlu0 %461  ;;  %v6329_v27 = vld [vmem:[%s5862_s27 + $0x1c8] sm:$0xff] }
  0x90   : > { %10683 = vst [vmem:[#allocation55_spill] sm:$0xff] %v6312_v20  ;;  %v6332_v20 = vld [vmem:[%s5862_s27 + $0x1c0] sm:$0xff]  ;;  %v6341_v29 = vrot.slane %v6329_v27, 1 }
  0x91   : > { %10685 = vst [vmem:[#allocation57_spill] sm:$0xff] %v6318_v35  ;;  %v455_v35 = vrot.slane %v6332_v20, 1 }
  0x92   : > { %10687 = vst [vmem:[#allocation59_spill] sm:$0xff] %v6326_v3 }
  0x93   : > { %10688 = vst [vmem:[#allocation60_spill] sm:$0xff] %v6332_v20 }
  0x94   : > { %561 = vrot.lane.b32.xlu2 %v6322_v11, %s5791_s28  ;;  %559 = vrot.lane.b32.xlu1 %v6315_v24, %s5791_s28  ;;  %10689 = vst [vmem:[#allocation61_spill] sm:$0xff] %v6341_v29  ;;  %v6352_v11 = vsel %vm376_vm0, %v455_v35, %v6341_v29  ;;  %v6358_v24 = vld [vmem:[%s5862_s27 + $0x1d0] sm:$0xff] }
  0x95   : > { %557 = vrot.lane.b32.xlu0 %v6326_v3, %s5791_s28  ;;  %10693 = vst [vmem:[#allocation65_spill] sm:$0xff] %v6352_v11  ;;  %v631_v3 = vrot.slane %v5871_v2, 2 }
  0x96   : > { %v6344_v51 = vpop.permute.xlu2 %495  ;;  %v6346_v12 = vpop.permute.xlu1 %475 }
  0x97   : > { %10690 = vst [vmem:[#allocation62_spill] sm:$0xff] %v6344_v51  ;;  %v6348_v4 = vpop.permute.xlu0 %473  ;;  %v630_v51 = vrot.slane %v5887_v8, 2  ;;  %v633_v8 = vrot.slane %v5884_v7, 2 }
  0x98   : > { %10691 = vst [vmem:[#allocation63_spill] sm:$0xff] %v6346_v12 }
  0x99   : > { %10692 = vst [vmem:[#allocation64_spill] sm:$0xff] %v6348_v4  ;;  %v6373_v4 = vrot.slane %v6355_v13, 1 }
  0x9b   : > { %10696 = vst [vmem:[#allocation68_spill] sm:$0xff] %v6373_v4 }
  0x9c   : > { %567 = vrot.lane.b32.xlu2 %v6341_v29, %s5791_s28  ;;  %565 = vrot.lane.b32.xlu1 %v6352_v11, %s5791_s28  ;;  %v458_v29 = vrot.slane %v6358_v24, 1  ;;  %v632_v11 = vsel %vm629_vm1, %v630_v51, %v631_v3 }
  0x9d   : > { %563 = vrot.lane.b32.xlu0 %v6308_v57, %s5791_s28  ;;  %v6390_v57 = vrot.slane %v5868_v1, 2 }
  0x9e   : > { %v6368_v12 = vpop.permute.xlu2 %501  ;;  %v6370_v35 = vpop.permute.xlu1 %481  ;;  %v6381_v2 = vsel %vm376_vm0, %v458_v29, %v6373_v4 }
  0x9f   : > { %10694 = vst [vmem:[#allocation66_spill] sm:$0xff] %v6368_v12  ;;  %v6376_v20 = vpop.permute.xlu0 %479 }
  0xa0   : > { %10695 = vst [vmem:[#allocation67_spill] sm:$0xff] %v6370_v35 }
  0xa1   : > { %10697 = vst [vmem:[#allocation69_spill] sm:$0xff] %v6376_v20 }
  0xa2   : > { %10698 = vst [vmem:[#allocation70_spill] sm:$0xff] %v6381_v2 }
  0xa3   : > { %10699 = vst [vmem:[#allocation71_spill] sm:$0xff] %v6390_v57 }
  0xa4   : > { %571 = vrot.lane.b32.xlu1 %v6373_v4, %s5791_s28  ;;  %714 = vrot.lane.b32.xlu2 %v632_v11, %s5792_s29  ;;  %v6400_v4 = vsel %vm629_vm1, %v633_v8, %v6390_v57  ;;  %v639_v11 = vrot.slane %v5916_v18, 2  ;;  %v6416_v8 = vrot.slane %v5865_v0, 2 }
  0xa5   : > { %569 = vrot.lane.b32.xlu0 %v6381_v2, %s5791_s28  ;;  %v6409_v2 = vrot.slane %v5913_v17, 2  ;;  %s5803_s28 = smov 50  }
  0xa6   : > { %v6392_v12 = vpop.permute.xlu2 %507  ;;  %v6394_v51 = vpop.permute.xlu1 %487  ;;  %10706 = vst [vmem:[#allocation78_spill] sm:$0xff] %v6416_v8 }
  0xa7   : > { %10700 = vst [vmem:[#allocation72_spill] sm:$0xff] %v6392_v12  ;;  %v6396_v29 = vpop.permute.xlu0 %485  ;;  %v6423_v20 = vsel %vm629_vm1, %v639_v11, %v6409_v2 }
  0xa8   : > { %10701 = vst [vmem:[#allocation73_spill] sm:$0xff] %v6394_v51 }
  0xa9   : > { %10702 = vst [vmem:[#allocation74_spill] sm:$0xff] %v6396_v29  ;;  %v636_v29 = vrot.slane %v5881_v6, 2 }
  0xaa   : > { %10703 = vst [vmem:[#allocation75_spill] sm:$0xff] %v6409_v2 }
  0xab   : > { %10708 = vst [vmem:[#allocation80_spill] sm:$0xff] %v6423_v20 }
  0xac   : > { %718 = vrot.lane.b32.xlu1 %v6400_v4, %s5792_s29  ;;  %720 = vrot.lane.b32.xlu2 %v6390_v57, %s5792_s29 }
  0xad   : > { %716 = vrot.lane.b32.xlu0 %v631_v3, %s5792_s29  ;;  %v6427_v3 = vsel %vm629_vm1, %v636_v29, %v6416_v8 }
  0xae   : > { %v6411_v12 = vpop.permute.xlu2 %513  ;;  %v6413_v51 = vpop.permute.xlu1 %493 }
  0xaf   : > { %10704 = vst [vmem:[#allocation76_spill] sm:$0xff] %v6411_v12  ;;  %v6419_v35 = vpop.permute.xlu0 %491  ;;  %v642_v12 = vrot.slane %v5907_v15, 2 }
  0xb0   : > { %10705 = vst [vmem:[#allocation77_spill] sm:$0xff] %v6413_v51  ;;  %v6437_v51 = vrot.slane %v5910_v16, 2 }
  0xb1   : > { %10707 = vst [vmem:[#allocation79_spill] sm:$0xff] %v6419_v35 }
  0xb2   : > { %10709 = vst [vmem:[#allocation81_spill] sm:$0xff] %v6437_v51 }
  0xb4   : > { %724 = vrot.lane.b32.xlu1 %v6416_v8, %s5792_s29  ;;  %726 = vrot.lane.b32.xlu2 %v6423_v20, %s5792_s29  ;;  %v6447_v8 = vsel %vm629_vm1, %v642_v12, %v6437_v51  ;;  %v648_v20 = vrot.slane %v5969_v33, 2  ;;  %v6464_v12 = vrot.slane %v5940_v25, 2 }
  0xb5   : > { %722 = vrot.lane.b32.xlu0 %v6427_v3, %s5792_s29  ;;  %10713 = vst [vmem:[#allocation85_spill] sm:$0xff] %v6447_v8 }
  0xb6   : > { %v6439_v11 = vpop.permute.xlu2 %519  ;;  %v6441_v35 = vpop.permute.xlu1 %499 }
  0xb7   : > { %10710 = vst [vmem:[#allocation82_spill] sm:$0xff] %v6439_v11  ;;  %v6443_v29 = vpop.permute.xlu0 %497  ;;  %v6457_v11 = vrot.slane %v5966_v32, 2  ;;  %v651_v32 = vrot.slane %v5960_v30, 2  ;;  %v657_v30 = vrot.slane %v6023_v48, 2 }
  0xb8   : > { %10711 = vst [vmem:[#allocation83_spill] sm:$0xff] %v6441_v35 }
  0xb9   : > { %10712 = vst [vmem:[#allocation84_spill] sm:$0xff] %v6443_v29 }
  0xbc   : > { %730 = vrot.lane.b32.xlu1 %v6447_v8, %s5792_s29  ;;  %732 = vrot.lane.b32.xlu2 %v6437_v51, %s5792_s29  ;;  %v645_v8 = vrot.slane %v5943_v26, 2  ;;  %v6471_v51 = vsel %vm629_vm1, %v648_v20, %v6457_v11 }
  0xbd   : > { %728 = vrot.lane.b32.xlu0 %v6409_v2, %s5792_s29 }
  0xbe   : > { %v6459_v35 = vpop.permute.xlu2 %525  ;;  %v6461_v29 = vpop.permute.xlu1 %505  ;;  %v6475_v2 = vsel %vm629_vm1, %v645_v8, %v6464_v12 }
  0xbf   : > { %10714 = vst [vmem:[#allocation86_spill] sm:$0xff] %v6459_v35  ;;  %v6467_v57 = vpop.permute.xlu0 %503  ;;  %v6485_v35 = vrot.slane %v5963_v31, 2  ;;  %v6505_v31 = vrot.slane %v6020_v47, 2 }
  0xc0   : > { %10715 = vst [vmem:[#allocation87_spill] sm:$0xff] %v6461_v29 }
  0xc1   : > { %10716 = vst [vmem:[#allocation88_spill] sm:$0xff] %v6467_v57  ;;  %v6495_v57 = vsel %vm629_vm1, %v651_v32, %v6485_v35  ;;  %v6512_v32 = vrot.slane %v5994_v40, 2  ;;  %v660_v40 = vrot.slane %v6014_v45, 2  ;;  %v666_v45 = vrot.slane %v6077_v63, 2 }
  0xc2   : > { %10717 = vst [vmem:[#allocation89_spill] sm:$0xff] %v6485_v35 }
  0xc3   : > { %10721 = vst [vmem:[#allocation93_spill] sm:$0xff] %v6495_v57 }
  0xc4   : > { %736 = vrot.lane.b32.xlu1 %v6464_v12, %s5792_s29  ;;  %738 = vrot.lane.b32.xlu2 %v6471_v51, %s5792_s29 }
  0xc5   : > { %734 = vrot.lane.b32.xlu0 %v6475_v2, %s5792_s29 }
  0xc6   : > { %v6487_v20 = vpop.permute.xlu2 %531  ;;  %v6489_v29 = vpop.permute.xlu1 %511 }
  0xc7   : > { %10718 = vst [vmem:[#allocation90_spill] sm:$0xff] %v6487_v20  ;;  %v6491_v8 = vpop.permute.xlu0 %509 }
  0xc8   : > { %10719 = vst [vmem:[#allocation91_spill] sm:$0xff] %v6489_v29  ;;  %v654_v29 = vrot.slane %v5997_v41, 2  ;;  %v6533_v41 = vrot.slane %v6017_v46, 2  ;;  %v6553_v46 = vrot.slane %v6074_v62, 2 }
  0xc9   : > { %10720 = vst [vmem:[#allocation92_spill] sm:$0xff] %v6491_v8 }
  0xca   : > { %v6523_v48 = vsel %vm629_vm1, %v654_v29, %v6512_v32 }
  0xcc   : > { %742 = vrot.lane.b32.xlu1 %v6495_v57, %s5792_s29  ;;  %744 = vrot.lane.b32.xlu2 %v6485_v35, %s5792_s29  ;;  %v6519_v35 = vsel %vm629_vm1, %v657_v30, %v6505_v31 }
  0xcd   : > { %740 = vrot.lane.b32.xlu0 %v6457_v11, %s5792_s29 }
  0xce   : > { %v6507_v20 = vpop.permute.xlu2 %537  ;;  %v6509_v8 = vpop.permute.xlu1 %517 }
  0xcf   : > { %10722 = vst [vmem:[#allocation94_spill] sm:$0xff] %v6507_v20  ;;  %v6515_v57 = vpop.permute.xlu0 %515  ;;  %v6543_v20 = vsel %vm629_vm1, %v660_v40, %v6533_v41  ;;  %v6560_v40 = vrot.slane %v6048_v55, 2  ;;  %v669_v55 = vrot.slane %v6068_v60, 2  ;;  %v675_v60 = vrot.slane %v6126_v5, 2 }
  0xd0   : > { %10723 = vst [vmem:[#allocation95_spill] sm:$0xff] %v6509_v8 }
  0xd1   : > { %10724 = vst [vmem:[#allocation96_spill] sm:$0xff] %v6515_v57  ;;  %v6567_v57 = vsel %vm629_vm1, %v666_v45, %v6553_v46 }
  0xd4   : > { %748 = vrot.lane.b32.xlu1 %v6512_v32, %s5792_s29  ;;  %750 = vrot.lane.b32.xlu2 %v6519_v35, %s5792_s29 }
  0xd5   : > { %746 = vrot.lane.b32.xlu0 %v6523_v48, %s5792_s29 }
  0xd6   : > { %v6535_v47 = vpop.permute.xlu2 %543  ;;  %v6537_v30 = vpop.permute.xlu1 %523 }
  0xd7   : > { %10725 = vst [vmem:[#allocation97_spill] sm:$0xff] %v6535_v47  ;;  %v6539_v29 = vpop.permute.xlu0 %521 }
  0xd8   : > { %10726 = vst [vmem:[#allocation98_spill] sm:$0xff] %v6537_v30 }
  0xd9   : > { %10727 = vst [vmem:[#allocation99_spill] sm:$0xff] %v6539_v29  ;;  %v663_v29 = vrot.slane %v6051_v56, 2  ;;  %v6581_v56 = vrot.slane %v6071_v61, 2  ;;  %v6601_v61 = vrot.slane %v6123_v58, 2  ;;  %v678_v58 = vrot.slane %v6117_v49, 2 }
  0xda   : > { %v684_v49 = vrot.slane %v6178_v14, 2 }
  0xdb   : > { %v6571_v63 = vsel %vm629_vm1, %v663_v29, %v6560_v40  ;;  %10731 = vst [vmem:[#allocation103_spill] sm:$0xff] %v6581_v56 }
  0xdc   : > { %754 = vrot.lane.b32.xlu1 %v6543_v20, %s5792_s29  ;;  %756 = vrot.lane.b32.xlu2 %v6533_v41, %s5792_s29  ;;  %10735 = vst [vmem:[#allocation107_spill] sm:$0xff] %v6601_v61 }
  0xdd   : > { %752 = vrot.lane.b32.xlu0 %v6505_v31, %s5792_s29 }
  0xde   : > { %v6555_v47 = vpop.permute.xlu2 %549  ;;  %v6557_v30 = vpop.permute.xlu1 %529 }
  0xdf   : > { %10728 = vst [vmem:[#allocation100_spill] sm:$0xff] %v6555_v47  ;;  %v6563_v8 = vpop.permute.xlu0 %527  ;;  %v6591_v47 = vsel %vm629_vm1, %v669_v55, %v6581_v56  ;;  %v673_v55 = vrot.slane %v6102_v22, 2  ;;  %v6622_v22 = vrot.slane %v6120_v52, 2  ;;  %v6642_v52 = vrot.slane %v6175_v50, 2 }
  0xe0   : > { %10729 = vst [vmem:[#allocation101_spill] sm:$0xff] %v6557_v30  ;;  %v6613_v30 = vsel %vm629_vm1, %v675_v60, %v6601_v61  ;;  %v687_v50 = vrot.slane %v6169_v59, 2  ;;  %v693_v59 = vrot.slane %v6236_v37, 2 }
  0xe1   : > { %10730 = vst [vmem:[#allocation102_spill] sm:$0xff] %v6563_v8 }
  0xe2   : > { %10739 = vst [vmem:[#allocation111_spill] sm:$0xff] %v6622_v22 }
  0xe3   : > { %10744 = vst [vmem:[#allocation116_spill] sm:$0xff] %v6642_v52 }
  0xe4   : > { %760 = vrot.lane.b32.xlu1 %v6560_v40, %s5792_s29  ;;  %762 = vrot.lane.b32.xlu2 %v6567_v57, %s5792_s29 }
  0xe5   : > { %758 = vrot.lane.b32.xlu0 %v6571_v63, %s5792_s29 }
  0xe6   : > { %v6583_v62 = vpop.permute.xlu2 %555  ;;  %v6585_v45 = vpop.permute.xlu1 %535 }
  0xe7   : > { %10732 = vst [vmem:[#allocation104_spill] sm:$0xff] %v6583_v62  ;;  %v6587_v29 = vpop.permute.xlu0 %533 }
  0xe8   : > { %10733 = vst [vmem:[#allocation105_spill] sm:$0xff] %v6585_v45 }
  0xe9   : > { %10734 = vst [vmem:[#allocation106_spill] sm:$0xff] %v6587_v29  ;;  %v672_v29 = vrot.slane %v6105_v28, 2 }
  0xec   : > { %766 = vrot.lane.b32.xlu1 %v6591_v47, %s5792_s29  ;;  %768 = vrot.lane.b32.xlu2 %v6581_v56, %s5792_s29  ;;  %v674_v56 = vsel %vm629_vm1, %v672_v29, %v673_v55  ;;  %v6632_v29 = vsel %vm629_vm1, %v678_v58, %v6622_v22  ;;  %v6649_v58 = vrot.slane %v6149_v9, 2  ;;  %v6670_v9 = vrot.slane %v6172_v34, 2 }
  0xed   : > { %764 = vrot.lane.b32.xlu0 %v6553_v46, %s5792_s29  ;;  %10743 = vst [vmem:[#allocation115_spill] sm:$0xff] %v6632_v29  ;;  %v6690_v34 = vrot.slane %v6233_v53, 2  ;;  %v6718_v53 = vrot.slane %v6230_v44, 2  ;;  %v702_v44 = vrot.slane %v6298_v21, 2 }
  0xee   : > { %v6603_v62 = vpop.permute.xlu2 %561  ;;  %v6605_v45 = vpop.permute.xlu1 %541  ;;  %10746 = vst [vmem:[#allocation118_spill] sm:$0xff] %v6649_v58 }
  0xef   : > { %10736 = vst [vmem:[#allocation108_spill] sm:$0xff] %v6603_v62  ;;  %v6609_v8 = vpop.permute.xlu0 %539 }
  0xf0   : > { %10737 = vst [vmem:[#allocation109_spill] sm:$0xff] %v6605_v45  ;;  %v6704_v45 = vsel %vm629_vm1, %v693_v59, %v6690_v34 }
  0xf1   : > { %10738 = vst [vmem:[#allocation110_spill] sm:$0xff] %v6609_v8 }
  0xf2   : > { %10750 = vst [vmem:[#allocation122_spill] sm:$0xff] %v6670_v9 }
  0xf3   : > { %10754 = vst [vmem:[#allocation126_spill] sm:$0xff] %v6690_v34 }
  0xf4   : > { %772 = vrot.lane.b32.xlu1 %v673_v55, %s5792_s29  ;;  %774 = vrot.lane.b32.xlu2 %v6613_v30, %s5792_s29  ;;  %10758 = vst [vmem:[#allocation130_spill] sm:$0xff] %v6704_v45 }
  0xf5   : > { %770 = vrot.lane.b32.xlu0 %v674_v56, %s5792_s29  ;;  %10760 = vst [vmem:[#allocation132_spill] sm:$0xff] %v6718_v53 }
  0xf6   : > { %v6624_v28 = vpop.permute.xlu2 %567  ;;  %v6626_v5 = vpop.permute.xlu1 %547 }
  0xf7   : > { %10740 = vst [vmem:[#allocation112_spill] sm:$0xff] %v6624_v28  ;;  %v6628_v60 = vpop.permute.xlu0 %545  ;;  %v681_v28 = vrot.slane %v6152_v10, 2 }
  0xf8   : > { %10741 = vst [vmem:[#allocation113_spill] sm:$0xff] %v6626_v5  ;;  %v6656_v5 = vsel %vm629_vm1, %v684_v49, %v6642_v52 }
  0xf9   : > { %10742 = vst [vmem:[#allocation114_spill] sm:$0xff] %v6628_v60  ;;  %v6660_v14 = vsel %vm629_vm1, %v681_v28, %v6649_v58 }
  0xfa   : > { %10748 = vst [vmem:[#allocation120_spill] sm:$0xff] %v6656_v5 }
  0xfb   : > { %10749 = vst [vmem:[#allocation121_spill] sm:$0xff] %v6660_v14 }
  0xfc   : > { %778 = vrot.lane.b32.xlu1 %v6632_v29, %s5792_s29  ;;  %780 = vrot.lane.b32.xlu2 %v6622_v22, %s5792_s29  ;;  %v7075_v29 = vld [vmem:[%s5862_s27 + $0x70] sm:$0xff] }
  0xfd   : > { %776 = vrot.lane.b32.xlu0 %v6601_v61, %s5792_s29  ;;  %v10829_v61 = vld [vmem:[#allocation14_spill] sm:$0xff] }
  0xfe   : > { %v6644_v56 = vpop.permute.xlu1 %553  ;;  %v6646_v55 = vpop.permute.xlu2 %714 }
  0xff   : > { %10745 = vst [vmem:[#allocation117_spill] sm:$0xff] %v6644_v56  ;;  %v6652_v62 = vpop.permute.xlu0 %551  ;;  %v6680_v56 = vsel %vm629_vm1, %v687_v50, %v6670_v9  ;;  %v6697_v50 = vrot.slane %v6205_v42, 2  ;;  %v696_v42 = vrot.slane %v6227_v19, 2  ;;  %v6738_v19 = vrot.slane %v6295_v43, 2 }
 0x100   : > { %10747 = vst [vmem:[#allocation119_spill] sm:$0xff] %v6652_v62  ;;  %v690_v62 = vrot.slane %v6208_v54, 2 }
 0x101   : > { %10753 = vst [vmem:[#allocation125_spill] sm:$0xff] %v6680_v56 }
 0x102   : > { %10756 = vst [vmem:[#allocation128_spill] sm:$0xff] %v6697_v50  ;;  %v6708_v37 = vsel %vm629_vm1, %v690_v62, %v6697_v50 }
 0x103   : > { %10759 = vst [vmem:[#allocation131_spill] sm:$0xff] %v6708_v37 }
 0x104   : > { %784 = vrot.lane.b32.xlu1 %v6649_v58, %s5792_s29  ;;  %786 = vrot.lane.b32.xlu2 %v6656_v5, %s5792_s29  ;;  %10764 = vst [vmem:[#allocation136_spill] sm:$0xff] %v6738_v19  ;;  %v10828_v5 = vld [vmem:[#allocation57_spill] sm:$0xff] }
 0x105   : > { %782 = vrot.lane.b32.xlu0 %v6660_v14, %s5792_s29 }
 0x106   : > { %v6672_v10 = vpop.permute.xlu1 %559  ;;  %v6674_v49 = vpop.permute.xlu2 %720 }
 0x107   : > { %10751 = vst [vmem:[#allocation123_spill] sm:$0xff] %v6672_v10  ;;  %v6676_v28 = vpop.permute.xlu0 %557 }
 0x108   : > { %10752 = vst [vmem:[#allocation124_spill] sm:$0xff] %v6676_v28 }
 0x10c   : > { %790 = vrot.lane.b32.xlu1 %v6680_v56, %s5792_s29  ;;  %792 = vrot.lane.b32.xlu2 %v6670_v9, %s5792_s29 }
 0x10d   : > { %788 = vrot.lane.b32.xlu0 %v6642_v52, %s5792_s29 }
 0x10e   : > { %v6692_v10 = vpop.permute.xlu1 %565  ;;  %v6694_v28 = vpop.permute.xlu2 %726 }
 0x10f   : > { %10755 = vst [vmem:[#allocation127_spill] sm:$0xff] %v6692_v10  ;;  %v6700_v60 = vpop.permute.xlu0 %563  ;;  %v6728_v10 = vsel %vm629_vm1, %v696_v42, %v6718_v53  ;;  %v6745_v42 = vrot.slane %v6263_v39, 2  ;;  %v6766_v39 = vrot.slane %v6292_v36, 2  ;;  %v6786_v36 = vrot.slane %v6355_v13, 2 }
 0x110   : > { %10757 = vst [vmem:[#allocation129_spill] sm:$0xff] %v6700_v60  ;;  %v699_v60 = vrot.slane %v6266_v38, 2  ;;  %v705_v38 = vrot.slane %v6289_v23, 2  ;;  %v711_v23 = vrot.slane %v6358_v24, 2 }
 0x111   : > { %10763 = vst [vmem:[#allocation135_spill] sm:$0xff] %v6728_v10 }
 0x112   : > { %10765 = vst [vmem:[#allocation137_spill] sm:$0xff] %v6745_v42  ;;  %v6756_v21 = vsel %vm629_vm1, %v699_v60, %v6745_v42 }
 0x113   : > { %10767 = vst [vmem:[#allocation139_spill] sm:$0xff] %v6756_v21 }
 0x114   : > { %796 = vrot.lane.b32.xlu1 %v6697_v50, %s5792_s29  ;;  %798 = vrot.lane.b32.xlu2 %v6704_v45, %s5792_s29  ;;  %10768 = vst [vmem:[#allocation140_spill] sm:$0xff] %v6766_v39 }
 0x115   : > { %794 = vrot.lane.b32.xlu0 %v6708_v37, %s5792_s29  ;;  %10770 = vst [vmem:[#allocation142_spill] sm:$0xff] %v6786_v36 }
 0x116   : > { %v6720_v54 = vpop.permute.xlu1 %571  ;;  %v6722_v59 = vpop.permute.xlu2 %732 }
 0x117   : > { %10761 = vst [vmem:[#allocation133_spill] sm:$0xff] %v6720_v54  ;;  %v6724_v62 = vpop.permute.xlu0 %569 }
 0x118   : > { %10762 = vst [vmem:[#allocation134_spill] sm:$0xff] %v6724_v62 }
 0x11c   : > { %802 = vrot.lane.b32.xlu1 %v6728_v10, %s5792_s29  ;;  %804 = vrot.lane.b32.xlu2 %v6718_v53, %s5792_s29  ;;  %v6752_v53 = vsel %vm629_vm1, %v702_v44, %v6738_v19  ;;  %v10772_v10 = vld [vmem:[#allocation60_spill] sm:$0xff] }
 0x11d   : > { %800 = vrot.lane.b32.xlu0 %v6690_v34, %s5792_s29  ;;  %10766 = vst [vmem:[#allocation138_spill] sm:$0xff] %v6752_v53 }
 0x11e   : > { %v6740_v54 = vpop.permute.xlu1 %718  ;;  %v6742_v62 = vpop.permute.xlu2 %738 }
 0x11f   : > { %v6748_v8 = vpop.permute.xlu0 %716 }
 0x124   : > { %808 = vrot.lane.b32.xlu1 %v6745_v42, %s5792_s29  ;;  %810 = vrot.lane.b32.xlu2 %v6752_v53, %s5792_s29  ;;  %v6776_v42 = vsel %vm629_vm1, %v705_v38, %v6766_v39  ;;  %v6793_v38 = vrot.slane %v6329_v27, 2 }
 0x125   : > { %806 = vrot.lane.b32.xlu0 %v6756_v21, %s5792_s29  ;;  %10769 = vst [vmem:[#allocation141_spill] sm:$0xff] %v6776_v42 }
 0x126   : > { %v6768_v43 = vpop.permute.xlu1 %724  ;;  %v6770_v44 = vpop.permute.xlu2 %744  ;;  %10771 = vst [vmem:[#allocation143_spill] sm:$0xff] %v6793_v38 }
 0x127   : > { %v6772_v60 = vpop.permute.xlu0 %722 }
 0x12c   : > { %814 = vrot.lane.b32.xlu1 %v6776_v42, %s5792_s29  ;;  %816 = vrot.lane.b32.xlu2 %v6766_v39, %s5792_s29  ;;  %v708_v42 = vrot.slane %v10772_v10, 2  ;;  %v6800_v39 = vsel %vm629_vm1, %v711_v23, %v6786_v36 }
 0x12d   : > { %812 = vrot.lane.b32.xlu0 %v6738_v19, %s5792_s29  ;;  %10773 = vst [vmem:[#allocation60_spill] sm:$0xff] %v6800_v39 }
 0x12e   : > { %v6788_v53 = vpop.permute.xlu1 %730  ;;  %v6790_v21 = vpop.permute.xlu2 %750  ;;  %v6804_v24 = vsel %vm629_vm1, %v708_v42, %v6793_v38 }
 0x12f   : > { %v6796_v34 = vpop.permute.xlu0 %728  ;;  %10774 = vst [vmem:[#allocation144_spill] sm:$0xff] %v6804_v24 }
 0x134   : > { %820 = vrot.lane.b32.xlu1 %v6793_v38, %s5792_s29  ;;  %822 = vrot.lane.b32.xlu2 %v6800_v39, %s5792_s29 }
 0x135   : > { %818 = vrot.lane.b32.xlu0 %v6804_v24, %s5792_s29 }
 0x136   : > { %v6812_v13 = vpop.permute.xlu1 %736  ;;  %v6814_v27 = vpop.permute.xlu2 %756 }
 0x137   : > { %10775 = vst [vmem:[#allocation145_spill] sm:$0xff] %v6814_v27  ;;  %v6816_v10 = vpop.permute.xlu0 %734  ;;  %v5729_v27 = vld [vmem:[%s5862_s27 + $0x10] sm:$0xff] }
 0x13c   : > { %886 = vrot.lane.b32.xlu1 %v5884_v7, %s5793_s30  ;;  %888 = vrot.lane.b32.xlu2 %v5868_v1, %s5793_s30 }
 0x13d   : > { %824 = vrot.lane.b32.xlu0 %v6786_v36, %s5792_s29  ;;  %s5804_s29 = smov 60  }
 0x13e   : > { %v6824_v42 = vpop.permute.xlu1 %742  ;;  %v6826_v23 = vpop.permute.xlu2 %762 }
 0x13f   : > { %10776 = vst [vmem:[#allocation146_spill] sm:$0xff] %v6826_v23  ;;  %v6828_v39 = vpop.permute.xlu0 %740 }
 0x144   : > { %892 = vrot.lane.b32.xlu1 %v5865_v0, %s5793_s30  ;;  %894 = vrot.lane.b32.xlu2 %v5916_v18, %s5793_s30 }
 0x145   : > { %890 = vrot.lane.b32.xlu0 %v5881_v6, %s5793_s30 }
 0x146   : > { %v6836_v7 = vpop.permute.xlu1 %748  ;;  %v6838_v1 = vpop.permute.xlu2 %768 }
 0x147   : > { %10777 = vst [vmem:[#allocation147_spill] sm:$0xff] %v6838_v1  ;;  %v6840_v36 = vpop.permute.xlu0 %746 }
 0x14c   : > { %898 = vrot.lane.b32.xlu1 %v5907_v15, %s5793_s30  ;;  %900 = vrot.lane.b32.xlu2 %v5910_v16, %s5793_s30 }
 0x14d   : > { %896 = vrot.lane.b32.xlu0 %v5913_v17, %s5793_s30 }
 0x14e   : > { %v6848_v38 = vpop.permute.xlu1 %754  ;;  %v6850_v24 = vpop.permute.xlu2 %774 }
 0x14f   : > { %10778 = vst [vmem:[#allocation148_spill] sm:$0xff] %v6848_v38  ;;  %v6852_v19 = vpop.permute.xlu0 %752 }
 0x150   : > { %10779 = vst [vmem:[#allocation149_spill] sm:$0xff] %v6850_v24 }
 0x154   : > { %904 = vrot.lane.b32.xlu1 %v5940_v25, %s5793_s30  ;;  %906 = vrot.lane.b32.xlu2 %v5969_v33, %s5793_s30  ;;  %v10783_v33 = vld [vmem:[#allocation6_spill] sm:$0xff] }
 0x155   : > { %902 = vrot.lane.b32.xlu0 %v5943_v26, %s5793_s30 }
 0x156   : > { %v6860_v45 = vpop.permute.xlu1 %760  ;;  %v6862_v50 = vpop.permute.xlu2 %780 }
 0x157   : > { %10780 = vst [vmem:[#allocation150_spill] sm:$0xff] %v6860_v45  ;;  %v6864_v37 = vpop.permute.xlu0 %758 }
 0x158   : > { %10781 = vst [vmem:[#allocation151_spill] sm:$0xff] %v6862_v50 }
 0x159   : > { %10782 = vst [vmem:[#allocation152_spill] sm:$0xff] %v6864_v37  ;;  %v7057_v37 = vld [vmem:[%s5862_s27 + $0x68] sm:$0xff] }
 0x15c   : > { %1234 = vrot.lane.b32.xlu1 %v6400_v4, %s5794_s7  ;;  %1406 = vrot.lane.b32.xlu2 %v5881_v6, %s5795_s8  ;;  %v10787_v4 = vld [vmem:[#allocation4_spill] sm:$0xff]  ;;  %v10788_v6 = vld [vmem:[#allocation5_spill] sm:$0xff] }
 0x15d   : > { %1060 = vrot.lane.b32.xlu0 %v10783_v33, %s5796_s9 }
 0x15e   : > { %v6872_v24 = vpop.permute.xlu1 %766  ;;  %v6874_v9 = vpop.permute.xlu2 %786 }
 0x15f   : > { %10784 = vst [vmem:[#allocation6_spill] sm:$0xff] %v6872_v24  ;;  %v6876_v56 = vpop.permute.xlu0 %764 }
 0x160   : > { %10785 = vst [vmem:[#allocation153_spill] sm:$0xff] %v6874_v9  ;;  %v10792_v9 = vld [vmem:[#allocation71_spill] sm:$0xff] }
 0x161   : > { %10786 = vst [vmem:[#allocation154_spill] sm:$0xff] %v6876_v56 }
 0x164   : > { %1754 = vrot.lane.b32.xlu1 %v6427_v3, %s5797_s10  ;;  %1062 = vrot.lane.b32.xlu2 %v10787_v4, %s5796_s9 }
 0x165   : > { %1580 = vrot.lane.b32.xlu0 %v10788_v6, %s5798_s11 }
 0x166   : > { %v6884_v50 = vpop.permute.xlu1 %772  ;;  %v6886_v33 = vpop.permute.xlu2 %792 }
 0x167   : > { %10789 = vst [vmem:[#allocation4_spill] sm:$0xff] %v6884_v50  ;;  %v6888_v1 = vpop.permute.xlu0 %770  ;;  %v2576_v50 = vld [vmem:[%s10449_s1 + $0x10] sm:$0xff] }
 0x168   : > { %10790 = vst [vmem:[#allocation5_spill] sm:$0xff] %v6886_v33 }
 0x169   : > { %10791 = vst [vmem:[#allocation155_spill] sm:$0xff] %v6888_v1  ;;  %v2575_v1 = vld [vmem:[%s10449_s1 + $0x8] sm:$0xff] }
 0x16c   : > { %1236 = vrot.lane.b32.xlu1 %v10792_v9, %s5794_s7  ;;  %1238 = vrot.lane.b32.xlu2 %v6427_v3, %s5794_s7  ;;  %v10796_v9 = vld [vmem:[#allocation3_spill] sm:$0xff] }
 0x16d   : > { %1064 = vrot.lane.b32.xlu0 %v10788_v6, %s5796_s9 }
 0x16e   : > { %v6896_v4 = vpop.permute.xlu1 %778  ;;  %v6898_v52 = vpop.permute.xlu2 %798 }
 0x16f   : > { %10793 = vst [vmem:[#allocation71_spill] sm:$0xff] %v6896_v4  ;;  %v6900_v24 = vpop.permute.xlu0 %776 }
 0x170   : > { %10794 = vst [vmem:[#allocation156_spill] sm:$0xff] %v6898_v52  ;;  %v10800_v52 = vld [vmem:[#allocation10_spill] sm:$0xff] }
 0x171   : > { %10795 = vst [vmem:[#allocation157_spill] sm:$0xff] %v6900_v24 }
 0x174   : > { %1408 = vrot.lane.b32.xlu1 %v5865_v0, %s5795_s8  ;;  %1410 = vrot.lane.b32.xlu2 %v5916_v18, %s5795_s8  ;;  %v10801_v0 = vld [vmem:[#allocation78_spill] sm:$0xff] }
 0x175   : > { %1066 = vrot.lane.b32.xlu0 %v10796_v9, %s5796_s9 }
 0x176   : > { %v6908_v33 = vpop.permute.xlu1 %784  ;;  %v6910_v3 = vpop.permute.xlu2 %804 }
 0x177   : > { %10797 = vst [vmem:[#allocation3_spill] sm:$0xff] %v6908_v33  ;;  %v6912_v6 = vpop.permute.xlu0 %782 }
 0x178   : > { %10798 = vst [vmem:[#allocation158_spill] sm:$0xff] %v6910_v3  ;;  %v10805_v3 = vld [vmem:[#allocation80_spill] sm:$0xff] }
 0x179   : > { %10799 = vst [vmem:[#allocation159_spill] sm:$0xff] %v6912_v6 }
 0x17c   : > { %1582 = vrot.lane.b32.xlu1 %v10796_v9, %s5798_s11  ;;  %1584 = vrot.lane.b32.xlu2 %v10800_v52, %s5798_s11 }
 0x17d   : > { %1240 = vrot.lane.b32.xlu0 %v10801_v0, %s5794_s7 }
 0x17e   : > { %v6920_v4 = vpop.permute.xlu1 %790  ;;  %v6922_v18 = vpop.permute.xlu2 %810 }
 0x17f   : > { %10802 = vst [vmem:[#allocation10_spill] sm:$0xff] %v6920_v4  ;;  %v6924_v24 = vpop.permute.xlu0 %788  ;;  %v10809_v4 = vld [vmem:[#allocation75_spill] sm:$0xff] }
 0x180   : > { %10803 = vst [vmem:[#allocation78_spill] sm:$0xff] %v6922_v18 }
 0x181   : > { %10804 = vst [vmem:[#allocation160_spill] sm:$0xff] %v6924_v24 }
 0x184   : > { %1756 = vrot.lane.b32.xlu1 %v10801_v0, %s5797_s10  ;;  %1758 = vrot.lane.b32.xlu2 %v10805_v3, %s5797_s10  ;;  %v10810_v0 = vld [vmem:[#allocation8_spill] sm:$0xff] }
 0x185   : > { %1412 = vrot.lane.b32.xlu0 %v5913_v17, %s5795_s8 }
 0x186   : > { %v6932_v9 = vpop.permute.xlu1 %796  ;;  %v6934_v33 = vpop.permute.xlu2 %816 }
 0x187   : > { %10806 = vst [vmem:[#allocation80_spill] sm:$0xff] %v6932_v9  ;;  %v6936_v6 = vpop.permute.xlu0 %794 }
 0x188   : > { %10807 = vst [vmem:[#allocation161_spill] sm:$0xff] %v6934_v33 }
 0x189   : > { %10808 = vst [vmem:[#allocation162_spill] sm:$0xff] %v6936_v6 }
 0x18c   : > { %1760 = vrot.lane.b32.xlu1 %v10809_v4, %s5797_s10  ;;  %1068 = vrot.lane.b32.xlu2 %v10800_v52, %s5796_s9 }
 0x18d   : > { %1586 = vrot.lane.b32.xlu0 %v10810_v0, %s5798_s11 }
 0x18e   : > { %v6944_v18 = vpop.permute.xlu1 %802  ;;  %v6946_v24 = vpop.permute.xlu2 %822 }
 0x18f   : > { %10811 = vst [vmem:[#allocation75_spill] sm:$0xff] %v6944_v18  ;;  %v6948_v17 = vpop.permute.xlu0 %800 }
 0x190   : > { %10812 = vst [vmem:[#allocation8_spill] sm:$0xff] %v6946_v24  ;;  %v10816_v24 = vld [vmem:[#allocation9_spill] sm:$0xff] }
 0x191   : > { %10813 = vst [vmem:[#allocation163_spill] sm:$0xff] %v6948_v17 }
 0x194   : > { %1242 = vrot.lane.b32.xlu1 %v10805_v3, %s5794_s7  ;;  %1244 = vrot.lane.b32.xlu2 %v10809_v4, %s5794_s7 }
 0x195   : > { %1070 = vrot.lane.b32.xlu0 %v10810_v0, %s5796_s9 }
 0x196   : > { %v6956_v33 = vpop.permute.xlu1 %808  ;;  %v6958_v52 = vpop.permute.xlu2 %888 }
 0x197   : > { %10814 = vst [vmem:[#allocation164_spill] sm:$0xff] %v6956_v33  ;;  %v6960_v6 = vpop.permute.xlu0 %806  ;;  %v10819_v33 = vld [vmem:[#allocation85_spill] sm:$0xff] }
 0x198   : > { %10815 = vst [vmem:[#allocation165_spill] sm:$0xff] %v6960_v6  ;;  %v10820_v6 = vld [vmem:[#allocation81_spill] sm:$0xff] }
 0x19c   : > { %1416 = vrot.lane.b32.xlu1 %v5910_v16, %s5795_s8  ;;  %1588 = vrot.lane.b32.xlu2 %v10816_v24, %s5798_s11  ;;  %v10821_v16 = vld [vmem:[#allocation7_spill] sm:$0xff] }
 0x19d   : > { %1414 = vrot.lane.b32.xlu0 %v5907_v15, %s5795_s8 }
 0x19e   : > { %v6968_v3 = vpop.permute.xlu1 %814  ;;  %v6970_v4 = vpop.permute.xlu2 %894 }
 0x19f   : > { %10817 = vst [vmem:[#allocation9_spill] sm:$0xff] %v6968_v3  ;;  %v6972_v0 = vpop.permute.xlu0 %812 }
 0x1a0   : > { %10818 = vst [vmem:[#allocation166_spill] sm:$0xff] %v6972_v0 }
 0x1a4   : > { %1762 = vrot.lane.b32.xlu1 %v10819_v33, %s5797_s10  ;;  %1764 = vrot.lane.b32.xlu2 %v10820_v6, %s5797_s10 }
 0x1a5   : > { %1590 = vrot.lane.b32.xlu0 %v10821_v16, %s5798_s11 }
 0x1a6   : > { %v6980_v18 = vpop.permute.xlu1 %820  ;;  %v6982_v17 = vpop.permute.xlu2 %900 }
 0x1a7   : > { %10822 = vst [vmem:[#allocation85_spill] sm:$0xff] %v6980_v18  ;;  %v6984_v15 = vpop.permute.xlu0 %818 }
 0x1a8   : > { %10823 = vst [vmem:[#allocation81_spill] sm:$0xff] %v6984_v15 }
 0x1ac   : > { %1074 = vrot.lane.b32.xlu1 %v10821_v16, %s5796_s9  ;;  %1246 = vrot.lane.b32.xlu2 %v10819_v33, %s5794_s7 }
 0x1ad   : > { %1072 = vrot.lane.b32.xlu0 %v10816_v24, %s5796_s9  ;;  %v10825_v24 = vld [vmem:[#allocation11_spill] sm:$0xff] }
 0x1ae   : > { %v887_v3 = vpop.permute.xlu1 %886  ;;  %v6992_v0 = vpop.permute.xlu2 %906 }
 0x1af   : > { %v6994_v9 = vpop.permute.xlu0 %824 }
 0x1b0   : > { %10824 = vst [vmem:[#allocation7_spill] sm:$0xff] %v6994_v9 }
 0x1b4   : > { %1418 = vrot.lane.b32.xlu1 %v5943_v26, %s5795_s8  ;;  %1420 = vrot.lane.b32.xlu2 %v5940_v25, %s5795_s8  ;;  %v10826_v26 = vld [vmem:[#allocation12_spill] sm:$0xff] }
 0x1b5   : > { %1248 = vrot.lane.b32.xlu0 %v10820_v6, %s5794_s7  ;;  %v2577_v6 = vld [vmem:[%s10449_s1 + $0x18] sm:$0x7] }
 0x1b6   : > { %v7002_v16 = vpop.permute.xlu1 %892  ;;  %v7004_v33 = vpop.permute.xlu2 %1406  ;;  %5611 = vmatpush.msk.msra.mxu0 %vm2930_vm2, %v2577_v6  ;;  %5678 = vmatpush.msk.msra.mxu1 %vm2930_vm2, %v2577_v6 }
 0x1b7   : > { %v7006_v18 = vpop.permute.xlu0 %890  ;;  %5679 = vmatpush.msk.msra.mxu2 %vm2930_vm2, %v2577_v6  ;;  %5680 = vmatpush.msk.msra.mxu3 %vm2930_vm2, %v2577_v6  ;;  %v2574_v6 = vld [vmem:[%s10449_s1] sm:$0xff] }
 0x1b8   : > { %2947 = vmatpush.msra.mxu0 %v2576_v50  ;;  %5681 = vmatpush.msra.mxu1 %v2576_v50 }
 0x1b9   : > { %5682 = vmatpush.msra.mxu2 %v2576_v50  ;;  %5683 = vmatpush.msra.mxu3 %v2576_v50 }
 0x1ba   : > { %2948 = vmatpush.msra.mxu0 %v2575_v1  ;;  %5684 = vmatpush.msra.mxu1 %v2575_v1 }
 0x1bb   : > { %5685 = vmatpush.msra.mxu2 %v2575_v1  ;;  %5686 = vmatpush.msra.mxu3 %v2575_v1 }
 0x1bc   : > { %1594 = vrot.lane.b32.xlu1 %v10825_v24, %s5798_s11  ;;  %1766 = vrot.lane.b32.xlu2 %v6475_v2, %s5797_s10 }
 0x1bd   : > { %1592 = vrot.lane.b32.xlu0 %v10826_v26, %s5798_s11  ;;  %2949 = vmatpush.msra.mxu0 %v2574_v6 }
 0x1be   : > { %v7014_v9 = vpop.permute.xlu1 %898  ;;  %v7016_v25 = vpop.permute.xlu2 %1062  ;;  %5687 = vmatpush.msra.mxu1 %v2574_v6  ;;  %5688 = vmatpush.msra.mxu2 %v2574_v6 }
 0x1bf   : > { %v7021_v15 = vpop.permute.xlu0 %896  ;;  %5689 = vmatpush.msra.mxu3 %v2574_v6 }
 0x1c4   : > { %1076 = vrot.lane.b32.xlu1 %v10826_v26, %s5796_s9  ;;  %1078 = vrot.lane.b32.xlu2 %v10825_v24, %s5796_s9  ;;  %v10827_v24 = vld [vmem:[#allocation16_spill] sm:$0xff]  ;;  %v5725_v26 = vld [vmem:[%s5862_s27] sm:$0xff] }
 0x1c5   : > { %1768 = vrot.lane.b32.xlu0 %v6464_v12, %s5797_s10  ;;  %v1923_v58 = vsel %vm1922_vm4, %v5725_v26, %v10828_v5  ;;  %v7064_v5 = vld [vmem:[%s5862_s27 + $0x60] sm:$0xff] }
 0x1c6   : > { %v7038_v23 = vpop.permute.xlu1 %904  ;;  %v1239_v50 = vpop.permute.xlu2 %1238  ;;  %v1980_v6 = vsel %vm1979_vm3, %v1923_v58, %v6646_v55 }
 0x1c7   : > { %v7040_v56 = vpop.permute.xlu0 %902  ;;  %v2037_v45 = vsel %vm2036_vm5, %v1980_v6, %v887_v3 }
 0x1cc   : > { %1252 = vrot.lane.b32.xlu1 %v6464_v12, %s5794_s7  ;;  %1080 = vrot.lane.b32.xlu2 %v10827_v24, %s5796_s9 }
 0x1cd   : > { %1250 = vrot.lane.b32.xlu0 %v6475_v2, %s5794_s7 }
 0x1ce   : > { %v1235_v1 = vpop.permute.xlu1 %1234  ;;  %v1411_v14 = vpop.permute.xlu2 %1410 }
 0x1cf   : > { %v1061_v12 = vpop.permute.xlu0 %1060 }
 0x1d0   : > { %v2094_v22 = vsel %vm2093_vm6, %v2037_v45, %v1061_v12 }
 0x1d1   : > { %v2151_v2 = vsel %vm2150_vm7, %v2094_v22, %v1235_v1 }
 0x1d2   : > { %v2208_v22 = vsel %vm2207_vm8, %v2151_v2, %v7004_v33  ;;  %v10830_v33 = vld [vmem:[#allocation55_spill] sm:$0xff] }
 0x1d3   : > { %v1925_v2 = vsel %vm1922_vm4, %v5729_v27, %v10830_v33 }
 0x1d4   : > { %1424 = vrot.lane.b32.xlu1 %v7057_v37, %s5795_s8  ;;  %1254 = vrot.lane.b32.xlu2 %v6471_v51, %s5794_s7 }
 0x1d5   : > { %1422 = vrot.lane.b32.xlu0 %v7064_v5, %s5795_s8 }
 0x1d6   : > { %v1755_v45 = vpop.permute.xlu1 %1754  ;;  %v1585_v55 = vpop.permute.xlu2 %1584 }
 0x1d7   : > { %v1581_v58 = vpop.permute.xlu0 %1580 }
 0x1d8   : > { %v2265_v3 = vsel %vm2264_vm9, %v2208_v22, %v1581_v58 }
 0x1d9   : > { %v2322_v26 = vsel %vm2321_vm10, %v2265_v3, %v1755_v45  ;;  %v1982_v45 = vsel %vm1979_vm3, %v1925_v2, %v6740_v54  ;;  %v10831_v54 = vld [vmem:[#allocation15_spill] sm:$0xff] }
 0x1da   : > { %v2434_v1 = vrot.slane %v2322_v26, 2  ;;  %v2435_v6 = vrot.slane %v2322_v26, 4  ;;  %v2436_v12 = vrot.slane %v2322_v26, 6  ;;  %2579 = vst [vmem:[#allocation1] ss:$4 sm:$0xff] %v2322_v26  ;;  %v2039_v3 = vsel %vm2036_vm5, %v1982_v45, %v7006_v18 }
 0x1dc   : > { %2581 = vst [vmem:[#allocation1 + $0x1] ss:$4 sm:$0xff] %v2434_v1  ;;  %1598 = vrot.lane.b32.xlu1 %v10829_v61, %s5798_s11  ;;  %1426 = vrot.lane.b32.xlu2 %v7075_v29, %s5795_s8 }
 0x1dd   : > { %2583 = vst [vmem:[#allocation1 + $0x2] ss:$4 sm:$0xff] %v2435_v6  ;;  %1596 = vrot.lane.b32.xlu0 %v10827_v24, %s5798_s11 }
 0x1de   : > { %2585 = vst [vmem:[#allocation1 + $0x3] ss:$4 sm:$0xff] %v2436_v12  ;;  %v1237_v22 = vpop.permute.xlu1 %1236  ;;  %v1759_v58 = vpop.permute.xlu2 %1758 }
 0x1df   : > { %v1065_v26 = vpop.permute.xlu0 %1064 }
 0x1e0   : > { %v2096_v1 = vsel %vm2093_vm6, %v2039_v3, %v1065_v26  ;;  %v5730_v3 = vld [vmem:[%s5862_s27 + $0x8] sm:$0xff] }
 0x1e1   : > { %v2153_v38 = vsel %vm2150_vm7, %v2096_v1, %v1239_v50  ;;  %v10833_v26 = vld [vmem:[#allocation51_spill] sm:$0xff] }
 0x1e2   : > { %v2210_v27 = vsel %vm2207_vm8, %v2153_v38, %v1411_v14  ;;  %v1924_v1 = vsel %vm1922_vm4, %v5730_v3, %v10833_v26  ;;  %v5731_v3 = vld [vmem:[%s5862_s27 + $0x18] sm:$0xff] }
 0x1e3   : > { %v2267_v6 = vsel %vm2264_vm9, %v2210_v27, %v1585_v55  ;;  %v10832_v55 = vld [vmem:[#allocation93_spill] sm:$0xff]  ;;  %v1981_v27 = vsel %vm1979_vm3, %v1924_v1, %v6748_v8  ;;  %v7144_v1 = vld [vmem:[%s5862_s27 + $0x80] sm:$0xff] }
 0x1e4   : > { %v2324_v24 = vsel %vm2321_vm10, %v2267_v6, %v1759_v58  ;;  %1772 = vrot.lane.b32.xlu1 %v6457_v11, %s5797_s10  ;;  %1600 = vrot.lane.b32.xlu2 %v10831_v54, %s5798_s11  ;;  %v2038_v6 = vsel %vm2036_vm5, %v1981_v27, %v6958_v52  ;;  %v7139_v26 = vld [vmem:[%s5862_s27 + $0x78] sm:$0xff] }
 0x1e5   : > { %v2594_v12 = vld.sshfl [vmem:[#allocation1] sm:$0xff pattern:$0x73625140]  ;;  %v2439_v18 = vrot.slane %v2324_v24, 2  ;;  %v2440_v33 = vrot.slane %v2324_v24, 4  ;;  %v2441_v2 = vrot.slane %v2324_v24, 6  ;;  %1770 = vrot.lane.b32.xlu0 %v6471_v51, %s5797_s10 }
 0x1e6   : > { %2593 = vst [vmem:[#allocation1 + $0x23] ss:$4 sm:$0xff] %v2324_v24  ;;  %5612 = vmatmul.msk.f32.vlgmr.msra.gmra.mxu0 %vm2831_vm11, %v2594_v12  ;;  %v1409_v14 = vpop.permute.xlu1 %1408  ;;  %v7100_v38 = vpop.permute.xlu2 %1068  ;;  %v2095_v24 = vsel %vm2093_vm6, %v2038_v6, %v7016_v25 }
 0x1e7   : > { %2596 = vst [vmem:[#allocation1] ss:$4 sm:$0xff] %v2439_v18  ;;  %v1067_v50 = vpop.permute.xlu0 %1066  ;;  %v2152_v12 = vsel %vm2150_vm7, %v2095_v24, %v1237_v22 }
 0x1e8   : > { %2597 = vst [vmem:[#allocation1 + $0x1] ss:$4 sm:$0xff] %v2440_v33  ;;  %v2209_v18 = vsel %vm2207_vm8, %v2152_v12, %v1409_v14 }
 0x1e9   : > { %2598 = vst [vmem:[#allocation1 + $0x2] ss:$4 sm:$0xff] %v2441_v2 }
 0x1ec   : > { %908 = vrot.lane.b32.xlu1 %v7057_v37, %s5793_s30  ;;  %910 = vrot.lane.b32.xlu2 %v7075_v29, %s5793_s30 }
 0x1ed   : > { %1774 = vrot.lane.b32.xlu0 %v10832_v55, %s5797_s10 }
 0x1ee   : > { %v1583_v51 = vpop.permute.xlu1 %1582  ;;  %v7108_v45 = vpop.permute.xlu2 %1244 }
 0x1ef   : > { %v1241_v58 = vpop.permute.xlu0 %1240  ;;  %v2266_v8 = vsel %vm2264_vm9, %v2209_v18, %v1583_v51 }
 0x1f4   : > { %1084 = vrot.lane.b32.xlu1 %v10831_v54, %s5796_s9  ;;  %1256 = vrot.lane.b32.xlu2 %v6457_v11, %s5794_s7  ;;  %v10834_v11 = vld [vmem:[#allocation50_spill] sm:$0xff] }
 0x1f5   : > { %1082 = vrot.lane.b32.xlu0 %v10829_v61, %s5796_s9  ;;  %v1926_v14 = vsel %vm1922_vm4, %v5731_v3, %v10834_v11 }
 0x1f6   : > { %v1757_v52 = vpop.permute.xlu1 %1756  ;;  %v7128_v33 = vpop.permute.xlu2 %1588  ;;  %v1983_v61 = vsel %vm1979_vm3, %v1926_v14, %v6674_v49  ;;  %v5734_v14 = vld [vmem:[%s5862_s27 + $0x20] sm:$0xff] }
 0x1f7   : > { %v2323_v25 = vsel %vm2321_vm10, %v2266_v8, %v1757_v52  ;;  %v1413_v22 = vpop.permute.xlu0 %1412  ;;  %v2040_v51 = vsel %vm2036_vm5, %v1983_v61, %v7002_v16  ;;  %v10838_v61 = vld [vmem:[#allocation41_spill] sm:$0xff] }
 0x1f8   : > { %v2437_v2 = vrot.slane %v2323_v25, 2  ;;  %v2438_v54 = vrot.slane %v2323_v25, 4  ;;  %2587 = vst [vmem:[#allocation1 + $0x20] ss:$4 sm:$0xff] %v2323_v25  ;;  %v2097_v27 = vsel %vm2093_vm6, %v2040_v51, %v1067_v50  ;;  %v10835_v50 = vld [vmem:[#allocation18_spill] sm:$0xff]  ;;  %v1927_v51 = vsel %vm1922_vm4, %v5734_v14, %v10838_v61 }
 0x1f9   : > { %v2154_v49 = vsel %vm2150_vm7, %v2097_v27, %v1241_v58  ;;  %v10837_v58 = vld [vmem:[#allocation13_spill] sm:$0xff] }
 0x1fa   : > { %2589 = vst [vmem:[#allocation1 + $0x21] ss:$4 sm:$0xff] %v2437_v2  ;;  %v2211_v16 = vsel %vm2207_vm8, %v2154_v49, %v1413_v22 }
 0x1fb   : > { %2591 = vst [vmem:[#allocation1 + $0x22] ss:$4 sm:$0xff] %v2438_v54 }
 0x1fc   : > { %1428 = vrot.lane.b32.xlu1 %v7139_v26, %s5795_s8  ;;  %1430 = vrot.lane.b32.xlu2 %v7144_v1, %s5795_s8 }
 0x1fd   : > { %1258 = vrot.lane.b32.xlu0 %v10832_v55, %s5794_s7  ;;  %v10836_v55 = vld [vmem:[#allocation89_spill] sm:$0xff] }
 0x1fe   : > { %v1761_v6 = vpop.permute.xlu1 %1760  ;;  %v1765_v24 = vpop.permute.xlu2 %1764 }
 0x1ff   : > { %v1587_v12 = vpop.permute.xlu0 %1586 }
 0x200   : > { %v2268_v18 = vsel %vm2264_vm9, %v2211_v16, %v1587_v12  ;;  %v5735_v12 = vld [vmem:[%s5862_s27 + $0x28] sm:$0xff] }
 0x201   : > { %v2325_v8 = vsel %vm2321_vm10, %v2268_v18, %v1761_v6  ;;  %v1984_v6 = vsel %vm1979_vm3, %v1927_v51, %v6772_v60  ;;  %v10839_v18 = vld [vmem:[#allocation36_spill] sm:$0xff] }
 0x202   : > { %v2595_v52 = vld.sshfl [vmem:[#allocation1 + $0x20] sm:$0xff pattern:$0x73625140]  ;;  %v2442_v25 = vrot.slane %v2325_v8, 2  ;;  %v2443_v2 = vrot.slane %v2325_v8, 4 }
 0x203   : > { %2599 = vst [vmem:[#allocation1 + $0x3] ss:$4 sm:$0xff] %v2325_v8  ;;  %5613 = vmatmul.msk.f32.gmra.mxu0 %vm2831_vm11, %v2595_v52  ;;  %v1928_v8 = vsel %vm1922_vm4, %v5735_v12, %v10839_v18  ;;  %v2041_v52 = vsel %vm2036_vm5, %v1984_v6, %v6970_v4 }
 0x204   : > { %2600 = vst [vmem:[#allocation1 + $0x20] ss:$4 sm:$0xff] %v2442_v25  ;;  %1604 = vrot.lane.b32.xlu1 %v10835_v50, %s5798_s11  ;;  %1776 = vrot.lane.b32.xlu2 %v10836_v55, %s5797_s10  ;;  %v1985_v25 = vsel %vm1979_vm3, %v1928_v8, %v6768_v43 }
 0x205   : > { %2601 = vst [vmem:[#allocation1 + $0x21] ss:$4 sm:$0xff] %v2443_v2  ;;  %1602 = vrot.lane.b32.xlu0 %v10837_v58, %s5798_s11  ;;  %v2098_v2 = vsel %vm2093_vm6, %v2041_v52, %v7100_v38 }
 0x206   : > { %v1243_v22 = vpop.permute.xlu1 %1242  ;;  %v7162_v54 = vpop.permute.xlu2 %1246 }
 0x207   : > { %v1071_v3 = vpop.permute.xlu0 %1070  ;;  %v2155_v14 = vsel %vm2150_vm7, %v2098_v2, %v1243_v22  ;;  %v10841_v2 = vld [vmem:[#allocation17_spill] sm:$0xff] }
 0x20a   : > { %v2604_v11 = vld.sshfl [vmem:[#allocation1] sm:$0xff pattern:$0x73625140] }
 0x20b   : > { %5614 = vmatmul.msk.f32.gmra.mxu0 %vm2831_vm11, %v2604_v11  ;;  %v2042_v11 = vsel %vm2036_vm5, %v1985_v25, %v7021_v15  ;;  %v10840_v25 = vld [vmem:[#allocation22_spill] sm:$0xff] }
 0x20c   : > { %912 = vrot.lane.b32.xlu1 %v7139_v26, %s5793_s30  ;;  %914 = vrot.lane.b32.xlu2 %v7144_v1, %s5793_s30  ;;  %v2099_v60 = vsel %vm2093_vm6, %v2042_v11, %v1071_v3 }
 0x20d   : > { %1778 = vrot.lane.b32.xlu0 %v6523_v48, %s5797_s10  ;;  %v2156_v43 = vsel %vm2150_vm7, %v2099_v60, %v7108_v45  ;;  %v5738_v60 = vld [vmem:[%s5862_s27 + $0x30] sm:$0xff] }
 0x20e   : > { %v1417_v27 = vpop.permute.xlu1 %1416  ;;  %v7174_v49 = vpop.permute.xlu2 %1420 }
 0x20f   : > { %v1415_v16 = vpop.permute.xlu0 %1414  ;;  %v2213_v22 = vsel %vm2207_vm8, %v2156_v43, %v1417_v27  ;;  %v7212_v27 = vld [vmem:[%s5862_s27 + $0x90] sm:$0xff] }
 0x210   : > { %v2212_v61 = vsel %vm2207_vm8, %v2155_v14, %v1415_v16 }
 0x211   : > { %v2269_v15 = vsel %vm2264_vm9, %v2212_v61, %v7128_v33  ;;  %v7207_v33 = vld [vmem:[%s5862_s27 + $0x88] sm:$0xff]  ;;  %v10842_v61 = vld [vmem:[#allocation64_spill] sm:$0xff] }
 0x212   : > { %v1929_v43 = vsel %vm1922_vm4, %v5738_v60, %v10842_v61 }
 0x214   : > { %1088 = vrot.lane.b32.xlu1 %v10835_v50, %s5796_s9  ;;  %1260 = vrot.lane.b32.xlu2 %v10836_v55, %s5794_s7 }
 0x215   : > { %1086 = vrot.lane.b32.xlu0 %v10837_v58, %s5796_s9 }
 0x216   : > { %v1763_v4 = vpop.permute.xlu1 %1762  ;;  %v1767_v38 = vpop.permute.xlu2 %1766 }
 0x217   : > { %v2326_v50 = vsel %vm2321_vm10, %v2269_v15, %v1763_v4  ;;  %v1591_v3 = vpop.permute.xlu0 %1590  ;;  %v1986_v4 = vsel %vm1979_vm3, %v1929_v43, %v6694_v28 }
 0x218   : > { %v2444_v51 = vrot.slane %v2326_v50, 2  ;;  %v2445_v55 = vrot.slane %v2326_v50, 4  ;;  %v2446_v6 = vrot.slane %v2326_v50, 6  ;;  %2602 = vst [vmem:[#allocation1 + $0x22] ss:$4 sm:$0xff] %v2326_v50  ;;  %v2270_v58 = vsel %vm2264_vm9, %v2213_v22, %v1591_v3 }
 0x219   : > { %v2327_v45 = vsel %vm2321_vm10, %v2270_v58, %v1765_v24  ;;  %v2043_v22 = vsel %vm2036_vm5, %v1986_v4, %v7014_v9  ;;  %v5739_v9 = vld [vmem:[%s5862_s27 + $0x38] sm:$0xff] }
 0x21a   : > { %2603 = vst [vmem:[#allocation1 + $0x23] ss:$4 sm:$0xff] %v2444_v51  ;;  %v2447_v16 = vrot.slane %v2327_v45, 2  ;;  %v2448_v8 = vrot.slane %v2327_v45, 4 }
 0x21b   : > { %2606 = vst [vmem:[#allocation1] ss:$4 sm:$0xff] %v2445_v55  ;;  %v10843_v55 = vld [vmem:[#allocation63_spill] sm:$0xff] }
 0x21c   : > { %2607 = vst [vmem:[#allocation1 + $0x1] ss:$4 sm:$0xff] %v2446_v6  ;;  %1432 = vrot.lane.b32.xlu1 %v7207_v33, %s5795_s8  ;;  %1434 = vrot.lane.b32.xlu2 %v7212_v27, %s5795_s8  ;;  %v1930_v6 = vsel %vm1922_vm4, %v5739_v9, %v10843_v55  ;;  %v10844_v9 = vld [vmem:[#allocation21_spill] sm:$0xff]  ;;  %v10845_v55 = vld [vmem:[#allocation20_spill] sm:$0xff] }
 0x21d   : > { %2608 = vst [vmem:[#allocation1 + $0x2] ss:$4 sm:$0xff] %v2327_v45  ;;  %1262 = vrot.lane.b32.xlu0 %v6523_v48, %s5794_s7 }
 0x21e   : > { %2609 = vst [vmem:[#allocation1 + $0x3] ss:$4 sm:$0xff] %v2447_v16  ;;  %v1075_v24 = vpop.permute.xlu1 %1074  ;;  %v7218_v12 = vpop.permute.xlu2 %1078  ;;  %v1987_v16 = vsel %vm1979_vm3, %v1930_v6, %v6796_v34 }
 0x21f   : > { %v1073_v18 = vpop.permute.xlu0 %1072 }
 0x220   : > { %v2100_v50 = vsel %vm2093_vm6, %v2043_v22, %v1073_v18 }
 0x221   : > { %v2605_v52 = vld.sshfl [vmem:[#allocation1 + $0x20] sm:$0xff pattern:$0x73625140]  ;;  %v2157_v28 = vsel %vm2150_vm7, %v2100_v50, %v7162_v54 }
 0x222   : > { %2610 = vst [vmem:[#allocation1 + $0x20] ss:$4 sm:$0xff] %v2448_v8  ;;  %5615 = vmatmul.msk.f32.gmra.mxu0 %vm2831_vm11, %v2605_v52  ;;  %v2044_v8 = vsel %vm2036_vm5, %v1987_v16, %v6982_v17 }
 0x223   : > { %v2101_v52 = vsel %vm2093_vm6, %v2044_v8, %v1075_v24  ;;  %v5742_v8 = vld [vmem:[%s5862_s27 + $0x48] sm:$0xff] }
 0x224   : > { %1608 = vrot.lane.b32.xlu1 %v10840_v25, %s5798_s11  ;;  %1780 = vrot.lane.b32.xlu2 %v6512_v32, %s5797_s10 }
 0x225   : > { %1606 = vrot.lane.b32.xlu0 %v10841_v2, %s5798_s11  ;;  %v2614_v15 = vld.sshfl [vmem:[#allocation1] sm:$0xff pattern:$0x73625140] }
 0x226   : > { %v1419_v48 = vpop.permute.xlu1 %1418  ;;  %v7227_v11 = vpop.permute.xlu2 %1080 }
 0x227   : > { %v1249_v14 = vpop.permute.xlu0 %1248  ;;  %v2214_v58 = vsel %vm2207_vm8, %v2157_v28, %v1419_v48 }
 0x228   : > { %v2158_v4 = vsel %vm2150_vm7, %v2101_v52, %v1249_v14 }
 0x229   : > { %v2215_v34 = vsel %vm2207_vm8, %v2158_v4, %v7174_v49  ;;  %v7278_v49 = vld [vmem:[%s5862_s27 + $0xa0] sm:$0xff] }
 0x22a   : > { %5616 = vmatmul.msk.f32.gmra.mxu0 %vm2831_vm11, %v2614_v15 }
 0x22c   : > { %916 = vrot.lane.b32.xlu1 %v7207_v33, %s5793_s30  ;;  %918 = vrot.lane.b32.xlu2 %v7212_v27, %s5793_s30 }
 0x22d   : > { %1782 = vrot.lane.b32.xlu0 %v6519_v35, %s5797_s10 }
 0x22e   : > { %v1595_v3 = vpop.permute.xlu1 %1594  ;;  %v7246_v51 = vpop.permute.xlu2 %1254 }
 0x22f   : > { %v1593_v45 = vpop.permute.xlu0 %1592  ;;  %v2272_v24 = vsel %vm2264_vm9, %v2215_v34, %v1595_v3 }
 0x230   : > { %v2271_v18 = vsel %vm2264_vm9, %v2214_v58, %v1593_v45 }
 0x231   : > { %v2328_v54 = vsel %vm2321_vm10, %v2271_v18, %v1767_v38 }
 0x232   : > { %v2449_v60 = vrot.slane %v2328_v54, 2  ;;  %v2450_v61 = vrot.slane %v2328_v54, 4  ;;  %v2451_v43 = vrot.slane %v2328_v54, 6  ;;  %2611 = vst [vmem:[#allocation1 + $0x21] ss:$4 sm:$0xff] %v2328_v54  ;;  %v10846_v54 = vld [vmem:[#allocation69_spill] sm:$0xff] }
 0x233   : > { %v1932_v52 = vsel %vm1922_vm4, %v5742_v8, %v10846_v54 }
 0x234   : > { %2612 = vst [vmem:[#allocation1 + $0x22] ss:$4 sm:$0xff] %v2449_v60  ;;  %1092 = vrot.lane.b32.xlu1 %v10840_v25, %s5796_s9  ;;  %1264 = vrot.lane.b32.xlu2 %v6512_v32, %s5794_s7  ;;  %v5743_v60 = vld [vmem:[%s5862_s27 + $0x40] sm:$0xff]  ;;  %v1989_v4 = vsel %vm1979_vm3, %v1932_v52, %v6722_v59  ;;  %v7325_v59 = vld [vmem:[%s5862_s27 + $0xa8] sm:$0xff] }
 0x235   : > { %2613 = vst [vmem:[#allocation1 + $0x23] ss:$4 sm:$0xff] %v2450_v61  ;;  %1090 = vrot.lane.b32.xlu0 %v10841_v2, %s5796_s9  ;;  %v7273_v2 = vld [vmem:[%s5862_s27 + $0x98] sm:$0xff]  ;;  %v10847_v61 = vld [vmem:[#allocation44_spill] sm:$0xff]  ;;  %v10848_v52 = vld [vmem:[#allocation67_spill] sm:$0xff] }
 0x236   : > { %2616 = vst [vmem:[#allocation1] ss:$4 sm:$0xff] %v2451_v43  ;;  %v1077_v17 = vpop.permute.xlu1 %1076  ;;  %v7268_v38 = vpop.permute.xlu2 %1426  ;;  %v1931_v43 = vsel %vm1922_vm4, %v5743_v60, %v10847_v61 }
 0x237   : > { %v1769_v48 = vpop.permute.xlu0 %1768  ;;  %v1988_v34 = vsel %vm1979_vm3, %v1931_v43, %v6788_v53 }
 0x238   : > { %v2329_v25 = vsel %vm2321_vm10, %v2272_v24, %v1769_v48  ;;  %v2046_v24 = vsel %vm2036_vm5, %v1989_v4, %v7038_v23  ;;  %v2045_v48 = vsel %vm2036_vm5, %v1988_v34, %v7040_v56  ;;  %v10849_v4 = vld [vmem:[#allocation19_spill] sm:$0xff] }
 0x239   : > { %v2452_v14 = vrot.slane %v2329_v25, 2  ;;  %v2453_v32 = vrot.slane %v2329_v25, 4  ;;  %2617 = vst [vmem:[#allocation1 + $0x1] ss:$4 sm:$0xff] %v2329_v25  ;;  %v2103_v25 = vsel %vm2093_vm6, %v2046_v24, %v7218_v12 }
 0x23b   : > { %2618 = vst [vmem:[#allocation1 + $0x2] ss:$4 sm:$0xff] %v2452_v14  ;;  %v2102_v14 = vsel %vm2093_vm6, %v2045_v48, %v1077_v17 }
 0x23c   : > { %v2615_v15 = vld.sshfl [vmem:[#allocation1 + $0x20] sm:$0xff pattern:$0x73625140]  ;;  %2619 = vst [vmem:[#allocation1 + $0x3] ss:$4 sm:$0xff] %v2453_v32  ;;  %1436 = vrot.lane.b32.xlu1 %v7273_v2, %s5795_s8  ;;  %1438 = vrot.lane.b32.xlu2 %v7278_v49, %s5795_s8 }
 0x23d   : > { %5617 = vmatmul.msk.f32.gmra.mxu0 %vm2831_vm11, %v2615_v15  ;;  %1266 = vrot.lane.b32.xlu0 %v6519_v35, %s5794_s7 }
 0x23e   : > { %v1253_v22 = vpop.permute.xlu1 %1252  ;;  %v7285_v50 = vpop.permute.xlu2 %1600 }
 0x23f   : > { %v1251_v28 = vpop.permute.xlu0 %1250  ;;  %v2160_v32 = vsel %vm2150_vm7, %v2103_v25, %v1253_v22 }
 0x240   : > { %v2159_v53 = vsel %vm2150_vm7, %v2102_v14, %v1251_v28 }
 0x243   : > { %v2624_v3 = vld.sshfl [vmem:[#allocation1] sm:$0xff pattern:$0x73625140] }
 0x244   : > { %1612 = vrot.lane.b32.xlu1 %v10844_v9, %s5798_s11  ;;  %1784 = vrot.lane.b32.xlu2 %v6505_v31, %s5797_s10 }
 0x245   : > { %5618 = vmatmul.msk.f32.gmra.mxu0 %vm2831_vm11, %v2624_v3  ;;  %1610 = vrot.lane.b32.xlu0 %v10845_v55, %s5798_s11 }
 0x246   : > { %v1425_v6 = vpop.permute.xlu1 %1424  ;;  %v7294_v35 = vpop.permute.xlu2 %910 }
 0x247   : > { %v1423_v58 = vpop.permute.xlu0 %1422  ;;  %v2217_v56 = vsel %vm2207_vm8, %v2160_v32, %v1425_v6  ;;  %v5745_v6 = vld [vmem:[%s5862_s27 + $0x50] sm:$0xff] }
 0x248   : > { %v2216_v23 = vsel %vm2207_vm8, %v2159_v53, %v1423_v58  ;;  %v7363_v32 = vld [vmem:[%s5862_s27 + $0xb0] sm:$0xff] }
 0x24c   : > { %920 = vrot.lane.b32.xlu1 %v7273_v2, %s5793_s30  ;;  %922 = vrot.lane.b32.xlu2 %v7278_v49, %s5793_s30 }
 0x24d   : > { %1786 = vrot.lane.b32.xlu0 %v6543_v20, %s5797_s10 }
 0x24e   : > { %v1599_v45 = vpop.permute.xlu1 %1598  ;;  %v7302_v16 = vpop.permute.xlu2 %1256 }
 0x24f   : > { %v1597_v18 = vpop.permute.xlu0 %1596  ;;  %v2274_v12 = vsel %vm2264_vm9, %v2217_v56, %v1599_v45  ;;  %v10850_v56 = vld [vmem:[#allocation24_spill] sm:$0xff] }
 0x250   : > { %v2273_v22 = vsel %vm2264_vm9, %v2216_v23, %v1597_v18  ;;  %v7377_v23 = vld [vmem:[%s5862_s27 + $0xb8] sm:$0xff] }
 0x254   : > { %1096 = vrot.lane.b32.xlu1 %v10844_v9, %s5796_s9  ;;  %924 = vrot.lane.b32.xlu2 %v7325_v59, %s5793_s30 }
 0x255   : > { %1094 = vrot.lane.b32.xlu0 %v10845_v55, %s5796_s9  ;;  %v1933_v55 = vsel %vm1922_vm4, %v5745_v6, %v10848_v52 }
 0x256   : > { %v1773_v17 = vpop.permute.xlu1 %1772  ;;  %v7335_v15 = vpop.permute.xlu2 %1430  ;;  %v1990_v45 = vsel %vm1979_vm3, %v1933_v55, %v6816_v10  ;;  %v10852_v55 = vld [vmem:[#allocation23_spill] sm:$0xff] }
 0x257   : > { %v2331_v3 = vsel %vm2321_vm10, %v2274_v12, %v1773_v17  ;;  %v1771_v9 = vpop.permute.xlu0 %1770  ;;  %v2047_v61 = vsel %vm2036_vm5, %v1990_v45, %v6992_v0 }
 0x258   : > { %v2457_v8 = vrot.slane %v2331_v3, 2  ;;  %v2458_v54 = vrot.slane %v2331_v3, 4  ;;  %2626 = vst [vmem:[#allocation1] ss:$4 sm:$0xff] %v2331_v3  ;;  %v2330_v28 = vsel %vm2321_vm10, %v2273_v22, %v1771_v9  ;;  %v2104_v43 = vsel %vm2093_vm6, %v2047_v61, %v7227_v11  ;;  %v5748_v9 = vld [vmem:[%s5862_s27 + $0x58] sm:$0xff] }
 0x259   : > { %v2454_v58 = vrot.slane %v2330_v28, 2  ;;  %v2455_v60 = vrot.slane %v2330_v28, 4  ;;  %2620 = vst [vmem:[#allocation1 + $0x20] ss:$4 sm:$0xff] %v2330_v28  ;;  %v2456_v18 = vrot.slane %v2330_v28, 6  ;;  %v2161_v10 = vsel %vm2150_vm7, %v2104_v43, %v7246_v51 }
 0x25a   : > { %2627 = vst [vmem:[#allocation1 + $0x1] ss:$4 sm:$0xff] %v2457_v8  ;;  %v2218_v0 = vsel %vm2207_vm8, %v2161_v10, %v7268_v38  ;;  %v10851_v8 = vld [vmem:[#allocation49_spill] sm:$0xff] }
 0x25b   : > { %2628 = vst [vmem:[#allocation1 + $0x2] ss:$4 sm:$0xff] %v2458_v54  ;;  %v1934_v54 = vsel %vm1922_vm4, %v5748_v9, %v10851_v8 }
 0x25c   : > { %2621 = vst [vmem:[#allocation1 + $0x21] ss:$4 sm:$0xff] %v2454_v58  ;;  %1270 = vrot.lane.b32.xlu1 %v6543_v20, %s5794_s7  ;;  %1098 = vrot.lane.b32.xlu2 %v10849_v4, %s5796_s9  ;;  %v2275_v20 = vsel %vm2264_vm9, %v2218_v0, %v7285_v50  ;;  %v1991_v28 = vsel %vm1979_vm3, %v1934_v54, %v6812_v13  ;;  %v255_v58 = vld [vmem:[%s10453_s5] sm:$0xff] }
 0x25d   : > { %2622 = vst [vmem:[#allocation1 + $0x22] ss:$4 sm:$0xff] %v2455_v60  ;;  %1268 = vrot.lane.b32.xlu0 %v6505_v31, %s5794_s7  ;;  %v7412_v0 = vperm.slane %v255_v58, 0 }
 0x25e   : > { %2623 = vst [vmem:[#allocation1 + $0x23] ss:$4 sm:$0xff] %v2456_v18  ;;  %v909_v11 = vpop.permute.xlu1 %908  ;;  %v1777_v34 = vpop.permute.xlu2 %1776  ;;  %v10853_v18 = vld [vmem:[#allocation74_spill] sm:$0xff] }
 0x25f   : > { %v1775_v24 = vpop.permute.xlu0 %1774  ;;  %v2048_v6 = vsel %vm2036_vm5, %v1991_v28, %v909_v11  ;;  %v1935_v61 = vsel %vm1922_vm4, %v7064_v5, %v10853_v18 }
 0x260   : > { %v2332_v48 = vsel %vm2321_vm10, %v2275_v20, %v1775_v24  ;;  %v1992_v10 = vsel %vm1979_vm3, %v1935_v61, %v6742_v62  ;;  %v7421_v62 = vperm.slane %v255_v58, 1 }
 0x261   : > { %2629 = vst [vmem:[#allocation1 + $0x3] ss:$4 sm:$0xff] %v2332_v48  ;;  %v2459_v25 = vrot.slane %v2332_v48, 2  ;;  %v2460_v51 = vrot.slane %v2332_v48, 4  ;;  %v2461_v14 = vrot.slane %v2332_v48, 6 }
 0x263   : > { %v2951_v11 = vpop.f32.mrf.mxu0 }
 0x264   : > { %1442 = vrot.lane.b32.xlu1 %v7363_v32, %s5795_s8  ;;  %1272 = vrot.lane.b32.xlu2 %v6533_v41, %s5794_s7 }
 0x265   : > { %v2625_v31 = vld.sshfl [vmem:[#allocation1 + $0x20] sm:$0xff pattern:$0x73625140]  ;;  %1440 = vrot.lane.b32.xlu0 %v7325_v59, %s5795_s8 }
 0x266   : > { %2630 = vst [vmem:[#allocation1 + $0x20] ss:$4 sm:$0xff] %v2459_v25  ;;  %5619 = vmatmul.msk.f32.gmra.mxu0 %vm2831_vm11, %v2625_v31  ;;  %v1085_v38 = vpop.permute.xlu1 %1084  ;;  %v7372_v50 = vpop.permute.xlu2 %914 }
 0x267   : > { %2631 = vst [vmem:[#allocation1 + $0x21] ss:$4 sm:$0xff] %v2460_v51  ;;  %v1083_v53 = vpop.permute.xlu0 %1082  ;;  %v2952_v51 = vadd.f32 %v2951_v11, %v7412_v0 }
 0x268   : > { %2632 = vst [vmem:[#allocation1 + $0x22] ss:$4 sm:$0xff] %v2461_v14  ;;  %v2634_v12 = vld.sshfl [vmem:[#allocation1] sm:$0xff pattern:$0x73625140]  ;;  %v2105_v52 = vsel %vm2093_vm6, %v2048_v6, %v1083_v53 }
 0x269   : > { %v2162_v13 = vsel %vm2150_vm7, %v2105_v52, %v7302_v16  ;;  %v2049_v16 = vsel %vm2036_vm5, %v1992_v10, %v7294_v35  ;;  %v3148_v53 = vmul.f32 %v7421_v62, %v2952_v51  ;;  %vm3098_vm12 = vcmp.gt.f32.partialorder %v2952_v51, 0.0 }
 0x26a   : > { %v2106_v24 = vsel %vm2093_vm6, %v2049_v16, %v1085_v38 }
 0x26b   : > { %v3197_v6 = vsel %vm3098_vm12, %v2952_v51, %v3148_v53 }
 0x26c   : > { %1616 = vrot.lane.b32.xlu1 %v10850_v56, %s5798_s11  ;;  %1444 = vrot.lane.b32.xlu2 %v7377_v23, %s5795_s8  ;;  %v3296_v11 = vrot.slane %v3197_v6, 4 }
 0x26d   : > { %1614 = vrot.lane.b32.xlu0 %v10849_v4, %s5798_s11 }
 0x26e   : > { %5620 = vmatmul.msk.f32.gmra.mxu0 %vm2831_vm11, %v2634_v12  ;;  %v1429_v17 = vpop.permute.xlu1 %1428  ;;  %v7384_v22 = vpop.permute.xlu2 %1260 }
 0x26f   : > { %v1259_v3 = vpop.permute.xlu0 %1258  ;;  %v2219_v43 = vsel %vm2207_vm8, %v2162_v13, %v1429_v17 }
 0x270   : > { %v2163_v25 = vsel %vm2150_vm7, %v2106_v24, %v1259_v3  ;;  %v7469_v24 = vld [vmem:[%s5862_s27 + $0xc8] sm:$0xff] }
 0x271   : > { %v2220_v35 = vsel %vm2207_vm8, %v2163_v25, %v7335_v15 }
 0x274   : > { %1790 = vrot.lane.b32.xlu1 %v6571_v63, %s5797_s10  ;;  %1618 = vrot.lane.b32.xlu2 %v10852_v55, %s5798_s11 }
 0x275   : > { %1788 = vrot.lane.b32.xlu0 %v6533_v41, %s5797_s10 }
 0x276   : > { %v1605_v60 = vpop.permute.xlu1 %1604  ;;  %v7404_v45 = vpop.permute.xlu2 %1434 }
 0x277   : > { %v1603_v4 = vpop.permute.xlu0 %1602  ;;  %v2277_v31 = vsel %vm2264_vm9, %v2220_v35, %v1605_v60 }
 0x278   : > { %v2276_v41 = vsel %vm2264_vm9, %v2219_v43, %v1603_v4  ;;  %v3295_v43 = vrot.slane %v3197_v6, 2  ;;  %v286_v4 = vld [vmem:[%s5862_s27 + $0xf0] sm:$0xff] }
 0x279   : > { %v2333_v20 = vsel %vm2321_vm10, %v2276_v41, %v1777_v34  ;;  %v3297_v41 = vrot.slane %v3197_v6, 6 }
 0x27a   : > { %v2462_v48 = vrot.slane %v2333_v20, 2  ;;  %v2463_v5 = vrot.slane %v2333_v20, 4  ;;  %2633 = vst [vmem:[#allocation1 + $0x23] ss:$4 sm:$0xff] %v2333_v20  ;;  %v7464_v20 = vld [vmem:[%s5862_s27 + $0xc0] sm:$0xff] }
 0x27c   : > { %2636 = vst [vmem:[#allocation1] ss:$4 sm:$0xff] %v2462_v48  ;;  %926 = vrot.lane.b32.xlu1 %v7363_v32, %s5793_s30  ;;  %928 = vrot.lane.b32.xlu2 %v7377_v23, %s5793_s30 }
 0x27d   : > { %2637 = vst [vmem:[#allocation1 + $0x1] ss:$4 sm:$0xff] %v2463_v5  ;;  %1792 = vrot.lane.b32.xlu0 %v6560_v40, %s5797_s10  ;;  %v7474_v5 = vsel %vm3589_vm14, %v3295_v43, -inf }
 0x27e   : > { %v7431_v34 = vpop.permute.xlu1 %912  ;;  %v7433_v14 = vpop.permute.xlu2 %1780 }
 0x27f   : > { %v1779_v38 = vpop.permute.xlu0 %1778 }
 0x280   : > { %v2334_v12 = vsel %vm2321_vm10, %v2277_v31, %v1779_v38  ;;  %v2954_v17 = vpop.f32.mrf.mxu0 }
 0x281   : > { %v2635_v3 = vld.sshfl [vmem:[#allocation1 + $0x20] sm:$0xff pattern:$0x73625140]  ;;  %v2464_v9 = vrot.slane %v2334_v12, 2  ;;  %v2465_v8 = vrot.slane %v2334_v12, 4  ;;  %v2466_v54 = vrot.slane %v2334_v12, 6  ;;  %v2955_v28 = vadd.f32 %v2954_v17, %v7412_v0 }
 0x282   : > { %2638 = vst [vmem:[#allocation1 + $0x2] ss:$4 sm:$0xff] %v2334_v12  ;;  %5621 = vmatmul.msk.f32.gmra.mxu0 %vm2831_vm11, %v2635_v3  ;;  %v10854_v12 = vld [vmem:[#allocation73_spill] sm:$0xff]  ;;  %v7487_v3 = vsel %vm3589_vm14, %v3296_v11, -inf  ;;  %v10858_v11 = vld [vmem:[#allocation26_spill] sm:$0xff] }
 0x283   : > { %2639 = vst [vmem:[#allocation1 + $0x3] ss:$4 sm:$0xff] %v2464_v9  ;;  %vm3099_vm13 = vcmp.gt.f32.partialorder %v2955_v28, 0.0  ;;  %v3149_v15 = vmul.f32 %v7421_v62, %v2955_v28  ;;  %v1936_v17 = vsel %vm1922_vm4, %v7057_v37, %v10854_v12  ;;  %v7490_v9 = vsel %vm3589_vm14, %v3297_v41, -inf }
 0x284   : > { %2640 = vst [vmem:[#allocation1 + $0x20] ss:$4 sm:$0xff] %v2465_v8  ;;  %1102 = vrot.lane.b32.xlu1 %v10852_v55, %s5796_s9  ;;  %1274 = vrot.lane.b32.xlu2 %v6571_v63, %s5794_s7  ;;  %v7453_v55 = vsel %vm3589_vm14, %v3197_v6, -inf  ;;  %v1993_v6 = vsel %vm1979_vm3, %v1936_v17, %v6828_v39  ;;  %v10859_v39 = vld [vmem:[#allocation28_spill] sm:$0xff] }
 0x285   : > { %2641 = vst [vmem:[#allocation1 + $0x21] ss:$4 sm:$0xff] %v2466_v54  ;;  %v7445_v52 = vsel %vm3099_vm13, %v2955_v28, %v3149_v15  ;;  %1100 = vrot.lane.b32.xlu0 %v10850_v56, %s5796_s9 }
 0x286   : > { %v3300_v58 = vrot.slane %v7445_v52, 6  ;;  %v1089_v13 = vpop.permute.xlu1 %1088  ;;  %v7450_v60 = vpop.permute.xlu2 %918  ;;  %10855 = vst [vmem:[#allocation11_spill] sm:$0xff] %v7490_v9  ;;  %v7496_v54 = vsel %vm3589_vm14, %v7445_v52, -inf }
 0x287   : > { %v1087_v18 = vpop.permute.xlu0 %1086 }
 0x288   : > { %v7456_v63 = vsel %vm3589_vm14, %v3300_v58, -inf  ;;  %v2957_v61 = vpop.f32.mrf.mxu0 }
 0x289   : > { %v2958_v56 = vadd.f32 %v2957_v61, %v7412_v0 }
 0x28a   : > { %v2644_v10 = vld.sshfl [vmem:[#allocation1] sm:$0xff pattern:$0x73625140] }
 0x28b   : > { %vm3100_vm15 = vcmp.gt.f32.partialorder %v2958_v56, 0.0  ;;  %v3150_v16 = vmul.f32 %v7421_v62, %v2958_v56  ;;  %5622 = vmatmul.msk.f32.gmra.mxu0 %vm2831_vm11, %v2644_v10 }
 0x28c   : > { %1446 = vrot.lane.b32.xlu1 %v7464_v20, %s5795_s8  ;;  %1448 = vrot.lane.b32.xlu2 %v7469_v24, %s5795_s8 }
 0x28d   : > { %v3199_v48 = vsel %vm3100_vm15, %v2958_v56, %v3150_v16  ;;  %1276 = vrot.lane.b32.xlu0 %v6560_v40, %s5794_s7  ;;  %v2050_v56 = vsel %vm2036_vm5, %v1993_v6, %v7431_v34 }
 0x28e   : > { %v3301_v25 = vrot.slane %v3199_v48, 2  ;;  %v3302_v51 = vrot.slane %v3199_v48, 4  ;;  %v3303_v35 = vrot.slane %v3199_v48, 6  ;;  %v7479_v31 = vsel %vm3589_vm14, %v3199_v48, -inf  ;;  %v1433_v38 = vpop.permute.xlu1 %1432  ;;  %v7481_v53 = vpop.permute.xlu2 %1264 }
 0x28f   : > { %v1263_v8 = vpop.permute.xlu0 %1262  ;;  %v2107_v10 = vsel %vm2093_vm6, %v2050_v56, %v1087_v18 }
 0x290   : > { %v7499_v28 = vsel %vm3589_vm14, %v3301_v25, -inf  ;;  %v7502_v15 = vsel %vm3589_vm14, %v3302_v51, -inf  ;;  %v7505_v37 = vsel %vm3589_vm14, %v3303_v35, -inf  ;;  %v2164_v41 = vsel %vm2150_vm7, %v2107_v10, %v7384_v22  ;;  %v10860_v25 = vld [vmem:[#allocation54_spill] sm:$0xff] }
 0x291   : > { %10856 = vst [vmem:[#allocation12_spill] sm:$0xff] %v7499_v28  ;;  %v1937_v34 = vsel %vm1922_vm4, %v7075_v29, %v10860_v25  ;;  %v2221_v18 = vsel %vm2207_vm8, %v2164_v41, %v1433_v38 }
 0x292   : > { %10857 = vst [vmem:[#allocation16_spill] sm:$0xff] %v7502_v15  ;;  %v1994_v35 = vsel %vm1979_vm3, %v1937_v34, %v6824_v42  ;;  %v3298_v34 = vrot.slane %v7445_v52, 2 }
 0x293   : > { %v2051_v17 = vsel %vm2036_vm5, %v1994_v35, %v7372_v50 }
 0x294   : > { %1622 = vrot.lane.b32.xlu1 %v10858_v11, %s5798_s11  ;;  %1794 = vrot.lane.b32.xlu2 %v6567_v57, %s5797_s10  ;;  %v2108_v6 = vsel %vm2093_vm6, %v2051_v17, %v1089_v13 }
 0x295   : > { %1620 = vrot.lane.b32.xlu0 %v10859_v39, %s5798_s11  ;;  %v2165_v29 = vsel %vm2150_vm7, %v2108_v6, %v1263_v8  ;;  %v7562_v6 = vsel %vm3589_vm14, %v3298_v34, -inf }
 0x296   : > { %v1609_v16 = vpop.permute.xlu1 %1608  ;;  %v7526_v48 = vpop.permute.xlu2 %1438  ;;  %v2222_v42 = vsel %vm2207_vm8, %v2165_v29, %v7404_v45  ;;  %v3299_v45 = vrot.slane %v7445_v52, 4 }
 0x297   : > { %v1607_v51 = vpop.permute.xlu0 %1606  ;;  %v2279_v13 = vsel %vm2264_vm9, %v2222_v42, %v1609_v16 }
 0x298   : > { %v2278_v12 = vsel %vm2264_vm9, %v2221_v18, %v1607_v51  ;;  %v7577_v29 = vsel %vm3589_vm14, %v3299_v45, -inf }
 0x299   : > { %v2335_v22 = vsel %vm2321_vm10, %v2278_v12, %v7433_v14 }
 0x29a   : > { %v2467_v56 = vrot.slane %v2335_v22, 2  ;;  %v2468_v10 = vrot.slane %v2335_v22, 4  ;;  %2642 = vst [vmem:[#allocation1 + $0x22] ss:$4 sm:$0xff] %v2335_v22 }
 0x29c   : > { %2643 = vst [vmem:[#allocation1 + $0x23] ss:$4 sm:$0xff] %v2467_v56  ;;  %930 = vrot.lane.b32.xlu1 %v7464_v20, %s5793_s30  ;;  %932 = vrot.lane.b32.xlu2 %v7469_v24, %s5793_s30 }
 0x29d   : > { %2646 = vst [vmem:[#allocation1] ss:$4 sm:$0xff] %v2468_v10  ;;  %1796 = vrot.lane.b32.xlu0 %v6553_v46, %s5797_s10 }
 0x29e   : > { %v917_v50 = vpop.permute.xlu1 %916  ;;  %v1785_v14 = vpop.permute.xlu2 %1784 }
 0x29f   : > { %v1783_v38 = vpop.permute.xlu0 %1782  ;;  %v2960_v8 = vpop.f32.mrf.mxu0 }
 0x2a0   : > { %v2336_v41 = vsel %vm2321_vm10, %v2279_v13, %v1783_v38  ;;  %v2961_v25 = vadd.f32 %v2960_v8, %v7412_v0  ;;  %v7591_v8 = vld [vmem:[%s5862_s27 + $0xd8] sm:$0xff] }
 0x2a1   : > { %v2469_v18 = vrot.slane %v2336_v41, 2  ;;  %v2470_v51 = vrot.slane %v2336_v41, 4  ;;  %v2471_v35 = vrot.slane %v2336_v41, 6  ;;  %2647 = vst [vmem:[#allocation1 + $0x1] ss:$4 sm:$0xff] %v2336_v41  ;;  %v7718_v38 = vld [vmem:[%s5862_s27 + $0xf8] sm:$0xff] }
 0x2a2   : > { %vm3101_vm2 = vcmp.gt.f32.partialorder %v2961_v25, 0.0  ;;  %v3151_v12 = vmul.f32 %v7421_v62, %v2961_v25 }
 0x2a3   : > { %v2645_v17 = vld.sshfl [vmem:[#allocation1 + $0x20] sm:$0xff pattern:$0x73625140]  ;;  %2648 = vst [vmem:[#allocation1 + $0x2] ss:$4 sm:$0xff] %v2469_v18  ;;  %v10861_v18 = vld [vmem:[#allocation79_spill] sm:$0xff] }
 0x2a4   : > { %2649 = vst [vmem:[#allocation1 + $0x3] ss:$4 sm:$0xff] %v2470_v51  ;;  %v7555_v16 = vsel %vm3101_vm2, %v2961_v25, %v3151_v12  ;;  %5623 = vmatmul.msk.f32.gmra.mxu0 %vm2831_vm11, %v2645_v17  ;;  %1106 = vrot.lane.b32.xlu1 %v10858_v11, %s5796_s9  ;;  %v1938_v51 = vsel %vm1922_vm4, %v7139_v26, %v10861_v18 }
 0x2a5   : > { %2650 = vst [vmem:[#allocation1 + $0x20] ss:$4 sm:$0xff] %v2471_v35  ;;  %v3304_v22 = vrot.slane %v7555_v16, 2  ;;  %v7566_v52 = vsel %vm3589_vm14, %v7555_v16, -inf  ;;  %1278 = vrot.lane.b32.xlu2 %v6567_v57, %s5794_s7  ;;  %1104 = vrot.lane.b32.xlu0 %v10859_v39, %s5796_s9  ;;  %v7586_v39 = vld [vmem:[%s5862_s27 + $0xd0] sm:$0xff]  ;;  %v1995_v35 = vsel %vm1979_vm3, %v1938_v51, %v6770_v44  ;;  %v10864_v51 = vld [vmem:[#allocation77_spill] sm:$0xff] }
 0x2a6   : > { %v1093_v56 = vpop.permute.xlu1 %1092  ;;  %v7574_v10 = vpop.permute.xlu2 %922  ;;  %v2052_v12 = vsel %vm2036_vm5, %v1995_v35, %v917_v50  ;;  %v1939_v35 = vsel %vm1922_vm4, %v7144_v1, %v10864_v51 }
 0x2a7   : > { %v7580_v42 = vsel %vm3589_vm14, %v3304_v22, -inf  ;;  %v1091_v13 = vpop.permute.xlu0 %1090  ;;  %v2963_v45 = vpop.f32.mrf.mxu0  ;;  %v10862_v22 = vld [vmem:[#allocation25_spill] sm:$0xff]  ;;  %v1996_v61 = vsel %vm1979_vm3, %v1939_v35, %v6840_v36  ;;  %v3305_v36 = vrot.slane %v7555_v16, 4 }
 0x2a8   : > { %v2109_v17 = vsel %vm2093_vm6, %v2052_v12, %v1091_v13 }
 0x2a9   : > { %v2166_v26 = vsel %vm2150_vm7, %v2109_v17, %v7481_v53  ;;  %v2053_v53 = vsel %vm2036_vm5, %v1996_v61, %v7450_v60  ;;  %v3306_v60 = vrot.slane %v7555_v16, 6 }
 0x2ab   : > { %v2654_v57 = vld.sshfl [vmem:[#allocation1] sm:$0xff pattern:$0x73625140] }
 0x2ac   : > { %5624 = vmatmul.msk.f32.gmra.mxu0 %vm2831_vm11, %v2654_v57  ;;  %1450 = vrot.lane.b32.xlu1 %v7586_v39, %s5795_s8  ;;  %v2964_v57 = vadd.f32 %v2963_v45, %v7412_v0 }
 0x2ad   : > { %1452 = vrot.lane.b32.xlu2 %v7591_v8, %s5795_s8  ;;  %1280 = vrot.lane.b32.xlu0 %v6553_v46, %s5794_s7  ;;  %v10863_v46 = vld [vmem:[#allocation27_spill] sm:$0xff] }
 0x2ae   : > { %v1437_v41 = vpop.permute.xlu1 %1436  ;;  %v7597_v25 = vpop.permute.xlu2 %924  ;;  %v3152_v17 = vmul.f32 %v7421_v62, %v2964_v57  ;;  %vm3102_vm12 = vcmp.gt.f32.partialorder %v2964_v57, 0.0 }
 0x2af   : > { %v1267_v34 = vpop.permute.xlu0 %1266  ;;  %v2223_v50 = vsel %vm2207_vm8, %v2166_v26, %v1437_v41  ;;  %v2110_v26 = vsel %vm2093_vm6, %v2053_v53, %v1093_v56  ;;  %v7658_v53 = vsel %vm3589_vm14, %v3306_v60, -inf }
 0x2b0   : > { %v7640_v56 = vsel %vm3102_vm12, %v2964_v57, %v3152_v17  ;;  %10867 = vst [vmem:[#allocation14_spill] sm:$0xff] %v7658_v53 }
 0x2b4   : > { %1626 = vrot.lane.b32.xlu1 %v10862_v22, %s5798_s11 }
 0x2b5   : > { %1798 = vrot.lane.b32.xlu2 %v6591_v47, %s5797_s10  ;;  %1624 = vrot.lane.b32.xlu0 %v10863_v46, %s5798_s11 }
 0x2b6   : > { %v1613_v44 = vpop.permute.xlu1 %1612  ;;  %v7615_v18 = vpop.permute.xlu2 %1098 }
 0x2b7   : > { %v1611_v13 = vpop.permute.xlu0 %1610 }
 0x2b8   : > { %v2280_v12 = vsel %vm2264_vm9, %v2223_v50, %v1611_v13  ;;  %v2167_v50 = vsel %vm2150_vm7, %v2110_v26, %v1267_v34 }
 0x2b9   : > { %v2337_v45 = vsel %vm2321_vm10, %v2280_v12, %v1785_v14  ;;  %v10865_v14 = vld [vmem:[#allocation103_spill] sm:$0xff]  ;;  %v2224_v16 = vsel %vm2207_vm8, %v2167_v50, %v7526_v48  ;;  %v7662_v48 = vsel %vm3589_vm14, %v7640_v56, -inf }
 0x2ba   : > { %v2472_v58 = vrot.slane %v2337_v45, 2  ;;  %v2473_v40 = vrot.slane %v2337_v45, 4  ;;  %2651 = vst [vmem:[#allocation1 + $0x21] ss:$4 sm:$0xff] %v2337_v45  ;;  %v2966_v41 = vpop.f32.mrf.mxu0  ;;  %v2281_v51 = vsel %vm2264_vm9, %v2224_v16, %v1613_v44  ;;  %v7655_v45 = vsel %vm3589_vm14, %v3305_v36, -inf  ;;  %v284_v44 = vld [vmem:[%s5862_s27 + $0xe0] sm:$0xff] }
 0x2bb   : > { %v2967_v1 = vadd.f32 %v2966_v41, %v7412_v0  ;;  %10866 = vst [vmem:[#allocation57_spill] sm:$0xff] %v7655_v45  ;;  %v10873_v45 = vld [vmem:[#allocation62_spill] sm:$0xff] }
 0x2bc   : > { %2652 = vst [vmem:[#allocation1 + $0x22] ss:$4 sm:$0xff] %v2472_v58  ;;  %934 = vrot.lane.b32.xlu1 %v7586_v39, %s5793_s30  ;;  %v1940_v15 = vsel %vm1922_vm4, %v7207_v33, %v10873_v45 }
 0x2bd   : > { %2653 = vst [vmem:[#allocation1 + $0x23] ss:$4 sm:$0xff] %v2473_v40  ;;  %vm3103_vm13 = vcmp.gt.f32.partialorder %v2967_v1, 0.0  ;;  %v3153_v61 = vmul.f32 %v7421_v62, %v2967_v1  ;;  %936 = vrot.lane.b32.xlu2 %v7591_v8, %s5793_s30  ;;  %1800 = vrot.lane.b32.xlu0 %v10865_v14, %s5797_s10  ;;  %v1997_v28 = vsel %vm1979_vm3, %v1940_v15, %v6836_v7  ;;  %v1748_v15 = vrot.slane %v286_v4, 2 }
 0x2be   : > { %v7642_v58 = vpop.permute.xlu1 %920  ;;  %v7644_v34 = vpop.permute.xlu2 %1272  ;;  %10868 = vst [vmem:[#allocation55_spill] sm:$0xff] %v7662_v48  ;;  %v10872_v48 = vld [vmem:[#allocation84_spill] sm:$0xff] }
 0x2bf   : > { %v7648_v40 = vsel %vm3103_vm13, %v2967_v1, %v3153_v61  ;;  %v1787_v13 = vpop.permute.xlu0 %1786 }
 0x2c0   : > { %v3310_v35 = vrot.slane %v7648_v40, 2  ;;  %v3311_v12 = vrot.slane %v7648_v40, 4  ;;  %v3312_v57 = vrot.slane %v7648_v40, 6  ;;  %v2338_v17 = vsel %vm2321_vm10, %v2281_v51, %v1787_v13  ;;  %v7682_v13 = vld [vmem:[%s5862_s27 + $0xe8] sm:$0xff] }
 0x2c1   : > { %v2474_v50 = vrot.slane %v2338_v17, 2  ;;  %2656 = vst [vmem:[#allocation1] ss:$4 sm:$0xff] %v2338_v17  ;;  %v2475_v16 = vrot.slane %v2338_v17, 4  ;;  %v7693_v60 = vrot.slane %v7682_v13, 1 }
 0x2c2   : > { %v7667_v41 = vsel %vm3589_vm14, %v3310_v35, -inf  ;;  %v7670_v26 = vsel %vm3589_vm14, %v3311_v12, -inf  ;;  %v7673_v1 = vsel %vm3589_vm14, %v3312_v57, -inf  ;;  %v2476_v35 = vrot.slane %v2338_v17, 6 }
 0x2c3   : > { %10869 = vst [vmem:[#allocation15_spill] sm:$0xff] %v7667_v41  ;;  %v1054_v12 = vrot.slane %v284_v44, 1 }
 0x2c4   : > { %10870 = vst [vmem:[#allocation93_spill] sm:$0xff] %v7670_v26  ;;  %v2655_v51 = vld.sshfl [vmem:[#allocation1 + $0x20] sm:$0xff pattern:$0x73625140]  ;;  %1110 = vrot.lane.b32.xlu1 %v10862_v22, %s5796_s9  ;;  %v1941_v26 = vsel %vm1922_vm4, %v7212_v27, %v10872_v48 }
 0x2c5   : > { %10871 = vst [vmem:[#allocation51_spill] sm:$0xff] %v7673_v1  ;;  %5625 = vmatmul.msk.f32.gmra.mxu0 %vm2831_vm11, %v2655_v51  ;;  %938 = vrot.lane.b32.xlu2 %v284_v44, %s5793_s30  ;;  %v1056_v22 = vsel %vm376_vm0, %v1054_v12, %v7693_v60  ;;  %v1998_v53 = vsel %vm1979_vm3, %v1941_v26, %v6790_v21 }
 0x2c6   : > { %2657 = vst [vmem:[#allocation1 + $0x1] ss:$4 sm:$0xff] %v2474_v50  ;;  %1108 = vrot.lane.b32.xlu0 %v10863_v46, %s5796_s9  ;;  %v1097_v57 = vpop.permute.xlu1 %1096  ;;  %v7690_v61 = vpop.permute.xlu2 %1444  ;;  %v2055_v41 = vsel %vm2036_vm5, %v1998_v53, %v7574_v10  ;;  %v2054_v21 = vsel %vm2036_vm5, %v1997_v28, %v7642_v58  ;;  %v1749_v28 = vrot.slane %v7718_v38, 2 }
 0x2c7   : > { %2658 = vst [vmem:[#allocation1 + $0x2] ss:$4 sm:$0xff] %v2475_v16  ;;  %v1095_v17 = vpop.permute.xlu0 %1094  ;;  %v1228_v16 = vrot.slane %v284_v44, 2  ;;  %v2112_v9 = vsel %vm2093_vm6, %v2055_v41, %v1097_v57 }
 0x2c8   : > { %2659 = vst [vmem:[#allocation1 + $0x3] ss:$4 sm:$0xff] %v2476_v35  ;;  %v7706_v35 = vrot.slane %v7682_v13, 2  ;;  %v2111_v53 = vsel %vm2093_vm6, %v2054_v21, %v1095_v17 }
 0x2cc   : > { %1284 = vrot.lane.b32.xlu1 %v10865_v14, %s5794_s7  ;;  %v1230_v14 = vsel %vm629_vm1, %v1228_v16, %v7706_v35  ;;  %v1574_v16 = vrot.slane %v286_v4, 1 }
 0x2cd   : > { %1112 = vrot.lane.b32.xlu2 %v1056_v22, %s5796_s9 }
 0x2ce   : > { %1282 = vrot.lane.b32.xlu0 %v6591_v47, %s5794_s7  ;;  %v1271_v46 = vpop.permute.xlu1 %1270  ;;  %v7703_v51 = vpop.permute.xlu2 %1618 }
 0x2cf   : > { %v2664_v50 = vld.sshfl [vmem:[#allocation1] sm:$0xff pattern:$0x73625140]  ;;  %v1269_v12 = vpop.permute.xlu0 %1268  ;;  %v2169_v27 = vsel %vm2150_vm7, %v2112_v9, %v1271_v46 }
 0x2d0   : > { %5626 = vmatmul.msk.f32.gmra.mxu0 %vm2831_vm11, %v2664_v50  ;;  %v2168_v9 = vsel %vm2150_vm7, %v2111_v53, %v1269_v12 }
 0x2d4   : > { %1456 = vrot.lane.b32.xlu1 %v7682_v13, %s5795_s8 }
 0x2d5   : > { %1286 = vrot.lane.b32.xlu2 %v1230_v14, %s5794_s7 }
 0x2d6   : > { %1454 = vrot.lane.b32.xlu0 %v284_v44, %s5795_s8  ;;  %v1443_v50 = vpop.permute.xlu1 %1442  ;;  %v7714_v36 = vpop.permute.xlu2 %928  ;;  %v1575_v44 = vrot.slane %v7718_v38, 1 }
 0x2d7   : > { %v1441_v47 = vpop.permute.xlu0 %1440  ;;  %v2226_v10 = vsel %vm2207_vm8, %v2169_v27, %v1443_v50 }
 0x2d8   : > { %v2225_v58 = vsel %vm2207_vm8, %v2168_v9, %v1441_v47 }
 0x2dc   : > { %1630 = vrot.lane.b32.xlu1 %v7693_v60, %s5798_s11 }
 0x2dd   : > { %1458 = vrot.lane.b32.xlu2 %v286_v4, %s5795_s8 }
 0x2de   : > { %1628 = vrot.lane.b32.xlu0 %v1056_v22, %s5798_s11  ;;  %v1617_v11 = vpop.permute.xlu1 %1616  ;;  %v7724_v43 = vpop.permute.xlu2 %1274  ;;  %v1576_v22 = vsel %vm376_vm0, %v1574_v16, %v1575_v44 }
 0x2df   : > { %v1615_v1 = vpop.permute.xlu0 %1614  ;;  %v2283_v33 = vsel %vm2264_vm9, %v2226_v10, %v1617_v11  ;;  %v10874_v11 = vld [vmem:[#allocation83_spill] sm:$0xff] }
 0x2e0   : > { %v1942_v46 = vsel %vm1922_vm4, %v7273_v2, %v10874_v11  ;;  %v7776_v2 = vld [vmem:[%s5862_s27 + $0x110] sm:$0xff] }
 0x2e1   : > { %v1999_v4 = vsel %vm1979_vm3, %v1942_v46, %v6852_v19 }
 0x2e2   : > { %v2056_v50 = vsel %vm2036_vm5, %v1999_v4, %v7597_v25 }
 0x2e3   : > { %v2113_v27 = vsel %vm2093_vm6, %v2056_v50, %v7615_v18 }
 0x2e4   : > { %1804 = vrot.lane.b32.xlu1 %v7706_v35, %s5797_s10  ;;  %v2170_v19 = vsel %vm2150_vm7, %v2113_v27, %v7644_v34 }
 0x2e5   : > { %1632 = vrot.lane.b32.xlu2 %v1576_v22, %s5798_s11  ;;  %v1750_v22 = vsel %vm629_vm1, %v1748_v15, %v1749_v28  ;;  %v2227_v25 = vsel %vm2207_vm8, %v2170_v19, %v7690_v61  ;;  %v7798_v15 = vld [vmem:[%s5862_s27 + $0x120] sm:$0xff] }
 0x2e6   : > { %1802 = vrot.lane.b32.xlu0 %v1230_v14, %s5797_s10  ;;  %v1791_v45 = vpop.permute.xlu1 %1790  ;;  %v7753_v7 = vpop.permute.xlu2 %1448  ;;  %v2282_v14 = vsel %vm2264_vm9, %v2225_v58, %v1615_v1  ;;  %v10876_v58 = vld [vmem:[#allocation66_spill] sm:$0xff] }
 0x2e7   : > { %v2340_v48 = vsel %vm2321_vm10, %v2283_v33, %v1791_v45  ;;  %v1789_v41 = vpop.permute.xlu0 %1788  ;;  %v10875_v33 = vld [vmem:[#allocation32_spill] sm:$0xff] }
 0x2e8   : > { %v2479_v26 = vrot.slane %v2340_v48, 2  ;;  %v2480_v57 = vrot.slane %v2340_v48, 4  ;;  %v2481_v17 = vrot.slane %v2340_v48, 6  ;;  %2663 = vst [vmem:[#allocation1 + $0x23] ss:$4 sm:$0xff] %v2340_v48  ;;  %v2339_v12 = vsel %vm2321_vm10, %v2282_v14, %v1789_v41  ;;  %v10878_v14 = vld [vmem:[#allocation31_spill] sm:$0xff] }
 0x2e9   : > { %v2477_v47 = vrot.slane %v2339_v12, 2  ;;  %v2478_v16 = vrot.slane %v2339_v12, 4  ;;  %2660 = vst [vmem:[#allocation1 + $0x20] ss:$4 sm:$0xff] %v2339_v12  ;;  %v10879_v12 = vld [vmem:[#allocation88_spill] sm:$0xff] }
 0x2ea   : > { %2666 = vst [vmem:[#allocation1] ss:$4 sm:$0xff] %v2479_v26  ;;  %v1943_v26 = vsel %vm1922_vm4, %v7278_v49, %v10876_v58  ;;  %v1944_v50 = vsel %vm1922_vm4, %v7325_v59, %v10879_v12  ;;  %v10885_v12 = vld [vmem:[#allocation152_spill] sm:$0xff] }
 0x2eb   : > { %2667 = vst [vmem:[#allocation1 + $0x1] ss:$4 sm:$0xff] %v2480_v57  ;;  %v10877_v57 = vld [vmem:[#allocation148_spill] sm:$0xff] }
 0x2ec   : > { %2668 = vst [vmem:[#allocation1 + $0x2] ss:$4 sm:$0xff] %v2481_v17  ;;  %940 = vrot.lane.b32.xlu1 %v7682_v13, %s5793_s30  ;;  %v2284_v13 = vsel %vm2264_vm9, %v2227_v25, %v7703_v51  ;;  %v2000_v17 = vsel %vm1979_vm3, %v1943_v26, %v10877_v57  ;;  %v7860_v57 = vld [vmem:[%s5862_s27 + $0x128] sm:$0xff] }
 0x2ed   : > { %942 = vrot.lane.b32.xlu2 %v7776_v2, %s5793_s30  ;;  %2661 = vst [vmem:[#allocation1 + $0x21] ss:$4 sm:$0xff] %v2477_v47 }
 0x2ee   : > { %1806 = vrot.lane.b32.xlu0 %v1750_v22, %s5797_s10  ;;  %v927_v18 = vpop.permute.xlu1 %926  ;;  %v1795_v1 = vpop.permute.xlu2 %1794  ;;  %2662 = vst [vmem:[#allocation1 + $0x22] ss:$4 sm:$0xff] %v2478_v16  ;;  %v10880_v22 = vld [vmem:[#allocation145_spill] sm:$0xff] }
 0x2ef   : > { %v1793_v21 = vpop.permute.xlu0 %1792  ;;  %v2057_v11 = vsel %vm2036_vm5, %v2000_v17, %v927_v18  ;;  %v7865_v17 = vld [vmem:[%s5862_s27 + $0x130] sm:$0xff] }
 0x2f0   : > { %v2341_v34 = vsel %vm2321_vm10, %v2284_v13, %v1793_v21  ;;  %v7837_v13 = vld [vmem:[%s5862_s27 + $0x118] sm:$0xff] }
 0x2f1   : > { %2669 = vst [vmem:[#allocation1 + $0x3] ss:$4 sm:$0xff] %v2341_v34  ;;  %v2482_v10 = vrot.slane %v2341_v34, 2  ;;  %v2483_v53 = vrot.slane %v2341_v34, 4 }
 0x2f4   : > { %1116 = vrot.lane.b32.xlu1 %v10875_v33, %s5796_s9 }
 0x2f5   : > { %1288 = vrot.lane.b32.xlu2 %v7706_v35, %s5794_s7  ;;  %v2665_v61 = vld.sshfl [vmem:[#allocation1 + $0x20] sm:$0xff pattern:$0x73625140] }
 0x2f6   : > { %1114 = vrot.lane.b32.xlu0 %v7693_v60, %s5796_s9  ;;  %v1103_v45 = vpop.permute.xlu1 %1102  ;;  %v7792_v51 = vpop.permute.xlu2 %932  ;;  %2670 = vst [vmem:[#allocation1 + $0x20] ss:$4 sm:$0xff] %v2482_v10  ;;  %5627 = vmatmul.msk.f32.gmra.mxu0 %vm2831_vm11, %v2665_v61 }
 0x2f7   : > { %v1101_v9 = vpop.permute.xlu0 %1100  ;;  %2671 = vst [vmem:[#allocation1 + $0x21] ss:$4 sm:$0xff] %v2483_v53 }
 0x2f8   : > { %v2674_v35 = vld.sshfl [vmem:[#allocation1] sm:$0xff pattern:$0x73625140]  ;;  %v2114_v46 = vsel %vm2093_vm6, %v2057_v11, %v1101_v9 }
 0x2f9   : > { %v2171_v49 = vsel %vm2150_vm7, %v2114_v46, %v7724_v43 }
 0x2fc   : > { %1460 = vrot.lane.b32.xlu1 %v7718_v38, %s5795_s8 }
 0x2fd   : > { %1462 = vrot.lane.b32.xlu2 %v7798_v15, %s5795_s8 }
 0x2fe   : > { %1290 = vrot.lane.b32.xlu0 %v6613_v30, %s5794_s7  ;;  %v1447_v60 = vpop.permute.xlu1 %1446  ;;  %5628 = vmatmul.msk.f32.gmra.mxu0 %vm2831_vm11, %v2674_v35  ;;  %v10883_v35 = vld [vmem:[#allocation30_spill] sm:$0xff] }
 0x2ff   : > { %v7805_v48 = vpop.permute.xlu2 %1278  ;;  %v1277_v41 = vpop.permute.xlu0 %1276  ;;  %v2228_v47 = vsel %vm2207_vm8, %v2171_v49, %v1447_v60 }
 0x304   : > { %1636 = vrot.lane.b32.xlu1 %v10878_v14, %s5798_s11 }
 0x305   : > { %1808 = vrot.lane.b32.xlu2 %v1749_v28, %s5797_s10  ;;  %v2001_v28 = vsel %vm1979_vm3, %v1944_v50, %v10880_v22  ;;  %v10886_v22 = vld [vmem:[#allocation34_spill] sm:$0xff] }
 0x306   : > { %1634 = vrot.lane.b32.xlu0 %v1575_v44, %s5798_s11  ;;  %v1623_v30 = vpop.permute.xlu1 %1622  ;;  %v2058_v44 = vsel %vm2036_vm5, %v2001_v28, %v7714_v36  ;;  %v10881_v36 = vld [vmem:[#allocation115_spill] sm:$0xff] }
 0x307   : > { %v7822_v4 = vpop.permute.xlu2 %1452  ;;  %v1621_v16 = vpop.permute.xlu0 %1620  ;;  %v2115_v43 = vsel %vm2093_vm6, %v2058_v44, %v1103_v45  ;;  %v10887_v28 = vld [vmem:[#allocation111_spill] sm:$0xff] }
 0x308   : > { %v2285_v38 = vsel %vm2264_vm9, %v2228_v47, %v1621_v16  ;;  %v2172_v59 = vsel %vm2150_vm7, %v2115_v43, %v1277_v41  ;;  %v10889_v43 = vld [vmem:[#allocation72_spill] sm:$0xff] }
 0x309   : > { %v2342_v27 = vsel %vm2321_vm10, %v2285_v38, %v1795_v1  ;;  %v2229_v21 = vsel %vm2207_vm8, %v2172_v59, %v7753_v7  ;;  %v10882_v7 = vld [vmem:[#allocation107_spill] sm:$0xff]  ;;  %v10888_v38 = vld [vmem:[#allocation29_spill] sm:$0xff]  ;;  %v10890_v59 = vld [vmem:[#allocation150_spill] sm:$0xff] }
 0x30a   : > { %v2484_v19 = vrot.slane %v2342_v27, 2  ;;  %v2485_v25 = vrot.slane %v2342_v27, 4  ;;  %v2486_v18 = vrot.slane %v2342_v27, 6  ;;  %2672 = vst [vmem:[#allocation1 + $0x22] ss:$4 sm:$0xff] %v2342_v27  ;;  %v2286_v10 = vsel %vm2264_vm9, %v2229_v21, %v1623_v30  ;;  %v10884_v30 = vld [vmem:[#allocation87_spill] sm:$0xff] }
 0x30b   : > { %v1945_v49 = vsel %vm1922_vm4, %v7363_v32, %v10884_v30 }
 0x30c   : > { %944 = vrot.lane.b32.xlu1 %v7837_v13, %s5793_s30  ;;  %2673 = vst [vmem:[#allocation1 + $0x23] ss:$4 sm:$0xff] %v2484_v19  ;;  %v2002_v50 = vsel %vm1979_vm3, %v1945_v49, %v10885_v12  ;;  %v1946_v19 = vsel %vm1922_vm4, %v7377_v23, %v10889_v43  ;;  %v7924_v12 = vld [vmem:[%s5862_s27 + $0x138] sm:$0xff] }
 0x30d   : > { %946 = vrot.lane.b32.xlu2 %v7798_v15, %s5793_s30  ;;  %2676 = vst [vmem:[#allocation1] ss:$4 sm:$0xff] %v2485_v25 }
 0x30e   : > { %1810 = vrot.lane.b32.xlu0 %v10881_v36, %s5797_s10  ;;  %v931_v1 = vpop.permute.xlu1 %930  ;;  %2677 = vst [vmem:[#allocation1 + $0x1] ss:$4 sm:$0xff] %v2486_v18 }
 0x30f   : > { %v1799_v34 = vpop.permute.xlu2 %1798  ;;  %v1797_v53 = vpop.permute.xlu0 %1796  ;;  %v2059_v47 = vsel %vm2036_vm5, %v2002_v50, %v931_v1  ;;  %v7929_v50 = vld [vmem:[%s5862_s27 + $0x140] sm:$0xff] }
 0x310   : > { %v2343_v33 = vsel %vm2321_vm10, %v2286_v10, %v1797_v53 }
 0x311   : > { %v2487_v61 = vrot.slane %v2343_v33, 2  ;;  %v2488_v45 = vrot.slane %v2343_v33, 4  ;;  %2678 = vst [vmem:[#allocation1 + $0x2] ss:$4 sm:$0xff] %v2343_v33 }
 0x313   : > { %v2675_v9 = vld.sshfl [vmem:[#allocation1 + $0x20] sm:$0xff pattern:$0x73625140]  ;;  %2679 = vst [vmem:[#allocation1 + $0x3] ss:$4 sm:$0xff] %v2487_v61 }
 0x314   : > { %1120 = vrot.lane.b32.xlu1 %v10878_v14, %s5796_s9  ;;  %2680 = vst [vmem:[#allocation1 + $0x20] ss:$4 sm:$0xff] %v2488_v45  ;;  %5629 = vmatmul.msk.f32.gmra.mxu0 %vm2831_vm11, %v2675_v9 }
 0x315   : > { %1292 = vrot.lane.b32.xlu2 %v10882_v7, %s5794_s7 }
 0x316   : > { %1118 = vrot.lane.b32.xlu0 %v10883_v35, %s5796_s9  ;;  %v1107_v60 = vpop.permute.xlu1 %1106 }
 0x317   : > { %v7856_v41 = vpop.permute.xlu2 %936  ;;  %v1105_v58 = vpop.permute.xlu0 %1104 }
 0x318   : > { %v2116_v16 = vsel %vm2093_vm6, %v2059_v47, %v1105_v58 }
 0x319   : > { %v2173_v32 = vsel %vm2150_vm7, %v2116_v16, %v7805_v48 }
 0x31a   : > { %v2684_v26 = vld.sshfl [vmem:[#allocation1] sm:$0xff pattern:$0x73625140] }
 0x31b   : > { %5630 = vmatmul.msk.f32.vlgmr.msra.gmra.mxu1 %vm2831_vm11, %v2684_v26 }
 0x31c   : > { %1464 = vrot.lane.b32.xlu1 %v7860_v57, %s5795_s8 }
 0x31d   : > { %1466 = vrot.lane.b32.xlu2 %v7865_v17, %s5795_s8 }
 0x31e   : > { %1294 = vrot.lane.b32.xlu0 %v10881_v36, %s5794_s7  ;;  %v1451_v11 = vpop.permute.xlu1 %1450  ;;  %v2003_v36 = vsel %vm1979_vm3, %v1946_v19, %v10890_v59 }
 0x31f   : > { %v7871_v46 = vpop.permute.xlu2 %938  ;;  %v1281_v14 = vpop.permute.xlu0 %1280  ;;  %v2230_v25 = vsel %vm2207_vm8, %v2173_v32, %v1451_v11  ;;  %v2060_v21 = vsel %vm2036_vm5, %v2003_v36, %v7792_v51  ;;  %v10891_v51 = vld [vmem:[#allocation121_spill] sm:$0xff]  ;;  %v10896_v36 = vld [vmem:[#allocation91_spill] sm:$0xff] }
 0x320   : > { %v2117_v48 = vsel %vm2093_vm6, %v2060_v21, %v1107_v60 }
 0x321   : > { %v2174_v23 = vsel %vm2150_vm7, %v2117_v48, %v1281_v14 }
 0x322   : > { %v2231_v45 = vsel %vm2207_vm8, %v2174_v23, %v7822_v4  ;;  %v10899_v23 = vld [vmem:[#allocation146_spill] sm:$0xff] }
 0x324   : > { %1640 = vrot.lane.b32.xlu1 %v10886_v22, %s5798_s11 }
 0x325   : > { %1812 = vrot.lane.b32.xlu2 %v10887_v28, %s5797_s10 }
 0x326   : > { %1638 = vrot.lane.b32.xlu0 %v10888_v38, %s5798_s11  ;;  %v1627_v44 = vpop.permute.xlu1 %1626 }
 0x327   : > { %v7888_v27 = vpop.permute.xlu2 %1112  ;;  %v1625_v18 = vpop.permute.xlu0 %1624  ;;  %v2288_v7 = vsel %vm2264_vm9, %v2231_v45, %v1627_v44  ;;  %v10894_v44 = vld [vmem:[#allocation33_spill] sm:$0xff] }
 0x328   : > { %v2287_v1 = vsel %vm2264_vm9, %v2230_v25, %v1625_v18  ;;  %v10895_v25 = vld [vmem:[#allocation120_spill] sm:$0xff] }
 0x329   : > { %v2344_v10 = vsel %vm2321_vm10, %v2287_v1, %v1799_v34  ;;  %v1948_v1 = vsel %vm1922_vm4, %v7469_v24, %v10896_v36 }
 0x32a   : > { %v2489_v53 = vrot.slane %v2344_v10, 2  ;;  %v2490_v33 = vrot.slane %v2344_v10, 4  ;;  %v2491_v61 = vrot.slane %v2344_v10, 6  ;;  %2681 = vst [vmem:[#allocation1 + $0x21] ss:$4 sm:$0xff] %v2344_v10  ;;  %v10897_v10 = vld [vmem:[#allocation154_spill] sm:$0xff] }
 0x32b   : > { %v2005_v48 = vsel %vm1979_vm3, %v1948_v1, %v10897_v10 }
 0x32c   : > { %948 = vrot.lane.b32.xlu1 %v7860_v57, %s5793_s30  ;;  %2682 = vst [vmem:[#allocation1 + $0x22] ss:$4 sm:$0xff] %v2489_v53  ;;  %v10898_v53 = vld [vmem:[#allocation92_spill] sm:$0xff] }
 0x32d   : > { %950 = vrot.lane.b32.xlu2 %v7865_v17, %s5793_s30  ;;  %2683 = vst [vmem:[#allocation1 + $0x23] ss:$4 sm:$0xff] %v2490_v33  ;;  %v1947_v33 = vsel %vm1922_vm4, %v7464_v20, %v10898_v53  ;;  %v7972_v20 = vld [vmem:[%s5862_s27 + $0x148] sm:$0xff] }
 0x32e   : > { %1814 = vrot.lane.b32.xlu0 %v10891_v51, %s5797_s10  ;;  %v935_v34 = vpop.permute.xlu1 %934  ;;  %2686 = vst [vmem:[#allocation1] ss:$4 sm:$0xff] %v2491_v61  ;;  %v2062_v61 = vsel %vm2036_vm5, %v2005_v48, %v7856_v41 }
 0x32f   : > { %v7910_v9 = vpop.permute.xlu2 %1286  ;;  %v1801_v35 = vpop.permute.xlu0 %1800 }
 0x330   : > { %v2345_v60 = vsel %vm2321_vm10, %v2288_v7, %v1801_v35 }
 0x331   : > { %v2492_v58 = vrot.slane %v2345_v60, 2  ;;  %2687 = vst [vmem:[#allocation1 + $0x1] ss:$4 sm:$0xff] %v2345_v60  ;;  %v2493_v26 = vrot.slane %v2345_v60, 4 }
 0x333   : > { %2688 = vst [vmem:[#allocation1 + $0x2] ss:$4 sm:$0xff] %v2492_v58 }
 0x334   : > { %1124 = vrot.lane.b32.xlu1 %v10886_v22, %s5796_s9  ;;  %v2685_v11 = vld.sshfl [vmem:[#allocation1 + $0x20] sm:$0xff pattern:$0x73625140]  ;;  %2689 = vst [vmem:[#allocation1 + $0x3] ss:$4 sm:$0xff] %v2493_v26 }
 0x335   : > { %1296 = vrot.lane.b32.xlu2 %v10887_v28, %s5794_s7  ;;  %5631 = vmatmul.msk.f32.gmra.mxu1 %vm2831_vm11, %v2685_v11  ;;  %v10892_v28 = vld [vmem:[#allocation39_spill] sm:$0xff] }
 0x336   : > { %1122 = vrot.lane.b32.xlu0 %v10888_v38, %s5796_s9  ;;  %v1111_v4 = vpop.permute.xlu1 %1110  ;;  %v10893_v38 = vld [vmem:[#allocation118_spill] sm:$0xff] }
 0x337   : > { %v7921_v14 = vpop.permute.xlu2 %1458  ;;  %v2119_v45 = vsel %vm2093_vm6, %v2062_v61, %v1111_v4 }
 0x338   : > { %v1109_v30 = vpop.permute.xlu0 %1108 }
 0x33b   : > { %v2694_v49 = vld.sshfl [vmem:[#allocation1] sm:$0xff pattern:$0x73625140] }
 0x33c   : > { %1468 = vrot.lane.b32.xlu1 %v7924_v12, %s5795_s8 }
 0x33d   : > { %1470 = vrot.lane.b32.xlu2 %v7929_v50, %s5795_s8  ;;  %5632 = vmatmul.msk.f32.gmra.mxu1 %vm2831_vm11, %v2694_v49 }
 0x33e   : > { %1298 = vrot.lane.b32.xlu0 %v10891_v51, %s5794_s7  ;;  %v1285_v47 = vpop.permute.xlu1 %1284  ;;  %v2004_v51 = vsel %vm1979_vm3, %v1947_v33, %v10899_v23 }
 0x33f   : > { %v1633_v16 = vpop.permute.xlu2 %1632  ;;  %v2061_v7 = vsel %vm2036_vm5, %v2004_v51, %v935_v34  ;;  %v2176_v24 = vsel %vm2150_vm7, %v2119_v45, %v1285_v47 }
 0x340   : > { %v1283_v22 = vpop.permute.xlu0 %1282  ;;  %v2118_v35 = vsel %vm2093_vm6, %v2061_v7, %v1109_v30  ;;  %v10903_v7 = vld [vmem:[#allocation116_spill] sm:$0xff] }
 0x341   : > { %v2175_v41 = vsel %vm2150_vm7, %v2118_v35, %v1283_v22 }
 0x344   : > { %1644 = vrot.lane.b32.xlu1 %v10892_v28, %s5798_s11 }
 0x345   : > { %1816 = vrot.lane.b32.xlu2 %v10893_v38, %s5797_s10 }
 0x346   : > { %1642 = vrot.lane.b32.xlu0 %v10894_v44, %s5798_s11  ;;  %v1457_v32 = vpop.permute.xlu1 %1456 }
 0x347   : > { %v7942_v43 = vpop.permute.xlu2 %942  ;;  %v2233_v60 = vsel %vm2207_vm8, %v2176_v24, %v1457_v32  ;;  %v10900_v32 = vld [vmem:[#allocation76_spill] sm:$0xff] }
 0x348   : > { %v1455_v19 = vpop.permute.xlu0 %1454 }
 0x349   : > { %v2232_v26 = vsel %vm2207_vm8, %v2175_v41, %v1455_v19  ;;  %v10901_v19 = vld [vmem:[#allocation6_spill] sm:$0xff]  ;;  %v8022_v41 = vld [vmem:[%s5862_s27 + $0x158] sm:$0xff] }
 0x34c   : > { %952 = vrot.lane.b32.xlu1 %v7924_v12, %s5793_s30 }
 0x34d   : > { %954 = vrot.lane.b32.xlu2 %v7929_v50, %s5793_s30 }
 0x34e   : > { %1818 = vrot.lane.b32.xlu0 %v10895_v25, %s5797_s10  ;;  %v1631_v18 = vpop.permute.xlu1 %1630 }
 0x34f   : > { %v7950_v59 = vpop.permute.xlu2 %1288  ;;  %v2290_v58 = vsel %vm2264_vm9, %v2233_v60, %v1631_v18  ;;  %v1949_v18 = vsel %vm1922_vm4, %v7586_v39, %v10900_v32  ;;  %v10902_v39 = vld [vmem:[#allocation37_spill] sm:$0xff]  ;;  %v10904_v60 = vld [vmem:[#allocation38_spill] sm:$0xff] }
 0x350   : > { %v1629_v21 = vpop.permute.xlu0 %1628  ;;  %v2006_v1 = vsel %vm1979_vm3, %v1949_v18, %v10901_v19  ;;  %v10907_v18 = vld [vmem:[#allocation125_spill] sm:$0xff] }
 0x351   : > { %v2289_v30 = vsel %vm2264_vm9, %v2232_v26, %v1629_v21  ;;  %v2063_v21 = vsel %vm2036_vm5, %v2006_v1, %v7871_v46  ;;  %v5763_v1 = vld [vmem:[%s5862_s27 + $0x100] sm:$0xff] }
 0x352   : > { %v2120_v48 = vsel %vm2093_vm6, %v2063_v21, %v7888_v27 }
 0x353   : > { %v2177_v53 = vsel %vm2150_vm7, %v2120_v48, %v7910_v9  ;;  %v8008_v9 = vld [vmem:[%s5862_s27 + $0x150] sm:$0xff] }
 0x354   : > { %1128 = vrot.lane.b32.xlu1 %v10892_v28, %s5796_s9  ;;  %v2234_v33 = vsel %vm2207_vm8, %v2177_v53, %v7921_v14  ;;  %v10910_v53 = vld [vmem:[#allocation155_spill] sm:$0xff] }
 0x355   : > { %956 = vrot.lane.b32.xlu2 %v7972_v20, %s5793_s30  ;;  %v2291_v27 = vsel %vm2264_vm9, %v2234_v33, %v1633_v16 }
 0x356   : > { %1126 = vrot.lane.b32.xlu0 %v10894_v44, %s5796_s9  ;;  %v1805_v34 = vpop.permute.xlu1 %1804 }
 0x357   : > { %v2347_v11 = vsel %vm2321_vm10, %v2290_v58, %v1805_v34  ;;  %v7982_v4 = vpop.permute.xlu2 %1462 }
 0x358   : > { %v2497_v49 = vrot.slane %v2347_v11, 2  ;;  %v2498_v47 = vrot.slane %v2347_v11, 4  ;;  %2696 = vst [vmem:[#allocation1] ss:$4 sm:$0xff] %v2347_v11  ;;  %v1803_v28 = vpop.permute.xlu0 %1802 }
 0x359   : > { %v2346_v22 = vsel %vm2321_vm10, %v2289_v30, %v1803_v28  ;;  %v10905_v30 = vld [vmem:[#allocation96_spill] sm:$0xff] }
 0x35a   : > { %2697 = vst [vmem:[#allocation1 + $0x1] ss:$4 sm:$0xff] %v2497_v49  ;;  %v2494_v44 = vrot.slane %v2346_v22, 2  ;;  %v2495_v36 = vrot.slane %v2346_v22, 4  ;;  %v2496_v10 = vrot.slane %v2346_v22, 6  ;;  %v1950_v49 = vsel %vm1922_vm4, %v7591_v8, %v10905_v30 }
 0x35b   : > { %2698 = vst [vmem:[#allocation1 + $0x2] ss:$4 sm:$0xff] %v2498_v47  ;;  %v10906_v47 = vld [vmem:[#allocation147_spill] sm:$0xff] }
 0x35c   : > { %2690 = vst [vmem:[#allocation1 + $0x20] ss:$4 sm:$0xff] %v2346_v22  ;;  %1302 = vrot.lane.b32.xlu1 %v10895_v25, %s5794_s7  ;;  %v2007_v28 = vsel %vm1979_vm3, %v1950_v49, %v10906_v47 }
 0x35d   : > { %2691 = vst [vmem:[#allocation1 + $0x21] ss:$4 sm:$0xff] %v2494_v44  ;;  %1130 = vrot.lane.b32.xlu2 %v10902_v39, %s5796_s9  ;;  %v10908_v44 = vld [vmem:[#allocation35_spill] sm:$0xff] }
 0x35e   : > { %2692 = vst [vmem:[#allocation1 + $0x22] ss:$4 sm:$0xff] %v2495_v36  ;;  %1300 = vrot.lane.b32.xlu0 %v10893_v38, %s5794_s7  ;;  %v941_v46 = vpop.permute.xlu1 %940 }
 0x35f   : > { %2693 = vst [vmem:[#allocation1 + $0x23] ss:$4 sm:$0xff] %v2496_v10  ;;  %v1809_v25 = vpop.permute.xlu2 %1808  ;;  %v2064_v22 = vsel %vm2036_vm5, %v2007_v28, %v941_v46  ;;  %v10909_v10 = vld [vmem:[#allocation95_spill] sm:$0xff] }
 0x360   : > { %v1807_v61 = vpop.permute.xlu0 %1806  ;;  %v1951_v21 = vsel %vm1922_vm4, %v5763_v1, %v10909_v10  ;;  %v10913_v10 = vld [vmem:[#allocation4_spill] sm:$0xff] }
 0x361   : > { %v2348_v23 = vsel %vm2321_vm10, %v2291_v27, %v1807_v61  ;;  %v2008_v46 = vsel %vm1979_vm3, %v1951_v21, %v10910_v53  ;;  %v10914_v53 = vld [vmem:[#allocation40_spill] sm:$0xff] }
 0x362   : > { %2699 = vst [vmem:[#allocation1 + $0x3] ss:$4 sm:$0xff] %v2348_v23  ;;  %v2499_v51 = vrot.slane %v2348_v23, 2  ;;  %v2500_v45 = vrot.slane %v2348_v23, 4  ;;  %v2501_v38 = vrot.slane %v2348_v23, 6  ;;  %v2065_v27 = vsel %vm2036_vm5, %v2008_v46, %v7942_v43  ;;  %v10915_v46 = vld [vmem:[#allocation131_spill] sm:$0xff] }
 0x364   : > { %1474 = vrot.lane.b32.xlu1 %v8008_v9, %s5795_s8 }
 0x365   : > { %1304 = vrot.lane.b32.xlu2 %v10903_v7, %s5794_s7 }
 0x366   : > { %v2695_v14 = vld.sshfl [vmem:[#allocation1 + $0x20] sm:$0xff pattern:$0x73625140]  ;;  %1472 = vrot.lane.b32.xlu0 %v7972_v20, %s5795_s8  ;;  %v1117_v16 = vpop.permute.xlu1 %1116 }
 0x367   : > { %2700 = vst [vmem:[#allocation1 + $0x20] ss:$4 sm:$0xff] %v2499_v51  ;;  %5633 = vmatmul.msk.f32.gmra.mxu1 %vm2831_vm11, %v2695_v14  ;;  %v8017_v24 = vpop.permute.xlu2 %946  ;;  %v2122_v61 = vsel %vm2093_vm6, %v2065_v27, %v1117_v16 }
 0x368   : > { %2701 = vst [vmem:[#allocation1 + $0x21] ss:$4 sm:$0xff] %v2500_v45  ;;  %v1115_v35 = vpop.permute.xlu0 %1114 }
 0x369   : > { %2702 = vst [vmem:[#allocation1 + $0x22] ss:$4 sm:$0xff] %v2501_v38  ;;  %v2704_v58 = vld.sshfl [vmem:[#allocation1] sm:$0xff pattern:$0x73625140]  ;;  %v2121_v32 = vsel %vm2093_vm6, %v2064_v22, %v1115_v35 }
 0x36a   : > { %v2178_v8 = vsel %vm2150_vm7, %v2121_v32, %v7950_v59  ;;  %v10911_v38 = vld [vmem:[#allocation122_spill] sm:$0xff]  ;;  %v8086_v32 = vld [vmem:[%s5862_s27 + $0x168] sm:$0xff] }
 0x36b   : > { %v8080_v22 = vld [vmem:[%s5862_s27 + $0x160] sm:$0xff] }
 0x36c   : > { %1648 = vrot.lane.b32.xlu1 %v10904_v60, %s5798_s11 }
 0x36d   : > { %1476 = vrot.lane.b32.xlu2 %v8022_v41, %s5795_s8 }
 0x36e   : > { %1646 = vrot.lane.b32.xlu0 %v10902_v39, %s5798_s11  ;;  %v1461_v34 = vpop.permute.xlu1 %1460 }
 0x36f   : > { %5634 = vmatmul.msk.f32.gmra.mxu1 %vm2831_vm11, %v2704_v58  ;;  %v8029_v26 = vpop.permute.xlu2 %1292  ;;  %v2235_v48 = vsel %vm2207_vm8, %v2178_v8, %v1461_v34  ;;  %v10912_v8 = vld [vmem:[#allocation82_spill] sm:$0xff] }
 0x370   : > { %v1291_v11 = vpop.permute.xlu0 %1290 }
 0x371   : > { %v2179_v23 = vsel %vm2150_vm7, %v2122_v61, %v1291_v11 }
 0x374   : > { %1822 = vrot.lane.b32.xlu1 %v10907_v18, %s5797_s10 }
 0x375   : > { %1650 = vrot.lane.b32.xlu2 %v10908_v44, %s5798_s11 }
 0x376   : > { %1820 = vrot.lane.b32.xlu0 %v10903_v7, %s5797_s10  ;;  %v1637_v36 = vpop.permute.xlu1 %1636  ;;  %v2236_v7 = vsel %vm2207_vm8, %v2179_v23, %v7982_v4  ;;  %v10917_v23 = vld [vmem:[#allocation99_spill] sm:$0xff] }
 0x377   : > { %v8046_v19 = vpop.permute.xlu2 %1466  ;;  %v2293_v14 = vsel %vm2264_vm9, %v2236_v7, %v1637_v36  ;;  %v5766_v36 = vld [vmem:[%s5862_s27 + $0x108] sm:$0xff] }
 0x378   : > { %v1635_v39 = vpop.permute.xlu0 %1634  ;;  %v1952_v1 = vsel %vm1922_vm4, %v5766_v36, %v10912_v8 }
 0x379   : > { %v2292_v33 = vsel %vm2264_vm9, %v2235_v48, %v1635_v39  ;;  %v2009_v21 = vsel %vm1979_vm3, %v1952_v1, %v10913_v10 }
 0x37a   : > { %v2349_v59 = vsel %vm2321_vm10, %v2292_v33, %v1809_v25  ;;  %v10916_v33 = vld [vmem:[#allocation42_spill] sm:$0xff] }
 0x37b   : > { %v2502_v51 = vrot.slane %v2349_v59, 2  ;;  %v2503_v45 = vrot.slane %v2349_v59, 4  ;;  %2703 = vst [vmem:[#allocation1 + $0x23] ss:$4 sm:$0xff] %v2349_v59 }
 0x37c   : > { %958 = vrot.lane.b32.xlu1 %v8008_v9, %s5793_s30 }
 0x37d   : > { %960 = vrot.lane.b32.xlu2 %v8022_v41, %s5793_s30  ;;  %2706 = vst [vmem:[#allocation1] ss:$4 sm:$0xff] %v2502_v51  ;;  %v1953_v51 = vsel %vm1922_vm4, %v7776_v2, %v10917_v23  ;;  %v10921_v23 = vld [vmem:[#allocation157_spill] sm:$0xff] }
 0x37e   : > { %1824 = vrot.lane.b32.xlu0 %v10911_v38, %s5797_s10  ;;  %v945_v43 = vpop.permute.xlu1 %944  ;;  %2707 = vst [vmem:[#allocation1 + $0x1] ss:$4 sm:$0xff] %v2503_v45 }
 0x37f   : > { %v1813_v25 = vpop.permute.xlu2 %1812  ;;  %v2066_v48 = vsel %vm2036_vm5, %v2009_v21, %v945_v43  ;;  %v10918_v43 = vld [vmem:[#allocation149_spill] sm:$0xff] }
 0x380   : > { %v1811_v16 = vpop.permute.xlu0 %1810  ;;  %v2010_v7 = vsel %vm1979_vm3, %v1953_v51, %v10918_v43 }
 0x381   : > { %v2350_v35 = vsel %vm2321_vm10, %v2293_v14, %v1811_v16  ;;  %v2067_v16 = vsel %vm2036_vm5, %v2010_v7, %v8017_v24  ;;  %v10923_v7 = vld [vmem:[#allocation130_spill] sm:$0xff] }
 0x382   : > { %2708 = vst [vmem:[#allocation1 + $0x2] ss:$4 sm:$0xff] %v2350_v35  ;;  %v2705_v58 = vld.sshfl [vmem:[#allocation1 + $0x20] sm:$0xff pattern:$0x73625140]  ;;  %v2504_v34 = vrot.slane %v2350_v35, 2 }
 0x383   : > { %v2505_v11 = vrot.slane %v2350_v35, 4  ;;  %v2506_v30 = vrot.slane %v2350_v35, 6  ;;  %5635 = vmatmul.msk.f32.gmra.mxu1 %vm2831_vm11, %v2705_v58 }
 0x384   : > { %1134 = vrot.lane.b32.xlu1 %v10908_v44, %s5796_s9  ;;  %2709 = vst [vmem:[#allocation1 + $0x3] ss:$4 sm:$0xff] %v2504_v34 }
 0x385   : > { %1306 = vrot.lane.b32.xlu2 %v10907_v18, %s5794_s7  ;;  %2710 = vst [vmem:[#allocation1 + $0x20] ss:$4 sm:$0xff] %v2505_v11  ;;  %v10919_v11 = vld [vmem:[#allocation128_spill] sm:$0xff] }
 0x386   : > { %1132 = vrot.lane.b32.xlu0 %v10904_v60, %s5796_s9  ;;  %v1121_v4 = vpop.permute.xlu1 %1120  ;;  %2711 = vst [vmem:[#allocation1 + $0x21] ss:$4 sm:$0xff] %v2506_v30 }
 0x387   : > { %v8077_v49 = vpop.permute.xlu2 %950 }
 0x388   : > { %v1119_v47 = vpop.permute.xlu0 %1118 }
 0x389   : > { %v2123_v39 = vsel %vm2093_vm6, %v2066_v48, %v1119_v47  ;;  %v8143_v48 = vld [vmem:[%s5862_s27 + $0x170] sm:$0xff] }
 0x38a   : > { %v2180_v61 = vsel %vm2150_vm7, %v2123_v39, %v8029_v26  ;;  %v2124_v26 = vsel %vm2093_vm6, %v2067_v16, %v1121_v4  ;;  %v8149_v39 = vld [vmem:[%s5862_s27 + $0x178] sm:$0xff] }
 0x38b   : > { %v2714_v28 = vld.sshfl [vmem:[#allocation1] sm:$0xff pattern:$0x73625140] }
 0x38c   : > { %1478 = vrot.lane.b32.xlu1 %v8080_v22, %s5795_s8  ;;  %5636 = vmatmul.msk.f32.vlgmr.msra.gmra.mxu2 %vm2831_vm11, %v2714_v28 }
 0x38d   : > { %1480 = vrot.lane.b32.xlu2 %v8086_v32, %s5795_s8 }
 0x38e   : > { %1308 = vrot.lane.b32.xlu0 %v10911_v38, %s5794_s7  ;;  %v1465_v60 = vpop.permute.xlu1 %1464 }
 0x38f   : > { %v8092_v18 = vpop.permute.xlu2 %1296  ;;  %v2237_v45 = vsel %vm2207_vm8, %v2180_v61, %v1465_v60 }
 0x390   : > { %v1295_v44 = vpop.permute.xlu0 %1294 }
 0x391   : > { %v2181_v2 = vsel %vm2150_vm7, %v2124_v26, %v1295_v44 }
 0x394   : > { %1654 = vrot.lane.b32.xlu1 %v10914_v53, %s5798_s11 }
 0x395   : > { %1826 = vrot.lane.b32.xlu2 %v10915_v46, %s5797_s10 }
 0x396   : > { %1652 = vrot.lane.b32.xlu0 %v10916_v33, %s5798_s11  ;;  %v1641_v27 = vpop.permute.xlu1 %1640 }
 0x397   : > { %v8109_v59 = vpop.permute.xlu2 %1470 }
 0x398   : > { %v1639_v38 = vpop.permute.xlu0 %1638 }
 0x399   : > { %v2294_v14 = vsel %vm2264_vm9, %v2237_v45, %v1639_v38  ;;  %v10922_v38 = vld [vmem:[#allocation45_spill] sm:$0xff] }
 0x39a   : > { %v2351_v35 = vsel %vm2321_vm10, %v2294_v14, %v1813_v25  ;;  %v2238_v25 = vsel %vm2207_vm8, %v2181_v2, %v8046_v19  ;;  %v10924_v14 = vld [vmem:[#allocation47_spill] sm:$0xff] }
 0x39b   : > { %v2507_v58 = vrot.slane %v2351_v35, 2  ;;  %v2508_v34 = vrot.slane %v2351_v35, 4  ;;  %2712 = vst [vmem:[#allocation1 + $0x22] ss:$4 sm:$0xff] %v2351_v35  ;;  %v2295_v4 = vsel %vm2264_vm9, %v2238_v25, %v1641_v27  ;;  %v10920_v27 = vld [vmem:[#allocation98_spill] sm:$0xff]  ;;  %v10926_v2 = vld [vmem:[#allocation71_spill] sm:$0xff] }
 0x39c   : > { %962 = vrot.lane.b32.xlu1 %v8080_v22, %s5793_s30  ;;  %v1954_v61 = vsel %vm1922_vm4, %v7837_v13, %v10920_v27  ;;  %v10925_v13 = vld [vmem:[#allocation86_spill] sm:$0xff] }
 0x39d   : > { %2713 = vst [vmem:[#allocation1 + $0x23] ss:$4 sm:$0xff] %v2507_v58  ;;  %964 = vrot.lane.b32.xlu2 %v8086_v32, %s5793_s30  ;;  %v2011_v51 = vsel %vm1979_vm3, %v1954_v61, %v10921_v23  ;;  %v1955_v26 = vsel %vm1922_vm4, %v7798_v15, %v10925_v13  ;;  %v8201_v27 = vld [vmem:[%s5862_s27 + $0x180] sm:$0xff]  ;;  %v8218_v13 = vld [vmem:[%s5862_s27 + $0x188] sm:$0xff] }
 0x39e   : > { %2716 = vst [vmem:[#allocation1] ss:$4 sm:$0xff] %v2508_v34  ;;  %1828 = vrot.lane.b32.xlu0 %v10919_v11, %s5797_s10  ;;  %v949_v24 = vpop.permute.xlu1 %948 }
 0x39f   : > { %v1817_v30 = vpop.permute.xlu2 %1816  ;;  %v2068_v45 = vsel %vm2036_vm5, %v2011_v51, %v949_v24 }
 0x3a0   : > { %v1815_v47 = vpop.permute.xlu0 %1814 }
 0x3a1   : > { %v2352_v28 = vsel %vm2321_vm10, %v2295_v4, %v1815_v47 }
 0x3a2   : > { %v2509_v60 = vrot.slane %v2352_v28, 2  ;;  %v2510_v44 = vrot.slane %v2352_v28, 4  ;;  %2717 = vst [vmem:[#allocation1 + $0x1] ss:$4 sm:$0xff] %v2352_v28  ;;  %v2511_v36 = vrot.slane %v2352_v28, 6 }
 0x3a4   : > { %v2715_v8 = vld.sshfl [vmem:[#allocation1 + $0x20] sm:$0xff pattern:$0x73625140]  ;;  %2718 = vst [vmem:[#allocation1 + $0x2] ss:$4 sm:$0xff] %v2509_v60  ;;  %1138 = vrot.lane.b32.xlu1 %v10914_v53, %s5796_s9 }
 0x3a5   : > { %2719 = vst [vmem:[#allocation1 + $0x3] ss:$4 sm:$0xff] %v2510_v44  ;;  %5637 = vmatmul.msk.f32.gmra.mxu2 %vm2831_vm11, %v2715_v8  ;;  %1310 = vrot.lane.b32.xlu2 %v10915_v46, %s5794_s7 }
 0x3a6   : > { %2720 = vst [vmem:[#allocation1 + $0x20] ss:$4 sm:$0xff] %v2511_v36  ;;  %1136 = vrot.lane.b32.xlu0 %v10916_v33, %s5796_s9  ;;  %v1125_v19 = vpop.permute.xlu1 %1124 }
 0x3a7   : > { %v8140_v1 = vpop.permute.xlu2 %954 }
 0x3a8   : > { %v1123_v10 = vpop.permute.xlu0 %1122 }
 0x3a9   : > { %v2125_v43 = vsel %vm2093_vm6, %v2068_v45, %v1123_v10  ;;  %v10928_v45 = vld [vmem:[#allocation46_spill] sm:$0xff] }
 0x3aa   : > { %v2182_v58 = vsel %vm2150_vm7, %v2125_v43, %v8092_v18 }
 0x3ac   : > { %v2724_v21 = vld.sshfl [vmem:[#allocation1] sm:$0xff pattern:$0x73625140]  ;;  %1482 = vrot.lane.b32.xlu1 %v8143_v48, %s5795_s8 }
 0x3ad   : > { %5638 = vmatmul.msk.f32.gmra.mxu2 %vm2831_vm11, %v2724_v21  ;;  %1484 = vrot.lane.b32.xlu2 %v8149_v39, %s5795_s8 }
 0x3ae   : > { %1312 = vrot.lane.b32.xlu0 %v10919_v11, %s5794_s7  ;;  %v1469_v53 = vpop.permute.xlu1 %1468  ;;  %v2012_v11 = vsel %vm1979_vm3, %v1955_v26, %v10926_v2  ;;  %v10929_v26 = vld [vmem:[#allocation135_spill] sm:$0xff] }
 0x3af   : > { %v8155_v46 = vpop.permute.xlu2 %956  ;;  %v2239_v24 = vsel %vm2207_vm8, %v2182_v58, %v1469_v53  ;;  %v2069_v25 = vsel %vm2036_vm5, %v2012_v11, %v8077_v49  ;;  %v10927_v49 = vld [vmem:[#allocation126_spill] sm:$0xff]  ;;  %v10930_v2 = vld [vmem:[#allocation43_spill] sm:$0xff]  ;;  %v8231_v11 = vld [vmem:[%s5862_s27 + $0x190] sm:$0xff] }
 0x3b0   : > { %v1299_v33 = vpop.permute.xlu0 %1298  ;;  %v2126_v47 = vsel %vm2093_vm6, %v2069_v25, %v1125_v19 }
 0x3b1   : > { %v2183_v15 = vsel %vm2150_vm7, %v2126_v47, %v1299_v33 }
 0x3b4   : > { %1658 = vrot.lane.b32.xlu1 %v10922_v38, %s5798_s11 }
 0x3b5   : > { %1830 = vrot.lane.b32.xlu2 %v10923_v7, %s5797_s10 }
 0x3b6   : > { %1656 = vrot.lane.b32.xlu0 %v10924_v14, %s5798_s11  ;;  %v1645_v16 = vpop.permute.xlu1 %1644 }
 0x3b7   : > { %v8170_v35 = vpop.permute.xlu2 %1130 }
 0x3b8   : > { %v1643_v34 = vpop.permute.xlu0 %1642 }
 0x3b9   : > { %v2296_v4 = vsel %vm2264_vm9, %v2239_v24, %v1643_v34 }
 0x3ba   : > { %v2353_v28 = vsel %vm2321_vm10, %v2296_v4, %v1817_v30  ;;  %v2240_v30 = vsel %vm2207_vm8, %v2183_v15, %v8109_v59  ;;  %v10931_v4 = vld [vmem:[#allocation101_spill] sm:$0xff]  ;;  %v10932_v15 = vld [vmem:[#allocation159_spill] sm:$0xff] }
 0x3bb   : > { %v2512_v60 = vrot.slane %v2353_v28, 2  ;;  %2721 = vst [vmem:[#allocation1 + $0x21] ss:$4 sm:$0xff] %v2353_v28  ;;  %v2513_v18 = vrot.slane %v2353_v28, 4  ;;  %v2297_v8 = vsel %vm2264_vm9, %v2240_v30, %v1645_v16  ;;  %v1957_v47 = vsel %vm1922_vm4, %v7865_v17, %v10931_v4 }
 0x3bc   : > { %966 = vrot.lane.b32.xlu1 %v8143_v48, %s5793_s30 }
 0x3bd   : > { %968 = vrot.lane.b32.xlu2 %v8149_v39, %s5793_s30  ;;  %2722 = vst [vmem:[#allocation1 + $0x22] ss:$4 sm:$0xff] %v2512_v60  ;;  %v2014_v60 = vsel %vm1979_vm3, %v1957_v47, %v10932_v15 }
 0x3be   : > { %1832 = vrot.lane.b32.xlu0 %v10927_v49, %s5797_s10  ;;  %v953_v44 = vpop.permute.xlu1 %952  ;;  %2723 = vst [vmem:[#allocation1 + $0x23] ss:$4 sm:$0xff] %v2513_v18  ;;  %v10933_v18 = vld [vmem:[#allocation102_spill] sm:$0xff]  ;;  %v2071_v30 = vsel %vm2036_vm5, %v2014_v60, %v8140_v1  ;;  %v10938_v60 = vld [vmem:[#allocation3_spill] sm:$0xff] }
 0x3bf   : > { %v8194_v36 = vpop.permute.xlu2 %1304 }
 0x3c0   : > { %v1819_v19 = vpop.permute.xlu0 %1818 }
 0x3c1   : > { %v2354_v10 = vsel %vm2321_vm10, %v2297_v8, %v1819_v19  ;;  %v10934_v8 = vld [vmem:[#allocation151_spill] sm:$0xff] }
 0x3c2   : > { %2726 = vst [vmem:[#allocation1] ss:$4 sm:$0xff] %v2354_v10  ;;  %v2514_v21 = vrot.slane %v2354_v10, 2  ;;  %v2515_v53 = vrot.slane %v2354_v10, 4  ;;  %v2516_v33 = vrot.slane %v2354_v10, 6 }
 0x3c4   : > { %1142 = vrot.lane.b32.xlu1 %v10922_v38, %s5796_s9  ;;  %2727 = vst [vmem:[#allocation1 + $0x1] ss:$4 sm:$0xff] %v2514_v21 }
 0x3c5   : > { %970 = vrot.lane.b32.xlu2 %v8201_v27, %s5793_s30  ;;  %v2725_v59 = vld.sshfl [vmem:[#allocation1 + $0x20] sm:$0xff pattern:$0x73625140]  ;;  %2728 = vst [vmem:[#allocation1 + $0x2] ss:$4 sm:$0xff] %v2515_v53  ;;  %v10935_v53 = vld [vmem:[#allocation132_spill] sm:$0xff] }
 0x3c6   : > { %1140 = vrot.lane.b32.xlu0 %v10924_v14, %s5796_s9  ;;  %v1129_v61 = vpop.permute.xlu1 %1128  ;;  %2729 = vst [vmem:[#allocation1 + $0x3] ss:$4 sm:$0xff] %v2516_v33  ;;  %5639 = vmatmul.msk.f32.gmra.mxu2 %vm2831_vm11, %v2725_v59 }
 0x3c7   : > { %v8208_v23 = vpop.permute.xlu2 %1476  ;;  %v2128_v10 = vsel %vm2093_vm6, %v2071_v30, %v1129_v61 }
 0x3c8   : > { %v1127_v51 = vpop.permute.xlu0 %1126 }
 0x3cc   : > { %1316 = vrot.lane.b32.xlu1 %v10927_v49, %s5794_s7  ;;  %v1956_v49 = vsel %vm1922_vm4, %v7860_v57, %v10933_v18  ;;  %v10936_v57 = vld [vmem:[#allocation52_spill] sm:$0xff] }
 0x3cd   : > { %1144 = vrot.lane.b32.xlu2 %v10928_v45, %s5796_s9  ;;  %v2734_v38 = vld.sshfl [vmem:[#allocation1] sm:$0xff pattern:$0x73625140]  ;;  %v2013_v19 = vsel %vm1979_vm3, %v1956_v49, %v10934_v8  ;;  %v10939_v8 = vld [vmem:[#allocation139_spill] sm:$0xff] }
 0x3ce   : > { %1314 = vrot.lane.b32.xlu0 %v10923_v7, %s5794_s7  ;;  %v1303_v43 = vpop.permute.xlu1 %1302  ;;  %5640 = vmatmul.msk.f32.gmra.mxu2 %vm2831_vm11, %v2734_v38  ;;  %v2070_v21 = vsel %vm2036_vm5, %v2013_v19, %v953_v44 }
 0x3cf   : > { %v1651_v14 = vpop.permute.xlu2 %1650  ;;  %v2185_v17 = vsel %vm2150_vm7, %v2128_v10, %v1303_v43  ;;  %v2127_v33 = vsel %vm2093_vm6, %v2070_v21, %v1127_v51 }
 0x3d0   : > { %v1301_v16 = vpop.permute.xlu0 %1300 }
 0x3d1   : > { %v2184_v1 = vsel %vm2150_vm7, %v2127_v33, %v1301_v16 }
 0x3d4   : > { %1488 = vrot.lane.b32.xlu1 %v8218_v13, %s5795_s8 }
 0x3d5   : > { %1318 = vrot.lane.b32.xlu2 %v10929_v26, %s5794_s7 }
 0x3d6   : > { %1486 = vrot.lane.b32.xlu0 %v8201_v27, %s5795_s8  ;;  %v1475_v58 = vpop.permute.xlu1 %1474 }
 0x3d7   : > { %v8226_v34 = vpop.permute.xlu2 %960  ;;  %v2242_v59 = vsel %vm2207_vm8, %v2185_v17, %v1475_v58 }
 0x3d8   : > { %v1473_v7 = vpop.permute.xlu0 %1472 }
 0x3d9   : > { %v2241_v61 = vsel %vm2207_vm8, %v2184_v1, %v1473_v7 }
 0x3dc   : > { %1662 = vrot.lane.b32.xlu1 %v10930_v2, %s5798_s11 }
 0x3dd   : > { %1490 = vrot.lane.b32.xlu2 %v8231_v11, %s5795_s8 }
 0x3de   : > { %1660 = vrot.lane.b32.xlu0 %v10928_v45, %s5798_s11  ;;  %v1649_v24 = vpop.permute.xlu1 %1648 }
 0x3df   : > { %v8237_v25 = vpop.permute.xlu2 %1306  ;;  %v2299_v45 = vsel %vm2264_vm9, %v2242_v59, %v1649_v24  ;;  %v10937_v24 = vld [vmem:[#allocation90_spill] sm:$0xff] }
 0x3e0   : > { %v1647_v28 = vpop.permute.xlu0 %1646 }
 0x3e1   : > { %v2298_v51 = vsel %vm2264_vm9, %v2241_v61, %v1647_v28 }
 0x3e4   : > { %1836 = vrot.lane.b32.xlu1 %v10935_v53, %s5797_s10 }
 0x3e5   : > { %1664 = vrot.lane.b32.xlu2 %v10936_v57, %s5798_s11 }
 0x3e6   : > { %1834 = vrot.lane.b32.xlu0 %v10929_v26, %s5797_s10  ;;  %v1823_v44 = vpop.permute.xlu1 %1822  ;;  %v1958_v26 = vsel %vm1922_vm4, %v7924_v12, %v10937_v24  ;;  %v10943_v24 = vld [vmem:[#allocation137_spill] sm:$0xff] }
 0x3e7   : > { %v2356_v38 = vsel %vm2321_vm10, %v2299_v45, %v1823_v44  ;;  %v8266_v43 = vpop.permute.xlu2 %1480  ;;  %v2015_v7 = vsel %vm1979_vm3, %v1958_v26, %v10938_v60  ;;  %v8301_v45 = vld [vmem:[%s5862_s27 + $0x198] sm:$0xff]  ;;  %v10944_v26 = vld [vmem:[#allocation48_spill] sm:$0xff] }
 0x3e8   : > { %v2519_v58 = vrot.slane %v2356_v38, 2  ;;  %v2520_v4 = vrot.slane %v2356_v38, 4  ;;  %v2521_v47 = vrot.slane %v2356_v38, 6  ;;  %2733 = vst [vmem:[#allocation1 + $0x23] ss:$4 sm:$0xff] %v2356_v38  ;;  %v1821_v15 = vpop.permute.xlu0 %1820  ;;  %v2072_v28 = vsel %vm2036_vm5, %v2015_v7, %v8155_v46  ;;  %v10940_v38 = vld [vmem:[#allocation106_spill] sm:$0xff] }
 0x3e9   : > { %v2355_v16 = vsel %vm2321_vm10, %v2298_v51, %v1821_v15  ;;  %v2129_v30 = vsel %vm2093_vm6, %v2072_v28, %v8170_v35  ;;  %v1959_v51 = vsel %vm1922_vm4, %v7929_v50, %v10940_v38 }
 0x3ea   : > { %2736 = vst [vmem:[#allocation1] ss:$4 sm:$0xff] %v2519_v58  ;;  %v2517_v18 = vrot.slane %v2355_v16, 2  ;;  %v2518_v49 = vrot.slane %v2355_v16, 4  ;;  %v2186_v12 = vsel %vm2150_vm7, %v2129_v30, %v8194_v36  ;;  %v10941_v58 = vld [vmem:[#allocation153_spill] sm:$0xff] }
 0x3eb   : > { %2737 = vst [vmem:[#allocation1 + $0x1] ss:$4 sm:$0xff] %v2520_v4  ;;  %v2243_v46 = vsel %vm2207_vm8, %v2186_v12, %v8208_v23  ;;  %v2016_v4 = vsel %vm1979_vm3, %v1959_v51, %v10941_v58  ;;  %v10946_v12 = vld [vmem:[#allocation160_spill] sm:$0xff]  ;;  %v8355_v51 = vld [vmem:[%s5862_s27 + $0x1a8] sm:$0xff] }
 0x3ec   : > { %2738 = vst [vmem:[#allocation1 + $0x2] ss:$4 sm:$0xff] %v2521_v47  ;;  %972 = vrot.lane.b32.xlu1 %v8218_v13, %s5793_s30  ;;  %v2300_v21 = vsel %vm2264_vm9, %v2243_v46, %v1651_v14 }
 0x3ed   : > { %2730 = vst [vmem:[#allocation1 + $0x20] ss:$4 sm:$0xff] %v2355_v16  ;;  %974 = vrot.lane.b32.xlu2 %v8231_v11, %s5793_s30  ;;  %v10942_v16 = vld [vmem:[#allocation59_spill] sm:$0xff] }
 0x3ee   : > { %2731 = vst [vmem:[#allocation1 + $0x21] ss:$4 sm:$0xff] %v2517_v18  ;;  %1838 = vrot.lane.b32.xlu0 %v10939_v8, %s5797_s10  ;;  %v959_v19 = vpop.permute.xlu1 %958  ;;  %v10945_v18 = vld [vmem:[#allocation105_spill] sm:$0xff] }
 0x3ef   : > { %2732 = vst [vmem:[#allocation1 + $0x22] ss:$4 sm:$0xff] %v2518_v49  ;;  %v1827_v10 = vpop.permute.xlu2 %1826  ;;  %v2073_v47 = vsel %vm2036_vm5, %v2016_v4, %v959_v19  ;;  %v1960_v49 = vsel %vm1922_vm4, %v7972_v20, %v10945_v18  ;;  %v10950_v18 = vld [vmem:[#allocation94_spill] sm:$0xff] }
 0x3f0   : > { %v1825_v35 = vpop.permute.xlu0 %1824 }
 0x3f1   : > { %v2357_v17 = vsel %vm2321_vm10, %v2300_v21, %v1825_v35 }
 0x3f2   : > { %2739 = vst [vmem:[#allocation1 + $0x3] ss:$4 sm:$0xff] %v2357_v17  ;;  %v2522_v33 = vrot.slane %v2357_v17, 2  ;;  %v2523_v36 = vrot.slane %v2357_v17, 4 }
 0x3f4   : > { %1148 = vrot.lane.b32.xlu1 %v10936_v57, %s5796_s9  ;;  %v8306_v57 = vld [vmem:[%s5862_s27 + $0x1a0] sm:$0xff] }
 0x3f5   : > { %1320 = vrot.lane.b32.xlu2 %v10935_v53, %s5794_s7 }
 0x3f6   : > { %v2735_v59 = vld.sshfl [vmem:[#allocation1 + $0x20] sm:$0xff pattern:$0x73625140]  ;;  %1146 = vrot.lane.b32.xlu0 %v10930_v2, %s5796_s9  ;;  %v1135_v23 = vpop.permute.xlu1 %1134 }
 0x3f7   : > { %2740 = vst [vmem:[#allocation1 + $0x20] ss:$4 sm:$0xff] %v2522_v33  ;;  %5641 = vmatmul.msk.f32.gmra.mxu2 %vm2831_vm11, %v2735_v59  ;;  %v8298_v14 = vpop.permute.xlu2 %964 }
 0x3f8   : > { %2741 = vst [vmem:[#allocation1 + $0x21] ss:$4 sm:$0xff] %v2523_v36  ;;  %v1133_v1 = vpop.permute.xlu0 %1132 }
 0x3f9   : > { %v2744_v53 = vld.sshfl [vmem:[#allocation1] sm:$0xff pattern:$0x73625140]  ;;  %v2130_v15 = vsel %vm2093_vm6, %v2073_v47, %v1133_v1 }
 0x3fa   : > { %v2187_v50 = vsel %vm2150_vm7, %v2130_v15, %v8237_v25 }
 0x3fc   : > { %1492 = vrot.lane.b32.xlu1 %v8301_v45, %s5795_s8 }
 0x3fd   : > { %1494 = vrot.lane.b32.xlu2 %v8306_v57, %s5795_s8 }
 0x3fe   : > { %1322 = vrot.lane.b32.xlu0 %v10939_v8, %s5794_s7  ;;  %v1479_v2 = vpop.permute.xlu1 %1478  ;;  %v2017_v8 = vsel %vm1979_vm3, %v1960_v49, %v10946_v12  ;;  %v1961_v49 = vsel %vm1922_vm4, %v8008_v9, %v10950_v18 }
 0x3ff   : > { %5642 = vmatmul.msk.f32.gmra.mxu2 %vm2831_vm11, %v2744_v53  ;;  %v8313_v44 = vpop.permute.xlu2 %1310  ;;  %v2244_v28 = vsel %vm2207_vm8, %v2187_v50, %v1479_v2  ;;  %v2074_v46 = vsel %vm2036_vm5, %v2017_v8, %v8226_v34  ;;  %v10947_v34 = vld [vmem:[#allocation138_spill] sm:$0xff] }
 0x400   : > { %v1309_v61 = vpop.permute.xlu0 %1308  ;;  %v2131_v25 = vsel %vm2093_vm6, %v2074_v46, %v1135_v23 }
 0x401   : > { %v2188_v20 = vsel %vm2150_vm7, %v2131_v25, %v1309_v61  ;;  %v10953_v25 = vld [vmem:[#allocation110_spill] sm:$0xff] }
 0x402   : > { %v2245_v36 = vsel %vm2207_vm8, %v2188_v20, %v8266_v43  ;;  %v10948_v43 = vld [vmem:[#allocation56_spill] sm:$0xff]  ;;  %v10954_v20 = vld [vmem:[#allocation5_spill] sm:$0xff] }
 0x404   : > { %1668 = vrot.lane.b32.xlu1 %v10942_v16, %s5798_s11 }
 0x405   : > { %1840 = vrot.lane.b32.xlu2 %v10943_v24, %s5797_s10 }
 0x406   : > { %1666 = vrot.lane.b32.xlu0 %v10944_v26, %s5798_s11  ;;  %v1655_v60 = vpop.permute.xlu1 %1654 }
 0x407   : > { %v8330_v7 = vpop.permute.xlu2 %1484  ;;  %v2302_v23 = vsel %vm2264_vm9, %v2245_v36, %v1655_v60 }
 0x408   : > { %v1653_v30 = vpop.permute.xlu0 %1652 }
 0x409   : > { %v2301_v19 = vsel %vm2264_vm9, %v2244_v28, %v1653_v30  ;;  %v10951_v28 = vld [vmem:[#allocation10_spill] sm:$0xff] }
 0x40a   : > { %v2358_v21 = vsel %vm2321_vm10, %v2301_v19, %v1827_v10  ;;  %v2018_v30 = vsel %vm1979_vm3, %v1961_v49, %v10951_v28  ;;  %v8383_v19 = vld [vmem:[%s5862_s27 + $0x1b0] sm:$0xff] }
 0x40b   : > { %v2524_v35 = vrot.slane %v2358_v21, 2  ;;  %v2525_v17 = vrot.slane %v2358_v21, 4  ;;  %v2526_v33 = vrot.slane %v2358_v21, 6  ;;  %2742 = vst [vmem:[#allocation1 + $0x22] ss:$4 sm:$0xff] %v2358_v21 }
 0x40c   : > { %976 = vrot.lane.b32.xlu1 %v8301_v45, %s5793_s30 }
 0x40d   : > { %2743 = vst [vmem:[#allocation1 + $0x23] ss:$4 sm:$0xff] %v2524_v35  ;;  %1150 = vrot.lane.b32.xlu2 %v10944_v26, %s5796_s9  ;;  %v10949_v26 = vld [vmem:[#allocation136_spill] sm:$0xff]  ;;  %v1962_v35 = vsel %vm1922_vm4, %v8022_v41, %v10953_v25 }
 0x40e   : > { %2746 = vst [vmem:[#allocation1] ss:$4 sm:$0xff] %v2525_v17  ;;  %1842 = vrot.lane.b32.xlu0 %v10947_v34, %s5797_s10  ;;  %v963_v10 = vpop.permute.xlu1 %962 }
 0x40f   : > { %2747 = vst [vmem:[#allocation1 + $0x1] ss:$4 sm:$0xff] %v2526_v33  ;;  %v1831_v59 = vpop.permute.xlu2 %1830  ;;  %v2075_v12 = vsel %vm2036_vm5, %v2018_v30, %v963_v10  ;;  %v2019_v10 = vsel %vm1979_vm3, %v1962_v35, %v10954_v20  ;;  %v10958_v35 = vld [vmem:[#allocation65_spill] sm:$0xff]  ;;  %v10959_v20 = vld [vmem:[#allocation144_spill] sm:$0xff] }
 0x410   : > { %v1829_v1 = vpop.permute.xlu0 %1828 }
 0x411   : > { %v2359_v53 = vsel %vm2321_vm10, %v2302_v23, %v1829_v1 }
 0x412   : > { %v2527_v2 = vrot.slane %v2359_v53, 2  ;;  %v2528_v61 = vrot.slane %v2359_v53, 4  ;;  %2748 = vst [vmem:[#allocation1 + $0x2] ss:$4 sm:$0xff] %v2359_v53 }
 0x414   : > { %v2745_v38 = vld.sshfl [vmem:[#allocation1 + $0x20] sm:$0xff pattern:$0x73625140]  ;;  %2749 = vst [vmem:[#allocation1 + $0x3] ss:$4 sm:$0xff] %v2527_v2  ;;  %1496 = vrot.lane.b32.xlu1 %v8355_v51, %s5795_s8 }
 0x415   : > { %2750 = vst [vmem:[#allocation1 + $0x20] ss:$4 sm:$0xff] %v2528_v61  ;;  %5643 = vmatmul.msk.f32.gmra.mxu2 %vm2831_vm11, %v2745_v38  ;;  %1670 = vrot.lane.b32.xlu2 %v10948_v43, %s5798_s11 }
 0x416   : > { %1324 = vrot.lane.b32.xlu0 %v10943_v24, %s5794_s7  ;;  %v1139_v58 = vpop.permute.xlu1 %1138 }
 0x417   : > { %v8364_v4 = vpop.permute.xlu2 %968 }
 0x418   : > { %v1137_v47 = vpop.permute.xlu0 %1136 }
 0x419   : > { %v2132_v8 = vsel %vm2093_vm6, %v2075_v12, %v1137_v47 }
 0x41a   : > { %v2189_v9 = vsel %vm2150_vm7, %v2132_v8, %v8313_v44  ;;  %v10957_v8 = vld [vmem:[#allocation140_spill] sm:$0xff] }
 0x41b   : > { %v2754_v15 = vld.sshfl [vmem:[#allocation1] sm:$0xff pattern:$0x73625140] }
 0x41c   : > { %978 = vrot.lane.b32.xlu1 %v8306_v57, %s5793_s30 }
 0x41d   : > { %5644 = vmatmul.msk.f32.gmra.mxu2 %vm2831_vm11, %v2754_v15  ;;  %1152 = vrot.lane.b32.xlu2 %v10942_v16, %s5796_s9  ;;  %v10952_v16 = vld [vmem:[#allocation58_spill] sm:$0xff] }
 0x41e   : > { %1844 = vrot.lane.b32.xlu0 %v10949_v26, %s5797_s10  ;;  %v1483_v60 = vpop.permute.xlu1 %1482 }
 0x41f   : > { %v8373_v50 = vpop.permute.xlu2 %970  ;;  %v2246_v17 = vsel %vm2207_vm8, %v2189_v9, %v1483_v60 }
 0x420   : > { %v1313_v24 = vpop.permute.xlu0 %1312 }
 0x424   : > { %1498 = vrot.lane.b32.xlu1 %v8383_v19, %s5795_s8 }
 0x425   : > { %1672 = vrot.lane.b32.xlu2 %v10952_v16, %s5798_s11 }
 0x426   : > { %1326 = vrot.lane.b32.xlu0 %v10947_v34, %s5794_s7  ;;  %v1659_v46 = vpop.permute.xlu1 %1658  ;;  %v2076_v34 = vsel %vm2036_vm5, %v2019_v10, %v8298_v14  ;;  %v10955_v14 = vld [vmem:[#allocation141_spill] sm:$0xff] }
 0x427   : > { %v8393_v21 = vpop.permute.xlu2 %1144  ;;  %v2133_v44 = vsel %vm2093_vm6, %v2076_v34, %v1139_v58  ;;  %v10960_v34 = vld [vmem:[#allocation97_spill] sm:$0xff] }
 0x428   : > { %v1657_v33 = vpop.permute.xlu0 %1656  ;;  %v2190_v41 = vsel %vm2150_vm7, %v2133_v44, %v1313_v24 }
 0x429   : > { %v2303_v36 = vsel %vm2264_vm9, %v2246_v17, %v1657_v33  ;;  %v2247_v61 = vsel %vm2207_vm8, %v2190_v41, %v8330_v7  ;;  %v10956_v7 = vld [vmem:[#allocation53_spill] sm:$0xff] }
 0x42a   : > { %v2360_v23 = vsel %vm2321_vm10, %v2303_v36, %v1831_v59  ;;  %v2304_v58 = vsel %vm2264_vm9, %v2247_v61, %v1659_v46  ;;  %v10962_v41 = vld [vmem:[#allocation109_spill] sm:$0xff]  ;;  %v10963_v61 = vld [vmem:[#allocation162_spill] sm:$0xff] }
 0x42b   : > { %v2529_v1 = vrot.slane %v2360_v23, 2  ;;  %v2530_v53 = vrot.slane %v2360_v23, 4  ;;  %2751 = vst [vmem:[#allocation1 + $0x21] ss:$4 sm:$0xff] %v2360_v23  ;;  %v2531_v2 = vrot.slane %v2360_v23, 6  ;;  %v1964_v23 = vsel %vm1922_vm4, %v8086_v32, %v10960_v34 }
 0x42c   : > { %980 = vrot.lane.b32.xlu1 %v8355_v51, %s5793_s30 }
 0x42d   : > { %2752 = vst [vmem:[#allocation1 + $0x22] ss:$4 sm:$0xff] %v2529_v1  ;;  %1154 = vrot.lane.b32.xlu2 %v10948_v43, %s5796_s9  ;;  %v8420_v43 = vld [vmem:[%s5862_s27 + $0x1b8] sm:$0xff]  ;;  %v10961_v1 = vld [vmem:[#allocation80_spill] sm:$0xff] }
 0x42e   : > { %2753 = vst [vmem:[#allocation1 + $0x23] ss:$4 sm:$0xff] %v2530_v53  ;;  %1846 = vrot.lane.b32.xlu0 %v10955_v14, %s5797_s10  ;;  %v967_v59 = vpop.permute.xlu1 %966  ;;  %v2021_v53 = vsel %vm1979_vm3, %v1964_v23, %v10961_v1 }
 0x42f   : > { %2756 = vst [vmem:[#allocation1] ss:$4 sm:$0xff] %v2531_v2  ;;  %v8415_v38 = vpop.permute.xlu2 %1318  ;;  %v1963_v2 = vsel %vm1922_vm4, %v8080_v22, %v10962_v41 }
 0x430   : > { %v1833_v47 = vpop.permute.xlu0 %1832 }
 0x431   : > { %v2361_v15 = vsel %vm2321_vm10, %v2304_v58, %v1833_v47  ;;  %v2020_v58 = vsel %vm1979_vm3, %v1963_v2, %v10963_v61  ;;  %v8504_v2 = vld [vmem:[%s5862_s27 + $0x1c8] sm:$0xff] }
 0x432   : > { %v2532_v60 = vrot.slane %v2361_v15, 2  ;;  %v2533_v24 = vrot.slane %v2361_v15, 4  ;;  %2757 = vst [vmem:[#allocation1 + $0x1] ss:$4 sm:$0xff] %v2361_v15  ;;  %v2077_v15 = vsel %vm2036_vm5, %v2020_v58, %v967_v59 }
 0x434   : > { %2758 = vst [vmem:[#allocation1 + $0x2] ss:$4 sm:$0xff] %v2532_v60  ;;  %1500 = vrot.lane.b32.xlu1 %v8420_v43, %s5795_s8 }
 0x435   : > { %v2755_v18 = vld.sshfl [vmem:[#allocation1 + $0x20] sm:$0xff pattern:$0x73625140]  ;;  %2759 = vst [vmem:[#allocation1 + $0x3] ss:$4 sm:$0xff] %v2533_v24  ;;  %1674 = vrot.lane.b32.xlu2 %v10956_v7, %s5798_s11 }
 0x436   : > { %5645 = vmatmul.msk.f32.gmra.mxu2 %vm2831_vm11, %v2755_v18  ;;  %1328 = vrot.lane.b32.xlu0 %v10949_v26, %s5794_s7  ;;  %v1143_v49 = vpop.permute.xlu1 %1142  ;;  %v8439_v26 = vld [vmem:[%s5862_s27 + $0x1c0] sm:$0xff] }
 0x437   : > { %v8429_v28 = vpop.permute.xlu2 %1490 }
 0x438   : > { %v1141_v30 = vpop.permute.xlu0 %1140 }
 0x439   : > { %v2134_v60 = vsel %vm2093_vm6, %v2077_v15, %v1141_v30  ;;  %v10967_v15 = vld [vmem:[#allocation143_spill] sm:$0xff] }
 0x43c   : > { %v2764_v12 = vld.sshfl [vmem:[#allocation1] sm:$0xff pattern:$0x73625140]  ;;  %982 = vrot.lane.b32.xlu1 %v8383_v19, %s5793_s30 }
 0x43d   : > { %1156 = vrot.lane.b32.xlu2 %v10952_v16, %s5796_s9 }
 0x43e   : > { %5646 = vmatmul.msk.f32.gmra.mxu2 %vm2831_vm11, %v2764_v12  ;;  %1848 = vrot.lane.b32.xlu0 %v10957_v8, %s5797_s10  ;;  %v1317_v46 = vpop.permute.xlu1 %1316 }
 0x43f   : > { %v1665_v9 = vpop.permute.xlu2 %1664 }
 0x440   : > { %v1315_v25 = vpop.permute.xlu0 %1314 }
 0x441   : > { %v2191_v22 = vsel %vm2150_vm7, %v2134_v60, %v1315_v25  ;;  %v10968_v60 = vld [vmem:[#allocation70_spill] sm:$0xff] }
 0x444   : > { %1502 = vrot.lane.b32.xlu1 %v8439_v26, %s5795_s8 }
 0x445   : > { %1676 = vrot.lane.b32.xlu2 %v10958_v35, %s5798_s11 }
 0x446   : > { %1330 = vrot.lane.b32.xlu0 %v10955_v14, %s5794_s7  ;;  %v1489_v16 = vpop.permute.xlu1 %1488  ;;  %v2078_v14 = vsel %vm2036_vm5, %v2021_v53, %v8364_v4 }
 0x447   : > { %v8447_v17 = vpop.permute.xlu2 %974  ;;  %v2135_v47 = vsel %vm2093_vm6, %v2078_v14, %v1143_v49 }
 0x448   : > { %v1487_v33 = vpop.permute.xlu0 %1486  ;;  %v2192_v32 = vsel %vm2150_vm7, %v2135_v47, %v1317_v46 }
 0x449   : > { %v2249_v24 = vsel %vm2207_vm8, %v2192_v32, %v1489_v16  ;;  %v2248_v18 = vsel %vm2207_vm8, %v2191_v22, %v1487_v33  ;;  %v10965_v33 = vld [vmem:[#allocation156_spill] sm:$0xff] }
 0x44a   : > { %v8517_v22 = vld [vmem:[%s5862_s27 + $0x1d0] sm:$0xff] }
 0x44c   : > { %984 = vrot.lane.b32.xlu1 %v8420_v43, %s5793_s30 }
 0x44d   : > { %1158 = vrot.lane.b32.xlu2 %v10956_v7, %s5796_s9 }
 0x44e   : > { %1850 = vrot.lane.b32.xlu0 %v10959_v20, %s5797_s10  ;;  %v1663_v10 = vpop.permute.xlu1 %1662 }
 0x44f   : > { %v8455_v36 = vpop.permute.xlu2 %1320  ;;  %v2306_v4 = vsel %vm2264_vm9, %v2249_v24, %v1663_v10 }
 0x450   : > { %v1661_v44 = vpop.permute.xlu0 %1660 }
 0x451   : > { %v2305_v30 = vsel %vm2264_vm9, %v2248_v18, %v1661_v44  ;;  %v10969_v18 = vld [vmem:[#allocation60_spill] sm:$0xff] }
 0x454   : > { %1332 = vrot.lane.b32.xlu1 %v10957_v8, %s5794_s7 }
 0x455   : > { %1160 = vrot.lane.b32.xlu2 %v10958_v35, %s5796_s9  ;;  %v10964_v35 = vld [vmem:[#allocation114_spill] sm:$0xff] }
 0x456   : > { %986 = vrot.lane.b32.xlu0 %v8439_v26, %s5793_s30  ;;  %v1837_v59 = vpop.permute.xlu1 %1836  ;;  %v1965_v16 = vsel %vm1922_vm4, %v8143_v48, %v10964_v35  ;;  %v10966_v48 = vld [vmem:[#allocation61_spill] sm:$0xff] }
 0x457   : > { %v2363_v7 = vsel %vm2321_vm10, %v2306_v4, %v1837_v59  ;;  %v8484_v49 = vpop.permute.xlu2 %1494  ;;  %v2022_v23 = vsel %vm1979_vm3, %v1965_v16, %v10965_v33  ;;  %v10972_v33 = vld [vmem:[#allocation68_spill] sm:$0xff] }
 0x458   : > { %2766 = vst [vmem:[#allocation1] ss:$4 sm:$0xff] %v2363_v7  ;;  %v1835_v12 = vpop.permute.xlu0 %1834  ;;  %v2537_v8 = vrot.slane %v2363_v7, 2  ;;  %v2538_v46 = vrot.slane %v2363_v7, 4  ;;  %v2079_v44 = vsel %vm2036_vm5, %v2022_v23, %v8373_v50 }
 0x459   : > { %v2362_v25 = vsel %vm2321_vm10, %v2305_v30, %v1835_v12  ;;  %v2136_v53 = vsel %vm2093_vm6, %v2079_v44, %v8393_v21  ;;  %v10973_v44 = vld [vmem:[#allocation100_spill] sm:$0xff] }
 0x45a   : > { %v2534_v10 = vrot.slane %v2362_v25, 2  ;;  %v2535_v34 = vrot.slane %v2362_v25, 4  ;;  %2760 = vst [vmem:[#allocation1 + $0x20] ss:$4 sm:$0xff] %v2362_v25  ;;  %v2536_v1 = vrot.slane %v2362_v25, 6  ;;  %v2193_v41 = vsel %vm2150_vm7, %v2136_v53, %v8415_v38  ;;  %v10971_v25 = vld [vmem:[#allocation163_spill] sm:$0xff] }
 0x45b   : > { %2767 = vst [vmem:[#allocation1 + $0x1] ss:$4 sm:$0xff] %v2537_v8  ;;  %v10970_v8 = vld [vmem:[#allocation113_spill] sm:$0xff]  ;;  %v1967_v53 = vsel %vm1922_vm4, %v8201_v27, %v10973_v44 }
 0x45c   : > { %2768 = vst [vmem:[#allocation1 + $0x2] ss:$4 sm:$0xff] %v2538_v46  ;;  %1334 = vrot.lane.b32.xlu1 %v10959_v20, %s5794_s7  ;;  %v2250_v20 = vsel %vm2207_vm8, %v2193_v41, %v8429_v28  ;;  %v1966_v46 = vsel %vm1922_vm4, %v8149_v39, %v10970_v8 }
 0x45d   : > { %2761 = vst [vmem:[#allocation1 + $0x21] ss:$4 sm:$0xff] %v2534_v10  ;;  %1678 = vrot.lane.b32.xlu2 %v10966_v48, %s5798_s11  ;;  %v2307_v14 = vsel %vm2264_vm9, %v2250_v20, %v1665_v9  ;;  %v2023_v35 = vsel %vm1979_vm3, %v1966_v46, %v10971_v25 }
 0x45e   : > { %2762 = vst [vmem:[#allocation1 + $0x22] ss:$4 sm:$0xff] %v2535_v34  ;;  %1504 = vrot.lane.b32.xlu0 %v8504_v2, %s5795_s8  ;;  %v973_v50 = vpop.permute.xlu1 %972  ;;  %v8541_v34 = vld [vmem:[%s5862_s27 + $0x1d8] sm:$0xff] }
 0x45f   : > { %2763 = vst [vmem:[#allocation1 + $0x23] ss:$4 sm:$0xff] %v2536_v1  ;;  %v1841_v21 = vpop.permute.xlu2 %1840  ;;  %v2080_v16 = vsel %vm2036_vm5, %v2023_v35, %v973_v50  ;;  %v10974_v50 = vld [vmem:[#allocation75_spill] sm:$0xff] }
 0x460   : > { %v1839_v61 = vpop.permute.xlu0 %1838  ;;  %v2024_v20 = vsel %vm1979_vm3, %v1967_v53, %v10974_v50 }
 0x461   : > { %v2364_v58 = vsel %vm2321_vm10, %v2307_v14, %v1839_v61  ;;  %v2081_v61 = vsel %vm2036_vm5, %v2024_v20, %v8447_v17  ;;  %v10975_v17 = vld [vmem:[#allocation142_spill] sm:$0xff] }
 0x462   : > { %2769 = vst [vmem:[#allocation1 + $0x3] ss:$4 sm:$0xff] %v2364_v58  ;;  %v2539_v38 = vrot.slane %v2364_v58, 2  ;;  %v2540_v47 = vrot.slane %v2364_v58, 4  ;;  %v2541_v32 = vrot.slane %v2364_v58, 6 }
 0x464   : > { %1852 = vrot.lane.b32.xlu1 %v10967_v15, %s5797_s10 }
 0x465   : > { %1680 = vrot.lane.b32.xlu2 %v10968_v60, %s5798_s11 }
 0x466   : > { %v2765_v24 = vld.sshfl [vmem:[#allocation1 + $0x20] sm:$0xff pattern:$0x73625140]  ;;  %1506 = vrot.lane.b32.xlu0 %v8517_v22, %s5795_s8  ;;  %v1149_v28 = vpop.permute.xlu1 %1148 }
 0x467   : > { %2770 = vst [vmem:[#allocation1 + $0x20] ss:$4 sm:$0xff] %v2539_v38  ;;  %5647 = vmatmul.msk.f32.gmra.mxu2 %vm2831_vm11, %v2765_v24  ;;  %v8522_v9 = vpop.permute.xlu2 %1150  ;;  %v2138_v58 = vsel %vm2093_vm6, %v2081_v61, %v1149_v28 }
 0x468   : > { %2771 = vst [vmem:[#allocation1 + $0x21] ss:$4 sm:$0xff] %v2540_v47  ;;  %v1147_v4 = vpop.permute.xlu0 %1146 }
 0x469   : > { %2772 = vst [vmem:[#allocation1 + $0x22] ss:$4 sm:$0xff] %v2541_v32  ;;  %v2774_v59 = vld.sshfl [vmem:[#allocation1] sm:$0xff pattern:$0x73625140]  ;;  %v2137_v10 = vsel %vm2093_vm6, %v2080_v16, %v1147_v4 }
 0x46a   : > { %v2194_v39 = vsel %vm2150_vm7, %v2137_v10, %v8455_v36  ;;  %v316_v32 = vld [vmem:[%s5862_s27 + $0x1e0] sm:$0xff] }
 0x46c   : > { %988 = vrot.lane.b32.xlu1 %v8504_v2, %s5793_s30 }
 0x46d   : > { %1162 = vrot.lane.b32.xlu2 %v10966_v48, %s5796_s9 }
 0x46e   : > { %1854 = vrot.lane.b32.xlu0 %v10969_v18, %s5797_s10  ;;  %v1493_v7 = vpop.permute.xlu1 %1492 }
 0x46f   : > { %5648 = vmatmul.msk.f32.gmra.mxu2 %vm2831_vm11, %v2774_v59  ;;  %v8531_v30 = vpop.permute.xlu2 %1670  ;;  %v2251_v48 = vsel %vm2207_vm8, %v2194_v39, %v1493_v7  ;;  %v1057_v59 = vrot.slane %v316_v32, 1  ;;  %v8578_v7 = vld [vmem:[%s5862_s27 + $0x1e8] sm:$0xff] }
 0x470   : > { %v1323_v12 = vpop.permute.xlu0 %1322 }
 0x471   : > { %v2195_v27 = vsel %vm2150_vm7, %v2138_v58, %v1323_v12 }
 0x474   : > { %1508 = vrot.lane.b32.xlu1 %v8541_v34, %s5795_s8 }
 0x475   : > { %1682 = vrot.lane.b32.xlu2 %v10972_v33, %s5798_s11 }
 0x476   : > { %1336 = vrot.lane.b32.xlu0 %v10967_v15, %s5794_s7  ;;  %v1669_v23 = vpop.permute.xlu1 %1668  ;;  %v2252_v15 = vsel %vm2207_vm8, %v2195_v27, %v8484_v49  ;;  %v10976_v49 = vld [vmem:[#allocation119_spill] sm:$0xff] }
 0x477   : > { %v8551_v1 = vpop.permute.xlu2 %1152  ;;  %v2309_v28 = vsel %vm2264_vm9, %v2252_v15, %v1669_v23  ;;  %v1968_v16 = vsel %vm1922_vm4, %v8218_v13, %v10976_v49  ;;  %v10977_v23 = vld [vmem:[#allocation158_spill] sm:$0xff]  ;;  %v1231_v13 = vrot.slane %v316_v32, 2 }
 0x478   : > { %v1667_v41 = vpop.permute.xlu0 %1666  ;;  %v2025_v39 = vsel %vm1979_vm3, %v1968_v16, %v10977_v23  ;;  %v318_v16 = vld [vmem:[%s5862_s27 + $0x1f0] sm:$0xff] }
 0x479   : > { %v2308_v14 = vsel %vm2264_vm9, %v2251_v48, %v1667_v41  ;;  %v8598_v48 = vrot.slane %v8578_v7, 2  ;;  %v1577_v23 = vrot.slane %v318_v16, 1 }
 0x47a   : > { %v2365_v36 = vsel %vm2321_vm10, %v2308_v14, %v1841_v21 }
 0x47b   : > { %v2542_v38 = vrot.slane %v2365_v36, 2  ;;  %v2543_v47 = vrot.slane %v2365_v36, 4  ;;  %2773 = vst [vmem:[#allocation1 + $0x23] ss:$4 sm:$0xff] %v2365_v36  ;;  %v1233_v36 = vsel %vm629_vm1, %v1231_v13, %v8598_v48 }
 0x47c   : > { %990 = vrot.lane.b32.xlu1 %v8517_v22, %s5793_s30 }
 0x47d   : > { %2776 = vst [vmem:[#allocation1] ss:$4 sm:$0xff] %v2542_v38  ;;  %1164 = vrot.lane.b32.xlu2 %v10968_v60, %s5796_s9  ;;  %v8582_v60 = vrot.slane %v8578_v7, 1 }
 0x47e   : > { %2777 = vst [vmem:[#allocation1 + $0x1] ss:$4 sm:$0xff] %v2543_v47  ;;  %1856 = vrot.lane.b32.xlu0 %v10975_v17, %s5797_s10  ;;  %v977_v21 = vpop.permute.xlu1 %976 }
 0x47f   : > { %v8574_v24 = vpop.permute.xlu2 %1672  ;;  %v1059_v10 = vsel %vm376_vm0, %v1057_v59, %v8582_v60  ;;  %v2082_v44 = vsel %vm2036_vm5, %v2025_v39, %v977_v21 }
 0x480   : > { %v1843_v4 = vpop.permute.xlu0 %1842  ;;  %v2139_v20 = vsel %vm2093_vm6, %v2082_v44, %v8522_v9  ;;  %v319_v44 = vld [vmem:[%s5862_s27 + $0x1f8] sm:$0xff]  ;;  %s5802_s27 = smov 40  }
 0x481   : > { %v2366_v12 = vsel %vm2321_vm10, %v2309_v28, %v1843_v4  ;;  %v10978_v28 = vld [vmem:[#allocation117_spill] sm:$0xff] }
 0x482   : > { %v2775_v8 = vld.sshfl [vmem:[#allocation1 + $0x20] sm:$0xff pattern:$0x73625140]  ;;  %v2544_v46 = vrot.slane %v2366_v12, 2  ;;  %v2545_v25 = vrot.slane %v2366_v12, 4  ;;  %v2546_v35 = vrot.slane %v2366_v12, 6  ;;  %v1969_v4 = vsel %vm1922_vm4, %v8231_v11, %v10978_v28 }
 0x483   : > { %2778 = vst [vmem:[#allocation1 + $0x2] ss:$4 sm:$0xff] %v2366_v12  ;;  %5649 = vmatmul.msk.f32.gmra.mxu2 %vm2831_vm11, %v2775_v8 }
 0x484   : > { %2779 = vst [vmem:[#allocation1 + $0x3] ss:$4 sm:$0xff] %v2544_v46  ;;  %1510 = vrot.lane.b32.xlu1 %v316_v32, %s5795_s8 }
 0x485   : > { %2780 = vst [vmem:[#allocation1 + $0x20] ss:$4 sm:$0xff] %v2545_v25  ;;  %1684 = vrot.lane.b32.xlu2 %v1059_v10, %s5798_s11 }
 0x486   : > { %2781 = vst [vmem:[#allocation1 + $0x21] ss:$4 sm:$0xff] %v2546_v35  ;;  %1338 = vrot.lane.b32.xlu0 %v10969_v18, %s5794_s7  ;;  %v1497_v53 = vpop.permute.xlu1 %1496 }
 0x487   : > { %v8600_v41 = vpop.permute.xlu2 %1154 }
 0x488   : > { %v1325_v50 = vpop.permute.xlu0 %1324 }
 0x489   : > { %v2196_v14 = vsel %vm2150_vm7, %v2139_v20, %v1325_v50  ;;  %v1578_v50 = vrot.slane %v319_v44, 1 }
 0x48a   : > { %v2253_v18 = vsel %vm2207_vm8, %v2196_v14, %v1497_v53 }
 0x48b   : > { %v2784_v61 = vld.sshfl [vmem:[#allocation1] sm:$0xff pattern:$0x73625140]  ;;  %v2310_v38 = vsel %vm2264_vm9, %v2253_v18, %v8531_v30 }
 0x48c   : > { %5650 = vmatmul.msk.f32.vlgmr.msra.gmra.mxu3 %vm2831_vm11, %v2784_v61  ;;  %992 = vrot.lane.b32.xlu1 %v8541_v34, %s5793_s30  ;;  %v10980_v61 = vld [vmem:[#allocation104_spill] sm:$0xff] }
 0x48d   : > { %1166 = vrot.lane.b32.xlu2 %v10972_v33, %s5796_s9  ;;  %v10979_v33 = vld [vmem:[#allocation165_spill] sm:$0xff]  ;;  %v1970_v18 = vsel %vm1922_vm4, %v8301_v45, %v10980_v61 }
 0x48e   : > { %1858 = vrot.lane.b32.xlu0 %v1233_v36, %s5797_s10  ;;  %v979_v58 = vpop.permute.xlu1 %978  ;;  %v2026_v59 = vsel %vm1979_vm3, %v1969_v4, %v10979_v33 }
 0x48f   : > { %v8614_v9 = vpop.permute.xlu2 %1674  ;;  %v2083_v30 = vsel %vm2036_vm5, %v2026_v59, %v979_v58 }
 0x490   : > { %v1845_v47 = vpop.permute.xlu0 %1844  ;;  %v2140_v46 = vsel %vm2093_vm6, %v2083_v30, %v8551_v1 }
 0x491   : > { %v2367_v27 = vsel %vm2321_vm10, %v2310_v38, %v1845_v47 }
 0x492   : > { %v2547_v21 = vrot.slane %v2367_v27, 2  ;;  %v2548_v15 = vrot.slane %v2367_v27, 4  ;;  %2782 = vst [vmem:[#allocation1 + $0x22] ss:$4 sm:$0xff] %v2367_v27  ;;  %v1751_v27 = vrot.slane %v318_v16, 2 }
 0x494   : > { %2783 = vst [vmem:[#allocation1 + $0x23] ss:$4 sm:$0xff] %v2547_v21  ;;  %1512 = vrot.lane.b32.xlu1 %v8578_v7, %s5795_s8  ;;  %v1752_v21 = vrot.slane %v319_v44, 2 }
 0x495   : > { %2786 = vst [vmem:[#allocation1] ss:$4 sm:$0xff] %v2548_v15  ;;  %1686 = vrot.lane.b32.xlu2 %v8582_v60, %s5798_s11 }
 0x496   : > { %1340 = vrot.lane.b32.xlu0 %v10975_v17, %s5794_s7  ;;  %v1499_v12 = vpop.permute.xlu1 %1498  ;;  %v1753_v4 = vsel %vm629_vm1, %v1751_v27, %v1752_v21 }
 0x497   : > { %v8631_v11 = vpop.permute.xlu2 %1156 }
 0x498   : > { %v1327_v8 = vpop.permute.xlu0 %1326 }
 0x499   : > { %v2197_v25 = vsel %vm2150_vm7, %v2140_v46, %v1327_v8 }
 0x49a   : > { %v2254_v49 = vsel %vm2207_vm8, %v2197_v25, %v1499_v12 }
 0x49b   : > { %v2785_v35 = vld.sshfl [vmem:[#allocation1 + $0x20] sm:$0xff pattern:$0x73625140]  ;;  %v2311_v1 = vsel %vm2264_vm9, %v2254_v49, %v8574_v24  ;;  %v10981_v24 = vld [vmem:[#allocation164_spill] sm:$0xff] }
 0x49c   : > { %5651 = vmatmul.msk.f32.gmra.mxu3 %vm2831_vm11, %v2785_v35  ;;  %994 = vrot.lane.b32.xlu1 %v316_v32, %s5793_s30  ;;  %v2027_v58 = vsel %vm1979_vm3, %v1970_v18, %v10981_v24 }
 0x49d   : > { %1168 = vrot.lane.b32.xlu2 %v1059_v10, %s5796_s9  ;;  %v1579_v10 = vsel %vm376_vm0, %v1577_v23, %v1578_v50 }
 0x49e   : > { %1860 = vrot.lane.b32.xlu0 %v8598_v48, %s5797_s10  ;;  %v981_v17 = vpop.permute.xlu1 %980 }
 0x49f   : > { %v1677_v13 = vpop.permute.xlu2 %1676  ;;  %v2084_v38 = vsel %vm2036_vm5, %v2027_v58, %v981_v17  ;;  %v10984_v58 = vld [vmem:[#allocation123_spill] sm:$0xff] }
 0x4a0   : > { %v1847_v39 = vpop.permute.xlu0 %1846  ;;  %v2141_v45 = vsel %vm2093_vm6, %v2084_v38, %v8600_v41  ;;  %v1972_v38 = vsel %vm1922_vm4, %v8355_v51, %v10984_v58 }
 0x4a1   : > { %v2368_v53 = vsel %vm2321_vm10, %v2311_v1, %v1847_v39 }
 0x4a2   : > { %v2549_v32 = vrot.slane %v2368_v53, 2  ;;  %v2550_v20 = vrot.slane %v2368_v53, 4  ;;  %v2551_v14 = vrot.slane %v2368_v53, 6  ;;  %2787 = vst [vmem:[#allocation1 + $0x1] ss:$4 sm:$0xff] %v2368_v53 }
 0x4a4   : > { %2788 = vst [vmem:[#allocation1 + $0x2] ss:$4 sm:$0xff] %v2549_v32  ;;  %1514 = vrot.lane.b32.xlu1 %v318_v16, %s5795_s8 }
 0x4a5   : > { %2789 = vst [vmem:[#allocation1 + $0x3] ss:$4 sm:$0xff] %v2550_v20  ;;  %1688 = vrot.lane.b32.xlu2 %v1579_v10, %s5798_s11 }
 0x4a6   : > { %2790 = vst [vmem:[#allocation1 + $0x20] ss:$4 sm:$0xff] %v2551_v14  ;;  %1342 = vrot.lane.b32.xlu0 %v1233_v36, %s5794_s7  ;;  %v1501_v47 = vpop.permute.xlu1 %1500 }
 0x4a7   : > { %v1159_v33 = vpop.permute.xlu2 %1158 }
 0x4a8   : > { %v1329_v15 = vpop.permute.xlu0 %1328 }
 0x4a9   : > { %v2198_v28 = vsel %vm2150_vm7, %v2141_v45, %v1329_v15 }
 0x4aa   : > { %v2255_v30 = vsel %vm2207_vm8, %v2198_v28, %v1501_v47  ;;  %v10985_v47 = vld [vmem:[#allocation166_spill] sm:$0xff] }
 0x4ab   : > { %v2312_v41 = vsel %vm2264_vm9, %v2255_v30, %v8614_v9 }
 0x4ac   : > { %v2794_v59 = vld.sshfl [vmem:[#allocation1] sm:$0xff pattern:$0x73625140]  ;;  %996 = vrot.lane.b32.xlu1 %v8578_v7, %s5793_s30  ;;  %v10982_v7 = vld [vmem:[#allocation124_spill] sm:$0xff]  ;;  %s5805_s30 = smov 70  }
 0x4ad   : > { %5652 = vmatmul.msk.f32.gmra.mxu3 %vm2831_vm11, %v2794_v59  ;;  %1170 = vrot.lane.b32.xlu2 %v8582_v60, %s5796_s9  ;;  %v1971_v35 = vsel %vm1922_vm4, %v8306_v57, %v10982_v7  ;;  %v10983_v60 = vld [vmem:[#allocation78_spill] sm:$0xff] }
 0x4ae   : > { %1862 = vrot.lane.b32.xlu0 %v1753_v4, %s5797_s10  ;;  %v983_v36 = vpop.permute.xlu1 %982  ;;  %v2028_v49 = vsel %vm1979_vm3, %v1971_v35, %v10983_v60 }
 0x4af   : > { %v1161_v17 = vpop.permute.xlu2 %1160  ;;  %v2085_v9 = vsel %vm2036_vm5, %v2028_v49, %v983_v36  ;;  %v10986_v36 = vld [vmem:[#allocation108_spill] sm:$0xff] }
 0x4b0   : > { %v1849_v12 = vpop.permute.xlu0 %1848  ;;  %v2142_v57 = vsel %vm2093_vm6, %v2085_v9, %v8631_v11  ;;  %v1973_v51 = vsel %vm1922_vm4, %v8383_v19, %v10986_v36  ;;  %v10990_v36 = vld [vmem:[#allocation127_spill] sm:$0xff] }
 0x4b1   : > { %v2369_v8 = vsel %vm2321_vm10, %v2312_v41, %v1849_v12 }
 0x4b2   : > { %v2552_v46 = vrot.slane %v2369_v8, 2  ;;  %v2553_v25 = vrot.slane %v2369_v8, 4  ;;  %2791 = vst [vmem:[#allocation1 + $0x21] ss:$4 sm:$0xff] %v2369_v8  ;;  %v10987_v8 = vld [vmem:[#allocation9_spill] sm:$0xff] }
 0x4b4   : > { %2792 = vst [vmem:[#allocation1 + $0x22] ss:$4 sm:$0xff] %v2552_v46  ;;  %1516 = vrot.lane.b32.xlu1 %v319_v44, %s5795_s8  ;;  %v2030_v46 = vsel %vm1979_vm3, %v1973_v51, %v10987_v8  ;;  %v10991_v51 = vld [vmem:[#allocation81_spill] sm:$0xff] }
 0x4b5   : > { %2793 = vst [vmem:[#allocation1 + $0x23] ss:$4 sm:$0xff] %v2553_v25  ;;  %1690 = vrot.lane.b32.xlu2 %v1578_v50, %s5798_s11 }
 0x4b6   : > { %1344 = vrot.lane.b32.xlu0 %v8598_v48, %s5794_s7  ;;  %v1503_v16 = vpop.permute.xlu1 %1502  ;;  %s5806_s7 = smov 80  }
 0x4b7   : > { %v1679_v50 = vpop.permute.xlu2 %1678 }
 0x4b8   : > { %v1331_v23 = vpop.permute.xlu0 %1330 }
 0x4b9   : > { %v2199_v1 = vsel %vm2150_vm7, %v2142_v57, %v1331_v23  ;;  %v8710_v23 = vpop.f32.mrf.mxu0 }
 0x4ba   : > { %v2256_v44 = vsel %vm2207_vm8, %v2199_v1, %v1503_v16 }
 0x4bb   : > { %v2313_v32 = vsel %vm2264_vm9, %v2256_v44, %v1677_v13  ;;  %v2029_v13 = vsel %vm1979_vm3, %v1972_v38, %v10985_v47 }
 0x4bc   : > { %v2795_v39 = vld.sshfl [vmem:[#allocation1 + $0x20] sm:$0xff pattern:$0x73625140] }
 0x4bd   : > { %5653 = vmatmul.msk.f32.gmra.mxu3 %vm2831_vm11, %v2795_v39 }
 0x4be   : > { %1864 = vrot.lane.b32.xlu0 %v1752_v21, %s5797_s10  ;;  %v985_v53 = vpop.permute.xlu1 %984  ;;  %s254_s10 = scalar_lea.vmem %s10454_s6, %s5610_s23 }
 0x4bf   : > { %v1681_v24 = vpop.permute.xlu2 %1680  ;;  %v2086_v27 = vsel %vm2036_vm5, %v2029_v13, %v985_v53 }
 0x4c0   : > { %v1851_v20 = vpop.permute.xlu0 %1850  ;;  %v2143_v28 = vsel %vm2093_vm6, %v2086_v27, %v1159_v33 }
 0x4c1   : > { %v2370_v48 = vsel %vm2321_vm10, %v2313_v32, %v1851_v20  ;;  %v10988_v20 = vld [vmem:[#allocation129_spill] sm:$0xff] }
 0x4c2   : > { %2796 = vst [vmem:[#allocation1] ss:$4 sm:$0xff] %v2370_v48  ;;  %v2554_v14 = vrot.slane %v2370_v48, 2  ;;  %v2555_v10 = vrot.slane %v2370_v48, 4  ;;  %v2556_v11 = vrot.slane %v2370_v48, 6  ;;  %v10989_v48 = vld [vmem:[#allocation161_spill] sm:$0xff] }
 0x4c4   : > { %2797 = vst [vmem:[#allocation1 + $0x1] ss:$4 sm:$0xff] %v2554_v14 }
 0x4c5   : > { %2798 = vst [vmem:[#allocation1 + $0x2] ss:$4 sm:$0xff] %v2555_v10  ;;  %v8719_v10 = vpop.f32.mrf.mxu0 }
 0x4c6   : > { %v1333_v61 = vpop.permute.xlu1 %1332  ;;  %2799 = vst [vmem:[#allocation1 + $0x3] ss:$4 sm:$0xff] %v2556_v11 }
 0x4c7   : > { %v2200_v4 = vsel %vm2150_vm7, %v2143_v28, %v1333_v61  ;;  %v1163_v30 = vpop.permute.xlu2 %1162 }
 0x4c8   : > { %v987_v18 = vpop.permute.xlu0 %986 }
 0x4c9   : > { %v2087_v7 = vsel %vm2036_vm5, %v2030_v46, %v987_v18 }
 0x4ca   : > { %v2144_v49 = vsel %vm2093_vm6, %v2087_v7, %v1161_v17  ;;  %v1974_v17 = vsel %vm1922_vm4, %v8420_v43, %v10988_v20 }
 0x4cb   : > { %v2031_v14 = vsel %vm1979_vm3, %v1974_v17, %v10989_v48  ;;  %v8751_v17 = vpop.f32.mrf.mxu2 }
 0x4cd   : > { %v2804_v21 = vld.sshfl [vmem:[#allocation1] sm:$0xff pattern:$0x73625140]  ;;  %v8726_v27 = vpop.f32.mrf.mxu0 }
 0x4ce   : > { %v1335_v15 = vpop.permute.xlu1 %1334  ;;  %5654 = vmatmul.msk.f32.gmra.mxu3 %vm2831_vm11, %v2804_v21 }
 0x4cf   : > { %v2201_v19 = vsel %vm2150_vm7, %v2144_v49, %v1335_v15  ;;  %v1683_v16 = vpop.permute.xlu2 %1682 }
 0x4d0   : > { %v1505_v45 = vpop.permute.xlu0 %1504 }
 0x4d1   : > { %v2257_v59 = vsel %vm2207_vm8, %v2200_v4, %v1505_v45 }
 0x4d2   : > { %v2314_v41 = vsel %vm2264_vm9, %v2257_v59, %v1679_v50 }
 0x4d5   : > { %v8736_v46 = vpop.f32.mrf.mxu0 }
 0x4d6   : > { %v1853_v12 = vpop.permute.xlu1 %1852 }
 0x4d7   : > { %v2371_v25 = vsel %vm2321_vm10, %v2314_v41, %v1853_v12  ;;  %v1165_v18 = vpop.permute.xlu2 %1164 }
 0x4d8   : > { %v2557_v33 = vrot.slane %v2371_v25, 2  ;;  %v2558_v35 = vrot.slane %v2371_v25, 4  ;;  %2800 = vst [vmem:[#allocation1 + $0x20] ss:$4 sm:$0xff] %v2371_v25  ;;  %v1507_v60 = vpop.permute.xlu0 %1506 }
 0x4d9   : > { %v2258_v9 = vsel %vm2207_vm8, %v2201_v19, %v1507_v60 }
 0x4da   : > { %2801 = vst [vmem:[#allocation1 + $0x21] ss:$4 sm:$0xff] %v2557_v33  ;;  %v2315_v1 = vsel %vm2264_vm9, %v2258_v9, %v1681_v24 }
 0x4db   : > { %2802 = vst [vmem:[#allocation1 + $0x22] ss:$4 sm:$0xff] %v2558_v35 }
 0x4de   : > { %v989_v57 = vpop.permute.xlu1 %988 }
 0x4df   : > { %v2088_v11 = vsel %vm2036_vm5, %v2031_v14, %v989_v57  ;;  %v1685_v28 = vpop.permute.xlu2 %1684  ;;  %v8744_v57 = vpop.f32.mrf.mxu0 }
 0x4e0   : > { %v1855_v39 = vpop.permute.xlu0 %1854  ;;  %v2145_v38 = vsel %vm2093_vm6, %v2088_v11, %v1163_v30  ;;  %v1975_v30 = vsel %vm1922_vm4, %v8439_v26, %v10990_v36 }
 0x4e1   : > { %v2372_v44 = vsel %vm2321_vm10, %v2315_v1, %v1855_v39  ;;  %v2032_v41 = vsel %vm1979_vm3, %v1975_v30, %v10991_v51  ;;  %v10995_v51 = vld [vmem:[#allocation8_spill] sm:$0xff] }
 0x4e2   : > { %v2559_v53 = vrot.slane %v2372_v44, 2  ;;  %v2560_v50 = vrot.slane %v2372_v44, 4  ;;  %v2561_v32 = vrot.slane %v2372_v44, 6  ;;  %2803 = vst [vmem:[#allocation1 + $0x23] ss:$4 sm:$0xff] %v2372_v44 }
 0x4e4   : > { %2806 = vst [vmem:[#allocation1] ss:$4 sm:$0xff] %v2559_v53  ;;  %v10992_v53 = vld [vmem:[#allocation112_spill] sm:$0xff] }
 0x4e5   : > { %2807 = vst [vmem:[#allocation1 + $0x1] ss:$4 sm:$0xff] %v2560_v50  ;;  %v1976_v50 = vsel %vm1922_vm4, %v8504_v2, %v10992_v53 }
 0x4e6   : > { %2808 = vst [vmem:[#allocation1 + $0x2] ss:$4 sm:$0xff] %v2561_v32  ;;  %v1509_v61 = vpop.permute.xlu1 %1508  ;;  %v10993_v32 = vld [vmem:[#allocation85_spill] sm:$0xff] }
 0x4e7   : > { %v1167_v60 = vpop.permute.xlu2 %1166  ;;  %v2033_v20 = vsel %vm1979_vm3, %v1976_v50, %v10993_v32 }
 0x4e8   : > { %v1337_v24 = vpop.permute.xlu0 %1336 }
 0x4e9   : > { %v2805_v58 = vld.sshfl [vmem:[#allocation1 + $0x20] sm:$0xff pattern:$0x73625140]  ;;  %v2202_v47 = vsel %vm2150_vm7, %v2145_v38, %v1337_v24  ;;  %v8755_v24 = vpop.f32.mrf.mxu0  ;;  %v8759_v38 = vpop.f32.mrf.mxu2 }
 0x4ea   : > { %5655 = vmatmul.msk.f32.gmra.mxu3 %vm2831_vm11, %v2805_v58  ;;  %v2259_v43 = vsel %vm2207_vm8, %v2202_v47, %v1509_v61 }
 0x4eb   : > { %v2316_v21 = vsel %vm2264_vm9, %v2259_v43, %v1683_v16 }
 0x4ee   : > { %v991_v13 = vpop.permute.xlu1 %990 }
 0x4ef   : > { %v2089_v12 = vsel %vm2036_vm5, %v2032_v41, %v991_v13  ;;  %v1687_v48 = vpop.permute.xlu2 %1686 }
 0x4f0   : > { %v1857_v15 = vpop.permute.xlu0 %1856  ;;  %v2146_v33 = vsel %vm2093_vm6, %v2089_v12, %v1165_v18 }
 0x4f1   : > { %v2373_v45 = vsel %vm2321_vm10, %v2316_v21, %v1857_v15  ;;  %v8767_v30 = vpop.f32.mrf.mxu0 }
 0x4f2   : > { %v2562_v4 = vrot.slane %v2373_v45, 2  ;;  %v2563_v59 = vrot.slane %v2373_v45, 4  ;;  %2809 = vst [vmem:[#allocation1 + $0x3] ss:$4 sm:$0xff] %v2373_v45 }
 0x4f4   : > { %2810 = vst [vmem:[#allocation1 + $0x20] ss:$4 sm:$0xff] %v2562_v4 }
 0x4f5   : > { %2811 = vst [vmem:[#allocation1 + $0x21] ss:$4 sm:$0xff] %v2563_v59  ;;  %v10994_v59 = vld [vmem:[#allocation134_spill] sm:$0xff] }
 0x4f6   : > { %v1511_v8 = vpop.permute.xlu1 %1510  ;;  %v1977_v36 = vsel %vm1922_vm4, %v8517_v22, %v10994_v59  ;;  %v3308_v59 = vrot.slane %v7640_v56, 4 }
 0x4f7   : > { %v1169_v13 = vpop.permute.xlu2 %1168  ;;  %v2034_v41 = vsel %vm1979_vm3, %v1977_v36, %v10995_v51  ;;  %v3309_v36 = vrot.slane %v7640_v56, 6 }
 0x4f8   : > { %v1339_v25 = vpop.permute.xlu0 %1338 }
 0x4f9   : > { %v2814_v7 = vld.sshfl [vmem:[#allocation1] sm:$0xff pattern:$0x73625140]  ;;  %v2203_v35 = vsel %vm2150_vm7, %v2146_v33, %v1339_v25  ;;  %v8772_v25 = vpop.f32.mrf.mxu2  ;;  %v8776_v22 = vpop.f32.mrf.mxu0 }
 0x4fa   : > { %5656 = vmatmul.msk.f32.gmra.mxu3 %vm2831_vm11, %v2814_v7  ;;  %v2260_v26 = vsel %vm2207_vm8, %v2203_v35, %v1511_v8 }
 0x4fb   : > { %v2317_v19 = vsel %vm2264_vm9, %v2260_v26, %v1685_v28 }
 0x4fe   : > { %v993_v49 = vpop.permute.xlu1 %992 }
 0x4ff   : > { %v2090_v14 = vsel %vm2036_vm5, %v2033_v20, %v993_v49  ;;  %v1689_v35 = vpop.permute.xlu2 %1688 }
 0x500   : > { %v1859_v9 = vpop.permute.xlu0 %1858  ;;  %v2147_v18 = vsel %vm2093_vm6, %v2090_v14, %v1167_v60 }
 0x501   : > { %v2374_v16 = vsel %vm2321_vm10, %v2317_v19, %v1859_v9  ;;  %v8780_v19 = vpop.f32.mrf.mxu2 }
 0x502   : > { %v2564_v1 = vrot.slane %v2374_v16, 2  ;;  %v2565_v39 = vrot.slane %v2374_v16, 4  ;;  %v2566_v44 = vrot.slane %v2374_v16, 6  ;;  %2812 = vst [vmem:[#allocation1 + $0x22] ss:$4 sm:$0xff] %v2374_v16 }
 0x504   : > { %2813 = vst [vmem:[#allocation1 + $0x23] ss:$4 sm:$0xff] %v2564_v1 }
 0x505   : > { %2816 = vst [vmem:[#allocation1] ss:$4 sm:$0xff] %v2565_v39 }
 0x506   : > { %2817 = vst [vmem:[#allocation1 + $0x1] ss:$4 sm:$0xff] %v2566_v44  ;;  %v1513_v11 = vpop.permute.xlu1 %1512  ;;  %v2970_v44 = vadd.f32 %v8710_v23, %v7412_v0 }
 0x507   : > { %v1171_v20 = vpop.permute.xlu2 %1170 }
 0x508   : > { %v1341_v61 = vpop.permute.xlu0 %1340  ;;  %vm3104_vm0 = vcmp.gt.f32.partialorder %v2970_v44, 0.0 }
 0x509   : > { %v2204_v58 = vsel %vm2150_vm7, %v2147_v18, %v1341_v61  ;;  %v3154_v18 = vmul.f32 %v7421_v62, %v2970_v44 }
 0x50a   : > { %v2261_v47 = vsel %vm2207_vm8, %v2204_v58, %v1513_v11  ;;  %v10997_v11 = vld [vmem:[#allocation7_spill] sm:$0xff]  ;;  %v8792_v58 = vpop.f32.mrf.mxu0 }
 0x50b   : > { %v2815_v2 = vld.sshfl [vmem:[#allocation1 + $0x20] sm:$0xff pattern:$0x73625140]  ;;  %v2318_v21 = vsel %vm2264_vm9, %v2261_v47, %v1687_v48  ;;  %v10996_v48 = vld [vmem:[#allocation133_spill] sm:$0xff] }
 0x50c   : > { %5657 = vmatmul.msk.f32.gmra.mxu3 %vm2831_vm11, %v2815_v2  ;;  %v1978_v14 = vsel %vm1922_vm4, %v8541_v34, %v10996_v48  ;;  %v8794_v2 = vpop.f32.mrf.mxu1 }
 0x50d   : > { %v2035_v61 = vsel %vm1979_vm3, %v1978_v14, %v10997_v11  ;;  %v3629_v11 = vsel %vm3589_vm14, %v7648_v40, -inf }
 0x50e   : > { %v995_v43 = vpop.permute.xlu1 %994 }
 0x50f   : > { %v2091_v12 = vsel %vm2036_vm5, %v2034_v41, %v995_v43  ;;  %v2973_v43 = vadd.f32 %v8719_v10, %v7412_v0 }
 0x510   : > { %v1861_v15 = vpop.permute.xlu0 %1860  ;;  %v2148_v33 = vsel %vm2093_vm6, %v2091_v12, %v1169_v13  ;;  %v3203_v13 = vsel %vm3104_vm0, %v2970_v44, %v3154_v18  ;;  %v2979_v12 = vadd.f32 %v8736_v46, %v7412_v0  ;;  %v2985_v18 = vadd.f32 %v8755_v24, %v7412_v0 }
 0x511   : > { %v2375_v45 = vsel %vm2321_vm10, %v2318_v21, %v1861_v15  ;;  %v2976_v21 = vadd.f32 %v8726_v27, %v7412_v0  ;;  %v8802_v15 = vpop.f32.mrf.mxu2  ;;  %v3313_v41 = vrot.slane %v3203_v13, 2  ;;  %v3155_v10 = vmul.f32 %v7421_v62, %v2973_v43 }
 0x512   : > { %v2567_v28 = vrot.slane %v2375_v45, 2  ;;  %v2568_v4 = vrot.slane %v2375_v45, 4  ;;  %2818 = vst [vmem:[#allocation1 + $0x2] ss:$4 sm:$0xff] %v2375_v45  ;;  %v10998_v27 = vmax.f32 %v7496_v54, %v7505_v37  ;;  %vm3105_vm1 = vcmp.gt.f32.partialorder %v2973_v43, 0.0 }
 0x513   : > { %v3314_v46 = vrot.slane %v3203_v13, 4  ;;  %vm3106_vm3 = vcmp.gt.f32.partialorder %v2976_v21, 0.0  ;;  %v2982_v54 = vadd.f32 %v8744_v57, %v7412_v0  ;;  %v11000_v37 = vmax.f32 %v7577_v29, %v7580_v42 }
 0x514   : > { %2819 = vst [vmem:[#allocation1 + $0x3] ss:$4 sm:$0xff] %v2567_v28  ;;  %v3157_v57 = vmul.f32 %v7421_v62, %v2979_v12  ;;  %vm3107_vm4 = vcmp.gt.f32.partialorder %v2979_v12, 0.0  ;;  %v2991_v24 = vadd.f32 %v8776_v22, %v7412_v0  ;;  %vm4142_vm0 = vcmask 80896  }
 0x515   : > { %2820 = vst [vmem:[#allocation1 + $0x20] ss:$4 sm:$0xff] %v2568_v4  ;;  %v3307_v4 = vrot.slane %v7640_v56, 2  ;;  %v8817_v56 = vpop.f32.mrf.mxu0  ;;  %v3158_v14 = vmul.f32 %v7421_v62, %v2982_v54 }
 0x516   : > { %v1515_v8 = vpop.permute.xlu1 %1514 }
 0x518   : > { %v1343_v7 = vpop.permute.xlu0 %1342 }
 0x519   : > { %v2205_v60 = vsel %vm2150_vm7, %v2148_v33, %v1343_v7  ;;  %v1691_v7 = vpop.permute.xlu2 %1690  ;;  %v3156_v33 = vmul.f32 %v7421_v62, %v2976_v21  ;;  %v8839_v42 = vpop.f32.mrf.mxu2 }
 0x51a   : > { %v2262_v49 = vsel %vm2207_vm8, %v2205_v60, %v1515_v8  ;;  %v10999_v60 = vmax.f32 %v7562_v6, %v7566_v52 }
 0x51b   : > { %v2824_v26 = vld.sshfl [vmem:[#allocation1] sm:$0xff pattern:$0x73625140]  ;;  %v2319_v9 = vsel %vm2264_vm9, %v2262_v49, %v1689_v35  ;;  %v8819_v35 = vpop.f32.mrf.mxu1  ;;  %v3623_v49 = vsel %vm3589_vm14, %v3308_v59, -inf  ;;  %v3205_v29 = vsel %vm3106_vm3, %v2976_v21, %v3156_v33 }
 0x51c   : > { %5658 = vmatmul.msk.f32.gmra.mxu3 %vm2831_vm11, %v2824_v26  ;;  %v3315_v26 = vrot.slane %v3203_v13, 6  ;;  %v3319_v40 = vrot.slane %v3205_v29, 2  ;;  %v3320_v59 = vrot.slane %v3205_v29, 4 }
 0x51e   : > { %v997_v16 = vpop.permute.xlu1 %996  ;;  %v3630_v48 = vsel %vm3589_vm14, %v3315_v26, -inf }
 0x51f   : > { %v2092_v23 = vsel %vm2036_vm5, %v2035_v61, %v997_v16  ;;  %v8832_v16 = vsel %vm3589_vm14, %v3307_v4, -inf  ;;  %vm3108_vm5 = vcmp.gt.f32.partialorder %v2982_v54, 0.0 }
 0x520   : > { %v1863_v1 = vpop.permute.xlu0 %1862  ;;  %v2149_v34 = vsel %vm2093_vm6, %v2092_v23, %v1171_v20  ;;  %v3627_v20 = vsel %vm3589_vm14, %v3314_v46, -inf  ;;  %vm3109_vm6 = vcmp.gt.f32.partialorder %v2985_v18, 0.0 }
 0x521   : > { %v2376_v39 = vsel %vm2321_vm10, %v2319_v9, %v1863_v1  ;;  %v3626_v9 = vsel %vm3589_vm14, %v3309_v36, -inf  ;;  %v3624_v1 = vsel %vm3589_vm14, %v3313_v41, -inf  ;;  %v3207_v36 = vsel %vm3108_vm5, %v2982_v54, %v3158_v14 }
 0x522   : > { %v2569_v53 = vrot.slane %v2376_v39, 2  ;;  %v2570_v50 = vrot.slane %v2376_v39, 4  ;;  %2821 = vst [vmem:[#allocation1 + $0x21] ss:$4 sm:$0xff] %v2376_v39  ;;  %v2571_v32 = vrot.slane %v2376_v39, 6  ;;  %v3204_v39 = vsel %vm3105_vm1, %v2973_v43, %v3155_v10 }
 0x523   : > { %v3317_v61 = vrot.slane %v3204_v39, 4  ;;  %v3625_v23 = vmax.f32 %v3623_v49, %v3624_v1  ;;  %v3321_v43 = vrot.slane %v3205_v29, 6  ;;  %v3628_v21 = vmax.f32 %v3626_v9, %v3627_v20 }
 0x524   : > { %2822 = vst [vmem:[#allocation1 + $0x22] ss:$4 sm:$0xff] %v2569_v53  ;;  %v3325_v26 = vrot.slane %v3207_v36, 2  ;;  %v2988_v54 = vadd.f32 %v8767_v30, %v7412_v0  ;;  %v3650_v49 = vsel %vm3589_vm14, %v3320_v59, -inf  ;;  %v3647_v9 = vsel %vm3589_vm14, %v3319_v40, -inf  ;;  %v11005_v59 = vld [vmem:[#allocation11_spill] sm:$0xff] }
 0x525   : > { %2823 = vst [vmem:[#allocation1 + $0x23] ss:$4 sm:$0xff] %v2570_v50  ;;  %v8862_v41 = vsel %vm3589_vm14, %v3317_v61, -inf  ;;  %v8871_v33 = vsel %vm3589_vm14, %v3321_v43, -inf  ;;  %v11001_v20 = vmax.f32 %v7453_v55, %v7456_v63  ;;  %v3327_v14 = vrot.slane %v3207_v36, 6  ;;  %v11003_v63 = vld [vmem:[#allocation12_spill] sm:$0xff] }
 0x526   : > { %2826 = vst [vmem:[#allocation1] ss:$4 sm:$0xff] %v2571_v32  ;;  %v1517_v28 = vpop.permute.xlu1 %1516  ;;  %v8842_v32 = vsel %vm3589_vm14, %v3203_v13, -inf  ;;  %v3160_v61 = vmul.f32 %v7421_v62, %v2988_v54  ;;  %v11004_v43 = vmax.f32 %v7487_v3, %v11003_v63 }
 0x527   : > { %v3622_v13 = vmax.f32 %v8832_v16, %v8842_v32  ;;  %v3009_v32 = vadd.f32 %v8819_v35, %v7412_v0 }
 0x528   : > { %v1345_v47 = vpop.permute.xlu0 %1344 }
 0x529   : > { %v2206_v45 = vsel %vm2150_vm7, %v2149_v34, %v1345_v47  ;;  %v3318_v47 = vrot.slane %v3204_v39, 6  ;;  %v3206_v34 = vsel %vm3107_vm4, %v2979_v12, %v3157_v57  ;;  %v3159_v12 = vmul.f32 %v7421_v62, %v2985_v18  ;;  %v8885_v57 = vpop.f32.mrf.mxu2 }
 0x52a   : > { %v2263_v8 = vsel %vm2207_vm8, %v2206_v45, %v1517_v28  ;;  %v3631_v45 = vmax.f32 %v3629_v11, %v3630_v48  ;;  %v3316_v28 = vrot.slane %v3204_v39, 2  ;;  %v3324_v10 = vrot.slane %v3206_v34, 6 }
 0x52b   : > { %v2320_v6 = vsel %vm2264_vm9, %v2263_v8, %v1691_v7  ;;  %v8865_v8 = vpop.f32.mrf.mxu1  ;;  %v8868_v7 = vsel %vm3589_vm14, %v3318_v47, -inf  ;;  %v3322_v22 = vrot.slane %v3206_v34, 2  ;;  %vm3111_vm7 = vcmp.gt.f32.partialorder %v2991_v24, 0.0 }
 0x52c   : > { %v2825_v51 = vld.sshfl [vmem:[#allocation1 + $0x20] sm:$0xff pattern:$0x73625140]  ;;  %v8874_v46 = vsel %vm3589_vm14, %v3316_v28, -inf  ;;  %v3645_v1 = vsel %vm3589_vm14, %v3324_v10, -inf  ;;  %v8888_v30 = vsel %vm3589_vm14, %v3206_v34, -inf  ;;  %v2994_v28 = vadd.f32 %v8792_v58, %v7412_v0 }
 0x52d   : > { %3990 = vst [vmem:[#allocation1 + $0x20] ss:$4 sm:$0xff] %v10998_v27  ;;  %5659 = vmatmul.msk.f32.gmra.mxu3 %vm2831_vm11, %v2825_v51  ;;  %v8859_v51 = vsel %vm3589_vm14, %v3204_v39, -inf  ;;  %v2999_v27 = vpop.f32.mrf.mxu0  ;;  %v3208_v39 = vsel %vm3109_vm6, %v2985_v18, %v3159_v12  ;;  %v3651_v11 = vsel %vm3589_vm14, %v3325_v26, -inf  ;;  %v11002_v18 = vmax.f32 %v7474_v5, %v7479_v31 }
 0x52e   : > { %3992 = vst [vmem:[#allocation1 + $0x21] ss:$4 sm:$0xff] %v10999_v60  ;;  %v3323_v60 = vrot.slane %v3206_v34, 4  ;;  %v3329_v47 = vrot.slane %v3208_v39, 4  ;;  %vm3110_vm8 = vcmp.gt.f32.partialorder %v2988_v54, 0.0  ;;  %v3637_v34 = vmax.f32 %v8874_v46, %v8888_v30 }
 0x52f   : > { %3994 = vst [vmem:[#allocation1 + $0x22] ss:$4 sm:$0xff] %v11000_v37  ;;  %v3644_v37 = vsel %vm3589_vm14, %v3205_v29, -inf  ;;  %v8891_v29 = vsel %vm3589_vm14, %v3322_v22, -inf  ;;  %v3652_v10 = vmax.f32 %v3650_v49, %v3651_v11  ;;  %v3328_v12 = vrot.slane %v3208_v39, 2 }
 0x530   : > { %v1865_v52 = vpop.permute.xlu0 %1864  ;;  %v8899_v48 = vsel %vm3589_vm14, %v3323_v60, -inf  ;;  %v3000_v22 = vadd.f32 %v2999_v27, %v7412_v0  ;;  %v8926_v60 = vsel %vm3589_vm14, %v3327_v14, -inf  ;;  %v3209_v58 = vsel %vm3110_vm8, %v2988_v54, %v3160_v61 }
 0x531   : > { %v2377_v44 = vsel %vm2321_vm10, %v2320_v6, %v1865_v52  ;;  %v3161_v6 = vmul.f32 %v7421_v62, %v2991_v24  ;;  %v3634_v52 = vmax.f32 %v8859_v51, %v8871_v33  ;;  %vm4144_vm9 = vcmask 78848  }
 0x532   : > { %v2572_v53 = vrot.slane %v2377_v44, 2  ;;  %v2573_v50 = vrot.slane %v2377_v44, 4  ;;  %2827 = vst [vmem:[#allocation1 + $0x1] ss:$4 sm:$0xff] %v2377_v44  ;;  %v8936_v27 = vsel %vm3589_vm14, %v3208_v39, -inf  ;;  %vm3112_vm10 = vcmp.gt.f32.partialorder %v2994_v28, 0.0 }
 0x533   : > { %v8907_v55 = vsel %vm3111_vm7, %v2991_v24, %v3161_v6  ;;  %v8916_v31 = vpop.f32.mrf.mxu1  ;;  %v3333_v14 = vrot.slane %v3209_v58, 6  ;;  %vm3117_vm1 = vcmp.gt.f32.partialorder %v3009_v32, 0.0 }
 0x534   : > { %2828 = vst [vmem:[#allocation1 + $0x2] ss:$4 sm:$0xff] %v2572_v53  ;;  %v3326_v53 = vrot.slane %v3207_v36, 4  ;;  %v3334_v26 = vrot.slane %v8907_v55, 2  ;;  %v3336_v49 = vrot.slane %v8907_v55, 6 }
 0x535   : > { %2829 = vst [vmem:[#allocation1 + $0x3] ss:$4 sm:$0xff] %v2573_v50  ;;  %v3648_v50 = vsel %vm3589_vm14, %v3207_v36, -inf  ;;  %v3002_v5 = vpop.f32.mrf.mxu0  ;;  %v11006_v36 = vld [vmem:[#allocation16_spill] sm:$0xff] }
 0x536   : > { %v8854_v4 = vld.sshfl [vmem:[#allocation1 + $0x20] sm:$0xff pattern:$0x73625140]  ;;  %v11007_v24 = vmax.f32 %v11005_v59, %v11006_v36  ;;  %v8922_v3 = vsel %vm3589_vm14, %v3326_v53, -inf  ;;  %v3003_v6 = vadd.f32 %v3002_v5, %v7412_v0  ;;  %v8941_v53 = vpop.f32.mrf.mxu2  ;;  %v3666_v11 = vsel %vm3589_vm14, %v3334_v26, -inf }
 0x537   : > { %4001 = vst [vmem:[#allocation1 + $0x20] ss:$4 sm:$0xff] %v3625_v23  ;;  %v3646_v23 = vmax.f32 %v3644_v37, %v3645_v1  ;;  %v3335_v37 = vrot.slane %v8907_v55, 4  ;;  %v3665_v1 = vsel %vm3589_vm14, %v3329_v47, -inf  ;;  %v3640_v26 = vmax.f32 %v8862_v41, %v8891_v29 }
 0x538   : > { %4002 = vst [vmem:[#allocation1 + $0x21] ss:$4 sm:$0xff] %v3628_v21  ;;  %v3649_v21 = vmax.f32 %v3647_v9, %v3648_v50  ;;  %v2997_v9 = vadd.f32 %v8817_v56, %v7412_v0  ;;  %v3331_v50 = vrot.slane %v3209_v58, 2  ;;  %v8946_v56 = vsel %vm3589_vm14, %v3328_v12, -inf  ;;  %v11012_v12 = vld [vmem:[#allocation93_spill] sm:$0xff] }
 0x539   : > { %4003 = vst [vmem:[#allocation1 + $0x22] ss:$4 sm:$0xff] %v3631_v45  ;;  %v3330_v45 = vrot.slane %v3208_v39, 6  ;;  %v3332_v39 = vrot.slane %v3209_v58, 4  ;;  %v3669_v61 = vsel %vm3589_vm14, %v3335_v37, -inf  ;;  %vm3115_vm2 = vcmp.gt.f32.partialorder %v3003_v6, 0.0 }
 0x53a   : > { %4145 = vst.msk [vmem:[#allocation2 + $0x8] sm:$0x3f] %vm4144_vm9, %v8854_v4  ;;  %v3163_v4 = vmul.f32 %v7421_v62, %v2997_v9  ;;  %vm3113_vm15 = vcmp.gt.f32.partialorder %v2997_v9, 0.0  ;;  %v3667_v59 = vmax.f32 %v3665_v1, %v3666_v11  ;;  %v8973_v37 = vsel %vm3589_vm14, %v3331_v50, -inf  ;;  %v11014_v1 = vld [vmem:[#allocation55_spill] sm:$0xff] }
 0x53b   : > { %v3668_v54 = vsel %vm3589_vm14, %v3330_v45, -inf  ;;  %v11009_v45 = vld [vmem:[#allocation15_spill] sm:$0xff]  ;;  %v8986_v50 = vsel %vm3589_vm14, %v3333_v14, -inf  ;;  %v8999_v14 = vsel %vm3589_vm14, %v8907_v55, -inf  ;;  %v3655_v33 = vmax.f32 %v8922_v3, %v8973_v37 }
 0x53c   : > { %v2830_v44 = vld.sshfl [vmem:[#allocation1] sm:$0xff pattern:$0x73625140] }
 0x53d   : > { %3982 = vst [vmem:[#allocation1] ss:$4 sm:$0xff] %v11001_v20  ;;  %5660 = vmatmul.msk.f32.gmra.mxu3 %vm2831_vm11, %v2830_v44  ;;  %v3162_v44 = vmul.f32 %v7421_v62, %v2994_v28  ;;  %v3164_v20 = vmul.f32 %v7421_v62, %v3000_v22  ;;  %vm3114_vm11 = vcmp.gt.f32.partialorder %v3000_v22, 0.0 }
 0x53e   : > { %3984 = vst [vmem:[#allocation1 + $0x1] ss:$4 sm:$0xff] %v11002_v18  ;;  %v3672_v18 = vsel %vm3589_vm14, %v3336_v49, -inf  ;;  %v3017_v49 = vpop.f32.mrf.mxu1 }
 0x53f   : > { %3986 = vst [vmem:[#allocation1 + $0x2] ss:$4 sm:$0xff] %v11004_v43  ;;  %v3211_v63 = vsel %vm3112_vm10, %v2994_v28, %v3162_v44  ;;  %v3006_v43 = vadd.f32 %v8794_v2, %v7412_v0  ;;  %v8961_v36 = vsel %vm3114_vm11, %v3000_v22, %v3164_v20  ;;  %v3643_v2 = vmax.f32 %v8868_v7, %v8899_v48  ;;  %v11015_v44 = vld [vmem:[#allocation51_spill] sm:$0xff] }
 0x540   : > { %v4005_v40 = vld.sshfl [vmem:[#allocation1 + $0x20] sm:$0xff pattern:$0x73625140]  ;;  %3988 = vst [vmem:[#allocation1 + $0x3] ss:$4 sm:$0xff] %v11007_v24  ;;  %v3012_v24 = vadd.f32 %v8865_v8, %v7412_v0  ;;  %v11016_v20 = vmax.f32 %v11014_v1, %v11015_v44  ;;  %v3338_v11 = vrot.slane %v3211_v63, 4  ;;  %v3027_v7 = vadd.f32 %v8759_v38, %v7412_v0 }
 0x541   : > { %4010 = vst [vmem:[#allocation1 + $0x20] ss:$4 sm:$0xff] %v3646_v23  ;;  %v3165_v23 = vmul.f32 %v7421_v62, %v3003_v6  ;;  %vm3116_vm12 = vcmp.gt.f32.partialorder %v3006_v43, 0.0 }
 0x542   : > { %4011 = vst [vmem:[#allocation1 + $0x21] ss:$4 sm:$0xff] %v3649_v21  ;;  %v11008_v21 = vld [vmem:[#allocation57_spill] sm:$0xff]  ;;  %vm3118_vm13 = vcmp.gt.f32.partialorder %v3012_v24, 0.0  ;;  %vm3123_vm6 = vcmp.gt.f32.partialorder %v3027_v7, 0.0 }
 0x543   : > { %4012 = vst [vmem:[#allocation1 + $0x22] ss:$4 sm:$0xff] %v3652_v10  ;;  %v11010_v5 = vmax.f32 %v11008_v21, %v11009_v45  ;;  %v11011_v10 = vld [vmem:[#allocation14_spill] sm:$0xff]  ;;  %v3212_v21 = vsel %vm3113_vm15, %v2997_v9, %v3163_v4  ;;  %v8980_v45 = vsel %vm3115_vm2, %v3003_v6, %v3165_v23  ;;  %v3168_v9 = vmul.f32 %v7421_v62, %v3012_v24 }
 0x544   : > { %4147 = vst.msk [vmem:[#allocation2 + $0x18] sm:$0x3f] %vm4144_vm9, %v4005_v40  ;;  %v3671_v40 = vsel %vm3589_vm14, %v3209_v58, -inf  ;;  %v11013_v28 = vmax.f32 %v11011_v10, %v11012_v12  ;;  %v3670_v58 = vmax.f32 %v3668_v54, %v3669_v61  ;;  %v3345_v54 = vrot.slane %v8961_v36, 6 }
 0x545   : > { %v3673_v8 = vmax.f32 %v3671_v40, %v3672_v18  ;;  %v3166_v61 = vmul.f32 %v7421_v62, %v3006_v43  ;;  %v3337_v10 = vrot.slane %v3211_v63, 2  ;;  %v3339_v18 = vrot.slane %v3211_v63, 6 }
 0x546   : > { %v3340_v6 = vrot.slane %v3212_v21, 2  ;;  %v3342_v4 = vrot.slane %v3212_v21, 6  ;;  %v3346_v23 = vrot.slane %v8980_v45, 2  ;;  %v9002_v40 = vsel %vm3589_vm14, %v3211_v63, -inf }
 0x547   : > { %v3995_v47 = vld.sshfl [vmem:[#allocation1] sm:$0xff pattern:$0x73625140]  ;;  %v3341_v12 = vrot.slane %v3212_v21, 4  ;;  %v9012_v16 = vsel %vm3116_vm12, %v3006_v43, %v3166_v61  ;;  %v3686_v55 = vsel %vm3589_vm14, %v3212_v21, -inf  ;;  %v9021_v63 = vsel %vm3589_vm14, %v3337_v10, -inf }
 0x548   : > { %3997 = vst [vmem:[#allocation1] ss:$4 sm:$0xff] %v11010_v5  ;;  %v8983_v5 = vsel %vm3589_vm14, %v3332_v39, -inf  ;;  %v8992_v39 = vpop.f32.mrf.mxu2  ;;  %v9026_v1 = vsel %vm3589_vm14, %v3342_v4, -inf  ;;  %v3689_v44 = vsel %vm3589_vm14, %v3340_v6, -inf  ;;  %v3693_v43 = vsel %vm3589_vm14, %v3346_v23, -inf }
 0x549   : > { %3998 = vst [vmem:[#allocation1 + $0x1] ss:$4 sm:$0xff] %v11013_v28  ;;  %v3687_v28 = vsel %vm3589_vm14, %v3345_v54, -inf  ;;  %v3692_v35 = vsel %vm3589_vm14, %v3341_v12, -inf  ;;  %v3350_v21 = vrot.slane %v9012_v16, 4  ;;  %v3167_v54 = vmul.f32 %v7421_v62, %v3009_v32 }
 0x54a   : > { %v4014_v22 = vld.sshfl [vmem:[#allocation1 + $0x20] sm:$0xff pattern:$0x73625140]  ;;  %3999 = vst [vmem:[#allocation1 + $0x2] ss:$4 sm:$0xff] %v11016_v20  ;;  %v3020_v20 = vpop.f32.mrf.mxu1  ;;  %v3018_v6 = vadd.f32 %v3017_v49, %v7412_v0  ;;  %v3343_v12 = vrot.slane %v8961_v36, 2 }
 0x54b   : > { %4019 = vst [vmem:[#allocation1 + $0x20] ss:$4 sm:$0xff] %v3667_v59  ;;  %v9005_v59 = vsel %vm3589_vm14, %v3338_v11, -inf  ;;  %v3021_v4 = vadd.f32 %v3020_v20, %v7412_v0  ;;  %v3347_v49 = vrot.slane %v8980_v45, 4  ;;  %v3707_v20 = vsel %vm3589_vm14, %v3350_v21, -inf }
 0x54c   : > { %4020 = vst [vmem:[#allocation1 + $0x21] ss:$4 sm:$0xff] %v3670_v58  ;;  %v3690_v58 = vsel %vm3589_vm14, %v8980_v45, -inf  ;;  %vm3120_vm3 = vcmp.gt.f32.partialorder %v3018_v6, 0.0 }
 0x54d   : > { %4021 = vst [vmem:[#allocation1 + $0x22] ss:$4 sm:$0xff] %v3673_v8  ;;  %v3688_v8 = vmax.f32 %v3686_v55, %v3687_v28  ;;  %v3691_v11 = vmax.f32 %v3689_v44, %v3690_v58  ;;  %v9043_v28 = vsel %vm3589_vm14, %v8961_v36, -inf  ;;  %v3024_v58 = vadd.f32 %v8751_v17, %v7412_v0 }
 0x54e   : > { %4000 = vst [vmem:[#allocation1 + $0x3] ss:$4 sm:$0xff] %v3622_v13  ;;  %v9017_v13 = vsel %vm3589_vm14, %v3339_v18, -inf  ;;  %v3694_v18 = vmax.f32 %v3692_v35, %v3693_v43  ;;  %v3348_v44 = vrot.slane %v8980_v45, 6  ;;  %v3349_v43 = vrot.slane %v9012_v16, 2 }
 0x54f   : > { %4149 = vst.msk [vmem:[#allocation2 + $0x28] sm:$0x3f] %vm4144_vm9, %v4014_v22  ;;  %v9023_v22 = vsel %vm3118_vm13, %v3012_v24, %v3168_v9  ;;  %v3351_v24 = vrot.slane %v9012_v16, 6  ;;  %v3171_v21 = vmul.f32 %v7421_v62, %v3021_v4  ;;  %vm3121_vm4 = vcmp.gt.f32.partialorder %v3021_v4, 0.0 }
 0x550   : > { %4143 = vst.msk [vmem:[#allocation2] sm:$0xff] %vm4142_vm0, %v3995_v47  ;;  %v3355_v61 = vrot.slane %v9023_v22, 2  ;;  %v3356_v9 = vrot.slane %v9023_v22, 4  ;;  %v3344_v47 = vrot.slane %v8961_v36, 4  ;;  %v9047_v55 = vpop.f32.mrf.mxu2  ;;  %v9055_v36 = vsel %vm3117_vm1, %v3009_v32, %v3167_v54 }
 0x551   : > { %v3710_v35 = vsel %vm3589_vm14, %v3351_v24, -inf  ;;  %v3172_v32 = vmul.f32 %v7421_v62, %v3024_v58  ;;  %vm3122_vm5 = vcmp.gt.f32.partialorder %v3024_v58, 0.0  ;;  %v3713_v46 = vsel %vm3589_vm14, %v9055_v36, -inf }
 0x552   : > { %v3708_v17 = vsel %vm3589_vm14, %v3355_v61, -inf  ;;  %v3711_v45 = vsel %vm3589_vm14, %v3356_v9, -inf  ;;  %v9086_v3 = vsel %vm3121_vm4, %v3021_v4, %v3171_v21  ;;  %v9098_v61 = vsel %vm3589_vm14, %v3343_v12, -inf  ;;  %v9106_v9 = vpop.f32.mrf.mxu3 }
 0x553   : > { %v3709_v30 = vmax.f32 %v3707_v20, %v3708_v17  ;;  %v3712_v41 = vmax.f32 %v3710_v35, %v3711_v45  ;;  %v9091_v48 = vsel %vm3122_vm5, %v3024_v58, %v3172_v32  ;;  %v9104_v38 = vsel %vm3589_vm14, %v3347_v49, -inf }
 0x554   : > { %v4023_v10 = vld.sshfl [vmem:[#allocation1 + $0x20] sm:$0xff pattern:$0x73625140]  ;;  %v9116_v4 = vsel %vm3589_vm14, %v3349_v43, -inf  ;;  %v3173_v49 = vmul.f32 %v7421_v62, %v3027_v7  ;;  %v3661_v35 = vmax.f32 %v8936_v27, %v8986_v50  ;;  %v3676_v17 = vmax.f32 %v9002_v40, %v9026_v1 }
 0x555   : > { %4028 = vst [vmem:[#allocation1 + $0x20] ss:$4 sm:$0xff] %v3688_v8  ;;  %v4004_v23 = vld.sshfl [vmem:[#allocation1] sm:$0xff pattern:$0x73625140]  ;;  %v3357_v8 = vrot.slane %v9023_v22, 6  ;;  %v3679_v27 = vmax.f32 %v9021_v63, %v9043_v28 }
 0x556   : > { %4029 = vst [vmem:[#allocation1 + $0x21] ss:$4 sm:$0xff] %v3691_v11  ;;  %v3170_v11 = vmul.f32 %v7421_v62, %v3018_v6  ;;  %v3732_v50 = vsel %vm3589_vm14, %v9091_v48, -inf }
 0x557   : > { %4030 = vst [vmem:[#allocation1 + $0x22] ss:$4 sm:$0xff] %v3694_v18  ;;  %v4172_v51 = vld [vmem:[#allocation2] ss:$2 sm:$0x7f]  ;;  %v9101_v18 = vsel %vm3589_vm14, %v3344_v47, -inf }
 0x558   : > { %4006 = vst [vmem:[#allocation1] ss:$4 sm:$0xff] %v3634_v52  ;;  %v4200_v52 = vld [vmem:[#allocation2 + $0x1] ss:$2 sm:$0x7f]  ;;  %v9084_v29 = vsel %vm3120_vm3, %v3018_v6, %v3170_v11  ;;  %v9113_v6 = vsel %vm3589_vm14, %v9012_v16, -inf  ;;  %v9119_v12 = vpop.f32.mrf.mxu2 }
 0x559   : > { %4007 = vst [vmem:[#allocation1 + $0x1] ss:$4 sm:$0xff] %v3637_v34  ;;  %v3714_v34 = vsel %vm3589_vm14, %v3357_v8, -inf  ;;  %v9080_v24 = vmax.f32 %v4172_v51, %v4200_v52  ;;  %v3361_v47 = vrot.slane %v9084_v29, 2  ;;  %v3362_v58 = vrot.slane %v9084_v29, 4 }
 0x55a   : > { %4008 = vst [vmem:[#allocation1 + $0x2] ss:$4 sm:$0xff] %v3640_v26  ;;  %v3033_v26 = vadd.f32 %v8780_v19, %v7412_v0  ;;  %v9109_v19 = vsel %vm3589_vm14, %v3348_v44, -inf  ;;  %v3367_v16 = vrot.slane %v9091_v48, 2  ;;  %v3658_v44 = vmax.f32 %v8926_v60, %v8983_v5  ;;  %v9162_v52 = vpop.f32.mrf.mxu3 }
 0x55b   : > { %4009 = vst [vmem:[#allocation1 + $0x3] ss:$4 sm:$0xff] %v3643_v2  ;;  %v4291_v37 = vrot.slane %v9080_v24, 2  ;;  %v4251_v54 = vrot.slane %v9080_v24, 1  ;;  %v3664_v8 = vmax.f32 %v8946_v56, %v8999_v14  ;;  %v3352_v60 = vrot.slane %v9055_v36, 2 }
 0x55c   : > { %4146 = vst.msk [vmem:[#allocation2 + $0x10] sm:$0xff] %vm4142_vm0, %v4004_v23  ;;  %v3366_v23 = vrot.slane %v9086_v3, 6  ;;  %v3175_v43 = vmul.f32 %v7421_v62, %v3033_v26  ;;  %vm3125_vm7 = vcmp.gt.f32.partialorder %v3033_v26, 0.0  ;;  %v3353_v5 = vrot.slane %v9055_v36, 4 }
 0x55d   : > { %4151 = vst.msk [vmem:[#allocation2 + $0x38] sm:$0x3f] %vm4144_vm9, %v4023_v10  ;;  %v3715_v10 = vmax.f32 %v3713_v46, %v3714_v34  ;;  %4301 = vrot.lane.b32.xlu0 %v4291_v37, %s5799_s24  ;;  %4261 = vrot.lane.b32.xlu1 %v4251_v54, %s5800_s25  ;;  %v3354_v11 = vrot.slane %v9055_v36, 6  ;;  %v3015_v56 = vadd.f32 %v8916_v31, %v7412_v0  ;;  %v3728_v1 = vsel %vm3589_vm14, %v9084_v29, -inf }
 0x55e   : > { %v4032_v2 = vld.sshfl [vmem:[#allocation1 + $0x20] sm:$0xff pattern:$0x73625140]  ;;  %v3729_v21 = vsel %vm3589_vm14, %v3366_v23, -inf  ;;  %v9148_v14 = vsel %vm3123_vm6, %v3027_v7, %v3173_v49  ;;  %v3735_v36 = vsel %vm3589_vm14, %v3367_v16, -inf  ;;  %v9154_v32 = vsel %vm3125_vm7, %v3033_v26, %v3175_v43 }
 0x55f   : > { %4037 = vst [vmem:[#allocation1 + $0x20] ss:$4 sm:$0xff] %v3709_v30  ;;  %v3734_v31 = vsel %vm3589_vm14, %v3362_v58, -inf  ;;  %v3730_v28 = vmax.f32 %v3728_v1, %v3729_v21  ;;  %v3731_v51 = vsel %vm3589_vm14, %v3361_v47, -inf  ;;  %v3371_v30 = vrot.slane %v9148_v14, 4 }
 0x560   : > { %4038 = vst [vmem:[#allocation1 + $0x21] ss:$4 sm:$0xff] %v3712_v41  ;;  %v3733_v46 = vmax.f32 %v3731_v51, %v3732_v50  ;;  %v9166_v34 = vpop.f32.mrf.mxu2  ;;  %v3376_v37 = vrot.slane %v9154_v32, 2  ;;  %v3377_v54 = vrot.slane %v9154_v32, 4  ;;  %v9178_v23 = vsel %vm3589_vm14, %v3353_v5, -inf }
 0x561   : > { %4039 = vst [vmem:[#allocation1 + $0x22] ss:$4 sm:$0xff] %v3715_v10  ;;  %v9175_v10 = vsel %vm3589_vm14, %v3352_v60, -inf  ;;  %v9181_v47 = vsel %vm3589_vm14, %v3354_v11, -inf  ;;  %vm3119_vm8 = vcmp.gt.f32.partialorder %v3015_v56, 0.0  ;;  %v3372_v58 = vrot.slane %v9148_v14, 6 }
 0x562   : > { %v4013_v20 = vld.sshfl [vmem:[#allocation1] sm:$0xff pattern:$0x73625140]  ;;  %4153 = vst.msk [vmem:[#allocation2 + $0x48] sm:$0x3f] %vm4144_vm9, %v4032_v2  ;;  %v3736_v2 = vmax.f32 %v3734_v31, %v3735_v36  ;;  %v3045_v49 = vadd.f32 %v8941_v53, %v7412_v0  ;;  %v3378_v43 = vrot.slane %v9154_v32, 6  ;;  %v3682_v53 = vmax.f32 %v9005_v59, %v9098_v61 }
 0x563   : > { %4015 = vst [vmem:[#allocation1] ss:$4 sm:$0xff] %v3655_v33  ;;  %v4174_v45 = vld [vmem:[#allocation2 + $0x10] ss:$2 sm:$0x7f]  ;;  %v3030_v33 = vadd.f32 %v8772_v25, %v7412_v0  ;;  %v3042_v25 = vadd.f32 %v8885_v57, %v7412_v0  ;;  %v3169_v57 = vmul.f32 %v7421_v62, %v3015_v56  ;;  %v3685_v11 = vmax.f32 %v9017_v13, %v9101_v18 }
 0x564   : > { %4016 = vst [vmem:[#allocation1 + $0x1] ss:$4 sm:$0xff] %v3658_v44  ;;  %v4202_v40 = vld [vmem:[#allocation2 + $0x11] ss:$2 sm:$0x7f]  ;;  %v3749_v44 = vsel %vm3589_vm14, %v3371_v30, -inf  ;;  %v3179_v50 = vmul.f32 %v7421_v62, %v3045_v49  ;;  %v3054_v30 = vadd.f32 %v9119_v12, %v7412_v0  ;;  %v3703_v12 = vmax.f32 %v9113_v6, %v9181_v47 }
 0x565   : > { %4017 = vst [vmem:[#allocation1 + $0x2] ss:$4 sm:$0xff] %v3661_v35  ;;  %v9156_v63 = vmax.f32 %v4174_v45, %v4202_v40  ;;  %v3174_v16 = vmul.f32 %v7421_v62, %v3030_v33  ;;  %vm3124_vm10 = vcmp.gt.f32.partialorder %v3030_v33, 0.0  ;;  %v3750_v35 = vsel %vm3589_vm14, %v3376_v37, -inf  ;;  %v9210_v40 = vpop.f32.mrf.mxu3 }
 0x566   : > { %4018 = vst [vmem:[#allocation1 + $0x3] ss:$4 sm:$0xff] %v3664_v8  ;;  %v3753_v8 = vsel %vm3589_vm14, %v3377_v54, -inf  ;;  %vm3128_vm11 = vcmp.gt.f32.partialorder %v3042_v25, 0.0  ;;  %v3178_v45 = vmul.f32 %v7421_v62, %v3042_v25  ;;  %v3756_v36 = vsel %vm3589_vm14, %v3378_v43, -inf }
 0x567   : > { %4148 = vst.msk [vmem:[#allocation2 + $0x20] sm:$0xff] %vm4142_vm0, %v4013_v20  ;;  %v4292_v7 = vrot.slane %v9156_v63, 2  ;;  %v4252_v26 = vrot.slane %v9156_v63, 1  ;;  %v3039_v20 = vadd.f32 %v8839_v42, %v7412_v0  ;;  %v9205_v42 = vsel %vm3119_vm8, %v3015_v56, %v3169_v57 }
 0x568   : > { %v4041_v41 = vld.sshfl [vmem:[#allocation1 + $0x20] sm:$0xff pattern:$0x73625140]  ;;  %v9207_v21 = vsel %vm3124_vm10, %v3030_v33, %v3174_v16  ;;  %vm3129_vm15 = vcmp.gt.f32.partialorder %v3045_v49, 0.0  ;;  %v3752_v13 = vsel %vm3589_vm14, %v3372_v58, -inf  ;;  %v3751_v18 = vmax.f32 %v3749_v44, %v3750_v35 }
 0x569   : > { %4046 = vst [vmem:[#allocation1 + $0x20] ss:$4 sm:$0xff] %v3730_v28  ;;  %4303 = vrot.lane.b32.xlu1 %v4292_v7, %s5799_s24  ;;  %4263 = vrot.lane.b32.xlu2 %v4252_v26, %s5800_s25  ;;  %v3177_v59 = vmul.f32 %v7421_v62, %v3039_v20  ;;  %vm3127_vm2 = vcmp.gt.f32.partialorder %v3039_v20, 0.0  ;;  %v3755_v56 = vsel %vm3589_vm14, %v9207_v21, -inf  ;;  %v3754_v31 = vmax.f32 %v3752_v13, %v3753_v8  ;;  %v9226_v28 = vpop.f32.mrf.mxu2 }
 0x56a   : > { %4047 = vst [vmem:[#allocation1 + $0x21] ss:$4 sm:$0xff] %v3733_v46  ;;  %v3359_v33 = vrot.slane %v9205_v42, 4  ;;  %v9234_v46 = vsel %vm3129_vm15, %v3045_v49, %v3179_v50  ;;  %v3048_v37 = vadd.f32 %v8992_v39, %v7412_v0  ;;  %v3700_v54 = vmax.f32 %v9109_v19, %v9178_v23 }
 0x56b   : > { %4048 = vst [vmem:[#allocation1 + $0x22] ss:$4 sm:$0xff] %v3736_v2  ;;  %v9243_v2 = vsel %vm3127_vm2, %v3039_v20, %v3177_v59  ;;  %v9258_v57 = vsel %vm3589_vm14, %v9205_v42, -inf  ;;  %v3363_v39 = vrot.slane %v9084_v29, 6  ;;  %v3388_v58 = vrot.slane %v9234_v46, 2 }
 0x56c   : > { %4155 = vst.msk [vmem:[#allocation2 + $0x58] sm:$0x3f] %vm4144_vm9, %v4041_v41  ;;  %v3697_v41 = vmax.f32 %v9104_v38, %v9175_v10  ;;  %v3358_v38 = vrot.slane %v9205_v42, 2  ;;  %v3360_v10 = vrot.slane %v9205_v42, 6  ;;  %v9264_v19 = vsel %vm3589_vm14, %v3359_v33, -inf }
 0x56d   : > { %v4022_v60 = vld.sshfl [vmem:[#allocation1] sm:$0xff pattern:$0x73625140]  ;;  %v3382_v6 = vrot.slane %v9243_v2, 2  ;;  %v3182_v23 = vmul.f32 %v7421_v62, %v3054_v30  ;;  %v9269_v47 = vpop.f32.mrf.mxu3  ;;  %v3180_v49 = vmul.f32 %v7421_v62, %v3048_v37  ;;  %vm3132_vm12 = vcmp.gt.f32.partialorder %v3054_v30, 0.0 }
 0x56e   : > { %4024 = vst [vmem:[#allocation1] ss:$4 sm:$0xff] %v3676_v17  ;;  %v4176_v5 = vld [vmem:[#allocation2 + $0x20] ss:$2 sm:$0x7f]  ;;  %v9218_v17 = vsel %vm3128_vm11, %v3042_v25, %v3178_v45  ;;  %v9277_v43 = vsel %vm3589_vm14, %v3358_v38, -inf  ;;  %v3060_v38 = vadd.f32 %v9226_v28, %v7412_v0 }
 0x56f   : > { %4025 = vst [vmem:[#allocation1 + $0x1] ss:$4 sm:$0xff] %v3679_v27  ;;  %v4204_v1 = vld [vmem:[#allocation2 + $0x21] ss:$2 sm:$0x7f]  ;;  %v9222_v27 = vsel %vm3589_vm14, %v9023_v22, -inf  ;;  %v3757_v22 = vmax.f32 %v3755_v56, %v3756_v36  ;;  %v9300_v36 = vsel %vm3132_vm12, %v3054_v30, %v3182_v23 }
 0x570   : > { %4026 = vst [vmem:[#allocation1 + $0x2] ss:$4 sm:$0xff] %v3682_v53  ;;  %v9214_v61 = vmax.f32 %v4176_v5, %v4204_v1  ;;  %v3706_v25 = vmax.f32 %v9116_v4, %v9222_v27  ;;  %v3383_v4 = vrot.slane %v9243_v2, 4  ;;  %v3774_v20 = vsel %vm3589_vm14, %v9234_v46, -inf }
 0x571   : > { %4027 = vst [vmem:[#allocation1 + $0x3] ss:$4 sm:$0xff] %v3685_v11  ;;  %4365 = vrot.lane.b32.xlu1 %v4252_v26, %s5802_s27  ;;  %4333 = vrot.lane.b32.xlu2 %v9156_v63, %s5801_s26  ;;  %v3387_v26 = vrot.slane %v9218_v17, 6  ;;  %vm3130_vm13 = vcmp.gt.f32.partialorder %v3048_v37, 0.0  ;;  %v9285_v8 = vsel %vm3589_vm14, %v3363_v39, -inf  ;;  %v3364_v45 = vrot.slane %v9086_v3, 2  ;;  %v3062_v5 = vpop.f32.mrf.mxu2 }
 0x572   : > { %v4050_v51 = vld.sshfl [vmem:[#allocation1 + $0x20] sm:$0xff pattern:$0x73625140]  ;;  %4150 = vst.msk [vmem:[#allocation2 + $0x30] sm:$0xff] %vm4142_vm0, %v4022_v60  ;;  %4335 = vrot.lane.b32.xlu0 %v9214_v61, %s5801_s26  ;;  %v9274_v44 = vrot.slane %v9214_v61, 2  ;;  %v9282_v35 = vrot.slane %v9214_v61, 1  ;;  %v3051_v1 = vadd.f32 %v9047_v55, %v7412_v0  ;;  %v3063_v55 = vadd.f32 %v3062_v5, %v7412_v0 }
 0x573   : > { %4055 = vst [vmem:[#allocation1 + $0x20] ss:$4 sm:$0xff] %v3751_v18  ;;  %v3771_v16 = vsel %vm3589_vm14, %v3387_v26, -inf  ;;  %v3770_v60 = vsel %vm3589_vm14, %v9243_v2, -inf  ;;  %v3777_v53 = vsel %vm3589_vm14, %v3388_v58, -inf  ;;  %v3773_v50 = vsel %vm3589_vm14, %v3382_v6, -inf }
 0x574   : > { %4056 = vst [vmem:[#allocation1 + $0x21] ss:$4 sm:$0xff] %v3754_v31  ;;  %v3772_v11 = vmax.f32 %v3770_v60, %v3771_v16  ;;  %v3776_v13 = vsel %vm3589_vm14, %v3383_v4, -inf  ;;  %v9306_v18 = vsel %vm3130_vm13, %v3048_v37, %v3180_v49  ;;  %v3365_v56 = vrot.slane %v9086_v3, 4 }
 0x575   : > { %4057 = vst [vmem:[#allocation1 + $0x22] ss:$4 sm:$0xff] %v3757_v22  ;;  %v3778_v31 = vmax.f32 %v3776_v13, %v3777_v53  ;;  %v3718_v33 = vmax.f32 %v9258_v57, %v9285_v8  ;;  %v3720_v22 = vsel %vm3589_vm14, %v9086_v3, -inf  ;;  %v3723_v30 = vsel %vm3589_vm14, %v3364_v45, -inf }
 0x576   : > { %4157 = vst.msk [vmem:[#allocation2 + $0x68] sm:$0x3f] %vm4144_vm9, %v4050_v51  ;;  %v3392_v26 = vrot.slane %v9306_v18, 4  ;;  %v3181_v37 = vmul.f32 %v7421_v62, %v3051_v1  ;;  %vm3131_vm1 = vcmp.gt.f32.partialorder %v3051_v1, 0.0  ;;  %v3399_v3 = vrot.slane %v9300_v36, 6 }
 0x577   : > { %v3721_v39 = vmax.f32 %v9277_v43, %v3720_v22  ;;  %v3726_v58 = vsel %vm3589_vm14, %v3365_v56, -inf  ;;  %v3393_v6 = vrot.slane %v9306_v18, 6  ;;  %v3724_v4 = vmax.f32 %v9264_v19, %v3723_v30 }
 0x578   : > { %v4031_v29 = vld.sshfl [vmem:[#allocation1] sm:$0xff pattern:$0x73625140]  ;;  %v3368_v23 = vrot.slane %v9091_v48, 4  ;;  %vm3135_vm3 = vcmp.gt.f32.partialorder %v3063_v55, 0.0  ;;  %v3369_v16 = vrot.slane %v9091_v48, 6  ;;  %v9343_v49 = vsel %vm3131_vm1, %v3051_v1, %v3181_v37 }
 0x579   : > { %4033 = vst [vmem:[#allocation1] ss:$4 sm:$0xff] %v3697_v41  ;;  %4399 = vrot.lane.b32.xlu1 %v9274_v44, %s5803_s28  ;;  %4367 = vrot.lane.b32.xlu2 %v9282_v35, %s5802_s27  ;;  %v4178_v59 = vld [vmem:[#allocation2 + $0x30] ss:$2 sm:$0x7f]  ;;  %v3397_v41 = vrot.slane %v9300_v36, 2  ;;  %v3184_v45 = vmul.f32 %v7421_v62, %v3060_v38 }
 0x57a   : > { %4034 = vst [vmem:[#allocation1 + $0x1] ss:$4 sm:$0xff] %v3700_v54  ;;  %4397 = vrot.lane.b32.xlu0 %v4292_v7, %s5803_s28  ;;  %v3775_v7 = vmax.f32 %v3773_v50, %v3774_v20  ;;  %v4206_v51 = vld [vmem:[#allocation2 + $0x31] ss:$2 sm:$0x7f]  ;;  %v3398_v54 = vrot.slane %v9300_v36, 4 }
 0x57b   : > { %4035 = vst [vmem:[#allocation1 + $0x2] ss:$4 sm:$0xff] %v3703_v12  ;;  %v3066_v12 = vadd.f32 %v9106_v9, %v7412_v0  ;;  %v9327_v57 = vmax.f32 %v4178_v59, %v4206_v51  ;;  %v3185_v9 = vmul.f32 %v7421_v62, %v3063_v55  ;;  %v3792_v28 = vsel %vm3589_vm14, %v3397_v41, -inf }
 0x57c   : > { %v4059_v27 = vld.sshfl [vmem:[#allocation1 + $0x20] sm:$0xff pattern:$0x73625140]  ;;  %4036 = vst [vmem:[#allocation1 + $0x3] ss:$4 sm:$0xff] %v3706_v25  ;;  %v9321_v25 = vpop.f32.mrf.mxu3  ;;  %v3795_v19 = vsel %vm3589_vm14, %v3398_v54, -inf }
 0x57d   : > { %4064 = vst [vmem:[#allocation1 + $0x20] ss:$4 sm:$0xff] %v3772_v11  ;;  %v3791_v20 = vsel %vm3589_vm14, %v3392_v26, -inf  ;;  %v3798_v8 = vsel %vm3589_vm14, %v3399_v3, -inf  ;;  %vm3136_vm4 = vcmp.gt.f32.partialorder %v3066_v12, 0.0  ;;  %v3794_v48 = vsel %vm3589_vm14, %v3393_v6, -inf }
 0x57e   : > { %4065 = vst [vmem:[#allocation1 + $0x21] ss:$4 sm:$0xff] %v3775_v7  ;;  %v3793_v60 = vmax.f32 %v3791_v20, %v3792_v28  ;;  %vm3134_vm5 = vcmp.gt.f32.partialorder %v3060_v38, 0.0  ;;  %v9354_v53 = vsel %vm3135_vm3, %v3063_v55, %v3185_v9  ;;  %v3797_v5 = vsel %vm3589_vm14, %v9343_v49, -inf }
 0x57f   : > { %4066 = vst [vmem:[#allocation1 + $0x22] ss:$4 sm:$0xff] %v3778_v31  ;;  %v3796_v11 = vmax.f32 %v3794_v48, %v3795_v19  ;;  %v3725_v1 = vsel %vm3589_vm14, %v3360_v10, -inf  ;;  %v3799_v59 = vmax.f32 %v3797_v5, %v3798_v8  ;;  %v3075_v7 = vadd.f32 %v9269_v47, %v7412_v0 }
 0x580   : > { %4152 = vst.msk [vmem:[#allocation2 + $0x40] sm:$0xff] %vm4142_vm0, %v4031_v29  ;;  %v3186_v29 = vmul.f32 %v7421_v62, %v3066_v12  ;;  %v3727_v56 = vmax.f32 %v3725_v1, %v3726_v58  ;;  %v9367_v31 = vsel %vm3134_vm5, %v3060_v38, %v3184_v45  ;;  %v3408_v55 = vrot.slane %v9354_v53, 6 }
 0x581   : > { %4159 = vst.msk [vmem:[#allocation2 + $0x78] sm:$0x3f] %vm4144_vm9, %v4059_v27  ;;  %4461 = vrot.lane.b32.xlu1 %v9282_v35, %s5805_s30  ;;  %4429 = vrot.lane.b32.xlu2 %v9214_v61, %s5804_s29  ;;  %v9371_v51 = vrot.slane %v9327_v57, 2  ;;  %v3374_v42 = vrot.slane %v9207_v21, 4  ;;  %v3036_v10 = vadd.f32 %v8802_v15, %v7412_v0  ;;  %v9379_v47 = vrot.slane %v9327_v57, 1 }
 0x582   : > { %4431 = vrot.lane.b32.xlu0 %v9327_v57, %s5804_s29  ;;  %v9361_v13 = vsel %vm3136_vm4, %v3066_v12, %v3186_v29  ;;  %v9382_v22 = vsel %vm3589_vm14, %v3368_v23, -inf  ;;  %v3740_v30 = vsel %vm3589_vm14, %v3369_v16, -inf  ;;  %v3370_v15 = vrot.slane %v9148_v14, 2 }
 0x583   : > { %v4040_v43 = vld.sshfl [vmem:[#allocation1] sm:$0xff pattern:$0x73625140]  ;;  %v3409_v41 = vrot.slane %v9361_v13, 2  ;;  %v3403_v26 = vrot.slane %v9367_v31, 2  ;;  %v3189_v37 = vmul.f32 %v7421_v62, %v3075_v7  ;;  %v3375_v54 = vrot.slane %v9207_v21, 6 }
 0x584   : > { %4042 = vst [vmem:[#allocation1] ss:$4 sm:$0xff] %v3718_v33  ;;  %v9365_v27 = vpop.f32.mrf.mxu3  ;;  %v3069_v33 = vadd.f32 %v9162_v52, %v7412_v0  ;;  %v3373_v52 = vrot.slane %v9207_v21, 2  ;;  %v3404_v12 = vrot.slane %v9367_v31, 4  ;;  %v3813_v3 = vsel %vm3589_vm14, %v3408_v55, -inf }
 0x585   : > { %4043 = vst [vmem:[#allocation1 + $0x1] ss:$4 sm:$0xff] %v3721_v39  ;;  %vm3139_vm6 = vcmp.gt.f32.partialorder %v3075_v7, 0.0  ;;  %v3741_v38 = vsel %vm3589_vm14, %v3374_v42, -inf  ;;  %vm3126_vm7 = vcmp.gt.f32.partialorder %v3036_v10, 0.0  ;;  %v3816_v39 = vsel %vm3589_vm14, %v9361_v13, -inf }
 0x586   : > { %v4068_v50 = vld.sshfl [vmem:[#allocation1 + $0x20] sm:$0xff pattern:$0x73625140]  ;;  %4044 = vst [vmem:[#allocation1 + $0x2] ss:$4 sm:$0xff] %v3724_v4  ;;  %v3187_v58 = vmul.f32 %v7421_v62, %v3069_v33  ;;  %v3176_v6 = vmul.f32 %v7421_v62, %v3036_v10  ;;  %v3812_v21 = vsel %vm3589_vm14, %v9367_v31, -inf  ;;  %v3072_v28 = vadd.f32 %v9210_v40, %v7412_v0 }
 0x587   : > { %4073 = vst [vmem:[#allocation1 + $0x20] ss:$4 sm:$0xff] %v3793_v60  ;;  %v3819_v9 = vsel %vm3589_vm14, %v3409_v41, -inf  ;;  %vm3137_vm8 = vcmp.gt.f32.partialorder %v3069_v33, 0.0  ;;  %v3814_v4 = vmax.f32 %v3812_v21, %v3813_v3  ;;  %v3815_v23 = vsel %vm3589_vm14, %v3403_v26, -inf }
 0x588   : > { %4074 = vst [vmem:[#allocation1 + $0x21] ss:$4 sm:$0xff] %v3796_v11  ;;  %v9412_v16 = vsel %vm3139_vm6, %v3075_v7, %v3189_v37  ;;  %v3743_v29 = vsel %vm3589_vm14, %v9148_v14, -inf  ;;  %v3818_v20 = vsel %vm3589_vm14, %v3404_v12, -inf  ;;  %v3817_v8 = vmax.f32 %v3815_v23, %v3816_v39 }
 0x589   : > { %4075 = vst [vmem:[#allocation1 + $0x22] ss:$4 sm:$0xff] %v3799_v59  ;;  %4495 = vrot.lane.b32.xlu1 %v9371_v51, %s5806_s7  ;;  %4463 = vrot.lane.b32.xlu2 %v9379_v47, %s5805_s30  ;;  %v3738_v48 = vsel %vm3589_vm14, %v3373_v52, -inf  ;;  %v3742_v60 = vmax.f32 %v3740_v30, %v3741_v38  ;;  %v3820_v5 = vmax.f32 %v3818_v20, %v3819_v9  ;;  %v3418_v14 = vrot.slane %v9412_v16, 2 }
 0x58a   : > { %4045 = vst [vmem:[#allocation1 + $0x3] ss:$4 sm:$0xff] %v3727_v56  ;;  %4493 = vrot.lane.b32.xlu0 %v9274_v44, %s5806_s7  ;;  %v9419_v11 = vsel %vm3137_vm8, %v3069_v33, %v3187_v58  ;;  %v9424_v1 = vsel %vm3126_vm7, %v3036_v10, %v3176_v6  ;;  %v3746_v56 = vsel %vm3589_vm14, %v3370_v15, -inf  ;;  %v3419_v55 = vrot.slane %v9412_v16, 4 }
 0x58b   : > { %4154 = vst.msk [vmem:[#allocation2 + $0x50] sm:$0xff] %vm4142_vm0, %v4040_v43  ;;  %v3744_v43 = vsel %vm3589_vm14, %v3375_v54, -inf  ;;  %v3739_v42 = vmax.f32 %v9382_v22, %v3738_v48  ;;  %v3413_v10 = vrot.slane %v9419_v11, 4  ;;  %vm3138_vm10 = vcmp.gt.f32.partialorder %v3072_v28, 0.0 }
 0x58c   : > { %4161 = vst.msk [vmem:[#allocation2 + $0x88] sm:$0x3f] %vm4144_vm9, %v4068_v50  ;;  %v3083_v19 = vpop.f32.mrf.mxu3  ;;  %v3747_v50 = vsel %vm3589_vm14, %v9154_v32, -inf  ;;  %v3745_v7 = vmax.f32 %v3743_v29, %v3744_v43  ;;  %v3188_v32 = vmul.f32 %v7421_v62, %v3072_v28  ;;  %v3379_v30 = vrot.slane %v9424_v1, 2 }
 0x58d   : > { %v3084_v59 = vadd.f32 %v3083_v19, %v7412_v0  ;;  %v3748_v33 = vmax.f32 %v3746_v56, %v3747_v50  ;;  %v3380_v41 = vrot.slane %v9424_v1, 4  ;;  %v3414_v15 = vrot.slane %v9419_v11, 6  ;;  %v4180_v39 = vld [vmem:[#allocation2 + $0x40] ss:$2 sm:$0x7f] }
 0x58e   : > { %v3384_v52 = vrot.slane %v9243_v2, 6  ;;  %v3834_v22 = vsel %vm3589_vm14, %v3418_v14, -inf  ;;  %v3386_v37 = vrot.slane %v9218_v17, 4  ;;  %v9448_v54 = vsel %vm3138_vm10, %v3072_v28, %v3188_v32  ;;  %v4208_v21 = vld [vmem:[#allocation2 + $0x41] ss:$2 sm:$0x7f] }
 0x58f   : > { %v3192_v26 = vmul.f32 %v7421_v62, %v3084_v59  ;;  %v3837_v12 = vsel %vm3589_vm14, %v3419_v55, -inf  ;;  %vm3142_vm11 = vcmp.gt.f32.partialorder %v3084_v59, 0.0  ;;  %v3833_v3 = vsel %vm3589_vm14, %v3413_v10, -inf }
 0x590   : > { %v4077_v45 = vld.sshfl [vmem:[#allocation1 + $0x20] sm:$0xff pattern:$0x73625140]  ;;  %v3081_v2 = vadd.f32 %v9365_v27, %v7412_v0  ;;  %v3836_v58 = vsel %vm3589_vm14, %v3414_v15, -inf  ;;  %v3835_v6 = vmax.f32 %v3833_v3, %v3834_v22  ;;  %v3759_v9 = vsel %vm3589_vm14, %v3384_v52, -inf }
 0x591   : > { %4082 = vst [vmem:[#allocation1 + $0x20] ss:$4 sm:$0xff] %v3814_v4  ;;  %v4049_v40 = vld.sshfl [vmem:[#allocation1] sm:$0xff pattern:$0x73625140]  ;;  %4267 = vrot.lane.b32.xlu1 %v9379_v47, %s5800_s25  ;;  %4265 = vrot.lane.b32.xlu2 %v9282_v35, %s5800_s25  ;;  %v3385_v35 = vrot.slane %v9218_v17, 2  ;;  %v3838_v28 = vmax.f32 %v3836_v58, %v3837_v12  ;;  %v9461_v19 = vsel %vm3142_vm11, %v3084_v59, %v3192_v26 }
 0x592   : > { %4083 = vst [vmem:[#allocation1 + $0x21] ss:$4 sm:$0xff] %v3817_v8  ;;  %4305 = vrot.lane.b32.xlu0 %v9274_v44, %s5799_s24  ;;  %v3420_v44 = vrot.slane %v9412_v16, 6  ;;  %v3839_v23 = vsel %vm3589_vm14, %v9448_v54, -inf  ;;  %v3381_v27 = vrot.slane %v9424_v1, 6  ;;  %v3758_v29 = vsel %vm3589_vm14, %v9424_v1, -inf }
 0x593   : > { %4084 = vst [vmem:[#allocation1 + $0x22] ss:$4 sm:$0xff] %v3820_v5  ;;  %v3762_v43 = vsel %vm3589_vm14, %v9218_v17, -inf  ;;  %v3761_v8 = vsel %vm3589_vm14, %v3379_v30, -inf  ;;  %v9477_v48 = vmax.f32 %v4180_v39, %v4208_v21  ;;  %v3768_v5 = vsel %vm3589_vm14, %v3386_v37, -inf }
 0x594   : > { %4052 = vst [vmem:[#allocation1 + $0x1] ss:$4 sm:$0xff] %v3742_v60  ;;  %v3840_v38 = vsel %vm3589_vm14, %v3420_v44, -inf  ;;  %v3760_v60 = vmax.f32 %v3758_v29, %v3759_v9  ;;  %vm3141_vm15 = vcmp.gt.f32.partialorder %v3081_v2, 0.0  ;;  %v3429_v17 = vrot.slane %v9461_v19, 6 }
 0x595   : > { %4053 = vst [vmem:[#allocation1 + $0x2] ss:$4 sm:$0xff] %v3745_v7  ;;  %v3841_v20 = vmax.f32 %v3839_v23, %v3840_v38  ;;  %v3763_v50 = vmax.f32 %v3761_v8, %v3762_v43  ;;  %v3767_v14 = vsel %vm3589_vm14, %v3381_v27, -inf  ;;  %v3394_v56 = vrot.slane %v9343_v49, 2 }
 0x596   : > { %4051 = vst [vmem:[#allocation1] ss:$4 sm:$0xff] %v3739_v42  ;;  %v3769_v7 = vmax.f32 %v3767_v14, %v3768_v5  ;;  %v9488_v55 = vrot.slane %v9477_v48, 1  ;;  %v3389_v42 = vrot.slane %v9234_v46, 4  ;;  %v3390_v10 = vrot.slane %v9234_v46, 6 }
 0x597   : > { %4054 = vst [vmem:[#allocation1 + $0x3] ss:$4 sm:$0xff] %v3748_v33  ;;  %v3855_v44 = vsel %vm3589_vm14, %v3429_v17, -inf  ;;  %v3395_v33 = vrot.slane %v9343_v49, 4  ;;  %v3396_v30 = vrot.slane %v9343_v49, 6  ;;  %v3780_v49 = vsel %vm3589_vm14, %v3394_v56, -inf }
 0x598   : > { %4156 = vst.msk [vmem:[#allocation2 + $0x60] sm:$0xff] %vm4142_vm0, %v4049_v40  ;;  %v3764_v40 = vsel %vm3589_vm14, %v3380_v41, -inf  ;;  %v3086_v41 = vpop.f32.mrf.mxu3  ;;  %v3057_v52 = vadd.f32 %v9166_v34, %v7412_v0  ;;  %v3779_v22 = vsel %vm3589_vm14, %v3389_v42, -inf  ;;  %v3782_v26 = vsel %vm3589_vm14, %v3390_v10, -inf }
 0x599   : > { %4163 = vst.msk [vmem:[#allocation2 + $0x98] sm:$0x3f] %vm4144_vm9, %v4077_v45  ;;  %4369 = vrot.lane.b32.xlu1 %v9379_v47, %s5802_s27  ;;  %4337 = vrot.lane.b32.xlu2 %v9327_v57, %s5801_s26  ;;  %v3765_v45 = vsel %vm3589_vm14, %v3385_v35, -inf  ;;  %v3191_v47 = vmul.f32 %v7421_v62, %v3081_v2  ;;  %v3087_v15 = vadd.f32 %v3086_v41, %v7412_v0  ;;  %v3391_v12 = vrot.slane %v9306_v18, 2 }
 0x59a   : > { %v4086_v4 = vld.sshfl [vmem:[#allocation1 + $0x20] sm:$0xff pattern:$0x73625140]  ;;  %4307 = vrot.lane.b32.xlu0 %v9371_v51, %s5799_s24  ;;  %v3766_v59 = vmax.f32 %v3764_v40, %v3765_v45  ;;  %v3783_v3 = vsel %vm3589_vm14, %v3395_v33, -inf  ;;  %v3786_v38 = vsel %vm3589_vm14, %v3396_v30, -inf  ;;  %v3781_v34 = vmax.f32 %v3779_v22, %v3780_v49 }
 0x59b   : > { %4091 = vst [vmem:[#allocation1 + $0x20] ss:$4 sm:$0xff] %v3835_v6  ;;  %v9485_v32 = vsel %vm3141_vm15, %v3081_v2, %v3191_v47  ;;  %vm3143_vm2 = vcmp.gt.f32.partialorder %v3087_v15, 0.0  ;;  %v3193_v37 = vmul.f32 %v7421_v62, %v3087_v15  ;;  %v3789_v39 = vsel %vm3589_vm14, %v9300_v36, -inf }
 0x59c   : > { %4092 = vst [vmem:[#allocation1 + $0x21] ss:$4 sm:$0xff] %v3838_v28  ;;  %v3854_v46 = vsel %vm3589_vm14, %v9485_v32, -inf  ;;  %v3424_v2 = vrot.slane %v9485_v32, 2  ;;  %v3425_v58 = vrot.slane %v9485_v32, 4  ;;  %v3183_v21 = vmul.f32 %v7421_v62, %v3057_v52 }
 0x59d   : > { %4093 = vst [vmem:[#allocation1 + $0x22] ss:$4 sm:$0xff] %v3841_v20  ;;  %v3856_v35 = vmax.f32 %v3854_v46, %v3855_v44  ;;  %v9519_v6 = vsel %vm3143_vm2, %v3087_v15, %v3193_v37  ;;  %v9526_v23 = vrot.slane %v9477_v48, 2  ;;  %v3785_v28 = vsel %vm3589_vm14, %v9306_v18, -inf }
 0x59e   : > { %v4058_v1 = vld.sshfl [vmem:[#allocation1] sm:$0xff pattern:$0x73625140]  ;;  %4165 = vst.msk [vmem:[#allocation2 + $0xa8] sm:$0x3f] %vm4144_vm9, %v4086_v4  ;;  %v3430_v9 = vrot.slane %v9519_v6, 2  ;;  %v3784_v27 = vmax.f32 %v3782_v26, %v3783_v3  ;;  %v3787_v29 = vmax.f32 %v3785_v28, %v3786_v38 }
 0x59f   : > { %4060 = vst [vmem:[#allocation1] ss:$4 sm:$0xff] %v3760_v60  ;;  %v3858_v4 = vsel %vm3589_vm14, %v9519_v6, -inf  ;;  %vm3133_vm12 = vcmp.gt.f32.partialorder %v3057_v52, 0.0  ;;  %v3788_v43 = vsel %vm3589_vm14, %v3391_v12, -inf  ;;  %v3857_v20 = vsel %vm3589_vm14, %v3424_v2, -inf }
 0x5a0   : > { %4061 = vst [vmem:[#allocation1 + $0x1] ss:$4 sm:$0xff] %v3763_v50  ;;  %v3861_v8 = vsel %vm3589_vm14, %v3430_v9, -inf  ;;  %v3790_v45 = vmax.f32 %v3788_v43, %v3789_v39  ;;  %v3860_v18 = vsel %vm3589_vm14, %v3425_v58, -inf  ;;  %v3859_v47 = vmax.f32 %v3857_v20, %v3858_v4  ;;  %v3089_v30 = vpop.f32.mrf.mxu3 }
 0x5a1   : > { %4062 = vst [vmem:[#allocation1 + $0x2] ss:$4 sm:$0xff] %v3766_v59  ;;  %4371 = vrot.lane.b32.xlu1 %v9488_v55, %s5802_s27  ;;  %4339 = vrot.lane.b32.xlu2 %v9477_v48, %s5801_s26  ;;  %v3232_v60 = vsel %vm3133_vm12, %v3057_v52, %v3183_v21  ;;  %v3405_v5 = vrot.slane %v9367_v31, 6  ;;  %v3862_v17 = vmax.f32 %v3860_v18, %v3861_v8  ;;  %v4182_v40 = vld [vmem:[#allocation2 + $0x50] ss:$2 sm:$0x7f] }
 0x5a2   : > { %4063 = vst [vmem:[#allocation1 + $0x3] ss:$4 sm:$0xff] %v3769_v7  ;;  %4401 = vrot.lane.b32.xlu0 %v9371_v51, %s5803_s28  ;;  %v3406_v50 = vrot.slane %v9354_v53, 2  ;;  %v3400_v14 = vrot.slane %v3232_v60, 2  ;;  %v3407_v59 = vrot.slane %v9354_v53, 4  ;;  %v3401_v7 = vrot.slane %v3232_v60, 4 }
 0x5a3   : > { %4158 = vst.msk [vmem:[#allocation2 + $0x70] sm:$0xff] %vm4142_vm0, %v4058_v1  ;;  %v4210_v1 = vld [vmem:[#allocation2 + $0x51] ss:$2 sm:$0x7f]  ;;  %v3801_v56 = vsel %vm3589_vm14, %v3405_v5, -inf  ;;  %v3402_v42 = vrot.slane %v3232_v60, 6  ;;  %v3090_v4 = vadd.f32 %v3089_v30, %v7412_v0 }
 0x5a4   : > { %v4095_v51 = vld.sshfl [vmem:[#allocation1 + $0x20] sm:$0xff pattern:$0x73625140]  ;;  %v3804_v31 = vsel %vm3589_vm14, %v9354_v53, -inf  ;;  %v9547_v10 = vmax.f32 %v4182_v40, %v4210_v1  ;;  %v3800_v44 = vsel %vm3589_vm14, %v3232_v60, -inf  ;;  %v3807_v33 = vsel %vm3589_vm14, %v3406_v50, -inf }
 0x5a5   : > { %4167 = vst.msk [vmem:[#allocation2 + $0xb8] sm:$0x3f] %vm4144_vm9, %v4095_v51  ;;  %v3802_v41 = vmax.f32 %v3800_v44, %v3801_v56  ;;  %v3803_v46 = vsel %vm3589_vm14, %v3400_v14, -inf  ;;  %v3810_v15 = vsel %vm3589_vm14, %v3407_v59, -inf  ;;  %v3806_v53 = vsel %vm3589_vm14, %v3401_v7, -inf }
 0x5a6   : > { %4100 = vst [vmem:[#allocation1 + $0x20] ss:$4 sm:$0xff] %v3856_v35  ;;  %v3805_v49 = vmax.f32 %v3803_v46, %v3804_v31  ;;  %v3078_v51 = vadd.f32 %v9321_v25, %v7412_v0  ;;  %v3809_v35 = vsel %vm3589_vm14, %v3402_v42, -inf  ;;  %v3808_v22 = vmax.f32 %v3806_v53, %v3807_v33  ;;  %v4184_v50 = vld [vmem:[#allocation2 + $0x60] ss:$2 sm:$0x7f] }
 0x5a7   : > { %4101 = vst [vmem:[#allocation1 + $0x21] ss:$4 sm:$0xff] %v3859_v47  ;;  %v3415_v26 = vrot.slane %v9448_v54, 2  ;;  %v3410_v12 = vrot.slane %v9361_v13, 4  ;;  %v3416_v3 = vrot.slane %v9448_v54, 4  ;;  %v4395_v2 = vrot.slane %v9547_v10, 2 }
 0x5a8   : > { %4102 = vst [vmem:[#allocation1 + $0x22] ss:$4 sm:$0xff] %v3862_v17  ;;  %v3190_v38 = vmul.f32 %v7421_v62, %v3078_v51  ;;  %v3411_v25 = vrot.slane %v9361_v13, 6  ;;  %vm3140_vm13 = vcmp.gt.f32.partialorder %v3078_v51, 0.0  ;;  %v4363_v39 = vrot.slane %v9547_v10, 1 }
 0x5a9   : > { %v4067_v36 = vld.sshfl [vmem:[#allocation1] sm:$0xff pattern:$0x73625140]  ;;  %4465 = vrot.lane.b32.xlu1 %v9488_v55, %s5805_s30  ;;  %4433 = vrot.lane.b32.xlu2 %v9477_v48, %s5804_s29  ;;  %v3412_v58 = vrot.slane %v9419_v11, 2  ;;  %v3822_v9 = vsel %vm3589_vm14, %v3415_v26, -inf  ;;  %v3825_v13 = vsel %vm3589_vm14, %v3416_v3, -inf  ;;  %v3194_v40 = vmul.f32 %v7421_v62, %v3090_v4 }
 0x5aa   : > { %4069 = vst [vmem:[#allocation1] ss:$4 sm:$0xff] %v3781_v34  ;;  %4403 = vrot.lane.b32.xlu0 %v9526_v23, %s5803_s28  ;;  %v3417_v34 = vrot.slane %v9448_v54, 6  ;;  %v3239_v54 = vsel %vm3140_vm13, %v3078_v51, %v3190_v38  ;;  %v3821_v28 = vsel %vm3589_vm14, %v3410_v12, -inf  ;;  %v3831_v20 = vsel %vm3589_vm14, %v9412_v16, -inf }
 0x5ab   : > { %4070 = vst [vmem:[#allocation1 + $0x1] ss:$4 sm:$0xff] %v3784_v27  ;;  %v3824_v27 = vsel %vm3589_vm14, %v3411_v25, -inf  ;;  %v3830_v43 = vsel %vm3589_vm14, %v3412_v58, -inf  ;;  %v3421_v18 = vrot.slane %v3239_v54, 2  ;;  %v3422_v47 = vrot.slane %v3239_v54, 4 }
 0x5ac   : > { %4071 = vst [vmem:[#allocation1 + $0x2] ss:$4 sm:$0xff] %v3787_v29  ;;  %v3823_v29 = vmax.f32 %v3821_v28, %v3822_v9  ;;  %v3826_v8 = vmax.f32 %v3824_v27, %v3825_v13  ;;  %v3423_v60 = vrot.slane %v3239_v54, 6  ;;  %v3426_v17 = vrot.slane %v9485_v32, 6 }
 0x5ad   : > { %4072 = vst [vmem:[#allocation1 + $0x3] ss:$4 sm:$0xff] %v3790_v45  ;;  %v3832_v1 = vmax.f32 %v3830_v43, %v3831_v20  ;;  %vm3144_vm1 = vcmp.gt.f32.partialorder %v3090_v4, 0.0  ;;  %v3842_v59 = vsel %vm3589_vm14, %v3239_v54, -inf  ;;  %v3427_v32 = vrot.slane %v9461_v19, 2 }
 0x5ae   : > { %4160 = vst.msk [vmem:[#allocation2 + $0x80] sm:$0xff] %vm4142_vm0, %v4067_v36  ;;  %v3828_v36 = vsel %vm3589_vm14, %v3417_v34, -inf  ;;  %v3848_v7 = vsel %vm3589_vm14, %v3422_v47, -inf  ;;  %v9600_v56 = vsel %vm3144_vm1, %v3090_v4, %v3194_v40  ;;  %v3851_v33 = vsel %vm3589_vm14, %v3423_v60, -inf }
 0x5af   : > { %v4104_v37 = vld.sshfl [vmem:[#allocation1 + $0x20] sm:$0xff pattern:$0x73625140]  ;;  %v3843_v30 = vsel %vm3589_vm14, %v3426_v17, -inf  ;;  %v3845_v46 = vsel %vm3589_vm14, %v3421_v18, -inf  ;;  %v3431_v47 = vrot.slane %v9519_v6, 4 }
 0x5b0   : > { %4169 = vst.msk [vmem:[#allocation2 + $0xc8] sm:$0x3f] %vm4144_vm9, %v4104_v37  ;;  %v3092_v21 = vpop.f32.mrf.mxu3  ;;  %v4214_v51 = vld [vmem:[#allocation2 + $0x71] ss:$2 sm:$0x7f]  ;;  %v3844_v12 = vmax.f32 %v3842_v59, %v3843_v30  ;;  %vm4752_vm5 = vcmask 1041408  }
 0x5b1   : > { %4269 = vrot.lane.b32.xlu1 %v9488_v55, %s5800_s25  ;;  %4435 = vrot.lane.b32.xlu2 %v9547_v10, %s5804_s29  ;;  %v3811_v55 = vmax.f32 %v3809_v35, %v3810_v15  ;;  %v3093_v16 = vadd.f32 %v3092_v21, %v7412_v0  ;;  %v3435_v35 = vrot.slane %v9600_v56, 6  ;;  %v3863_v59 = vsel %vm3589_vm14, %v3431_v47, -inf }
 0x5b2   : > { %4497 = vrot.lane.b32.xlu0 %v9526_v23, %s5806_s7  ;;  %v3869_v30 = vsel %vm3589_vm14, %v9600_v56, -inf  ;;  %vm4555_vm6 = vcmask 326656   ;;  %vm4566_vm7 = vcmask 408576   ;;  %vm4577_vm8 = vcmask 490496  }
 0x5b3   : > { %v3195_v15 = vmul.f32 %v7421_v62, %v3093_v16  ;;  %vm3145_vm4 = vcmp.gt.f32.partialorder %v3093_v16, 0.0  ;;  %v3878_v4 = vsel %vm3589_vm14, %v3435_v35, -inf  ;;  %v4668_v35 = vld [vmem:[%s10450_s2 + $0x40] sm:$0xff]  ;;  %vm4588_vm10 = vcmask 572416  }
 0x5b4   : > { %v4076_v52 = vld.sshfl [vmem:[#allocation1] sm:$0xff pattern:$0x73625140]  ;;  %vm4599_vm11 = vcmask 654336   ;;  %vm4737_vm15 = vcmask 736256  }
 0x5b5   : > { %4078 = vst [vmem:[#allocation1] ss:$4 sm:$0xff] %v3802_v41  ;;  %v3428_v41 = vrot.slane %v9461_v19, 4  ;;  %v4188_v26 = vld [vmem:[#allocation2 + $0x80] ss:$2 sm:$0x7f]  ;;  %v3244_v58 = vsel %vm3145_vm4, %v3093_v16, %v3195_v15 }
 0x5b6   : > { %4079 = vst [vmem:[#allocation1 + $0x1] ss:$4 sm:$0xff] %v3805_v49  ;;  %v3849_v49 = vsel %vm3589_vm14, %v3427_v32, -inf  ;;  %v3881_v43 = vsel %vm3589_vm14, %v3244_v58, -inf  ;;  %v3438_v60 = vrot.slane %v3244_v58, 6  ;;  %v4670_v15 = vld [vmem:[%s10450_s2 + $0x50] sm:$0xff] }
 0x5b7   : > { %4080 = vst [vmem:[#allocation1 + $0x2] ss:$4 sm:$0xff] %v3808_v22  ;;  %v3850_v34 = vmax.f32 %v3848_v7, %v3849_v49 }
 0x5b8   : > { %4081 = vst [vmem:[#allocation1 + $0x3] ss:$4 sm:$0xff] %v3811_v55  ;;  %v3870_v32 = vsel %vm3589_vm14, %v3438_v60, -inf }
 0x5b9   : > { %4162 = vst.msk [vmem:[#allocation2 + $0x90] sm:$0xff] %vm4142_vm0, %v4076_v52  ;;  %4499 = vrot.lane.b32.xlu1 %v4395_v2, %s5806_s7  ;;  %4467 = vrot.lane.b32.xlu2 %v4363_v39, %s5805_s30  ;;  %v4186_v52 = vld [vmem:[#allocation2 + $0x70] ss:$2 sm:$0x7f] }
 0x5ba   : > { %4309 = vrot.lane.b32.xlu0 %v9526_v23, %s5799_s24  ;;  %v3827_v23 = vsel %vm3589_vm14, %v9419_v11, -inf  ;;  %v4212_v11 = vld [vmem:[#allocation2 + $0x61] ss:$2 sm:$0x7f] }
 0x5bb   : > { %v3829_v5 = vmax.f32 %v3827_v23, %v3828_v36  ;;  %v4233_v31 = vmax.f32 %v4184_v50, %v4212_v11  ;;  %v9629_v36 = vmax.f32 %v4186_v52, %v4214_v51  ;;  %v3433_v50 = vrot.slane %v9600_v56, 2 }
 0x5bd   : > { %v4459_v22 = vrot.slane %v4233_v31, 1  ;;  %v4491_v55 = vrot.slane %v4233_v31, 2  ;;  %v4296_v40 = vrot.slane %v9629_v36, 2  ;;  %v4256_v11 = vrot.slane %v9629_v36, 1 }
 0x5be   : > { %v3872_v52 = vsel %vm3589_vm14, %v3433_v50, -inf  ;;  %v4660_v50 = vld [vmem:[%s10450_s2] sm:$0xff] }
 0x5bf   : > { %v4085_v45 = vld.sshfl [vmem:[#allocation1] sm:$0xff pattern:$0x73625140] }
 0x5c0   : > { %4087 = vst [vmem:[#allocation1] ss:$4 sm:$0xff] %v3823_v29  ;;  %v3095_v14 = vpop.f32.mrf.mxu3  ;;  %v3436_v29 = vrot.slane %v3244_v58, 2 }
 0x5c1   : > { %4088 = vst [vmem:[#allocation1 + $0x1] ss:$4 sm:$0xff] %v3826_v8  ;;  %4405 = vrot.lane.b32.xlu1 %v4395_v2, %s5803_s28  ;;  %4341 = vrot.lane.b32.xlu2 %v9547_v10, %s5801_s26  ;;  %v3096_v44 = vadd.f32 %v3095_v14, %v7412_v0  ;;  %v3846_v10 = vsel %vm3589_vm14, %v9461_v19, -inf  ;;  %v3434_v0 = vrot.slane %v9600_v56, 4  ;;  %v4671_v14 = vld [vmem:[%s10450_s2 + $0x58] sm:$0x3] }
 0x5c2   : > { %4089 = vst [vmem:[#allocation1 + $0x2] ss:$4 sm:$0xff] %v3829_v5  ;;  %4373 = vrot.lane.b32.xlu0 %v4363_v39, %s5802_s27  ;;  %v4216_v19 = vld [vmem:[#allocation2 + $0x81] ss:$2 sm:$0x7f]  ;;  %v3852_v39 = vsel %vm3589_vm14, %v3428_v41, -inf  ;;  %5661 = vmatpush.msk.msrb.mxu1 %vm4752_vm5, %v4671_v14 }
 0x5c3   : > { %4090 = vst [vmem:[#allocation1 + $0x3] ss:$4 sm:$0xff] %v3832_v1  ;;  %v9602_v42 = vpop.permute.xlu2 %4263  ;;  %vm3146_vm3 = vcmp.gt.f32.partialorder %v3096_v44, 0.0  ;;  %v3196_v53 = vmul.f32 %v7421_v62, %v3096_v44  ;;  %v3847_v62 = vmax.f32 %v3845_v46, %v3846_v10  ;;  %v3875_v21 = vsel %vm3589_vm14, %v3434_v0, -inf }
 0x5c4   : > { %4164 = vst.msk [vmem:[#allocation2 + $0xa0] sm:$0xff] %vm4142_vm0, %v4085_v45  ;;  %v9627_v28 = vmax.f32 %v4188_v26, %v4216_v19  ;;  %v3853_v23 = vmax.f32 %v3851_v33, %v3852_v39  ;;  %v3437_v45 = vrot.slane %v3244_v58, 4  ;;  %v3432_v5 = vrot.slane %v9519_v6, 6  ;;  %v4190_v33 = vld [vmem:[#allocation2 + $0x90] ss:$2 sm:$0x7f]  ;;  %4761 = vmatpush.msrb.mxu1 %v4670_v15 }
 0x5c5   : > { %v3245_v37 = vsel %vm3146_vm3, %v3096_v44, %v3196_v53  ;;  %v3864_v1 = vsel %vm3589_vm14, %v3436_v29, -inf  ;;  %v4218_v10 = vld [vmem:[#allocation2 + $0x91] ss:$2 sm:$0x7f]  ;;  %v4669_v53 = vld [vmem:[%s10450_s2 + $0x48] sm:$0xff]  ;;  %v3871_v0 = vmax.f32 %v3869_v30, %v3870_v32 }
 0x5c6   : > { %v3439_v3 = vrot.slane %v3245_v37, 2  ;;  %v3440_v38 = vrot.slane %v3245_v37, 4  ;;  %v3441_v2 = vrot.slane %v3245_v37, 6  ;;  %v4257_v17 = vrot.slane %v9627_v28, 1  ;;  %4762 = vmatpush.msrb.mxu1 %v4669_v53  ;;  %v4667_v26 = vld [vmem:[%s10450_s2 + $0x38] sm:$0xff] }
 0x5c7   : > { %v3867_v16 = vsel %vm3589_vm14, %v3437_v45, -inf  ;;  %v3866_v7 = vsel %vm3589_vm14, %v3432_v5, -inf  ;;  %v3873_v44 = vsel %vm3589_vm14, %v3245_v37, -inf  ;;  %v9667_v51 = vmax.f32 %v4190_v33, %v4218_v10  ;;  %v4661_v5 = vld [vmem:[%s10450_s2 + $0x8] sm:$0xff] }
 0x5c8   : > { %v3876_v9 = vsel %vm3589_vm14, %v3439_v3, -inf  ;;  %v3879_v13 = vsel %vm3589_vm14, %v3440_v38, -inf  ;;  %v3882_v54 = vsel %vm3589_vm14, %v3441_v2, -inf  ;;  %v3868_v41 = vmax.f32 %v3866_v7, %v3867_v16  ;;  %4763 = vmatpush.msrb.mxu1 %v4668_v35  ;;  %v4666_v2 = vld [vmem:[%s10450_s2 + $0x30] sm:$0xff] }
 0x5c9   : > { %4501 = vrot.lane.b32.xlu1 %v4491_v55, %s5806_s7  ;;  %4437 = vrot.lane.b32.xlu2 %v4233_v31, %s5804_s29  ;;  %v3877_v27 = vmax.f32 %v3875_v21, %v3876_v9  ;;  %v3880_v8 = vmax.f32 %v3878_v4, %v3879_v13  ;;  %v3883_v18 = vmax.f32 %v3881_v43, %v3882_v54  ;;  %v4297_v55 = vrot.slane %v9627_v28, 2 }
 0x5ca   : > { %v4094_v25 = vld.sshfl [vmem:[#allocation1] sm:$0xff pattern:$0x73625140]  ;;  %4469 = vrot.lane.b32.xlu0 %v4459_v22, %s5805_s30  ;;  %v3865_v31 = vmax.f32 %v3863_v59, %v3864_v1  ;;  %v3874_v56 = vmax.f32 %v3872_v52, %v3873_v44  ;;  %4764 = vmatpush.msrb.mxu1 %v4667_v26  ;;  %v4258_v3 = vrot.slane %v9667_v51, 1  ;;  %v4298_v9 = vrot.slane %v9667_v51, 2 }
 0x5cb   : > { %4166 = vst.msk [vmem:[#allocation2 + $0xb0] sm:$0xff] %vm4142_vm0, %v4094_v25  ;;  %v9632_v20 = vpop.permute.xlu2 %4333  ;;  %v4192_v39 = vld [vmem:[#allocation2 + $0xa0] ss:$2 sm:$0x7f]  ;;  %vm4533_vm14 = vcmask 162816   ;;  %v4524_v45 = vsel %vm4142_vm0, %v9156_v63, %v9602_v42 }
 0x5cc   : > { %4096 = vst [vmem:[#allocation1] ss:$4 sm:$0xff] %v3844_v12  ;;  %4765 = vmatpush.msrb.mxu1 %v4666_v2  ;;  %v4220_v58 = vld [vmem:[#allocation2 + $0xa1] ss:$2 sm:$0x7f] }
 0x5cd   : > { %4097 = vst [vmem:[#allocation1 + $0x1] ss:$4 sm:$0xff] %v3847_v62  ;;  %v9692_v21 = vmax.f32 %v4192_v39, %v4220_v58 }
 0x5ce   : > { %4098 = vst [vmem:[#allocation1 + $0x2] ss:$4 sm:$0xff] %v3850_v34 }
 0x5cf   : > { %4099 = vst [vmem:[#allocation1 + $0x3] ss:$4 sm:$0xff] %v3853_v23  ;;  %v9644_v6 = vpop.permute.xlu1 %4261  ;;  %v4302_v37 = vpop.permute.xlu0 %4301  ;;  %v4664_v23 = vld [vmem:[%s10450_s2 + $0x20] sm:$0xff]  ;;  %v9712_v43 = vrot.slane %v9692_v21, 1 }
 0x5d0   : > { %4109 = vst [vmem:[#allocation1 + $0x20] ss:$4 sm:$0xff] %v3877_v27  ;;  %v4665_v27 = vld [vmem:[%s10450_s2 + $0x28] sm:$0xff]  ;;  %v4523_v29 = vsel %vm4142_vm0, %v9080_v24, %v9644_v6  ;;  %v4662_v24 = vld [vmem:[%s10450_s2 + $0x10] sm:$0xff] }
 0x5d1   : > { %4110 = vst [vmem:[#allocation1 + $0x21] ss:$4 sm:$0xff] %v3880_v8  ;;  %4311 = vrot.lane.b32.xlu1 %v4296_v40, %s5799_s24  ;;  %4271 = vrot.lane.b32.xlu2 %v4256_v11, %s5800_s25  ;;  %v4663_v8 = vld [vmem:[%s10450_s2 + $0x18] sm:$0xff] }
 0x5d2   : > { %4273 = vrot.lane.b32.xlu0 %v4257_v17, %s5800_s25  ;;  %4111 = vst [vmem:[#allocation1 + $0x22] ss:$4 sm:$0xff] %v3883_v18  ;;  %4766 = vmatpush.msrb.mxu1 %v4665_v27  ;;  %v4534_v18 = vsel %vm4533_vm14, %v4523_v29, %v4302_v37 }
 0x5d3   : > { %v9657_v46 = vpop.permute.xlu2 %4367 }
 0x5d4   : > { %4767 = vmatpush.msrb.mxu1 %v4664_v23 }
 0x5d6   : > { %v4103_v49 = vld.sshfl [vmem:[#allocation1] sm:$0xff pattern:$0x73625140]  ;;  %4768 = vmatpush.msrb.mxu1 %v4663_v8 }
 0x5d7   : > { %4168 = vst.msk [vmem:[#allocation2 + $0xc0] sm:$0xff] %vm4142_vm0, %v4103_v49 }
 0x5d8   : > { %4105 = vst [vmem:[#allocation1] ss:$4 sm:$0xff] %v3865_v31  ;;  %4769 = vmatpush.msrb.mxu1 %v4662_v24 }
 0x5d9   : > { %4106 = vst [vmem:[#allocation1 + $0x1] ss:$4 sm:$0xff] %v3868_v41  ;;  %v4113_v22 = vld.sshfl [vmem:[#allocation1 + $0x20] sm:$0xff pattern:$0x73625140]  ;;  %4345 = vrot.lane.b32.xlu1 %v9667_v51, %s5801_s26  ;;  %4313 = vrot.lane.b32.xlu2 %v4297_v55, %s5799_s24 }
 0x5da   : > { %4107 = vst [vmem:[#allocation1 + $0x2] ss:$4 sm:$0xff] %v3871_v0  ;;  %4343 = vrot.lane.b32.xlu0 %v9627_v28, %s5801_s26  ;;  %4770 = vmatpush.msrb.mxu1 %v4661_v5  ;;  %v4194_v0 = vld [vmem:[#allocation2 + $0xb0] ss:$2 sm:$0x7f] }
 0x5db   : > { %4108 = vst [vmem:[#allocation1 + $0x3] ss:$4 sm:$0xff] %v3874_v56  ;;  %v4304_v12 = vpop.permute.xlu1 %4303  ;;  %v9682_v19 = vpop.permute.xlu2 %4429  ;;  %v4222_v56 = vld [vmem:[#allocation2 + $0xb1] ss:$2 sm:$0x7f] }
 0x5dc   : > { %4171 = vst.msk [vmem:[#allocation2 + $0xd8] sm:$0x3f] %vm4144_vm9, %v4113_v22  ;;  %v4535_v47 = vsel %vm4533_vm14, %v4524_v45, %v4304_v12  ;;  %vm4544_vm9 = vcmask 244736   ;;  %4771 = vmatpush.msrb.mxu1 %v4660_v50 }
 0x5dd   : > { %v4545_v40 = vsel %vm4544_vm9, %v4534_v18, %v9632_v20  ;;  %v4299_v20 = vrot.slane %v9692_v21, 2 }
 0x5e1   : > { %4407 = vrot.lane.b32.xlu1 %v4297_v55, %s5803_s28  ;;  %4375 = vrot.lane.b32.xlu2 %v4257_v17, %s5802_s27  ;;  %v9763_v55 = vmax.f32 %v4194_v0, %v4222_v56 }
 0x5e2   : > { %v4112_v38 = vld.sshfl [vmem:[#allocation1] sm:$0xff pattern:$0x73625140]  ;;  %4377 = vrot.lane.b32.xlu0 %v4258_v3, %s5802_s27 }
 0x5e3   : > { %4170 = vst.msk [vmem:[#allocation2 + $0xd0] sm:$0xff] %vm4142_vm0, %v4112_v38  ;;  %v4366_v62 = vpop.permute.xlu1 %4365  ;;  %v4464_v34 = vpop.permute.xlu2 %4463  ;;  %v4260_v37 = vrot.slane %v9763_v55, 1  ;;  %v4300_v12 = vrot.slane %v9763_v55, 2 }
 0x5e4   : > { %v4336_v25 = vpop.permute.xlu0 %4335  ;;  %v4556_v1 = vsel %vm4555_vm6, %v4545_v40, %v4366_v62 }
 0x5e5   : > { %v4546_v60 = vsel %vm4544_vm9, %v4535_v47, %v4336_v25 }
 0x5e6   : > { %v4557_v11 = vsel %vm4555_vm6, %v4546_v60, %v9657_v46 }
 0x5e9   : > { %4441 = vrot.lane.b32.xlu1 %v9692_v21, %s5804_s29  ;;  %4409 = vrot.lane.b32.xlu2 %v4298_v9, %s5803_s28 }
 0x5ea   : > { %4439 = vrot.lane.b32.xlu0 %v9667_v51, %s5804_s29 }
 0x5eb   : > { %v4400_v54 = vpop.permute.xlu1 %4399  ;;  %v9700_v4 = vpop.permute.xlu2 %4265 }
 0x5ec   : > { %v4398_v13 = vpop.permute.xlu0 %4397  ;;  %v4568_v6 = vsel %vm4566_vm7, %v4557_v11, %v4400_v54  ;;  %v4525_v27 = vsel %vm4142_vm0, %v9214_v61, %v9700_v4  ;;  %v4226_v11 = vld [vmem:[#allocation2 + $0xd1] ss:$2 sm:$0x7f] }
 0x5ed   : > { %v4567_v16 = vsel %vm4566_vm7, %v4556_v1, %v4398_v13  ;;  %v4224_v13 = vld [vmem:[#allocation2 + $0xc1] ss:$2 sm:$0x7f]  ;;  %v4198_v1 = vld [vmem:[#allocation2 + $0xd0] ss:$2 sm:$0x7f] }
 0x5ee   : > { %v4578_v59 = vsel %vm4577_vm8, %v4567_v16, %v9682_v19 }
 0x5f1   : > { %4503 = vrot.lane.b32.xlu1 %v4298_v9, %s5806_s7  ;;  %4471 = vrot.lane.b32.xlu2 %v4258_v3, %s5805_s30 }
 0x5f2   : > { %4473 = vrot.lane.b32.xlu0 %v9712_v43, %s5805_s30 }
 0x5f3   : > { %v4462_v42 = vpop.permute.xlu1 %4461  ;;  %v9733_v17 = vpop.permute.xlu2 %4337 }
 0x5f4   : > { %v4432_v63 = vpop.permute.xlu0 %4431  ;;  %v4589_v32 = vsel %vm4588_vm10, %v4578_v59, %v4462_v42 }
 0x5f5   : > { %v4579_v14 = vsel %vm4577_vm8, %v4568_v6, %v4432_v63 }
 0x5f6   : > { %v4590_v44 = vsel %vm4588_vm10, %v4579_v14, %v4464_v34 }
 0x5f9   : > { %4315 = vrot.lane.b32.xlu1 %v4298_v9, %s5799_s24  ;;  %4505 = vrot.lane.b32.xlu2 %v4299_v20, %s5806_s7  ;;  %v4196_v9 = vld [vmem:[#allocation2 + $0xc0] ss:$2 sm:$0x7f] }
 0x5fa   : > { %4275 = vrot.lane.b32.xlu0 %v4258_v3, %s5800_s25  ;;  %v4239_v54 = vmax.f32 %v4196_v9, %v4224_v13 }
 0x5fb   : > { %v4496_v31 = vpop.permute.xlu1 %4495  ;;  %v9756_v41 = vpop.permute.xlu2 %4339 }
 0x5fc   : > { %v4494_v7 = vpop.permute.xlu0 %4493  ;;  %v4601_v30 = vsel %vm4599_vm11, %v4590_v44, %v4496_v31  ;;  %v4364_v18 = vrot.slane %v4239_v54, 1  ;;  %v4396_v31 = vrot.slane %v4239_v54, 2 }
 0x5fd   : > { %v4600_v33 = vsel %vm4599_vm11, %v4589_v32, %v4494_v7  ;;  %4683 = vst [vmem:[#allocation1 + $0x5] ss:$9 sm:$0xff] %v4601_v30  ;;  %v4624_v49 = vrot.slane %v4601_v30, 1  ;;  %v4625_v52 = vrot.slane %v4601_v30, 2  ;;  %v4626_v19 = vrot.slane %v4601_v30, 3 }
 0x5fe   : > { %v4620_v46 = vrot.slane %v4600_v33, 1  ;;  %v4621_v10 = vrot.slane %v4600_v33, 2  ;;  %v4622_v15 = vrot.slane %v4600_v33, 3  ;;  %4673 = vst [vmem:[#allocation1] ss:$9 sm:$0xff] %v4600_v33  ;;  %v4623_v53 = vrot.slane %v4600_v33, 4 }
 0x5ff   : > { %4685 = vst [vmem:[#allocation1 + $0x6] ss:$9 sm:$0xff] %v4624_v49  ;;  %v4627_v3 = vrot.slane %v4601_v30, 4  ;;  %v4240_v32 = vmax.f32 %v4198_v1, %v4226_v11 }
 0x600   : > { %4675 = vst [vmem:[#allocation1 + $0x1] ss:$9 sm:$0xff] %v4620_v46 }
 0x601   : > { %4677 = vst [vmem:[#allocation1 + $0x2] ss:$9 sm:$0xff] %v4621_v10  ;;  %4411 = vrot.lane.b32.xlu1 %v4299_v20, %s5803_s28  ;;  %4347 = vrot.lane.b32.xlu2 %v9692_v21, %s5801_s26  ;;  %v4460_v10 = vrot.slane %v4240_v32, 1 }
 0x602   : > { %4679 = vst [vmem:[#allocation1 + $0x3] ss:$9 sm:$0xff] %v4622_v15  ;;  %4379 = vrot.lane.b32.xlu0 %v9712_v43, %s5802_s27 }
 0x603   : > { %4681 = vst [vmem:[#allocation1 + $0x4] ss:$9 sm:$0xff] %v4623_v53  ;;  %v4268_v22 = vpop.permute.xlu1 %4267  ;;  %v4434_v26 = vpop.permute.xlu2 %4433 }
 0x604   : > { %v4306_v35 = vpop.permute.xlu0 %4305  ;;  %4687 = vst [vmem:[#allocation1 + $0x7] ss:$9 sm:$0xff] %v4625_v52  ;;  %v4526_v61 = vsel %vm4142_vm0, %v9327_v57, %v4268_v22 }
 0x605   : > { %v4536_v23 = vsel %vm4533_vm14, %v4525_v27, %v4306_v35 }
 0x606   : > { %v4547_v45 = vsel %vm4544_vm9, %v4536_v23, %v9733_v17 }
 0x609   : > { %4507 = vrot.lane.b32.xlu1 %v4300_v12, %s5806_s7  ;;  %4443 = vrot.lane.b32.xlu2 %v9763_v55, %s5804_s29 }
 0x60a   : > { %4475 = vrot.lane.b32.xlu0 %v4260_v37, %s5805_s30 }
 0x60b   : > { %v4688_v38 = vld [vmem:[#allocation1] sm:$0xff]  ;;  %v4370_v25 = vpop.permute.xlu1 %4369  ;;  %v4436_v62 = vpop.permute.xlu2 %4435 }
 0x60c   : > { %v4308_v2 = vpop.permute.xlu0 %4307  ;;  %4689 = vst [vmem:[#allocation1] ss:$9 sm:$0xff] %v4626_v19  ;;  %5662 = vmatmul.msk.f32.vlgmr.msrb.gmra.mxu1 %vm4737_vm15, %v4688_v38  ;;  %v4558_v24 = vsel %vm4555_vm6, %v4547_v45, %v4370_v25 }
 0x60d   : > { %4690 = vst [vmem:[#allocation1 + $0x1] ss:$9 sm:$0xff] %v4627_v3  ;;  %v4537_v47 = vsel %vm4533_vm14, %v4526_v61, %v4308_v2  ;;  %v4492_v3 = vrot.slane %v4240_v32, 2 }
 0x60e   : > { %v4548_v63 = vsel %vm4544_vm9, %v4537_v47, %v9756_v41 }
 0x611   : > { %4317 = vrot.lane.b32.xlu1 %v4299_v20, %s5799_s24  ;;  %4277 = vrot.lane.b32.xlu2 %v9712_v43, %s5800_s25 }
 0x612   : > { %4279 = vrot.lane.b32.xlu0 %v4260_v37, %s5800_s25 }
 0x613   : > { %v4372_v39 = vpop.permute.xlu1 %4371  ;;  %v4468_v58 = vpop.permute.xlu2 %4467 }
 0x614   : > { %v4402_v34 = vpop.permute.xlu0 %4401  ;;  %v4559_v17 = vsel %vm4555_vm6, %v4548_v63, %v4372_v39 }
 0x615   : > { %v4569_v4 = vsel %vm4566_vm7, %v4558_v24, %v4402_v34 }
 0x616   : > { %v4580_v60 = vsel %vm4577_vm8, %v4569_v4, %v4434_v26 }
 0x619   : > { %4351 = vrot.lane.b32.xlu1 %v4239_v54, %s5801_s26  ;;  %4319 = vrot.lane.b32.xlu2 %v4300_v12, %s5799_s24 }
 0x61a   : > { %4349 = vrot.lane.b32.xlu0 %v9763_v55, %s5801_s26  ;;  %s5807_s26 = smov 16  }
 0x61b   : > { %v4466_v43 = vpop.permute.xlu1 %4465  ;;  %v4342_v8 = vpop.permute.xlu2 %4341 }
 0x61c   : > { %v4404_v29 = vpop.permute.xlu0 %4403  ;;  %v4591_v42 = vsel %vm4588_vm10, %v4580_v60, %v4466_v43 }
 0x61d   : > { %v4570_v16 = vsel %vm4566_vm7, %v4559_v17, %v4404_v29 }
 0x61e   : > { %v4581_v7 = vsel %vm4577_vm8, %v4570_v16, %v4436_v62 }
 0x61f   : > { %v4592_v30 = vsel %vm4588_vm10, %v4581_v7, %v4468_v58 }
 0x621   : > { %4413 = vrot.lane.b32.xlu1 %v4300_v12, %s5803_s28  ;;  %4381 = vrot.lane.b32.xlu2 %v4260_v37, %s5802_s27 }
 0x622   : > { %4383 = vrot.lane.b32.xlu0 %v4364_v18, %s5802_s27  ;;  %s5808_s27 = smov 32  }
 0x623   : > { %v4270_v57 = vpop.permute.xlu1 %4269  ;;  %v4438_v50 = vpop.permute.xlu2 %4437 }
 0x624   : > { %v4498_v5 = vpop.permute.xlu0 %4497  ;;  %v4527_v15 = vsel %vm4142_vm0, %v9477_v48, %v4270_v57 }
 0x625   : > { %v4602_v40 = vsel %vm4599_vm11, %v4591_v42, %v4498_v5 }
 0x626   : > { %v4628_v6 = vrot.slane %v4602_v40, 1  ;;  %v4629_v14 = vrot.slane %v4602_v40, 2  ;;  %v4630_v20 = vrot.slane %v4602_v40, 3  ;;  %4691 = vst [vmem:[#allocation1 + $0x2] ss:$9 sm:$0xff] %v4602_v40  ;;  %v4631_v59 = vrot.slane %v4602_v40, 4 }
 0x628   : > { %4692 = vst [vmem:[#allocation1 + $0x3] ss:$9 sm:$0xff] %v4628_v6 }
 0x629   : > { %4693 = vst [vmem:[#allocation1 + $0x4] ss:$9 sm:$0xff] %v4629_v14  ;;  %4447 = vrot.lane.b32.xlu1 %v4240_v32, %s5804_s29  ;;  %4415 = vrot.lane.b32.xlu2 %v4396_v31, %s5803_s28  ;;  %s5809_s28 = smov 48  }
 0x62a   : > { %4694 = vst [vmem:[#allocation1 + $0x5] ss:$9 sm:$0xff] %v4630_v20  ;;  %4445 = vrot.lane.b32.xlu0 %v4239_v54, %s5804_s29  ;;  %s5810_s29 = smov 64  }
 0x62b   : > { %4695 = vst [vmem:[#allocation1 + $0x6] ss:$9 sm:$0xff] %v4631_v59  ;;  %v4500_v33 = vpop.permute.xlu1 %4499  ;;  %v4272_v46 = vpop.permute.xlu2 %4271 }
 0x62c   : > { %v4310_v44 = vpop.permute.xlu0 %4309  ;;  %v4603_v41 = vsel %vm4599_vm11, %v4592_v30, %v4500_v33  ;;  %v4528_v47 = vsel %vm4142_vm0, %v9629_v36, %v4272_v46 }
 0x62d   : > { %4696 = vst [vmem:[#allocation1 + $0x7] ss:$9 sm:$0xff] %v4603_v41  ;;  %v4538_v53 = vsel %vm4533_vm14, %v4527_v15, %v4310_v44  ;;  %v4632_v49 = vrot.slane %v4603_v41, 1  ;;  %v4633_v56 = vrot.slane %v4603_v41, 2  ;;  %v4634_v37 = vrot.slane %v4603_v41, 3 }
 0x62e   : > { %v4549_v22 = vsel %vm4544_vm9, %v4538_v53, %v4342_v8  ;;  %v4635_v12 = vrot.slane %v4603_v41, 4 }
 0x631   : > { %4509 = vrot.lane.b32.xlu1 %v4396_v31, %s5806_s7  ;;  %4477 = vrot.lane.b32.xlu2 %v4364_v18, %s5805_s30 }
 0x632   : > { %4479 = vrot.lane.b32.xlu0 %v4460_v10, %s5805_s30  ;;  %s5811_s30 = smov 96  }
 0x633   : > { %v4406_v52 = vpop.permute.xlu1 %4405  ;;  %v4314_v26 = vpop.permute.xlu2 %4313 }
 0x634   : > { %v4374_v0 = vpop.permute.xlu0 %4373  ;;  %v4697_v35 = vld [vmem:[#allocation1] sm:$0xff] }
 0x635   : > { %4698 = vst [vmem:[#allocation1] ss:$9 sm:$0xff] %v4632_v49  ;;  %v4560_v48 = vsel %vm4555_vm6, %v4549_v22, %v4374_v0  ;;  %5663 = vmatmul.msk.f32.gmra.mxu1 %vm4737_vm15, %v4697_v35 }
 0x636   : > { %4699 = vst [vmem:[#allocation1 + $0x1] ss:$9 sm:$0xff] %v4633_v56  ;;  %v4571_v19 = vsel %vm4566_vm7, %v4560_v48, %v4406_v52 }
 0x637   : > { %4700 = vst [vmem:[#allocation1 + $0x2] ss:$9 sm:$0xff] %v4634_v37  ;;  %v4582_v38 = vsel %vm4577_vm8, %v4571_v19, %v4438_v50 }
 0x638   : > { %4701 = vst [vmem:[#allocation1 + $0x3] ss:$9 sm:$0xff] %v4635_v12 }
 0x639   : > { %4511 = vrot.lane.b32.xlu2 %v4492_v3, %s5806_s7 }
 0x63b   : > { %v4502_v25 = vpop.permute.xlu1 %4501  ;;  %v4376_v34 = vpop.permute.xlu2 %4375 }
 0x63c   : > { %v4470_v2 = vpop.permute.xlu0 %4469 }
 0x63d   : > { %v4593_v62 = vsel %vm4588_vm10, %v4582_v38, %v4470_v2 }
 0x63e   : > { %v4604_v39 = vsel %vm4599_vm11, %v4593_v62, %v4502_v25 }
 0x63f   : > { %v4636_v58 = vrot.slane %v4604_v39, 1  ;;  %v4637_v9 = vrot.slane %v4604_v39, 2  ;;  %v4638_v13 = vrot.slane %v4604_v39, 3  ;;  %4702 = vst [vmem:[#allocation1 + $0x4] ss:$9 sm:$0xff] %v4604_v39  ;;  %v4639_v29 = vrot.slane %v4604_v39, 4 }
 0x641   : > { %4703 = vst [vmem:[#allocation1 + $0x5] ss:$9 sm:$0xff] %v4636_v58 }
 0x642   : > { %4704 = vst [vmem:[#allocation1 + $0x6] ss:$9 sm:$0xff] %v4637_v9 }
 0x643   : > { %4705 = vst [vmem:[#allocation1 + $0x7] ss:$9 sm:$0xff] %v4638_v13  ;;  %v4312_v27 = vpop.permute.xlu1 %4311  ;;  %v4410_v23 = vpop.permute.xlu2 %4409 }
 0x644   : > { %v4274_v54 = vpop.permute.xlu0 %4273  ;;  %v4539_v63 = vsel %vm4533_vm14, %v4528_v47, %v4312_v27 }
 0x645   : > { %v4529_v60 = vsel %vm4142_vm0, %v9627_v28, %v4274_v54 }
 0x646   : > { %v4540_v17 = vsel %vm4533_vm14, %v4529_v60, %v4314_v26 }
 0x64a   : > { %v4706_v43 = vld [vmem:[#allocation1] sm:$0xff] }
 0x64b   : > { %4707 = vst [vmem:[#allocation1] ss:$9 sm:$0xff] %v4639_v29  ;;  %5664 = vmatmul.msk.f32.gmra.mxu1 %vm4737_vm15, %v4706_v43  ;;  %v4346_v45 = vpop.permute.xlu1 %4345  ;;  %v4472_v24 = vpop.permute.xlu2 %4471 }
 0x64c   : > { %v4344_v8 = vpop.permute.xlu0 %4343  ;;  %v4551_v40 = vsel %vm4544_vm9, %v4540_v17, %v4346_v45 }
 0x64d   : > { %v4550_v42 = vsel %vm4544_vm9, %v4539_v63, %v4344_v8 }
 0x64e   : > { %v4561_v50 = vsel %vm4555_vm6, %v4550_v42, %v4376_v34 }
 0x653   : > { %v4408_v4 = vpop.permute.xlu1 %4407  ;;  %v4506_v18 = vpop.permute.xlu2 %4505 }
 0x654   : > { %v4378_v61 = vpop.permute.xlu0 %4377  ;;  %v4572_v36 = vsel %vm4566_vm7, %v4561_v50, %v4408_v4 }
 0x655   : > { %v4562_v11 = vsel %vm4555_vm6, %v4551_v40, %v4378_v61 }
 0x656   : > { %v4573_v28 = vsel %vm4566_vm7, %v4562_v11, %v4410_v23 }
 0x65b   : > { %v4442_v57 = vpop.permute.xlu1 %4441  ;;  %v4348_v1 = vpop.permute.xlu2 %4347 }
 0x65c   : > { %v4440_v5 = vpop.permute.xlu0 %4439  ;;  %v4584_v6 = vsel %vm4577_vm8, %v4573_v28, %v4442_v57 }
 0x65d   : > { %v4583_v16 = vsel %vm4577_vm8, %v4572_v36, %v4440_v5 }
 0x65e   : > { %v4594_v20 = vsel %vm4588_vm10, %v4583_v16, %v4472_v24 }
 0x663   : > { %v4504_v59 = vpop.permute.xlu1 %4503  ;;  %v4444_v10 = vpop.permute.xlu2 %4443 }
 0x664   : > { %v4474_v14 = vpop.permute.xlu0 %4473  ;;  %v4605_v7 = vsel %vm4599_vm11, %v4594_v20, %v4504_v59 }
 0x665   : > { %v4595_v32 = vsel %vm4588_vm10, %v4584_v6, %v4474_v14  ;;  %v4640_v44 = vrot.slane %v4605_v7, 1  ;;  %v4641_v33 = vrot.slane %v4605_v7, 2  ;;  %4708 = vst [vmem:[#allocation1 + $0x1] ss:$9 sm:$0xff] %v4605_v7  ;;  %v4642_v41 = vrot.slane %v4605_v7, 3 }
 0x666   : > { %v4606_v31 = vsel %vm4599_vm11, %v4595_v32, %v4506_v18  ;;  %v4643_v46 = vrot.slane %v4605_v7, 4 }
 0x667   : > { %v4644_v30 = vrot.slane %v4606_v31, 1  ;;  %4713 = vst [vmem:[#allocation1 + $0x6] ss:$9 sm:$0xff] %v4606_v31  ;;  %v4646_v0 = vrot.slane %v4606_v31, 3  ;;  %v4647_v56 = vrot.slane %v4606_v31, 4  ;;  %v4645_v26 = vrot.slane %v4606_v31, 2 }
 0x668   : > { %4709 = vst [vmem:[#allocation1 + $0x2] ss:$9 sm:$0xff] %v4640_v44 }
 0x669   : > { %4714 = vst [vmem:[#allocation1 + $0x7] ss:$9 sm:$0xff] %v4644_v30 }
 0x66a   : > { %4710 = vst [vmem:[#allocation1 + $0x3] ss:$9 sm:$0xff] %v4641_v33 }
 0x66b   : > { %4711 = vst [vmem:[#allocation1 + $0x4] ss:$9 sm:$0xff] %v4642_v41  ;;  %v4316_v53 = vpop.permute.xlu1 %4315  ;;  %v4278_v22 = vpop.permute.xlu2 %4277  ;;  %v5781_v41 = vld [vmem:[%s10453_s5] sm:$0xff] }
 0x66c   : > { %4712 = vst [vmem:[#allocation1 + $0x5] ss:$9 sm:$0xff] %v4643_v46  ;;  %v4276_v15 = vpop.permute.xlu0 %4275  ;;  %v4531_v4 = vsel %vm4142_vm0, %v9692_v21, %v4278_v22  ;;  %v9872_v46 = vperm.slane %v5781_v41, 2 }
 0x66d   : > { %v4530_v49 = vsel %vm4142_vm0, %v9667_v51, %v4276_v15 }
 0x66e   : > { %v4541_v52 = vsel %vm4533_vm14, %v4530_v49, %v4316_v53  ;;  %v9875_v53 = vperm.slane %v5781_v41, 3 }
 0x66f   : > { %v4552_v12 = vsel %vm4544_vm9, %v4541_v52, %v4348_v1 }
 0x673   : > { %v4715_v35 = vld [vmem:[#allocation1] sm:$0xff]  ;;  %v4412_v48 = vpop.permute.xlu1 %4411  ;;  %v4320_v25 = vpop.permute.xlu2 %4319 }
 0x674   : > { %4717 = vst [vmem:[#allocation1 + $0x1] ss:$9 sm:$0xff] %v4646_v0  ;;  %5665 = vmatmul.msk.f32.gmra.mxu1 %vm4737_vm15, %v4715_v35  ;;  %v4380_v37 = vpop.permute.xlu0 %4379 }
 0x675   : > { %4718 = vst [vmem:[#allocation1 + $0x2] ss:$9 sm:$0xff] %v4647_v56  ;;  %v4563_v19 = vsel %vm4555_vm6, %v4552_v12, %v4380_v37 }
 0x676   : > { %4716 = vst [vmem:[#allocation1] ss:$9 sm:$0xff] %v4645_v26  ;;  %v4574_v51 = vsel %vm4566_vm7, %v4563_v19, %v4412_v48 }
 0x677   : > { %v4585_v3 = vsel %vm4577_vm8, %v4574_v51, %v4444_v10 }
 0x67b   : > { %v4508_v2 = vpop.permute.xlu1 %4507  ;;  %v4382_v23 = vpop.permute.xlu2 %4381 }
 0x67c   : > { %v4476_v38 = vpop.permute.xlu0 %4475 }
 0x67d   : > { %v4596_v62 = vsel %vm4588_vm10, %v4585_v3, %v4476_v38 }
 0x67e   : > { %v4607_v34 = vsel %vm4599_vm11, %v4596_v62, %v4508_v2 }
 0x67f   : > { %v4648_v39 = vrot.slane %v4607_v34, 1  ;;  %v4649_v58 = vrot.slane %v4607_v34, 2  ;;  %v4650_v9 = vrot.slane %v4607_v34, 3  ;;  %4719 = vst [vmem:[#allocation1 + $0x3] ss:$9 sm:$0xff] %v4607_v34  ;;  %v4651_v13 = vrot.slane %v4607_v34, 4 }
 0x681   : > { %4720 = vst [vmem:[#allocation1 + $0x4] ss:$9 sm:$0xff] %v4648_v39 }
 0x682   : > { %4721 = vst [vmem:[#allocation1 + $0x5] ss:$9 sm:$0xff] %v4649_v58 }
 0x683   : > { %4722 = vst [vmem:[#allocation1 + $0x6] ss:$9 sm:$0xff] %v4650_v9  ;;  %v4318_v27 = vpop.permute.xlu1 %4317  ;;  %v4416_v45 = vpop.permute.xlu2 %4415 }
 0x684   : > { %4723 = vst [vmem:[#allocation1 + $0x7] ss:$9 sm:$0xff] %v4651_v13  ;;  %v4280_v54 = vpop.permute.xlu0 %4279  ;;  %v4542_v47 = vsel %vm4533_vm14, %v4531_v4, %v4318_v27 }
 0x685   : > { %v4532_v18 = vsel %vm4142_vm0, %v9763_v55, %v4280_v54 }
 0x686   : > { %v4543_v57 = vsel %vm4533_vm14, %v4532_v18, %v4320_v25  ;;  %vm5232_vm14 = vcmask 130048  }
 0x689   : > { %v4773_v10 = vpop.f32.mrf.mxu1 }
 0x68a   : > { %v4774_v15 = vadd.f32 %v4773_v10, %v9872_v46 }
 0x68b   : > { %v4724_v29 = vld [vmem:[#allocation1] sm:$0xff]  ;;  %v4352_v8 = vpop.permute.xlu1 %4351  ;;  %v4478_v60 = vpop.permute.xlu2 %4477 }
 0x68c   : > { %5666 = vmatmul.msk.f32.gmra.mxu1 %vm4737_vm15, %v4724_v29  ;;  %v4350_v43 = vpop.permute.xlu0 %4349  ;;  %v4554_v17 = vsel %vm4544_vm9, %v4543_v57, %v4352_v8  ;;  %v4802_v56 = vmul.f32 %v9875_v53, %v4774_v15  ;;  %vm4794_vm0 = vcmp.gt.f32.partialorder %v4774_v15, 0.0 }
 0x68d   : > { %v4553_v63 = vsel %vm4544_vm9, %v4542_v47, %v4350_v43  ;;  %vm5239_vm9 = vcmask 261120  }
 0x68e   : > { %v4564_v40 = vsel %vm4555_vm6, %v4553_v63, %v4382_v23  ;;  %v9879_v35 = vsel %vm4794_vm0, %v4774_v15, %v4802_v56  ;;  %vm5294_vm0 = vcmask 1041409  }
 0x68f   : > { %v4823_v22 = vrot.slane %v9879_v35, 1  ;;  %v9883_v37 = vrot.slane %v9879_v35, 2  ;;  %v4827_v19 = vrot.slane %v9879_v35, 5  ;;  %v9891_v51 = vrot.slane %v9879_v35, 6 }
 0x690   : > { %v9896_v38 = vrot.slane %v9879_v35, 7 }
 0x693   : > { %v4414_v61 = vpop.permute.xlu1 %4413  ;;  %v4512_v6 = vpop.permute.xlu2 %4511 }
 0x694   : > { %v4384_v24 = vpop.permute.xlu0 %4383  ;;  %v4575_v21 = vsel %vm4566_vm7, %v4564_v40, %v4414_v61 }
 0x695   : > { %v4565_v50 = vsel %vm4555_vm6, %v4554_v17, %v4384_v24  ;;  %vm5246_vm6 = vcmask 392192  }
 0x696   : > { %v4576_v55 = vsel %vm4566_vm7, %v4565_v50, %v4416_v45  ;;  %v4825_v50 = vrot.slane %v9879_v35, 3  ;;  %vm5253_vm7 = vcmask 523264  }
 0x69b   : > { %v4448_v5 = vpop.permute.xlu1 %4447 }
 0x69c   : > { %v4446_v42 = vpop.permute.xlu0 %4445  ;;  %v4587_v11 = vsel %vm4577_vm8, %v4576_v55, %v4448_v5 }
 0x69d   : > { %v4586_v1 = vsel %vm4577_vm8, %v4575_v21, %v4446_v42  ;;  %vm5266_vm8 = vcmask 785408  }
 0x69e   : > { %v4597_v16 = vsel %vm4588_vm10, %v4586_v1, %v4478_v60 }
 0x6a3   : > { %v4510_v28 = vpop.permute.xlu1 %4509 }
 0x6a4   : > { %v4480_v36 = vpop.permute.xlu0 %4479  ;;  %v4608_v20 = vsel %vm4599_vm11, %v4597_v16, %v4510_v28 }
 0x6a5   : > { %v4598_v14 = vsel %vm4588_vm10, %v4587_v11, %v4480_v36  ;;  %v4652_v32 = vrot.slane %v4608_v20, 1  ;;  %4725 = vst [vmem:[#allocation1] ss:$9 sm:$0xff] %v4608_v20  ;;  %v4653_v44 = vrot.slane %v4608_v20, 2  ;;  %v4654_v33 = vrot.slane %v4608_v20, 3 }
 0x6a6   : > { %v4609_v59 = vsel %vm4599_vm11, %v4598_v14, %v4512_v6  ;;  %v4655_v30 = vrot.slane %v4608_v20, 4  ;;  %vm5273_vm10 = vcmask 916480  }
 0x6a7   : > { %v4656_v7 = vrot.slane %v4609_v59, 1  ;;  %v4657_v31 = vrot.slane %v4609_v59, 2  ;;  %4730 = vst [vmem:[#allocation1 + $0x5] ss:$9 sm:$0xff] %v4609_v59  ;;  %v4658_v49 = vrot.slane %v4609_v59, 3  ;;  %v4659_v0 = vrot.slane %v4609_v59, 4 }
 0x6a8   : > { %4726 = vst [vmem:[#allocation1 + $0x1] ss:$9 sm:$0xff] %v4652_v32  ;;  %v4826_v59 = vrot.slane %v9879_v35, 4 }
 0x6a9   : > { %4731 = vst [vmem:[#allocation1 + $0x6] ss:$9 sm:$0xff] %v4656_v7 }
 0x6aa   : > { %4732 = vst [vmem:[#allocation1 + $0x7] ss:$9 sm:$0xff] %v4657_v31 }
 0x6ab   : > { %4727 = vst [vmem:[#allocation1 + $0x2] ss:$9 sm:$0xff] %v4653_v44 }
 0x6ac   : > { %4728 = vst [vmem:[#allocation1 + $0x3] ss:$9 sm:$0xff] %v4654_v33 }
 0x6ad   : > { %4729 = vst [vmem:[#allocation1 + $0x4] ss:$9 sm:$0xff] %v4655_v30 }
 0x6b2   : > { %v4776_v48 = vpop.f32.mrf.mxu1 }
 0x6b3   : > { %v4777_v12 = vadd.f32 %v4776_v48, %v9872_v46 }
 0x6b4   : > { %v4733_v52 = vld [vmem:[#allocation1] sm:$0xff] }
 0x6b5   : > { %4734 = vst [vmem:[#allocation1] ss:$9 sm:$0xff] %v4658_v49  ;;  %5667 = vmatmul.msk.f32.gmra.mxu1 %vm4737_vm15, %v4733_v52  ;;  %v4803_v2 = vmul.f32 %v9875_v53, %v4777_v12  ;;  %vm4795_vm2 = vcmp.gt.f32.partialorder %v4777_v12, 0.0 }
 0x6b6   : > { %4735 = vst [vmem:[#allocation1 + $0x1] ss:$9 sm:$0xff] %v4659_v0 }
 0x6b7   : > { %v9903_v25 = vsel %vm4795_vm2, %v4777_v12, %v4803_v2  ;;  %vm5297_vm2 = vcmask 1042434  }
 0x6b8   : > { %v9906_v62 = vrot.slane %v9903_v25, 2  ;;  %v9909_v34 = vrot.slane %v9903_v25, 3  ;;  %v9914_v58 = vrot.slane %v9903_v25, 4  ;;  %v9970_v55 = vrot.slane %v9903_v25, 5 }
 0x6b9   : > { %v4830_v7 = vrot.slane %v9903_v25, 1  ;;  %v10006_v44 = vrot.slane %v9903_v25, 6 }
 0x6bd   : > { %v4736_v26 = vld [vmem:[#allocation1] sm:$0xff] }
 0x6be   : > { %4866 = vst [vmem:[#allocation1] ss:$9 sm:$0xff] %v9879_v35  ;;  %5668 = vmatmul.msk.f32.gmra.mxu1 %vm4737_vm15, %v4736_v26  ;;  %v4836_v26 = vrot.slane %v9903_v25, 7  ;;  %vm5292_vm15 = vcmask 1040384  }
 0x6bf   : > { %4868 = vst [vmem:[#allocation1 + $0x1] ss:$9 sm:$0xff] %v4823_v22 }
 0x6c0   : > { %4870 = vst [vmem:[#allocation1 + $0x2] ss:$9 sm:$0xff] %v9883_v37 }
 0x6c7   : > { %v9893_v3 = vld [vmem:[#allocation1] sm:$0xff] }
 0x6c8   : > { %4872 = vst [vmem:[#allocation1] ss:$9 sm:$0xff] %v4827_v19  ;;  %v9919_v9 = vpop.f32.mrf.mxu1 }
 0x6c9   : > { %4873 = vst [vmem:[#allocation1 + $0x1] ss:$9 sm:$0xff] %v9891_v51  ;;  %v4780_v52 = vadd.f32 %v9919_v9, %v9872_v46 }
 0x6ca   : > { %4874 = vst [vmem:[#allocation1 + $0x2] ss:$9 sm:$0xff] %v9896_v38 }
 0x6cb   : > { %v4804_v35 = vmul.f32 %v9875_v53, %v4780_v52  ;;  %vm4796_vm1 = vcmp.gt.f32.partialorder %v4780_v52, 0.0 }
 0x6d1   : > { %v9911_v39 = vld [vmem:[#allocation1] sm:$0xff] }
 0x6d2   : > { %4876 = vst [vmem:[#allocation1] ss:$9 sm:$0xff] %v9906_v62 }
 0x6d3   : > { %4877 = vst [vmem:[#allocation1 + $0x1] ss:$9 sm:$0xff] %v9909_v34 }
 0x6d4   : > { %4878 = vst [vmem:[#allocation1 + $0x2] ss:$9 sm:$0xff] %v9914_v58 }
 0x6db   : > { %v9930_v45 = vld [vmem:[#allocation1] sm:$0xff] }
 0x6f1   : > { %v4782_v13 = vpop.f32.mrf.mxu1 }
 0x6f2   : > { %v4783_v54 = vadd.f32 %v4782_v13, %v9872_v46 }
 0x6f4   : > { %vm4797_vm12 = vcmp.gt.f32.partialorder %v4783_v54, 0.0  ;;  %v4805_v27 = vmul.f32 %v9875_v53, %v4783_v54 }
 0x6f6   : > { %v9923_v23 = vsel %vm4797_vm12, %v4783_v54, %v4805_v27 }
 0x6f7   : > { %v4844_v29 = vrot.slane %v9923_v23, 1  ;;  %v4845_v43 = vrot.slane %v9923_v23, 2  ;;  %v9928_v8 = vrot.slane %v9923_v23, 3  ;;  %v4849_v24 = vrot.slane %v9923_v23, 6 }
 0x6f8   : > { %v9935_v61 = vrot.slane %v9923_v23, 7  ;;  %v4847_v36 = vrot.slane %v9923_v23, 4  ;;  %v4848_v30 = vrot.slane %v9923_v23, 5 }
 0x6f9   : > { %4880 = vst [vmem:[#allocation1] ss:$9 sm:$0xff] %v4844_v29 }
 0x6fa   : > { %4881 = vst [vmem:[#allocation1 + $0x1] ss:$9 sm:$0xff] %v4845_v43 }
 0x6fb   : > { %4882 = vst [vmem:[#allocation1 + $0x2] ss:$9 sm:$0xff] %v9928_v8 }
 0x702   : > { %v9937_v4 = vld [vmem:[#allocation1] sm:$0xff] }
 0x703   : > { %4884 = vst [vmem:[#allocation1] ss:$9 sm:$0xff] %v4849_v24 }
 0x704   : > { %4885 = vst [vmem:[#allocation1 + $0x1] ss:$9 sm:$0xff] %v9935_v61 }
 0x709   : > { %v4785_v18 = vpop.f32.mrf.mxu1 }
 0x70a   : > { %v4786_v47 = vadd.f32 %v4785_v18, %v9872_v46 }
 0x70c   : > { %vm4798_vm13 = vcmp.gt.f32.partialorder %v4786_v47, 0.0  ;;  %v4806_v60 = vmul.f32 %v9875_v53, %v4786_v47 }
 0x70e   : > { %v9944_v63 = vsel %vm4798_vm13, %v4786_v47, %v4806_v60 }
 0x70f   : > { %4886 = vst [vmem:[#allocation1 + $0x2] ss:$9 sm:$0xff] %v9944_v63  ;;  %v9948_v42 = vrot.slane %v9944_v63, 3  ;;  %v9951_v5 = vrot.slane %v9944_v63, 4  ;;  %v9956_v17 = vrot.slane %v9944_v63, 5  ;;  %v9982_v28 = vrot.slane %v9944_v63, 1 }
 0x710   : > { %v9990_v14 = vrot.slane %v9944_v63, 6  ;;  %v4852_v10 = vrot.slane %v9944_v63, 2  ;;  %v10025_v49 = vrot.slane %v9944_v63, 7 }
 0x716   : > { %v9953_v57 = vld [vmem:[#allocation1] sm:$0xff] }
 0x717   : > { %4888 = vst [vmem:[#allocation1] ss:$9 sm:$0xff] %v9948_v42 }
 0x718   : > { %4889 = vst [vmem:[#allocation1 + $0x1] ss:$9 sm:$0xff] %v9951_v5 }
 0x719   : > { %4890 = vst [vmem:[#allocation1 + $0x2] ss:$9 sm:$0xff] %v9956_v17 }
 0x720   : > { %v9961_v40 = vld [vmem:[#allocation1] sm:$0xff] }
 0x721   : > { %4898 = vst [vmem:[#allocation1] ss:$9 sm:$0xff] %v4823_v22  ;;  %v10043_v22 = vsel %vm4796_vm1, %v4780_v52, %v4804_v35 }
 0x722   : > { %4900 = vst [vmem:[#allocation1 + $0x1] ss:$9 sm:$0xff] %v9883_v37  ;;  %v10047_v48 = vrot.slane %v10043_v22, 1  ;;  %v10089_v47 = vrot.slane %v10043_v22, 2 }
 0x723   : > { %4902 = vst [vmem:[#allocation1 + $0x2] ss:$9 sm:$0xff] %v4825_v50 }
 0x72a   : > { %v4903_v21 = vld [vmem:[#allocation1] sm:$0xff] }
 0x72b   : > { %4904 = vst [vmem:[#allocation1] ss:$9 sm:$0xff] %v9891_v51  ;;  %4924 = vrot.lane.b32.xlu0 %v4903_v21, %s5807_s26 }
 0x72c   : > { %4905 = vst [vmem:[#allocation1 + $0x1] ss:$9 sm:$0xff] %v9896_v38 }
 0x72d   : > { %4906 = vst [vmem:[#allocation1 + $0x2] ss:$9 sm:$0xff] %v9903_v25 }
 0x734   : > { %v4907_v1 = vld [vmem:[#allocation1] sm:$0xff] }
 0x735   : > { %4908 = vst [vmem:[#allocation1] ss:$9 sm:$0xff] %v9909_v34  ;;  %4926 = vrot.lane.b32.xlu1 %v4907_v1, %s5807_s26 }
 0x736   : > { %4909 = vst [vmem:[#allocation1 + $0x1] ss:$9 sm:$0xff] %v9914_v58 }
 0x737   : > { %4910 = vst [vmem:[#allocation1 + $0x2] ss:$9 sm:$0xff] %v9970_v55 }
 0x73e   : > { %v4911_v11 = vld [vmem:[#allocation1] sm:$0xff] }
 0x73f   : > { %4912 = vst [vmem:[#allocation1] ss:$9 sm:$0xff] %v4845_v43  ;;  %4928 = vrot.lane.b32.xlu2 %v4911_v11, %s5807_s26 }
 0x740   : > { %4913 = vst [vmem:[#allocation1 + $0x1] ss:$9 sm:$0xff] %v9928_v8 }
 0x741   : > { %4914 = vst [vmem:[#allocation1 + $0x2] ss:$9 sm:$0xff] %v4847_v36 }
 0x748   : > { %v9979_v16 = vld [vmem:[#allocation1] sm:$0xff] }
 0x749   : > { %4916 = vst [vmem:[#allocation1] ss:$9 sm:$0xff] %v9935_v61 }
 0x74a   : > { %4917 = vst [vmem:[#allocation1 + $0x1] ss:$9 sm:$0xff] %v9944_v63 }
 0x74b   : > { %4918 = vst [vmem:[#allocation1 + $0x2] ss:$9 sm:$0xff] %v9982_v28 }
 0x752   : > { %v9987_v6 = vld [vmem:[#allocation1] sm:$0xff] }
 0x753   : > { %4920 = vst [vmem:[#allocation1] ss:$9 sm:$0xff] %v9951_v5 }
 0x754   : > { %4921 = vst [vmem:[#allocation1 + $0x1] ss:$9 sm:$0xff] %v9956_v17 }
 0x755   : > { %4922 = vst [vmem:[#allocation1 + $0x2] ss:$9 sm:$0xff] %v9990_v14 }
 0x75c   : > { %v9995_v20 = vld [vmem:[#allocation1] sm:$0xff] }
 0x75d   : > { %4942 = vst [vmem:[#allocation1] ss:$9 sm:$0xff] %v9883_v37 }
 0x75e   : > { %4944 = vst [vmem:[#allocation1 + $0x1] ss:$9 sm:$0xff] %v4825_v50 }
 0x75f   : > { %4946 = vst [vmem:[#allocation1 + $0x2] ss:$9 sm:$0xff] %v4826_v59 }
 0x766   : > { %v4947_v32 = vld [vmem:[#allocation1] sm:$0xff] }
 0x767   : > { %4948 = vst [vmem:[#allocation1] ss:$9 sm:$0xff] %v9896_v38  ;;  %4968 = vrot.lane.b32.xlu0 %v4947_v32, %s5808_s27 }
 0x768   : > { %4949 = vst [vmem:[#allocation1 + $0x1] ss:$9 sm:$0xff] %v9903_v25 }
 0x769   : > { %4950 = vst [vmem:[#allocation1 + $0x2] ss:$9 sm:$0xff] %v4830_v7 }
 0x770   : > { %v4951_v31 = vld [vmem:[#allocation1] sm:$0xff] }
 0x771   : > { %4952 = vst [vmem:[#allocation1] ss:$9 sm:$0xff] %v9914_v58  ;;  %4970 = vrot.lane.b32.xlu1 %v4951_v31, %s5808_s27  ;;  %v4840_v31 = vrot.slane %v10043_v22, 4 }
 0x772   : > { %4953 = vst [vmem:[#allocation1 + $0x1] ss:$9 sm:$0xff] %v9970_v55 }
 0x773   : > { %4954 = vst [vmem:[#allocation1 + $0x2] ss:$9 sm:$0xff] %v10006_v44 }
 0x77a   : > { %v4955_v33 = vld [vmem:[#allocation1] sm:$0xff] }
 0x77b   : > { %4956 = vst [vmem:[#allocation1] ss:$9 sm:$0xff] %v9928_v8  ;;  %4972 = vrot.lane.b32.xlu2 %v4955_v33, %s5808_s27  ;;  %v4841_v33 = vrot.slane %v10043_v22, 5 }
 0x77c   : > { %4957 = vst [vmem:[#allocation1 + $0x1] ss:$9 sm:$0xff] %v4847_v36  ;;  %v4839_v36 = vrot.slane %v10043_v22, 3 }
 0x77d   : > { %4958 = vst [vmem:[#allocation1 + $0x2] ss:$9 sm:$0xff] %v4848_v30  ;;  %v10158_v30 = vrot.slane %v10043_v22, 6 }
 0x784   : > { %v10015_v41 = vld [vmem:[#allocation1] sm:$0xff] }
 0x785   : > { %4960 = vst [vmem:[#allocation1] ss:$9 sm:$0xff] %v9944_v63 }
 0x786   : > { %4961 = vst [vmem:[#allocation1 + $0x1] ss:$9 sm:$0xff] %v9982_v28 }
 0x787   : > { %4962 = vst [vmem:[#allocation1 + $0x2] ss:$9 sm:$0xff] %v4852_v10 }
 0x78e   : > { %v10022_v15 = vld [vmem:[#allocation1] sm:$0xff] }
 0x78f   : > { %4964 = vst [vmem:[#allocation1] ss:$9 sm:$0xff] %v9956_v17 }
 0x790   : > { %4965 = vst [vmem:[#allocation1 + $0x1] ss:$9 sm:$0xff] %v9990_v14 }
 0x791   : > { %4966 = vst [vmem:[#allocation1 + $0x2] ss:$9 sm:$0xff] %v10025_v49 }
 0x798   : > { %v10030_v0 = vld [vmem:[#allocation1] sm:$0xff] }
 0x799   : > { %4986 = vst [vmem:[#allocation1] ss:$9 sm:$0xff] %v4827_v19  ;;  %v4788_v19 = vpop.f32.mrf.mxu1 }
 0x79a   : > { %4988 = vst [vmem:[#allocation1 + $0x1] ss:$9 sm:$0xff] %v9891_v51  ;;  %v4789_v2 = vadd.f32 %v4788_v19, %v9872_v46 }
 0x79b   : > { %4990 = vst [vmem:[#allocation1 + $0x2] ss:$9 sm:$0xff] %v9896_v38 }
 0x79c   : > { %v4807_v13 = vmul.f32 %v9875_v53, %v4789_v2  ;;  %vm4799_vm3 = vcmp.gt.f32.partialorder %v4789_v2, 0.0 }
 0x79e   : > { %v10066_v54 = vsel %vm4799_vm3, %v4789_v2, %v4807_v13  ;;  %v5342_v2 = vld [vmem:[%s10451_s3 + $0x88] sm:$0xff]  ;;  %v5336_v13 = vld [vmem:[%s10451_s3 + $0x58] sm:$0xff] }
 0x79f   : > { %v10069_v27 = vrot.slane %v10066_v54, 1  ;;  %v10074_v43 = vrot.slane %v10066_v54, 2  ;;  %v10107_v21 = vrot.slane %v10066_v54, 3  ;;  %v4862_v52 = vrot.slane %v10066_v54, 5  ;;  %5424 = vmatpush.msrb.mxu3 %v5342_v2 }
 0x7a2   : > { %v4991_v56 = vld [vmem:[#allocation1] sm:$0xff] }
 0x7a3   : > { %4992 = vst [vmem:[#allocation1] ss:$9 sm:$0xff] %v9906_v62  ;;  %5012 = vrot.lane.b32.xlu0 %v4991_v56, %s5809_s28  ;;  %v4863_v56 = vrot.slane %v10066_v54, 6 }
 0x7a4   : > { %4993 = vst [vmem:[#allocation1 + $0x1] ss:$9 sm:$0xff] %v9909_v34 }
 0x7a5   : > { %4994 = vst [vmem:[#allocation1 + $0x2] ss:$9 sm:$0xff] %v9914_v58 }
 0x7ac   : > { %v4995_v37 = vld [vmem:[#allocation1] sm:$0xff] }
 0x7ad   : > { %4996 = vst [vmem:[#allocation1] ss:$9 sm:$0xff] %v4836_v26  ;;  %5014 = vrot.lane.b32.xlu1 %v4995_v37, %s5809_s28 }
 0x7ae   : > { %4997 = vst [vmem:[#allocation1 + $0x1] ss:$9 sm:$0xff] %v10043_v22 }
 0x7af   : > { %4998 = vst [vmem:[#allocation1 + $0x2] ss:$9 sm:$0xff] %v10047_v48 }
 0x7b6   : > { %v4999_v12 = vld [vmem:[#allocation1] sm:$0xff] }
 0x7b7   : > { %5000 = vst [vmem:[#allocation1] ss:$9 sm:$0xff] %v4849_v24  ;;  %5016 = vrot.lane.b32.xlu2 %v4999_v12, %s5809_s28 }
 0x7b8   : > { %5001 = vst [vmem:[#allocation1 + $0x1] ss:$9 sm:$0xff] %v9935_v61 }
 0x7b9   : > { %5002 = vst [vmem:[#allocation1 + $0x2] ss:$9 sm:$0xff] %v9944_v63 }
 0x7c0   : > { %v10060_v9 = vld [vmem:[#allocation1] sm:$0xff] }
 0x7c1   : > { %5006 = vst [vmem:[#allocation1 + $0x2] ss:$9 sm:$0xff] %v9956_v17 }
 0x7c2   : > { %5004 = vst [vmem:[#allocation1] ss:$9 sm:$0xff] %v9948_v42 }
 0x7c3   : > { %5005 = vst [vmem:[#allocation1 + $0x1] ss:$9 sm:$0xff] %v9951_v5 }
 0x7ca   : > { %v10071_v29 = vld [vmem:[#allocation1] sm:$0xff] }
 0x7cb   : > { %5008 = vst [vmem:[#allocation1] ss:$9 sm:$0xff] %v10066_v54 }
 0x7cc   : > { %5009 = vst [vmem:[#allocation1 + $0x1] ss:$9 sm:$0xff] %v10069_v27 }
 0x7cd   : > { %5010 = vst [vmem:[#allocation1 + $0x2] ss:$9 sm:$0xff] %v10074_v43 }
 0x7d4   : > { %v10079_v8 = vld [vmem:[#allocation1] sm:$0xff] }
 0x7d5   : > { %5030 = vst [vmem:[#allocation1] ss:$9 sm:$0xff] %v9891_v51 }
 0x7d6   : > { %5032 = vst [vmem:[#allocation1 + $0x1] ss:$9 sm:$0xff] %v9896_v38 }
 0x7d7   : > { %5034 = vst [vmem:[#allocation1 + $0x2] ss:$9 sm:$0xff] %v9903_v25 }
 0x7de   : > { %v5035_v24 = vld [vmem:[#allocation1] sm:$0xff] }
 0x7df   : > { %5056 = vrot.lane.b32.xlu0 %v5035_v24, %s5810_s29  ;;  %5036 = vst [vmem:[#allocation1] ss:$9 sm:$0xff] %v9909_v34 }
 0x7e0   : > { %5037 = vst [vmem:[#allocation1 + $0x1] ss:$9 sm:$0xff] %v9914_v58 }
 0x7e1   : > { %5038 = vst [vmem:[#allocation1 + $0x2] ss:$9 sm:$0xff] %v9970_v55 }
 0x7e8   : > { %v5039_v18 = vld [vmem:[#allocation1] sm:$0xff] }
 0x7e9   : > { %5058 = vrot.lane.b32.xlu1 %v5039_v18, %s5810_s29  ;;  %5040 = vst [vmem:[#allocation1] ss:$9 sm:$0xff] %v10043_v22  ;;  %v10281_v18 = vpop.permute.xlu1 %4926 }
 0x7ea   : > { %5041 = vst [vmem:[#allocation1 + $0x1] ss:$9 sm:$0xff] %v10047_v48 }
 0x7eb   : > { %5042 = vst [vmem:[#allocation1 + $0x2] ss:$9 sm:$0xff] %v10089_v47 }
 0x7f2   : > { %v5043_v51 = vld [vmem:[#allocation1] sm:$0xff] }
 0x7f3   : > { %5060 = vrot.lane.b32.xlu2 %v5043_v51, %s5810_s29  ;;  %5044 = vst [vmem:[#allocation1] ss:$9 sm:$0xff] %v9935_v61 }
 0x7f4   : > { %5045 = vst [vmem:[#allocation1 + $0x1] ss:$9 sm:$0xff] %v9944_v63 }
 0x7f5   : > { %5046 = vst [vmem:[#allocation1 + $0x2] ss:$9 sm:$0xff] %v9982_v28 }
 0x7fc   : > { %v10099_v60 = vld [vmem:[#allocation1] sm:$0xff] }
 0x7fd   : > { %5048 = vst [vmem:[#allocation1] ss:$9 sm:$0xff] %v9951_v5 }
 0x7fe   : > { %5049 = vst [vmem:[#allocation1 + $0x1] ss:$9 sm:$0xff] %v9956_v17 }
 0x7ff   : > { %5050 = vst [vmem:[#allocation1 + $0x2] ss:$9 sm:$0xff] %v9990_v14 }
 0x806   : > { %v10104_v50 = vld [vmem:[#allocation1] sm:$0xff] }
 0x807   : > { %5052 = vst [vmem:[#allocation1] ss:$9 sm:$0xff] %v10069_v27 }
 0x808   : > { %5053 = vst [vmem:[#allocation1 + $0x1] ss:$9 sm:$0xff] %v10074_v43 }
 0x809   : > { %5054 = vst [vmem:[#allocation1 + $0x2] ss:$9 sm:$0xff] %v10107_v21 }
 0x810   : > { %v10112_v61 = vld [vmem:[#allocation1] sm:$0xff] }
 0x811   : > { %5074 = vst [vmem:[#allocation1] ss:$9 sm:$0xff] %v9896_v38 }
 0x812   : > { %5076 = vst [vmem:[#allocation1 + $0x1] ss:$9 sm:$0xff] %v9903_v25 }
 0x813   : > { %5078 = vst [vmem:[#allocation1 + $0x2] ss:$9 sm:$0xff] %v4830_v7  ;;  %v4861_v7 = vrot.slane %v10066_v54, 4 }
 0x81a   : > { %v5079_v1 = vld [vmem:[#allocation1] sm:$0xff] }
 0x81b   : > { %5100 = vrot.lane.b32.xlu0 %v5079_v1, %s5806_s7  ;;  %5080 = vst [vmem:[#allocation1] ss:$9 sm:$0xff] %v9914_v58 }
 0x81c   : > { %5081 = vst [vmem:[#allocation1 + $0x1] ss:$9 sm:$0xff] %v9970_v55 }
 0x81d   : > { %5082 = vst [vmem:[#allocation1 + $0x2] ss:$9 sm:$0xff] %v10006_v44 }
 0x824   : > { %v5083_v11 = vld [vmem:[#allocation1] sm:$0xff] }
 0x825   : > { %5102 = vrot.lane.b32.xlu1 %v5083_v11, %s5806_s7  ;;  %5084 = vst [vmem:[#allocation1] ss:$9 sm:$0xff] %v10047_v48 }
 0x826   : > { %5085 = vst [vmem:[#allocation1 + $0x1] ss:$9 sm:$0xff] %v10089_v47 }
 0x827   : > { %5086 = vst [vmem:[#allocation1 + $0x2] ss:$9 sm:$0xff] %v4839_v36 }
 0x82e   : > { %v5087_v38 = vld [vmem:[#allocation1] sm:$0xff] }
 0x82f   : > { %5104 = vrot.lane.b32.xlu2 %v5087_v38, %s5806_s7  ;;  %5088 = vst [vmem:[#allocation1] ss:$9 sm:$0xff] %v9944_v63  ;;  %v5330_v38 = vld [vmem:[%s10451_s3 + $0x28] sm:$0xff] }
 0x830   : > { %5089 = vst [vmem:[#allocation1 + $0x1] ss:$9 sm:$0xff] %v9982_v28 }
 0x831   : > { %5090 = vst [vmem:[#allocation1 + $0x2] ss:$9 sm:$0xff] %v4852_v10 }
 0x838   : > { %v10133_v59 = vld [vmem:[#allocation1] sm:$0xff] }
 0x839   : > { %5092 = vst [vmem:[#allocation1] ss:$9 sm:$0xff] %v9956_v17 }
 0x83a   : > { %5093 = vst [vmem:[#allocation1 + $0x1] ss:$9 sm:$0xff] %v9990_v14 }
 0x83b   : > { %5094 = vst [vmem:[#allocation1 + $0x2] ss:$9 sm:$0xff] %v10025_v49 }
 0x842   : > { %v10138_v32 = vld [vmem:[#allocation1] sm:$0xff] }
 0x843   : > { %5096 = vst [vmem:[#allocation1] ss:$9 sm:$0xff] %v10074_v43 }
 0x844   : > { %5097 = vst [vmem:[#allocation1 + $0x1] ss:$9 sm:$0xff] %v10107_v21 }
 0x845   : > { %5098 = vst [vmem:[#allocation1 + $0x2] ss:$9 sm:$0xff] %v4861_v7 }
 0x84c   : > { %v10145_v63 = vld [vmem:[#allocation1] sm:$0xff] }
 0x84d   : > { %5118 = vst [vmem:[#allocation1] ss:$9 sm:$0xff] %v9906_v62 }
 0x84e   : > { %5120 = vst [vmem:[#allocation1 + $0x1] ss:$9 sm:$0xff] %v9909_v34 }
 0x84f   : > { %5122 = vst [vmem:[#allocation1 + $0x2] ss:$9 sm:$0xff] %v9914_v58 }
 0x856   : > { %v5123_v28 = vld [vmem:[#allocation1] sm:$0xff] }
 0x857   : > { %5144 = vrot.lane.b32.xlu0 %v5123_v28, %s5811_s30  ;;  %5124 = vst [vmem:[#allocation1] ss:$9 sm:$0xff] %v4836_v26  ;;  %v10174_v26 = vrot.slane %v10066_v54, 7 }
 0x858   : > { %5125 = vst [vmem:[#allocation1 + $0x1] ss:$9 sm:$0xff] %v10043_v22 }
 0x859   : > { %5126 = vst [vmem:[#allocation1 + $0x2] ss:$9 sm:$0xff] %v10047_v48 }
 0x860   : > { %v5127_v62 = vld [vmem:[#allocation1] sm:$0xff] }
 0x861   : > { %5146 = vrot.lane.b32.xlu1 %v5127_v62, %s5811_s30  ;;  %5128 = vst [vmem:[#allocation1] ss:$9 sm:$0xff] %v4840_v31  ;;  %v5326_v31 = vld [vmem:[%s10451_s3 + $0x8] sm:$0xff]  ;;  %v5341_v62 = vld [vmem:[%s10451_s3 + $0x80] sm:$0xff] }
 0x862   : > { %5129 = vst [vmem:[#allocation1 + $0x1] ss:$9 sm:$0xff] %v4841_v33  ;;  %5425 = vmatpush.msrb.mxu3 %v5341_v62 }
 0x863   : > { %5130 = vst [vmem:[#allocation1 + $0x2] ss:$9 sm:$0xff] %v10158_v30 }
 0x86a   : > { %v5131_v25 = vld [vmem:[#allocation1] sm:$0xff] }
 0x86b   : > { %5148 = vrot.lane.b32.xlu2 %v5131_v25, %s5811_s30  ;;  %5132 = vst [vmem:[#allocation1] ss:$9 sm:$0xff] %v9948_v42 }
 0x86c   : > { %5133 = vst [vmem:[#allocation1 + $0x1] ss:$9 sm:$0xff] %v9951_v5 }
 0x86d   : > { %5134 = vst [vmem:[#allocation1 + $0x2] ss:$9 sm:$0xff] %v9956_v17 }
 0x874   : > { %v10166_v10 = vld [vmem:[#allocation1] sm:$0xff] }
 0x875   : > { %5136 = vst [vmem:[#allocation1] ss:$9 sm:$0xff] %v10066_v54  ;;  %v5327_v54 = vld [vmem:[%s10451_s3 + $0x10] sm:$0xff] }
 0x876   : > { %5137 = vst [vmem:[#allocation1 + $0x1] ss:$9 sm:$0xff] %v10069_v27 }
 0x877   : > { %5138 = vst [vmem:[#allocation1 + $0x2] ss:$9 sm:$0xff] %v10074_v43 }
 0x87e   : > { %v5139_v35 = vld [vmem:[#allocation1] sm:$0xff] }
 0x87f   : > { %5140 = vst [vmem:[#allocation1] ss:$9 sm:$0xff] %v4862_v52 }
 0x880   : > { %5141 = vst [vmem:[#allocation1 + $0x1] ss:$9 sm:$0xff] %v4863_v56 }
 0x881   : > { %5142 = vst [vmem:[#allocation1 + $0x2] ss:$9 sm:$0xff] %v10174_v26 }
 0x888   : > { %v10177_v42 = vld [vmem:[#allocation1] sm:$0xff] }
 0x889   : > { %5162 = vst [vmem:[#allocation1] ss:$9 sm:$0xff] %v9909_v34  ;;  %v4843_v34 = vrot.slane %v10043_v22, 7 }
 0x88a   : > { %5164 = vst [vmem:[#allocation1 + $0x1] ss:$9 sm:$0xff] %v9914_v58 }
 0x88b   : > { %5166 = vst [vmem:[#allocation1 + $0x2] ss:$9 sm:$0xff] %v9970_v55 }
 0x892   : > { %v5167_v37 = vld [vmem:[#allocation1] sm:$0xff] }
 0x893   : > { %5188 = vrot.lane.b32.xlu0 %v5167_v37, %s5812_s18  ;;  %5168 = vst [vmem:[#allocation1] ss:$9 sm:$0xff] %v10043_v22  ;;  %v5334_v22 = vld [vmem:[%s10451_s3 + $0x48] sm:$0xff] }
 0x894   : > { %5169 = vst [vmem:[#allocation1 + $0x1] ss:$9 sm:$0xff] %v10047_v48 }
 0x895   : > { %5170 = vst [vmem:[#allocation1 + $0x2] ss:$9 sm:$0xff] %v10089_v47 }
 0x89b   : > { %4930 = vrot.lane.b32.xlu0 %v9979_v16, %s5807_s26 }
 0x89c   : > { %v5171_v12 = vld [vmem:[#allocation1] sm:$0xff] }
 0x89d   : > { %5190 = vrot.lane.b32.xlu1 %v5171_v12, %s5812_s18  ;;  %5172 = vst [vmem:[#allocation1] ss:$9 sm:$0xff] %v4841_v33  ;;  %v5325_v33 = vld [vmem:[%s10451_s3] sm:$0xff] }
 0x89e   : > { %5173 = vst [vmem:[#allocation1 + $0x1] ss:$9 sm:$0xff] %v10158_v30 }
 0x89f   : > { %5174 = vst [vmem:[#allocation1 + $0x2] ss:$9 sm:$0xff] %v4843_v34 }
 0x8a3   : > { %4976 = vrot.lane.b32.xlu0 %v10022_v15, %s5808_s27 }
 0x8a5   : > { %4932 = vrot.lane.b32.xlu1 %v9987_v6, %s5807_s26  ;;  %v4791_v6 = vpop.f32.mrf.mxu1 }
 0x8a6   : > { %v5175_v19 = vld [vmem:[#allocation1] sm:$0xff] }
 0x8a7   : > { %5192 = vrot.lane.b32.xlu2 %v5175_v19, %s5812_s18  ;;  %5176 = vst [vmem:[#allocation1] ss:$9 sm:$0xff] %v9951_v5  ;;  %v4792_v5 = vadd.f32 %v4791_v6, %v9872_v46 }
 0x8a8   : > { %5177 = vst [vmem:[#allocation1 + $0x1] ss:$9 sm:$0xff] %v9956_v17 }
 0x8a9   : > { %5178 = vst [vmem:[#allocation1 + $0x2] ss:$9 sm:$0xff] %v9990_v14  ;;  %vm4800_vm4 = vcmp.gt.f32.partialorder %v4792_v5, 0.0 }
 0x8ab   : > { %5020 = vrot.lane.b32.xlu0 %v10071_v29, %s5809_s28  ;;  %v5335_v29 = vld [vmem:[%s10451_s3 + $0x50] sm:$0xff] }
 0x8ad   : > { %4934 = vrot.lane.b32.xlu1 %v9995_v20, %s5807_s26  ;;  %v5340_v20 = vld [vmem:[%s10451_s3 + $0x78] sm:$0xff] }
 0x8ae   : > { %5384 = vmatpush.msrb.mxu2 %v5340_v20 }
 0x8af   : > { %4974 = vrot.lane.b32.xlu2 %v10015_v41, %s5808_s27  ;;  %v4808_v41 = vmul.f32 %v9875_v53, %v4792_v5  ;;  %v5339_v53 = vld [vmem:[%s10451_s3 + $0x70] sm:$0xff] }
 0x8b0   : > { %v5179_v16 = vld [vmem:[#allocation1] sm:$0xff]  ;;  %5385 = vmatpush.msrb.mxu2 %v5339_v53 }
 0x8b1   : > { %5180 = vst [vmem:[#allocation1] ss:$9 sm:$0xff] %v10069_v27  ;;  %v10223_v46 = vsel %vm4800_vm4, %v4792_v5, %v4808_v41 }
 0x8b2   : > { %5181 = vst [vmem:[#allocation1 + $0x1] ss:$9 sm:$0xff] %v10074_v43 }
 0x8b3   : > { %5064 = vrot.lane.b32.xlu0 %v10104_v50, %s5810_s29  ;;  %5182 = vst [vmem:[#allocation1 + $0x2] ss:$9 sm:$0xff] %v10107_v21 }
 0x8b5   : > { %4978 = vrot.lane.b32.xlu1 %v10030_v0, %s5808_s27  ;;  %v5338_v0 = vld [vmem:[%s10451_s3 + $0x68] sm:$0xff] }
 0x8b6   : > { %5386 = vmatpush.msrb.mxu2 %v5338_v0 }
 0x8b7   : > { %5018 = vrot.lane.b32.xlu2 %v10060_v9, %s5809_s28  ;;  %v5337_v9 = vld [vmem:[%s10451_s3 + $0x60] sm:$0xff] }
 0x8b8   : > { %5387 = vmatpush.msrb.mxu2 %v5337_v9 }
 0x8ba   : > { %v5183_v15 = vld [vmem:[#allocation1] sm:$0xff]  ;;  %5388 = vmatpush.msrb.mxu2 %v5336_v13 }
 0x8bb   : > { %5108 = vrot.lane.b32.xlu0 %v10138_v32, %s5806_s7  ;;  %5184 = vst [vmem:[#allocation1] ss:$9 sm:$0xff] %v4863_v56 }
 0x8bc   : > { %5185 = vst [vmem:[#allocation1 + $0x1] ss:$9 sm:$0xff] %v10174_v26  ;;  %5389 = vmatpush.msrb.mxu2 %v5335_v29 }
 0x8bd   : > { %5022 = vrot.lane.b32.xlu1 %v10079_v8, %s5809_s28  ;;  %5186 = vst [vmem:[#allocation1 + $0x2] ss:$9 sm:$0xff] %v10223_v46 }
 0x8be   : > { %5390 = vmatpush.msrb.mxu2 %v5334_v22 }
 0x8bf   : > { %5062 = vrot.lane.b32.xlu2 %v10099_v60, %s5810_s29 }
 0x8c3   : > { %5152 = vrot.lane.b32.xlu0 %v5139_v35, %s5811_s30 }
 0x8c4   : > { %v5187_v27 = vld [vmem:[#allocation1] sm:$0xff] }
 0x8c5   : > { %5066 = vrot.lane.b32.xlu1 %v10112_v61, %s5810_s29  ;;  %5206 = vst [vmem:[#allocation1] ss:$9 sm:$0xff] %v9914_v58  ;;  %v4929_v58 = vpop.permute.xlu2 %4928  ;;  %v5333_v61 = vld [vmem:[%s10451_s3 + $0x40] sm:$0xff] }
 0x8c6   : > { %5208 = vst [vmem:[#allocation1 + $0x1] ss:$9 sm:$0xff] %v9970_v55  ;;  %v10268_v55 = vpop.permute.xlu0 %4924  ;;  %5391 = vmatpush.msrb.mxu2 %v5333_v61 }
 0x8c7   : > { %5106 = vrot.lane.b32.xlu2 %v10133_v59, %s5806_s7  ;;  %5210 = vst [vmem:[#allocation1 + $0x2] ss:$9 sm:$0xff] %v10006_v44  ;;  %v5329_v59 = vld [vmem:[%s10451_s3 + $0x20] sm:$0xff] }
 0x8cb   : > { %5196 = vrot.lane.b32.xlu0 %v5183_v15, %s5812_s18 }
 0x8cd   : > { %5110 = vrot.lane.b32.xlu1 %v10145_v63, %s5806_s7  ;;  %v4973_v24 = vpop.permute.xlu2 %4972 }
 0x8ce   : > { %v10260_v8 = vld [vmem:[#allocation1] sm:$0xff] }
 0x8cf   : > { %5150 = vrot.lane.b32.xlu2 %v10166_v10, %s5811_s30  ;;  %5212 = vst [vmem:[#allocation1] ss:$9 sm:$0xff] %v10047_v48  ;;  %v10279_v48 = vpop.permute.xlu0 %4968  ;;  %v5286_v0 = vrot.slane %v10260_v8, 7 }
 0x8d0   : > { %5213 = vst [vmem:[#allocation1 + $0x1] ss:$9 sm:$0xff] %v10089_v47 }
 0x8d1   : > { %5214 = vst [vmem:[#allocation1 + $0x2] ss:$9 sm:$0xff] %v4839_v36 }
 0x8d5   : > { %5154 = vrot.lane.b32.xlu1 %v10177_v42, %s5811_s30  ;;  %v5017_v47 = vpop.permute.xlu2 %5016 }
 0x8d7   : > { %5194 = vrot.lane.b32.xlu2 %v5179_v16, %s5812_s18  ;;  %v5013_v60 = vpop.permute.xlu0 %5012 }
 0x8d8   : > { %v10273_v44 = vld [vmem:[#allocation1] sm:$0xff] }
 0x8d9   : > { %5216 = vst [vmem:[#allocation1] ss:$9 sm:$0xff] %v10158_v30  ;;  %v5235_v30 = vsel %vm5232_vm14, %v9930_v45, %v4929_v58 }
 0x8da   : > { %5217 = vst [vmem:[#allocation1 + $0x1] ss:$9 sm:$0xff] %v4843_v34  ;;  %v5242_v25 = vsel %vm5239_vm9, %v5235_v30, %v4973_v24 }
 0x8db   : > { %5218 = vst [vmem:[#allocation1 + $0x2] ss:$9 sm:$0xff] %v9923_v23  ;;  %v10292_v23 = vpop.permute.xlu1 %4970  ;;  %v5249_v52 = vsel %vm5246_vm6, %v5242_v25, %v5017_v47 }
 0x8dd   : > { %v5061_v50 = vpop.permute.xlu2 %5060 }
 0x8de   : > { %v5256_v56 = vsel %vm5253_vm7, %v5249_v52, %v5061_v50 }
 0x8df   : > { %5198 = vrot.lane.b32.xlu2 %v5187_v27, %s5812_s18 }
 0x8e2   : > { %v10284_v51 = vld [vmem:[#allocation1] sm:$0xff] }
 0x8e3   : > { %5220 = vst [vmem:[#allocation1] ss:$9 sm:$0xff] %v9956_v17  ;;  %v5332_v17 = vld [vmem:[%s10451_s3 + $0x38] sm:$0xff]  ;;  %v10307_v11 = vpop.permute.xlu1 %5014  ;;  %v5288_v34 = vrot.slane %v10284_v51, 7 }
 0x8e4   : > { %5221 = vst [vmem:[#allocation1 + $0x1] ss:$9 sm:$0xff] %v9990_v14  ;;  %v5331_v14 = vld [vmem:[%s10451_s3 + $0x30] sm:$0xff]  ;;  %5392 = vmatpush.msrb.mxu2 %v5332_v17  ;;  %v5287_v17 = vrot.slane %v10273_v44, 7 }
 0x8e5   : > { %5222 = vst [vmem:[#allocation1 + $0x2] ss:$9 sm:$0xff] %v10025_v49  ;;  %v5057_v49 = vpop.permute.xlu0 %5056  ;;  %v5105_v36 = vpop.permute.xlu2 %5104 }
 0x8e6   : > { %5393 = vmatpush.msrb.mxu2 %v5331_v14  ;;  %v5262_v42 = vsel %vm4599_vm11, %v5256_v56, %v5105_v36 }
 0x8e8   : > { %5394 = vmatpush.msrb.mxu2 %v5330_v38 }
 0x8ea   : > { %5395 = vmatpush.msrb.mxu2 %v5329_v59 }
 0x8eb   : > { %v5059_v63 = vpop.permute.xlu1 %5058 }
 0x8ec   : > { %v10303_v1 = vld [vmem:[#allocation1] sm:$0xff] }
 0x8ed   : > { %5224 = vst [vmem:[#allocation1] ss:$9 sm:$0xff] %v10074_v43  ;;  %v5328_v43 = vld [vmem:[%s10451_s3 + $0x18] sm:$0xff]  ;;  %v5149_v28 = vpop.permute.xlu2 %5148 }
 0x8ee   : > { %5225 = vst [vmem:[#allocation1 + $0x1] ss:$9 sm:$0xff] %v10107_v21  ;;  %v5101_v21 = vpop.permute.xlu0 %5100  ;;  %5396 = vmatpush.msrb.mxu2 %v5328_v43  ;;  %v5269_v37 = vsel %vm5266_vm8, %v5262_v42, %v5149_v28 }
 0x8ef   : > { %5226 = vst [vmem:[#allocation1 + $0x2] ss:$9 sm:$0xff] %v4861_v7  ;;  %v4865_v7 = vrot.slane %v10223_v46, 1 }
 0x8f0   : > { %5397 = vmatpush.msrb.mxu2 %v5327_v54 }
 0x8f2   : > { %5398 = vmatpush.msrb.mxu2 %v5326_v31 }
 0x8f3   : > { %v5103_v35 = vpop.permute.xlu1 %5102 }
 0x8f4   : > { %5399 = vmatpush.msrb.mxu2 %v5325_v33 }
 0x8f6   : > { %v10323_v32 = vld [vmem:[#allocation1] sm:$0xff]  ;;  %v5145_v10 = vpop.permute.xlu0 %5144 }
 0x8f7   : > { %5228 = vst [vmem:[#allocation1] ss:$9 sm:$0xff] %v10174_v26  ;;  %v5233_v26 = vsel %vm5232_vm14, %v9893_v3, %v10268_v55 }
 0x8f8   : > { %5229 = vst [vmem:[#allocation1 + $0x1] ss:$9 sm:$0xff] %v10223_v46  ;;  %v5240_v45 = vsel %vm5239_vm9, %v5233_v26, %v10279_v48  ;;  %v5234_v48 = vsel %vm5232_vm14, %v9911_v39, %v10281_v18 }
 0x8f9   : > { %5230 = vst [vmem:[#allocation1 + $0x2] ss:$9 sm:$0xff] %v4865_v7  ;;  %v5247_v19 = vsel %vm5246_vm6, %v5240_v45, %v5013_v60  ;;  %v5241_v8 = vsel %vm5239_vm9, %v5234_v48, %v10292_v23 }
 0x8fa   : > { %v5254_v6 = vsel %vm5253_vm7, %v5247_v19, %v5057_v49  ;;  %v5248_v47 = vsel %vm5246_vm6, %v5241_v8, %v10307_v11 }
 0x8fb   : > { %v5260_v41 = vsel %vm4599_vm11, %v5254_v6, %v5101_v21  ;;  %v5147_v9 = vpop.permute.xlu1 %5146  ;;  %v5255_v51 = vsel %vm5253_vm7, %v5248_v47, %v5059_v63 }
 0x8fc   : > { %v5267_v46 = vsel %vm5266_vm8, %v5260_v41, %v5145_v10  ;;  %v5261_v60 = vsel %vm4599_vm11, %v5255_v51, %v5103_v35 }
 0x8fd   : > { %v5268_v50 = vsel %vm5266_vm8, %v5261_v60, %v5147_v9 }
 0x900   : > { %v10355_v20 = vld [vmem:[#allocation1] sm:$0xff] }
 0x901   : > { %v5193_v12 = vpop.permute.xlu2 %5192 }
 0x902   : > { %v5276_v16 = vsel %vm5273_vm10, %v5269_v37, %v5193_v12  ;;  %v5289_v12 = vrot.slane %v10303_v1, 7 }
 0x903   : > { %v5305_v3 = vsel %vm5292_vm15, %v5276_v16, %v5288_v34  ;;  %v5306_v5 = vsel %vm5294_vm0, %v5276_v16, %v5288_v34  ;;  %v5308_v43 = vsel %vm5297_vm2, %v5276_v16, %v5288_v34 }
 0x904   : > { %v5307_v15 = vrot.slane %v5306_v5, 1  ;;  %5356 = vst [vmem:[#allocation1 + $0x6] ss:$9 sm:$0xff] %v5305_v3  ;;  %v5309_v44 = vrot.slane %v5308_v43, 2  ;;  %v5448_v43 = vld [vmem:[%s10452_s4 + $0x10] sm:$0xff] }
 0x905   : > { %v5189_v53 = vpop.permute.xlu0 %5188 }
 0x906   : > { %v5274_v2 = vsel %vm5273_vm10, %v5267_v46, %v5189_v53  ;;  %5358 = vst [vmem:[#allocation1 + $0x7] ss:$9 sm:$0xff] %v5307_v15 }
 0x907   : > { %v5293_v13 = vsel %vm5292_vm15, %v5274_v2, %v5286_v0  ;;  %v5295_v27 = vsel %vm5294_vm0, %v5274_v2, %v5286_v0  ;;  %v5298_v29 = vsel %vm5297_vm2, %v5274_v2, %v5286_v0 }
 0x908   : > { %v5296_v58 = vrot.slane %v5295_v27, 1  ;;  %v5299_v55 = vrot.slane %v5298_v29, 2  ;;  %5344 = vst [vmem:[#allocation1] ss:$9 sm:$0xff] %v5293_v13  ;;  %v5290_v13 = vrot.slane %v10323_v32, 7 }
 0x909   : > { %v4975_v24 = vpop.permute.xlu2 %4974 }
 0x90a   : > { %5346 = vst [vmem:[#allocation1 + $0x1] ss:$9 sm:$0xff] %v5296_v58 }
 0x90b   : > { %5348 = vst [vmem:[#allocation1 + $0x2] ss:$9 sm:$0xff] %v5299_v55 }
 0x90d   : > { %v4931_v22 = vpop.permute.xlu0 %4930 }
 0x90e   : > { %v5236_v30 = vsel %vm5232_vm14, %v9937_v4, %v4931_v22 }
 0x90f   : > { %v5191_v61 = vpop.permute.xlu1 %5190  ;;  %v5243_v10 = vsel %vm5239_vm9, %v5236_v30, %v4975_v24 }
 0x910   : > { %v5275_v39 = vsel %vm5273_vm10, %v5268_v50, %v5191_v61 }
 0x911   : > { %v5300_v18 = vsel %vm5292_vm15, %v5275_v39, %v5287_v17  ;;  %v5301_v23 = vsel %vm5294_vm0, %v5275_v39, %v5287_v17  ;;  %v5303_v14 = vsel %vm5297_vm2, %v5275_v39, %v5287_v17  ;;  %v5019_v49 = vpop.permute.xlu2 %5018  ;;  %v5291_v17 = vrot.slane %v10355_v20, 7 }
 0x912   : > { %v5302_v11 = vrot.slane %v5301_v23, 1  ;;  %v5304_v36 = vrot.slane %v5303_v14, 2  ;;  %5350 = vst [vmem:[#allocation1 + $0x3] ss:$9 sm:$0xff] %v5300_v18  ;;  %v5250_v56 = vsel %vm5246_vm6, %v5243_v10, %v5019_v49 }
 0x914   : > { %5352 = vst [vmem:[#allocation1 + $0x4] ss:$9 sm:$0xff] %v5302_v11 }
 0x915   : > { %v4977_v38 = vpop.permute.xlu0 %4976  ;;  %5354 = vst [vmem:[#allocation1 + $0x5] ss:$9 sm:$0xff] %v5304_v36 }
 0x917   : > { %v4933_v59 = vpop.permute.xlu1 %4932 }
 0x918   : > { %v5237_v41 = vsel %vm5232_vm14, %v9953_v57, %v4933_v59  ;;  %v5449_v59 = vld [vmem:[%s10452_s4 + $0x18] sm:$0xff] }
 0x919   : > { %v5063_v21 = vpop.permute.xlu2 %5062  ;;  %v5244_v1 = vsel %vm5239_vm9, %v5237_v41, %v4977_v38  ;;  %5472 = vmatpush.msra.mxu3 %v5449_v59 }
 0x91a   : > { %v5257_v35 = vsel %vm5253_vm7, %v5250_v56, %v5063_v21  ;;  %v5447_v21 = vld [vmem:[%s10452_s4 + $0x8] sm:$0xff] }
 0x91b   : > { %5473 = vmatpush.msra.mxu3 %v5448_v43 }
 0x91c   : > { %v5359_v54 = vld [vmem:[#allocation1] sm:$0xff]  ;;  %v5360_v7 = vld [vmem:[#allocation1 + $0x9] sm:$0xff] }
 0x91d   : > { %5400 = vmatmul.f32.vlgmr.msrb.gmra.mxu2 %v5359_v54  ;;  %5669 = vmatmul.msk.f32.vlgmr.msrb.gmra.mxu3 %vm5232_vm14, %v5360_v7  ;;  %5361 = vst [vmem:[#allocation1] ss:$9 sm:$0xff] %v5309_v44  ;;  %v5021_v63 = vpop.permute.xlu0 %5020  ;;  %v5446_v44 = vld [vmem:[%s10452_s4] sm:$0xff] }
 0x91e   : > { %v5251_v46 = vsel %vm5246_vm6, %v5244_v1, %v5021_v63  ;;  %5474 = vmatpush.msra.mxu3 %v5447_v21  ;;  %v5782_v54 = vld [vmem:[%s10453_s5] sm:$0xff] }
 0x91f   : > { %v4935_v28 = vpop.permute.xlu1 %4934  ;;  %v5343_v7 = vperm.slane %v5782_v54, 4 }
 0x920   : > { %v5238_v8 = vsel %vm5232_vm14, %v9961_v40, %v4935_v28  ;;  %5475 = vmatpush.msra.mxu3 %v5446_v44 }
 0x921   : > { %v5107_v31 = vpop.permute.xlu2 %5106 }
 0x922   : > { %v5263_v42 = vsel %vm4599_vm11, %v5257_v35, %v5107_v31  ;;  %v5439_v31 = vperm.slane %v5782_v54, 5 }
 0x925   : > { %v5065_v33 = vpop.permute.xlu0 %5064 }
 0x926   : > { %v5258_v53 = vsel %vm5253_vm7, %v5251_v46, %v5065_v33 }
 0x927   : > { %v4979_v62 = vpop.permute.xlu1 %4978 }
 0x928   : > { %v5245_v47 = vsel %vm5239_vm9, %v5238_v8, %v4979_v62 }
 0x929   : > { %v5151_v25 = vpop.permute.xlu2 %5150 }
 0x92a   : > { %v5270_v45 = vsel %vm5266_vm8, %v5263_v42, %v5151_v25 }
 0x92d   : > { %v5109_v52 = vpop.permute.xlu0 %5108 }
 0x92e   : > { %v5264_v0 = vsel %vm4599_vm11, %v5258_v53, %v5109_v52 }
 0x92f   : > { %v5023_v26 = vpop.permute.xlu1 %5022 }
 0x930   : > { %v5252_v32 = vsel %vm5246_vm6, %v5245_v47, %v5023_v26 }
 0x931   : > { %v5195_v37 = vpop.permute.xlu2 %5194 }
 0x932   : > { %v5277_v34 = vsel %vm5273_vm10, %v5270_v45, %v5195_v37 }
 0x933   : > { %v5310_v4 = vsel %vm5292_vm15, %v5277_v34, %v5289_v12  ;;  %v5311_v19 = vsel %vm5294_vm0, %v5277_v34, %v5289_v12  ;;  %v5313_v16 = vsel %vm5297_vm2, %v5277_v34, %v5289_v12 }
 0x934   : > { %v5312_v6 = vrot.slane %v5311_v19, 1  ;;  %v5314_v3 = vrot.slane %v5313_v16, 2  ;;  %5362 = vst [vmem:[#allocation1 + $0x1] ss:$9 sm:$0xff] %v5310_v4  ;;  %v5450_v16 = vperm.slane %v5782_v54, 6 }
 0x935   : > { %v5153_v5 = vpop.permute.xlu0 %5152 }
 0x936   : > { %5363 = vst [vmem:[#allocation1 + $0x2] ss:$9 sm:$0xff] %v5312_v6  ;;  %v5271_v2 = vsel %vm5266_vm8, %v5264_v0, %v5153_v5 }
 0x937   : > { %5364 = vst [vmem:[#allocation1 + $0x3] ss:$9 sm:$0xff] %v5314_v3  ;;  %v5067_v15 = vpop.permute.xlu1 %5066 }
 0x938   : > { %v5259_v51 = vsel %vm5253_vm7, %v5252_v32, %v5067_v15 }
 0x939   : > { %v5199_v50 = vpop.permute.xlu2 %5198 }
 0x93d   : > { %v5197_v9 = vpop.permute.xlu0 %5196 }
 0x93e   : > { %v5278_v27 = vsel %vm5273_vm10, %v5271_v2, %v5197_v9 }
 0x93f   : > { %v5111_v29 = vpop.permute.xlu1 %5110  ;;  %v5315_v57 = vsel %vm5292_vm15, %v5278_v27, %v5290_v13  ;;  %v5316_v58 = vsel %vm5294_vm0, %v5278_v27, %v5290_v13  ;;  %v5318_v55 = vsel %vm5297_vm2, %v5278_v27, %v5290_v13 }
 0x940   : > { %v5317_v24 = vrot.slane %v5316_v58, 1  ;;  %v5319_v48 = vrot.slane %v5318_v55, 2  ;;  %5365 = vst [vmem:[#allocation1 + $0x4] ss:$9 sm:$0xff] %v5315_v57  ;;  %v5265_v22 = vsel %vm4599_vm11, %v5259_v51, %v5111_v29 }
 0x942   : > { %5366 = vst [vmem:[#allocation1 + $0x5] ss:$9 sm:$0xff] %v5317_v24 }
 0x943   : > { %5367 = vst [vmem:[#allocation1 + $0x6] ss:$9 sm:$0xff] %v5319_v48 }
 0x947   : > { %v5155_v60 = vpop.permute.xlu1 %5154 }
 0x948   : > { %v5272_v61 = vsel %vm5266_vm8, %v5265_v22, %v5155_v60 }
 0x949   : > { %v5279_v39 = vsel %vm5273_vm10, %v5272_v61, %v5199_v50 }
 0x94a   : > { %v5320_v18 = vsel %vm5292_vm15, %v5279_v39, %v5291_v17  ;;  %v5321_v40 = vsel %vm5294_vm0, %v5279_v39, %v5291_v17  ;;  %v5323_v23 = vsel %vm5297_vm2, %v5279_v39, %v5291_v17 }
 0x94b   : > { %5368 = vst [vmem:[#allocation1 + $0x7] ss:$9 sm:$0xff] %v5320_v18  ;;  %v5322_v14 = vrot.slane %v5321_v40, 1  ;;  %v5324_v49 = vrot.slane %v5323_v23, 2 }
 0x952   : > { %v5369_v11 = vld [vmem:[#allocation1] sm:$0xff]  ;;  %v5370_v36 = vld [vmem:[#allocation1 + $0x9] sm:$0xff] }
 0x953   : > { %5403 = vmatmul.f32.gmra.mxu2 %v5369_v11  ;;  %5670 = vmatmul.msk.f32.gmra.mxu3 %vm5232_vm14, %v5370_v36  ;;  %5371 = vst [vmem:[#allocation1] ss:$9 sm:$0xff] %v5322_v14 }
 0x954   : > { %5372 = vst [vmem:[#allocation1 + $0x1] ss:$9 sm:$0xff] %v5324_v49 }
 0x95b   : > { %v5373_v38 = vld [vmem:[#allocation1] sm:$0xff]  ;;  %v5374_v20 = vld [vmem:[#allocation1 + $0x9] sm:$0xff] }
 0x95c   : > { %5406 = vmatmul.f32.gmra.mxu2 %v5373_v38  ;;  %5671 = vmatmul.msk.f32.gmra.mxu3 %vm5232_vm14, %v5374_v20 }
 0x9a0   : > { %v5401_v63 = vpop.f32.mrf.mxu2  ;;  %v5427_v33 = vpop.f32.mrf.mxu3 }
 0x9a1   : > { %v5402_v28 = vadd.f32 %v5401_v63, %v5343_v7 }
 0x9a3   : > { %v5428_v62 = vadd.f32 %v5427_v33, %v5402_v28 }
 0x9a5   : > { %vm5436_vm11 = vcmp.gt.f32.partialorder %v5428_v62, 0.0  ;;  %v5440_v30 = vmul.f32 %v5439_v31, %v5428_v62 }
 0x9a7   : > { %v5443_v25 = vsel %vm5436_vm11, %v5428_v62, %v5440_v30 }
 0x9a8   : > { %5672 = vmatmul.msk.f32.vlgmr.msra.gmra.mxu3 %vm5239_vm9, %v5443_v25 }
 0x9d6   : > { %v5404_v10 = vpop.f32.mrf.mxu2  ;;  %v5430_v56 = vpop.f32.mrf.mxu3 }
 0x9d7   : > { %v5405_v52 = vadd.f32 %v5404_v10, %v5343_v7 }
 0x9d9   : > { %v5431_v35 = vadd.f32 %v5430_v56, %v5405_v52 }
 0x9db   : > { %v5441_v26 = vmul.f32 %v5439_v31, %v5431_v35  ;;  %vm5437_vm12 = vcmp.gt.f32.partialorder %v5431_v35, 0.0 }
 0x9dd   : > { %v5444_v42 = vsel %vm5437_vm12, %v5431_v35, %v5441_v26 }
 0x9de   : > { %5673 = vmatmul.msk.f32.gmra.mxu3 %vm5239_vm9, %v5444_v42 }
 0x9df   : > { %v5407_v45 = vpop.f32.mrf.mxu2  ;;  %v5433_v12 = vpop.f32.mrf.mxu3 }
 0x9e0   : > { %v5408_v37 = vadd.f32 %v5407_v45, %v5343_v7 }
 0x9e2   : > { %v5434_v34 = vadd.f32 %v5433_v12, %v5408_v37 }
 0x9e4   : > { %v5442_v4 = vmul.f32 %v5439_v31, %v5434_v34  ;;  %vm5438_vm13 = vcmp.gt.f32.partialorder %v5434_v34, 0.0 }
 0x9e6   : > { %v5445_v19 = vsel %vm5438_vm13, %v5434_v34, %v5442_v4 }
 0x9e7   : > { %5674 = vmatmul.msk.f32.gmra.mxu3 %vm5239_vm9, %v5445_v19  ;;  %vm5547_vm9 = vcmask 144384  }
 0xa2b   : > { %v5477_v6 = vpop.f32.mrf.mxu3 }
 0xa2c   : > { %v5478_v3 = vadd.f32 %v5477_v6, %v5450_v16 }
 0xa2e   : > { %5487 = vxpose.xlu0.b32.start [1/3] (short) (narrow) %v5478_v3, 8 }
 0xa61   : > { %v5480_v5 = vpop.f32.mrf.mxu3 }
 0xa62   : > { %v5481_v41 = vadd.f32 %v5480_v5, %v5450_v16 }
 0xa64   : > { %5488 = vxpose.xlu0.b32.cont [2/3] (short) (narrow) %v5481_v41, 8 }
 0xa6a   : > { %v5483_v15 = vpop.f32.mrf.mxu3 }
 0xa6b   : > { %v5484_v1 = vadd.f32 %v5483_v15, %v5450_v16 }
 0xa6d   : > { %v5486_v46 = vsel %vm4752_vm5, %v5484_v1, 0.0 }
 0xa6e   : > { %5489 = vxpose.xlu0.b32.end [3/3] (short) (narrow) %v5486_v46, 8 }
 0xb02   : > { %v5503_v53 = vpop.trf.xlu0 }
 0xb03   : > { %v5520_v0 = vrot.slane %v5503_v53, 1 }
 0xb05   : > { %v5522_v2 = vsub.f32 %v5503_v53, %v5520_v0 }
 0xb07   : > { %v5523_v9 = vmul.f32 1.442695, %v5522_v2 }
 0xb09   : > { %5721 = vpow2.f32 %v5523_v9 }
 0xb0f   : > { %v5722_v13 = vpop.eup %5721 }
 0xb10   : > { %v5525_v27 = vadd.f32 1.0, %v5722_v13 }
 0xb12   : > { %5723 = vrcp.f32 %v5525_v27  ;;  %v5537_v55 = vand.u32 2147483648, %v5525_v27  ;;  %v5535_v48 = vand.u32 2147483647, %v5525_v27  ;;  %vm5531_vm3 = vweird.f32 %v5525_v27 }
 0xb14   : > { %v5538_v47 = vor.u32 1.1754944e-38, %v5537_v55  ;;  %vm5536_vm14 = vcmp.eq.f32.partialorder %v5535_v48, 8.507059e+37 }
 0xb18   : > { %v5724_v29 = vpop.eup %5723 }
 0xb19   : > { %v5527_v57 = vmul.f32 %v5724_v29, %v5525_v27  ;;  %vm5532_vm1 = vweird.f32 %v5724_v29 }
 0xb1a   : > { %vm5533_vm4 = vmor %vm5531_vm3, %vm5532_vm1 }
 0xb1b   : > { %v5528_v58 = vsub.f32 1.0, %v5527_v57 }
 0xb1d   : > { %v5529_v24 = vmul.f32 %v5724_v29, %v5528_v58 }
 0xb1f   : > { %v5530_v8 = vadd.f32 %v5724_v29, %v5529_v24 }
 0xb21   : > { %v5534_v32 = vsel %vm5533_vm4, %v5724_v29, %v5530_v8 }
 0xb22   : > { %v5539_v51 = vsel %vm5536_vm14, %v5538_v47, %v5534_v32 }
 0xb23   : > { %v5541_v22 = vsub.f32 1.0, %v5539_v51  ;;  %v5543_v60 = vrot.slane %v5539_v51, 7 }
 0xb25   : > { %v5545_v50 = vsel %vm5292_vm15, %v5541_v22, %v5543_v60 }
 0xb26   : > { %v5546_v61 = vsel %vm4752_vm5, %v5545_v50, %v5503_v53 }
 0xb27   : > { %5548 = vst.msk [vmem:[%s254_s10] sm:$0x3f] %vm5547_vm9, %v5546_v61 }
 0xb28 PF: > { %s16_s21 = sadd.s32 1, %s5789_s21  }
 0xb29   : > { %p13_p5 = scmp.ge.s32.totalorder %s16_s21, 4  }
 0xb2b   :  { %15 = sbr.rel (!%p13_p5) target bundleno = 1 (0x1), region = 146 }

</bundles_post_ra>
